<compile_context>
chip_gen: v7x
topology: tpu7x:2x2x1
jax: 0.10.0
libtpu: 0.0.40
codegen_flags: <defaults>
</compile_context>

<pallas_src>
import numpy as np

import jax
import jax.numpy as jnp
from jax import lax
from jax.experimental import pallas as pl
from jax.experimental.pallas import tpu as pltpu


# ------------------------------ Pallas kernel -------------------------------

def _generator_kernel(z_ref, wl_ref, bl_ref, band1_ref, bias1_ref,
                      band2_ref, bias2_ref, bandc_ref, biasc_ref,
                      out_ref, x1_ref, y1_ref, y2_ref):
    f32 = jnp.float32
    bf16 = jnp.bfloat16
    b = pl.program_id(0)

    # Zero-init the vertically padded activation scratch (border rows must be 0).
    x1_ref[...] = jnp.zeros(x1_ref.shape, f32)
    y1_ref[...] = jnp.zeros(y1_ref.shape, f32)

    # ---- lin1 + ReLU -> X1 (9, 448): row 1+i holds image row i, lanes (w, ci).
    z_row = z_ref[pl.ds(b, 1), :].astype(bf16)                        # (1, 64)
    for i in range(7):
        row = jnp.dot(z_row, wl_ref[i], preferred_element_type=f32)   # (1, 448)
        x1_ref[1 + i:2 + i, :] = jnp.maximum(row + bl_ref[i], 0.0)

    # ---- ct1: ConvTranspose2d(64->32, k=4, s=2) + ReLU -> Y1 (18, 512).
    # Per output vertical parity r: two vertical taps (dh) x banded GEMM over
    # the full padded row; rows are then scattered at stride 2 (sub-pixel).
    lhs_h0 = x1_ref[1:9, :].astype(bf16)     # dh = 0 window (rows p)
    lhs_h1 = x1_ref[0:8, :].astype(bf16)     # dh = 1 window (rows p-1)
    for r in range(2):
        acc = jnp.dot(lhs_h0, band1_ref[r, 0], preferred_element_type=f32)
        acc = acc + jnp.dot(lhs_h1, band1_ref[r, 1], preferred_element_type=f32)
        acc = jnp.maximum(acc + bias1_ref[...], 0.0)                  # (8, 512)
        for p in range(8):
            y1_ref[1 + 2 * p + r:2 + 2 * p + r, :] = acc[p:p + 1, :]

    # ---- ct2: ConvTranspose2d(32->16, k=4, s=2) + ReLU -> Y2 (34, 544).
    lhs_h0 = y1_ref[1:18, :].astype(bf16)
    lhs_h1 = y1_ref[0:17, :].astype(bf16)
    for r in range(2):
        acc = jnp.dot(lhs_h0, band2_ref[r, 0], preferred_element_type=f32)
        acc = acc + jnp.dot(lhs_h1, band2_ref[r, 1], preferred_element_type=f32)
        acc = jnp.maximum(acc + bias2_ref[...], 0.0)                  # (17, 544)
        for m in range(17):
            y2_ref[2 * m + r:2 * m + r + 1, :] = acc[m:m + 1, :]

    # ---- conv: Conv2d(16->1, k=7, valid).  7 vertical taps, banded over width.
    acc = jnp.dot(y2_ref[0:28, :].astype(bf16), bandc_ref[0],
                  preferred_element_type=f32)                          # (28, 28)
    for kh in range(1, 7):
        acc = acc + jnp.dot(y2_ref[kh:kh + 28, :].astype(bf16), bandc_ref[kh],
                            preferred_element_type=f32)
    out_ref[0, 0, :, :] = acc + biasc_ref[...]


# ------------------------- parameter preparation ----------------------------

def prepare_params(params):
    """One-time host-side re-layout of PyTorch weights into kernel layouts."""
    def npa(x):
        return np.asarray(x, dtype=np.float32)

    W_lin = npa(params["lin1_w"])          # (3136, 64)
    b_lin = npa(params["lin1_b"])          # (3136,)
    W1, b1 = npa(params["ct1_w"]), npa(params["ct1_b"])   # (64,32,4,4), (32,)
    W2, b2 = npa(params["ct2_w"]), npa(params["ct2_b"])   # (32,16,4,4), (16,)
    Wc, bc = npa(params["conv_w"]), npa(params["conv_b"])  # (1,16,7,7), (1,)

    # lin1: per-image-row weight slices, output lane order (w, ci).
    Wl = W_lin.reshape(64, 7, 7, 64).transpose(1, 3, 2, 0).reshape(7, 64, 448)
    bl = b_lin.reshape(64, 7, 7).transpose(1, 2, 0).reshape(7, 1, 448)

    def ct_band(W, Wi):
        """Banded matrices for ConvTranspose2d(k=4, s=2): index [r, dh]."""
        CI, CO = W.shape[0], W.shape[1]
        Wo = 2 * Wi + 2
        band = np.zeros((2, 2, Wi * CI, Wo * CO), np.float32)
        for r in range(2):
            for dh in range(2):
                for ow in range(Wo):
                    q, s = divmod(ow, 2)
                    for dw in range(2):
                        iw = q - dw
                        if 0 <= iw < Wi:
                            band[r, dh, iw * CI:(iw + 1) * CI,
                                 ow * CO:(ow + 1) * CO] = W[:, :, 2 * dh + r,
                                                            2 * dw + s]
        return band

    band1 = ct_band(W1, 7)                  # (2, 2, 448, 512)
    band2 = ct_band(W2, 16)                 # (2, 2, 512, 544)
    bias1 = np.tile(b1, 16)[None, :]        # (1, 512): lane ow*32+co -> b1[co]
    bias2 = np.tile(b2, 34)[None, :]        # (1, 544)

    # Final 7x7 valid conv: per-kh banded matrices over (w, ci) -> ow.
    bandc = np.zeros((7, 34 * 16, 28), np.float32)
    for kh in range(7):
        for ow in range(28):
            for kw in range(7):
                iw = ow + kw
                bandc[kh, iw * 16:(iw + 1) * 16, ow] = Wc[0, :, kh, kw]
    biasc = bc.reshape(1, 1)

    return {
        "wl": jnp.asarray(Wl, jnp.bfloat16),
        "bl": jnp.asarray(bl, jnp.float32),
        "band1": jnp.asarray(band1, jnp.bfloat16),
        "bias1": jnp.asarray(bias1, jnp.float32),
        "band2": jnp.asarray(band2, jnp.bfloat16),
        "bias2": jnp.asarray(bias2, jnp.float32),
        "bandc": jnp.asarray(bandc, jnp.bfloat16),
        "biasc": jnp.asarray(biasc, jnp.float32),
    }


# ------------------------------ forward wrapper ------------------------------

@jax.jit
def generator_forward(prep, z):
    B = z.shape[0]

    def const_spec(x):
        return pl.BlockSpec(x.shape, lambda i, _n=x.ndim: (0,) * _n)

    args = (z.astype(jnp.float32), prep["wl"], prep["bl"],
            prep["band1"], prep["bias1"], prep["band2"], prep["bias2"],
            prep["bandc"], prep["biasc"])

    return pl.pallas_call(
        _generator_kernel,
        out_shape=jax.ShapeDtypeStruct((B, 1, 28, 28), jnp.float32),
        grid=(B,),
        in_specs=[const_spec(a) for a in args],
        out_specs=pl.BlockSpec((1, 1, 28, 28), lambda i: (i, 0, 0, 0)),
        scratch_shapes=[
            pltpu.VMEM((9, 448), jnp.float32),    # lin1 output (padded rows)
            pltpu.VMEM((18, 512), jnp.float32),   # ct1 output (padded rows)
            pltpu.VMEM((34, 544), jnp.float32),   # ct2 output
        ],
        compiler_params=pltpu.CompilerParams(
            dimension_semantics=("parallel",),
            vmem_limit_bytes=24 * 1024 * 1024,
        ),
    )(*args)


# ----------------------------- pure-JAX reference ----------------------------

def _ref_forward(params, z):
    x = jnp.maximum(z @ params["lin1_w"].T + params["lin1_b"], 0.0)
    x = x.reshape(-1, 64, 7, 7)

    def ct(x, w, b):
        k = w.shape[2]
        w_conv = jnp.flip(w, axis=(2, 3)).transpose(1, 0, 2, 3)
        y = lax.conv_general_dilated(
            x, w_conv, window_strides=(1, 1),
            padding=[(k - 1, k - 1), (k - 1, k - 1)], lhs_dilation=(2, 2),
            dimension_numbers=("NCHW", "OIHW", "NCHW"))
        return y + b[None, :, None, None]

    x = jnp.maximum(ct(x, params["ct1_w"], params["ct1_b"]), 0.0)
    x = jnp.maximum(ct(x, params["ct2_w"], params["ct2_b"]), 0.0)
    y = lax.conv_general_dilated(
        x, params["conv_w"], window_strides=(1, 1), padding="VALID",
        dimension_numbers=("NCHW", "OIHW", "NCHW"))
    return y + params["conv_b"][None, :, None, None]


# ----------------------------------- main ------------------------------------

if __name__ == "__main__":
    latent_dim = 64
    batch = 2

    key = jax.random.PRNGKey(0)
    ks = jax.random.split(key, 9)
    params = {
        "lin1_w": 0.05 * jax.random.normal(ks[0], (7 * 7 * 64, latent_dim), jnp.float32),
        "lin1_b": 0.05 * jax.random.normal(ks[1], (7 * 7 * 64,), jnp.float32),
        "ct1_w": 0.05 * jax.random.normal(ks[2], (64, 32, 4, 4), jnp.float32),
        "ct1_b": 0.05 * jax.random.normal(ks[3], (32,), jnp.float32),
        "ct2_w": 0.05 * jax.random.normal(ks[4], (32, 16, 4, 4), jnp.float32),
        "ct2_b": 0.05 * jax.random.normal(ks[5], (16,), jnp.float32),
        "conv_w": 0.05 * jax.random.normal(ks[6], (1, 16, 7, 7), jnp.float32),
        "conv_b": 0.05 * jax.random.normal(ks[7], (1,), jnp.float32),
    }
    z = jax.random.normal(ks[8], (batch, latent_dim), jnp.float32)

    prep = prepare_params(params)
    out = jax.block_until_ready(generator_forward(prep, z))
    assert out.shape == (batch, 1, 28, 28), out.shape

    ref = jax.block_until_ready(_ref_forward(params, z))
    max_err = float(jnp.max(jnp.abs(out - ref)))
    # bf16 GEMM operands with f32 accumulation -> small quantization error.
    assert jnp.allclose(out, ref, atol=2e-2, rtol=2e-2), max_err

    print("KERNEL_OK")
</pallas_src>

<mosaic_0001>
module attributes {stable_mosaic.version = 11 : i64} {
  func.func @_generator_kernel(%arg0: i32, %arg1: memref<2x64xf32, #tpu.memory_space<vmem>>, %arg2: memref<7x64x448xbf16, #tpu.memory_space<vmem>>, %arg3: memref<7x1x448xf32, #tpu.memory_space<vmem>>, %arg4: memref<2x2x448x512xbf16, #tpu.memory_space<vmem>>, %arg5: memref<1x512xf32, #tpu.memory_space<vmem>>, %arg6: memref<2x2x512x544xbf16, #tpu.memory_space<vmem>>, %arg7: memref<1x544xf32, #tpu.memory_space<vmem>>, %arg8: memref<7x544x28xbf16, #tpu.memory_space<vmem>>, %arg9: memref<1x1xf32, #tpu.memory_space<vmem>>, %arg10: memref<1x1x28x28xf32, #tpu.memory_space<vmem>>, %arg11: memref<9x448xf32, #tpu.memory_space<vmem>>, %arg12: memref<18x512xf32, #tpu.memory_space<vmem>>, %arg13: memref<34x544xf32, #tpu.memory_space<vmem>>) attributes {dimension_semantics = [#tpu.dimension_semantics<parallel>], iteration_bounds = array<i64: 2>, scalar_prefetch = 0 : i64, scratch_operands = 3 : i64, tpu.core_type = #tpu.core_type<tc>, window_params = [{pipeline_mode = #tpu.pipeline_mode<synchronous>, transform_indices = @transform_0, window_bounds = array<i64: 2, 64>}, {pipeline_mode = #tpu.pipeline_mode<synchronous>, transform_indices = @transform_1, window_bounds = array<i64: 7, 64, 448>}, {pipeline_mode = #tpu.pipeline_mode<synchronous>, transform_indices = @transform_2, window_bounds = array<i64: 7, 1, 448>}, {pipeline_mode = #tpu.pipeline_mode<synchronous>, transform_indices = @transform_3, window_bounds = array<i64: 2, 2, 448, 512>}, {pipeline_mode = #tpu.pipeline_mode<synchronous>, transform_indices = @transform_4, window_bounds = array<i64: 1, 512>}, {pipeline_mode = #tpu.pipeline_mode<synchronous>, transform_indices = @transform_5, window_bounds = array<i64: 2, 2, 512, 544>}, {pipeline_mode = #tpu.pipeline_mode<synchronous>, transform_indices = @transform_6, window_bounds = array<i64: 1, 544>}, {pipeline_mode = #tpu.pipeline_mode<synchronous>, transform_indices = @transform_7, window_bounds = array<i64: 7, 544, 28>}, {pipeline_mode = #tpu.pipeline_mode<synchronous>, transform_indices = @transform_8, window_bounds = array<i64: 1, 1>}, {transform_indices = @transform_9, window_bounds = array<i64: 1, 1, 28, 28>}]} {
    %cst = arith.constant 0.000000e+00 : f32
    %0 = vector.broadcast %cst : f32 to vector<9x448xf32>
    %c0 = arith.constant 0 : index
    %c0_0 = arith.constant 0 : index
    %1 = vector.load %arg11[%c0, %c0_0] : memref<9x448xf32, #tpu.memory_space<vmem>>, vector<9x448xf32>
    tpu.vector_store %arg11[%c0, %c0_0], %0 {strides = array<i32>} : memref<9x448xf32, #tpu.memory_space<vmem>>, vector<9x448xf32>,
    %cst_1 = arith.constant 0.000000e+00 : f32
    %2 = vector.broadcast %cst_1 : f32 to vector<18x512xf32>
    %c0_2 = arith.constant 0 : index
    %c0_3 = arith.constant 0 : index
    %3 = vector.load %arg12[%c0_2, %c0_3] : memref<18x512xf32, #tpu.memory_space<vmem>>, vector<18x512xf32>
    tpu.vector_store %arg12[%c0_2, %c0_3], %2 {strides = array<i32>} : memref<18x512xf32, #tpu.memory_space<vmem>>, vector<18x512xf32>,
    %4 = arith.index_cast %arg0 : i32 to index
    %c0_4 = arith.constant 0 : index
    %5 = vector.load %arg1[%4, %c0_4] : memref<2x64xf32, #tpu.memory_space<vmem>>, vector<1x64xf32>
    %6 = arith.truncf %5 : vector<1x64xf32> to vector<1x64xbf16>
    %c0_5 = arith.constant 0 : index
    %c0_6 = arith.constant 0 : index
    %c0_7 = arith.constant 0 : index
    %7 = vector.load %arg2[%c0_5, %c0_6, %c0_7] : memref<7x64x448xbf16, #tpu.memory_space<vmem>>, vector<1x64x448xbf16>
    %8 = vector.shape_cast %7 : vector<1x64x448xbf16> to vector<64x448xbf16>
    %cst_8 = arith.constant dense<0.000000e+00> : vector<1x448xf32>
    %9 = tpu.matmul %6, %8, %cst_8 {dimension_numbers = #tpu.dot_dimension_numbers<[1], [0], [0], [1], [0, 0, 1, 1], [], []>} : vector<1x64xbf16>, vector<64x448xbf16>, vector<1x448xf32> -> vector<1x448xf32>
    %c0_9 = arith.constant 0 : index
    %c0_10 = arith.constant 0 : index
    %c0_11 = arith.constant 0 : index
    %10 = vector.load %arg3[%c0_9, %c0_10, %c0_11] : memref<7x1x448xf32, #tpu.memory_space<vmem>>, vector<1x1x448xf32>
    %11 = vector.shape_cast %10 : vector<1x1x448xf32> to vector<1x448xf32>
    %12 = arith.addf %9, %11 : vector<1x448xf32>
    %cst_12 = arith.constant 0.000000e+00 : f32
    %13 = vector.broadcast %cst_12 : f32 to vector<1x448xf32>
    %14 = arith.maximumf %12, %13 : vector<1x448xf32>
    %c1 = arith.constant 1 : index
    %c0_13 = arith.constant 0 : index
    %15 = vector.load %arg11[%c1, %c0_13] : memref<9x448xf32, #tpu.memory_space<vmem>>, vector<1x448xf32>
    tpu.vector_store %arg11[%c1, %c0_13], %14 {strides = array<i32>} : memref<9x448xf32, #tpu.memory_space<vmem>>, vector<1x448xf32>,
    %c1_14 = arith.constant 1 : index
    %c0_15 = arith.constant 0 : index
    %c0_16 = arith.constant 0 : index
    %16 = vector.load %arg2[%c1_14, %c0_15, %c0_16] : memref<7x64x448xbf16, #tpu.memory_space<vmem>>, vector<1x64x448xbf16>
    %17 = vector.shape_cast %16 : vector<1x64x448xbf16> to vector<64x448xbf16>
    %cst_17 = arith.constant dense<0.000000e+00> : vector<1x448xf32>
    %18 = tpu.matmul %6, %17, %cst_17 {dimension_numbers = #tpu.dot_dimension_numbers<[1], [0], [0], [1], [0, 0, 1, 1], [], []>} : vector<1x64xbf16>, vector<64x448xbf16>, vector<1x448xf32> -> vector<1x448xf32>
    %c1_18 = arith.constant 1 : index
    %c0_19 = arith.constant 0 : index
    %c0_20 = arith.constant 0 : index
    %19 = vector.load %arg3[%c1_18, %c0_19, %c0_20] : memref<7x1x448xf32, #tpu.memory_space<vmem>>, vector<1x1x448xf32>
    %20 = vector.shape_cast %19 : vector<1x1x448xf32> to vector<1x448xf32>
    %21 = arith.addf %18, %20 : vector<1x448xf32>
    %cst_21 = arith.constant 0.000000e+00 : f32
    %22 = vector.broadcast %cst_21 : f32 to vector<1x448xf32>
    %23 = arith.maximumf %21, %22 : vector<1x448xf32>
    %c2 = arith.constant 2 : index
    %c0_22 = arith.constant 0 : index
    %24 = vector.load %arg11[%c2, %c0_22] : memref<9x448xf32, #tpu.memory_space<vmem>>, vector<1x448xf32>
    tpu.vector_store %arg11[%c2, %c0_22], %23 {strides = array<i32>} : memref<9x448xf32, #tpu.memory_space<vmem>>, vector<1x448xf32>,
    %c2_23 = arith.constant 2 : index
    %c0_24 = arith.constant 0 : index
    %c0_25 = arith.constant 0 : index
    %25 = vector.load %arg2[%c2_23, %c0_24, %c0_25] : memref<7x64x448xbf16, #tpu.memory_space<vmem>>, vector<1x64x448xbf16>
    %26 = vector.shape_cast %25 : vector<1x64x448xbf16> to vector<64x448xbf16>
    %cst_26 = arith.constant dense<0.000000e+00> : vector<1x448xf32>
    %27 = tpu.matmul %6, %26, %cst_26 {dimension_numbers = #tpu.dot_dimension_numbers<[1], [0], [0], [1], [0, 0, 1, 1], [], []>} : vector<1x64xbf16>, vector<64x448xbf16>, vector<1x448xf32> -> vector<1x448xf32>
    %c2_27 = arith.constant 2 : index
    %c0_28 = arith.constant 0 : index
    %c0_29 = arith.constant 0 : index
    %28 = vector.load %arg3[%c2_27, %c0_28, %c0_29] : memref<7x1x448xf32, #tpu.memory_space<vmem>>, vector<1x1x448xf32>
    %29 = vector.shape_cast %28 : vector<1x1x448xf32> to vector<1x448xf32>
    %30 = arith.addf %27, %29 : vector<1x448xf32>
    %cst_30 = arith.constant 0.000000e+00 : f32
    %31 = vector.broadcast %cst_30 : f32 to vector<1x448xf32>
    %32 = arith.maximumf %30, %31 : vector<1x448xf32>
    %c3 = arith.constant 3 : index
    %c0_31 = arith.constant 0 : index
    %33 = vector.load %arg11[%c3, %c0_31] : memref<9x448xf32, #tpu.memory_space<vmem>>, vector<1x448xf32>
    tpu.vector_store %arg11[%c3, %c0_31], %32 {strides = array<i32>} : memref<9x448xf32, #tpu.memory_space<vmem>>, vector<1x448xf32>,
    %c3_32 = arith.constant 3 : index
    %c0_33 = arith.constant 0 : index
    %c0_34 = arith.constant 0 : index
    %34 = vector.load %arg2[%c3_32, %c0_33, %c0_34] : memref<7x64x448xbf16, #tpu.memory_space<vmem>>, vector<1x64x448xbf16>
    %35 = vector.shape_cast %34 : vector<1x64x448xbf16> to vector<64x448xbf16>
    %cst_35 = arith.constant dense<0.000000e+00> : vector<1x448xf32>
    %36 = tpu.matmul %6, %35, %cst_35 {dimension_numbers = #tpu.dot_dimension_numbers<[1], [0], [0], [1], [0, 0, 1, 1], [], []>} : vector<1x64xbf16>, vector<64x448xbf16>, vector<1x448xf32> -> vector<1x448xf32>
    %c3_36 = arith.constant 3 : index
    %c0_37 = arith.constant 0 : index
    %c0_38 = arith.constant 0 : index
    %37 = vector.load %arg3[%c3_36, %c0_37, %c0_38] : memref<7x1x448xf32, #tpu.memory_space<vmem>>, vector<1x1x448xf32>
    %38 = vector.shape_cast %37 : vector<1x1x448xf32> to vector<1x448xf32>
    %39 = arith.addf %36, %38 : vector<1x448xf32>
    %cst_39 = arith.constant 0.000000e+00 : f32
    %40 = vector.broadcast %cst_39 : f32 to vector<1x448xf32>
    %41 = arith.maximumf %39, %40 : vector<1x448xf32>
    %c4 = arith.constant 4 : index
    %c0_40 = arith.constant 0 : index
    %42 = vector.load %arg11[%c4, %c0_40] : memref<9x448xf32, #tpu.memory_space<vmem>>, vector<1x448xf32>
    tpu.vector_store %arg11[%c4, %c0_40], %41 {strides = array<i32>} : memref<9x448xf32, #tpu.memory_space<vmem>>, vector<1x448xf32>,
    %c4_41 = arith.constant 4 : index
    %c0_42 = arith.constant 0 : index
    %c0_43 = arith.constant 0 : index
    %43 = vector.load %arg2[%c4_41, %c0_42, %c0_43] : memref<7x64x448xbf16, #tpu.memory_space<vmem>>, vector<1x64x448xbf16>
    %44 = vector.shape_cast %43 : vector<1x64x448xbf16> to vector<64x448xbf16>
    %cst_44 = arith.constant dense<0.000000e+00> : vector<1x448xf32>
    %45 = tpu.matmul %6, %44, %cst_44 {dimension_numbers = #tpu.dot_dimension_numbers<[1], [0], [0], [1], [0, 0, 1, 1], [], []>} : vector<1x64xbf16>, vector<64x448xbf16>, vector<1x448xf32> -> vector<1x448xf32>
    %c4_45 = arith.constant 4 : index
    %c0_46 = arith.constant 0 : index
    %c0_47 = arith.constant 0 : index
    %46 = vector.load %arg3[%c4_45, %c0_46, %c0_47] : memref<7x1x448xf32, #tpu.memory_space<vmem>>, vector<1x1x448xf32>
    %47 = vector.shape_cast %46 : vector<1x1x448xf32> to vector<1x448xf32>
    %48 = arith.addf %45, %47 : vector<1x448xf32>
    %cst_48 = arith.constant 0.000000e+00 : f32
    %49 = vector.broadcast %cst_48 : f32 to vector<1x448xf32>
    %50 = arith.maximumf %48, %49 : vector<1x448xf32>
    %c5 = arith.constant 5 : index
    %c0_49 = arith.constant 0 : index
    %51 = vector.load %arg11[%c5, %c0_49] : memref<9x448xf32, #tpu.memory_space<vmem>>, vector<1x448xf32>
    tpu.vector_store %arg11[%c5, %c0_49], %50 {strides = array<i32>} : memref<9x448xf32, #tpu.memory_space<vmem>>, vector<1x448xf32>,
    %c5_50 = arith.constant 5 : index
    %c0_51 = arith.constant 0 : index
    %c0_52 = arith.constant 0 : index
    %52 = vector.load %arg2[%c5_50, %c0_51, %c0_52] : memref<7x64x448xbf16, #tpu.memory_space<vmem>>, vector<1x64x448xbf16>
    %53 = vector.shape_cast %52 : vector<1x64x448xbf16> to vector<64x448xbf16>
    %cst_53 = arith.constant dense<0.000000e+00> : vector<1x448xf32>
    %54 = tpu.matmul %6, %53, %cst_53 {dimension_numbers = #tpu.dot_dimension_numbers<[1], [0], [0], [1], [0, 0, 1, 1], [], []>} : vector<1x64xbf16>, vector<64x448xbf16>, vector<1x448xf32> -> vector<1x448xf32>
    %c5_54 = arith.constant 5 : index
    %c0_55 = arith.constant 0 : index
    %c0_56 = arith.constant 0 : index
    %55 = vector.load %arg3[%c5_54, %c0_55, %c0_56] : memref<7x1x448xf32, #tpu.memory_space<vmem>>, vector<1x1x448xf32>
    %56 = vector.shape_cast %55 : vector<1x1x448xf32> to vector<1x448xf32>
    %57 = arith.addf %54, %56 : vector<1x448xf32>
    %cst_57 = arith.constant 0.000000e+00 : f32
    %58 = vector.broadcast %cst_57 : f32 to vector<1x448xf32>
    %59 = arith.maximumf %57, %58 : vector<1x448xf32>
    %c6 = arith.constant 6 : index
    %c0_58 = arith.constant 0 : index
    %60 = vector.load %arg11[%c6, %c0_58] : memref<9x448xf32, #tpu.memory_space<vmem>>, vector<1x448xf32>
    tpu.vector_store %arg11[%c6, %c0_58], %59 {strides = array<i32>} : memref<9x448xf32, #tpu.memory_space<vmem>>, vector<1x448xf32>,
    %c6_59 = arith.constant 6 : index
    %c0_60 = arith.constant 0 : index
    %c0_61 = arith.constant 0 : index
    %61 = vector.load %arg2[%c6_59, %c0_60, %c0_61] : memref<7x64x448xbf16, #tpu.memory_space<vmem>>, vector<1x64x448xbf16>
    %62 = vector.shape_cast %61 : vector<1x64x448xbf16> to vector<64x448xbf16>
    %cst_62 = arith.constant dense<0.000000e+00> : vector<1x448xf32>
    %63 = tpu.matmul %6, %62, %cst_62 {dimension_numbers = #tpu.dot_dimension_numbers<[1], [0], [0], [1], [0, 0, 1, 1], [], []>} : vector<1x64xbf16>, vector<64x448xbf16>, vector<1x448xf32> -> vector<1x448xf32>
    %c6_63 = arith.constant 6 : index
    %c0_64 = arith.constant 0 : index
    %c0_65 = arith.constant 0 : index
    %64 = vector.load %arg3[%c6_63, %c0_64, %c0_65] : memref<7x1x448xf32, #tpu.memory_space<vmem>>, vector<1x1x448xf32>
    %65 = vector.shape_cast %64 : vector<1x1x448xf32> to vector<1x448xf32>
    %66 = arith.addf %63, %65 : vector<1x448xf32>
    %cst_66 = arith.constant 0.000000e+00 : f32
    %67 = vector.broadcast %cst_66 : f32 to vector<1x448xf32>
    %68 = arith.maximumf %66, %67 : vector<1x448xf32>
    %c7 = arith.constant 7 : index
    %c0_67 = arith.constant 0 : index
    %69 = vector.load %arg11[%c7, %c0_67] : memref<9x448xf32, #tpu.memory_space<vmem>>, vector<1x448xf32>
    tpu.vector_store %arg11[%c7, %c0_67], %68 {strides = array<i32>} : memref<9x448xf32, #tpu.memory_space<vmem>>, vector<1x448xf32>,
    %c1_68 = arith.constant 1 : index
    %c0_69 = arith.constant 0 : index
    %70 = vector.load %arg11[%c1_68, %c0_69] : memref<9x448xf32, #tpu.memory_space<vmem>>, vector<8x448xf32>
    %71 = arith.truncf %70 : vector<8x448xf32> to vector<8x448xbf16>
    %c0_70 = arith.constant 0 : index
    %c0_71 = arith.constant 0 : index
    %72 = vector.load %arg11[%c0_70, %c0_71] : memref<9x448xf32, #tpu.memory_space<vmem>>, vector<8x448xf32>
    %73 = arith.truncf %72 : vector<8x448xf32> to vector<8x448xbf16>
    %c0_72 = arith.constant 0 : index
    %c0_73 = arith.constant 0 : index
    %c0_74 = arith.constant 0 : index
    %c0_75 = arith.constant 0 : index
    %74 = vector.load %arg4[%c0_72, %c0_73, %c0_74, %c0_75] : memref<2x2x448x512xbf16, #tpu.memory_space<vmem>>, vector<1x1x448x512xbf16>
    %75 = vector.shape_cast %74 : vector<1x1x448x512xbf16> to vector<448x512xbf16>
    %cst_76 = arith.constant dense<0.000000e+00> : vector<8x512xf32>
    %76 = tpu.matmul %71, %75, %cst_76 {dimension_numbers = #tpu.dot_dimension_numbers<[1], [0], [0], [1], [0, 0, 1, 1], [], []>} : vector<8x448xbf16>, vector<448x512xbf16>, vector<8x512xf32> -> vector<8x512xf32>
    %c0_77 = arith.constant 0 : index
    %c1_78 = arith.constant 1 : index
    %c0_79 = arith.constant 0 : index
    %c0_80 = arith.constant 0 : index
    %77 = vector.load %arg4[%c0_77, %c1_78, %c0_79, %c0_80] : memref<2x2x448x512xbf16, #tpu.memory_space<vmem>>, vector<1x1x448x512xbf16>
    %78 = vector.shape_cast %77 : vector<1x1x448x512xbf16> to vector<448x512xbf16>
    %cst_81 = arith.constant dense<0.000000e+00> : vector<8x512xf32>
    %79 = tpu.matmul %73, %78, %cst_81 {dimension_numbers = #tpu.dot_dimension_numbers<[1], [0], [0], [1], [0, 0, 1, 1], [], []>} : vector<8x448xbf16>, vector<448x512xbf16>, vector<8x512xf32> -> vector<8x512xf32>
    %80 = arith.addf %76, %79 : vector<8x512xf32>
    %c0_82 = arith.constant 0 : index
    %c0_83 = arith.constant 0 : index
    %81 = vector.load %arg5[%c0_82, %c0_83] : memref<1x512xf32, #tpu.memory_space<vmem>>, vector<1x512xf32>
    %82 = vector.broadcast %81 : vector<1x512xf32> to vector<8x512xf32>
    %83 = arith.addf %80, %82 : vector<8x512xf32>
    %cst_84 = arith.constant 0.000000e+00 : f32
    %84 = vector.broadcast %cst_84 : f32 to vector<8x512xf32>
    %85 = arith.maximumf %83, %84 : vector<8x512xf32>
    %86 = vector.extract_strided_slice %85 {offsets = [0, 0], sizes = [1, 512], strides = [1, 1]} : vector<8x512xf32> to vector<1x512xf32>
    %c1_85 = arith.constant 1 : index
    %c0_86 = arith.constant 0 : index
    %87 = vector.load %arg12[%c1_85, %c0_86] : memref<18x512xf32, #tpu.memory_space<vmem>>, vector<1x512xf32>
    tpu.vector_store %arg12[%c1_85, %c0_86], %86 {strides = array<i32>} : memref<18x512xf32, #tpu.memory_space<vmem>>, vector<1x512xf32>,
    %88 = vector.extract_strided_slice %85 {offsets = [1, 0], sizes = [1, 512], strides = [1, 1]} : vector<8x512xf32> to vector<1x512xf32>
    %c3_87 = arith.constant 3 : index
    %c0_88 = arith.constant 0 : index
    %89 = vector.load %arg12[%c3_87, %c0_88] : memref<18x512xf32, #tpu.memory_space<vmem>>, vector<1x512xf32>
    tpu.vector_store %arg12[%c3_87, %c0_88], %88 {strides = array<i32>} : memref<18x512xf32, #tpu.memory_space<vmem>>, vector<1x512xf32>,
    %90 = vector.extract_strided_slice %85 {offsets = [2, 0], sizes = [1, 512], strides = [1, 1]} : vector<8x512xf32> to vector<1x512xf32>
    %c5_89 = arith.constant 5 : index
    %c0_90 = arith.constant 0 : index
    %91 = vector.load %arg12[%c5_89, %c0_90] : memref<18x512xf32, #tpu.memory_space<vmem>>, vector<1x512xf32>
    tpu.vector_store %arg12[%c5_89, %c0_90], %90 {strides = array<i32>} : memref<18x512xf32, #tpu.memory_space<vmem>>, vector<1x512xf32>,
    %92 = vector.extract_strided_slice %85 {offsets = [3, 0], sizes = [1, 512], strides = [1, 1]} : vector<8x512xf32> to vector<1x512xf32>
    %c7_91 = arith.constant 7 : index
    %c0_92 = arith.constant 0 : index
    %93 = vector.load %arg12[%c7_91, %c0_92] : memref<18x512xf32, #tpu.memory_space<vmem>>, vector<1x512xf32>
    tpu.vector_store %arg12[%c7_91, %c0_92], %92 {strides = array<i32>} : memref<18x512xf32, #tpu.memory_space<vmem>>, vector<1x512xf32>,
    %94 = vector.extract_strided_slice %85 {offsets = [4, 0], sizes = [1, 512], strides = [1, 1]} : vector<8x512xf32> to vector<1x512xf32>
    %c9 = arith.constant 9 : index
    %c0_93 = arith.constant 0 : index
    %95 = vector.load %arg12[%c9, %c0_93] : memref<18x512xf32, #tpu.memory_space<vmem>>, vector<1x512xf32>
    tpu.vector_store %arg12[%c9, %c0_93], %94 {strides = array<i32>} : memref<18x512xf32, #tpu.memory_space<vmem>>, vector<1x512xf32>,
    %96 = vector.extract_strided_slice %85 {offsets = [5, 0], sizes = [1, 512], strides = [1, 1]} : vector<8x512xf32> to vector<1x512xf32>
    %c11 = arith.constant 11 : index
    %c0_94 = arith.constant 0 : index
    %97 = vector.load %arg12[%c11, %c0_94] : memref<18x512xf32, #tpu.memory_space<vmem>>, vector<1x512xf32>
    tpu.vector_store %arg12[%c11, %c0_94], %96 {strides = array<i32>} : memref<18x512xf32, #tpu.memory_space<vmem>>, vector<1x512xf32>,
    %98 = vector.extract_strided_slice %85 {offsets = [6, 0], sizes = [1, 512], strides = [1, 1]} : vector<8x512xf32> to vector<1x512xf32>
    %c13 = arith.constant 13 : index
    %c0_95 = arith.constant 0 : index
    %99 = vector.load %arg12[%c13, %c0_95] : memref<18x512xf32, #tpu.memory_space<vmem>>, vector<1x512xf32>
    tpu.vector_store %arg12[%c13, %c0_95], %98 {strides = array<i32>} : memref<18x512xf32, #tpu.memory_space<vmem>>, vector<1x512xf32>,
    %100 = vector.extract_strided_slice %85 {offsets = [7, 0], sizes = [1, 512], strides = [1, 1]} : vector<8x512xf32> to vector<1x512xf32>
    %c15 = arith.constant 15 : index
    %c0_96 = arith.constant 0 : index
    %101 = vector.load %arg12[%c15, %c0_96] : memref<18x512xf32, #tpu.memory_space<vmem>>, vector<1x512xf32>
    tpu.vector_store %arg12[%c15, %c0_96], %100 {strides = array<i32>} : memref<18x512xf32, #tpu.memory_space<vmem>>, vector<1x512xf32>,
    %c1_97 = arith.constant 1 : index
    %c0_98 = arith.constant 0 : index
    %c0_99 = arith.constant 0 : index
    %c0_100 = arith.constant 0 : index
    %102 = vector.load %arg4[%c1_97, %c0_98, %c0_99, %c0_100] : memref<2x2x448x512xbf16, #tpu.memory_space<vmem>>, vector<1x1x448x512xbf16>
    %103 = vector.shape_cast %102 : vector<1x1x448x512xbf16> to vector<448x512xbf16>
    %cst_101 = arith.constant dense<0.000000e+00> : vector<8x512xf32>
    %104 = tpu.matmul %71, %103, %cst_101 {dimension_numbers = #tpu.dot_dimension_numbers<[1], [0], [0], [1], [0, 0, 1, 1], [], []>} : vector<8x448xbf16>, vector<448x512xbf16>, vector<8x512xf32> -> vector<8x512xf32>
    %c1_102 = arith.constant 1 : index
    %c1_103 = arith.constant 1 : index
    %c0_104 = arith.constant 0 : index
    %c0_105 = arith.constant 0 : index
    %105 = vector.load %arg4[%c1_102, %c1_103, %c0_104, %c0_105] : memref<2x2x448x512xbf16, #tpu.memory_space<vmem>>, vector<1x1x448x512xbf16>
    %106 = vector.shape_cast %105 : vector<1x1x448x512xbf16> to vector<448x512xbf16>
    %cst_106 = arith.constant dense<0.000000e+00> : vector<8x512xf32>
    %107 = tpu.matmul %73, %106, %cst_106 {dimension_numbers = #tpu.dot_dimension_numbers<[1], [0], [0], [1], [0, 0, 1, 1], [], []>} : vector<8x448xbf16>, vector<448x512xbf16>, vector<8x512xf32> -> vector<8x512xf32>
    %108 = arith.addf %104, %107 : vector<8x512xf32>
    %c0_107 = arith.constant 0 : index
    %c0_108 = arith.constant 0 : index
    %109 = vector.load %arg5[%c0_107, %c0_108] : memref<1x512xf32, #tpu.memory_space<vmem>>, vector<1x512xf32>
    %110 = vector.broadcast %109 : vector<1x512xf32> to vector<8x512xf32>
    %111 = arith.addf %108, %110 : vector<8x512xf32>
    %cst_109 = arith.constant 0.000000e+00 : f32
    %112 = vector.broadcast %cst_109 : f32 to vector<8x512xf32>
    %113 = arith.maximumf %111, %112 : vector<8x512xf32>
    %114 = vector.extract_strided_slice %113 {offsets = [0, 0], sizes = [1, 512], strides = [1, 1]} : vector<8x512xf32> to vector<1x512xf32>
    %c2_110 = arith.constant 2 : index
    %c0_111 = arith.constant 0 : index
    %115 = vector.load %arg12[%c2_110, %c0_111] : memref<18x512xf32, #tpu.memory_space<vmem>>, vector<1x512xf32>
    tpu.vector_store %arg12[%c2_110, %c0_111], %114 {strides = array<i32>} : memref<18x512xf32, #tpu.memory_space<vmem>>, vector<1x512xf32>,
    %116 = vector.extract_strided_slice %113 {offsets = [1, 0], sizes = [1, 512], strides = [1, 1]} : vector<8x512xf32> to vector<1x512xf32>
    %c4_112 = arith.constant 4 : index
    %c0_113 = arith.constant 0 : index
    %117 = vector.load %arg12[%c4_112, %c0_113] : memref<18x512xf32, #tpu.memory_space<vmem>>, vector<1x512xf32>
    tpu.vector_store %arg12[%c4_112, %c0_113], %116 {strides = array<i32>} : memref<18x512xf32, #tpu.memory_space<vmem>>, vector<1x512xf32>,
    %118 = vector.extract_strided_slice %113 {offsets = [2, 0], sizes = [1, 512], strides = [1, 1]} : vector<8x512xf32> to vector<1x512xf32>
    %c6_114 = arith.constant 6 : index
    %c0_115 = arith.constant 0 : index
    %119 = vector.load %arg12[%c6_114, %c0_115] : memref<18x512xf32, #tpu.memory_space<vmem>>, vector<1x512xf32>
    tpu.vector_store %arg12[%c6_114, %c0_115], %118 {strides = array<i32>} : memref<18x512xf32, #tpu.memory_space<vmem>>, vector<1x512xf32>,
    %120 = vector.extract_strided_slice %113 {offsets = [3, 0], sizes = [1, 512], strides = [1, 1]} : vector<8x512xf32> to vector<1x512xf32>
    %c8 = arith.constant 8 : index
    %c0_116 = arith.constant 0 : index
    %121 = vector.load %arg12[%c8, %c0_116] : memref<18x512xf32, #tpu.memory_space<vmem>>, vector<1x512xf32>
    tpu.vector_store %arg12[%c8, %c0_116], %120 {strides = array<i32>} : memref<18x512xf32, #tpu.memory_space<vmem>>, vector<1x512xf32>,
    %122 = vector.extract_strided_slice %113 {offsets = [4, 0], sizes = [1, 512], strides = [1, 1]} : vector<8x512xf32> to vector<1x512xf32>
    %c10 = arith.constant 10 : index
    %c0_117 = arith.constant 0 : index
    %123 = vector.load %arg12[%c10, %c0_117] : memref<18x512xf32, #tpu.memory_space<vmem>>, vector<1x512xf32>
    tpu.vector_store %arg12[%c10, %c0_117], %122 {strides = array<i32>} : memref<18x512xf32, #tpu.memory_space<vmem>>, vector<1x512xf32>,
    %124 = vector.extract_strided_slice %113 {offsets = [5, 0], sizes = [1, 512], strides = [1, 1]} : vector<8x512xf32> to vector<1x512xf32>
    %c12 = arith.constant 12 : index
    %c0_118 = arith.constant 0 : index
    %125 = vector.load %arg12[%c12, %c0_118] : memref<18x512xf32, #tpu.memory_space<vmem>>, vector<1x512xf32>
    tpu.vector_store %arg12[%c12, %c0_118], %124 {strides = array<i32>} : memref<18x512xf32, #tpu.memory_space<vmem>>, vector<1x512xf32>,
    %126 = vector.extract_strided_slice %113 {offsets = [6, 0], sizes = [1, 512], strides = [1, 1]} : vector<8x512xf32> to vector<1x512xf32>
    %c14 = arith.constant 14 : index
    %c0_119 = arith.constant 0 : index
    %127 = vector.load %arg12[%c14, %c0_119] : memref<18x512xf32, #tpu.memory_space<vmem>>, vector<1x512xf32>
    tpu.vector_store %arg12[%c14, %c0_119], %126 {strides = array<i32>} : memref<18x512xf32, #tpu.memory_space<vmem>>, vector<1x512xf32>,
    %128 = vector.extract_strided_slice %113 {offsets = [7, 0], sizes = [1, 512], strides = [1, 1]} : vector<8x512xf32> to vector<1x512xf32>
    %c16 = arith.constant 16 : index
    %c0_120 = arith.constant 0 : index
    %129 = vector.load %arg12[%c16, %c0_120] : memref<18x512xf32, #tpu.memory_space<vmem>>, vector<1x512xf32>
    tpu.vector_store %arg12[%c16, %c0_120], %128 {strides = array<i32>} : memref<18x512xf32, #tpu.memory_space<vmem>>, vector<1x512xf32>,
    %c1_121 = arith.constant 1 : index
    %c0_122 = arith.constant 0 : index
    %130 = vector.load %arg12[%c1_121, %c0_122] : memref<18x512xf32, #tpu.memory_space<vmem>>, vector<17x512xf32>
    %131 = arith.truncf %130 : vector<17x512xf32> to vector<17x512xbf16>
    %c0_123 = arith.constant 0 : index
    %c0_124 = arith.constant 0 : index
    %132 = vector.load %arg12[%c0_123, %c0_124] : memref<18x512xf32, #tpu.memory_space<vmem>>, vector<17x512xf32>
    %133 = arith.truncf %132 : vector<17x512xf32> to vector<17x512xbf16>
    %c0_125 = arith.constant 0 : index
    %c0_126 = arith.constant 0 : index
    %c0_127 = arith.constant 0 : index
    %c0_128 = arith.constant 0 : index
    %134 = vector.load %arg6[%c0_125, %c0_126, %c0_127, %c0_128] : memref<2x2x512x544xbf16, #tpu.memory_space<vmem>>, vector<1x1x512x544xbf16>
    %135 = vector.shape_cast %134 : vector<1x1x512x544xbf16> to vector<512x544xbf16>
    %cst_129 = arith.constant dense<0.000000e+00> : vector<17x544xf32>
    %136 = tpu.matmul %131, %135, %cst_129 {dimension_numbers = #tpu.dot_dimension_numbers<[1], [0], [0], [1], [0, 0, 1, 1], [], []>} : vector<17x512xbf16>, vector<512x544xbf16>, vector<17x544xf32> -> vector<17x544xf32>
    %c0_130 = arith.constant 0 : index
    %c1_131 = arith.constant 1 : index
    %c0_132 = arith.constant 0 : index
    %c0_133 = arith.constant 0 : index
    %137 = vector.load %arg6[%c0_130, %c1_131, %c0_132, %c0_133] : memref<2x2x512x544xbf16, #tpu.memory_space<vmem>>, vector<1x1x512x544xbf16>
    %138 = vector.shape_cast %137 : vector<1x1x512x544xbf16> to vector<512x544xbf16>
    %cst_134 = arith.constant dense<0.000000e+00> : vector<17x544xf32>
    %139 = tpu.matmul %133, %138, %cst_134 {dimension_numbers = #tpu.dot_dimension_numbers<[1], [0], [0], [1], [0, 0, 1, 1], [], []>} : vector<17x512xbf16>, vector<512x544xbf16>, vector<17x544xf32> -> vector<17x544xf32>
    %140 = arith.addf %136, %139 : vector<17x544xf32>
    %c0_135 = arith.constant 0 : index
    %c0_136 = arith.constant 0 : index
    %141 = vector.load %arg7[%c0_135, %c0_136] : memref<1x544xf32, #tpu.memory_space<vmem>>, vector<1x544xf32>
    %142 = vector.broadcast %141 : vector<1x544xf32> to vector<17x544xf32>
    %143 = arith.addf %140, %142 : vector<17x544xf32>
    %cst_137 = arith.constant 0.000000e+00 : f32
    %144 = vector.broadcast %cst_137 : f32 to vector<17x544xf32>
    %145 = arith.maximumf %143, %144 : vector<17x544xf32>
    %146 = vector.extract_strided_slice %145 {offsets = [0, 0], sizes = [1, 544], strides = [1, 1]} : vector<17x544xf32> to vector<1x544xf32>
    %c0_138 = arith.constant 0 : index
    %c0_139 = arith.constant 0 : index
    %147 = vector.load %arg13[%c0_138, %c0_139] : memref<34x544xf32, #tpu.memory_space<vmem>>, vector<1x544xf32>
    tpu.vector_store %arg13[%c0_138, %c0_139], %146 {strides = array<i32>} : memref<34x544xf32, #tpu.memory_space<vmem>>, vector<1x544xf32>,
    %148 = vector.extract_strided_slice %145 {offsets = [1, 0], sizes = [1, 544], strides = [1, 1]} : vector<17x544xf32> to vector<1x544xf32>
    %c2_140 = arith.constant 2 : index
    %c0_141 = arith.constant 0 : index
    %149 = vector.load %arg13[%c2_140, %c0_141] : memref<34x544xf32, #tpu.memory_space<vmem>>, vector<1x544xf32>
    tpu.vector_store %arg13[%c2_140, %c0_141], %148 {strides = array<i32>} : memref<34x544xf32, #tpu.memory_space<vmem>>, vector<1x544xf32>,
    %150 = vector.extract_strided_slice %145 {offsets = [2, 0], sizes = [1, 544], strides = [1, 1]} : vector<17x544xf32> to vector<1x544xf32>
    %c4_142 = arith.constant 4 : index
    %c0_143 = arith.constant 0 : index
    %151 = vector.load %arg13[%c4_142, %c0_143] : memref<34x544xf32, #tpu.memory_space<vmem>>, vector<1x544xf32>
    tpu.vector_store %arg13[%c4_142, %c0_143], %150 {strides = array<i32>} : memref<34x544xf32, #tpu.memory_space<vmem>>, vector<1x544xf32>,
    %152 = vector.extract_strided_slice %145 {offsets = [3, 0], sizes = [1, 544], strides = [1, 1]} : vector<17x544xf32> to vector<1x544xf32>
    %c6_144 = arith.constant 6 : index
    %c0_145 = arith.constant 0 : index
    %153 = vector.load %arg13[%c6_144, %c0_145] : memref<34x544xf32, #tpu.memory_space<vmem>>, vector<1x544xf32>
    tpu.vector_store %arg13[%c6_144, %c0_145], %152 {strides = array<i32>} : memref<34x544xf32, #tpu.memory_space<vmem>>, vector<1x544xf32>,
    %154 = vector.extract_strided_slice %145 {offsets = [4, 0], sizes = [1, 544], strides = [1, 1]} : vector<17x544xf32> to vector<1x544xf32>
    %c8_146 = arith.constant 8 : index
    %c0_147 = arith.constant 0 : index
    %155 = vector.load %arg13[%c8_146, %c0_147] : memref<34x544xf32, #tpu.memory_space<vmem>>, vector<1x544xf32>
    tpu.vector_store %arg13[%c8_146, %c0_147], %154 {strides = array<i32>} : memref<34x544xf32, #tpu.memory_space<vmem>>, vector<1x544xf32>,
    %156 = vector.extract_strided_slice %145 {offsets = [5, 0], sizes = [1, 544], strides = [1, 1]} : vector<17x544xf32> to vector<1x544xf32>
    %c10_148 = arith.constant 10 : index
    %c0_149 = arith.constant 0 : index
    %157 = vector.load %arg13[%c10_148, %c0_149] : memref<34x544xf32, #tpu.memory_space<vmem>>, vector<1x544xf32>
    tpu.vector_store %arg13[%c10_148, %c0_149], %156 {strides = array<i32>} : memref<34x544xf32, #tpu.memory_space<vmem>>, vector<1x544xf32>,
    %158 = vector.extract_strided_slice %145 {offsets = [6, 0], sizes = [1, 544], strides = [1, 1]} : vector<17x544xf32> to vector<1x544xf32>
    %c12_150 = arith.constant 12 : index
    %c0_151 = arith.constant 0 : index
    %159 = vector.load %arg13[%c12_150, %c0_151] : memref<34x544xf32, #tpu.memory_space<vmem>>, vector<1x544xf32>
    tpu.vector_store %arg13[%c12_150, %c0_151], %158 {strides = array<i32>} : memref<34x544xf32, #tpu.memory_space<vmem>>, vector<1x544xf32>,
    %160 = vector.extract_strided_slice %145 {offsets = [7, 0], sizes = [1, 544], strides = [1, 1]} : vector<17x544xf32> to vector<1x544xf32>
    %c14_152 = arith.constant 14 : index
    %c0_153 = arith.constant 0 : index
    %161 = vector.load %arg13[%c14_152, %c0_153] : memref<34x544xf32, #tpu.memory_space<vmem>>, vector<1x544xf32>
    tpu.vector_store %arg13[%c14_152, %c0_153], %160 {strides = array<i32>} : memref<34x544xf32, #tpu.memory_space<vmem>>, vector<1x544xf32>,
    %162 = vector.extract_strided_slice %145 {offsets = [8, 0], sizes = [1, 544], strides = [1, 1]} : vector<17x544xf32> to vector<1x544xf32>
    %c16_154 = arith.constant 16 : index
    %c0_155 = arith.constant 0 : index
    %163 = vector.load %arg13[%c16_154, %c0_155] : memref<34x544xf32, #tpu.memory_space<vmem>>, vector<1x544xf32>
    tpu.vector_store %arg13[%c16_154, %c0_155], %162 {strides = array<i32>} : memref<34x544xf32, #tpu.memory_space<vmem>>, vector<1x544xf32>,
    %164 = vector.extract_strided_slice %145 {offsets = [9, 0], sizes = [1, 544], strides = [1, 1]} : vector<17x544xf32> to vector<1x544xf32>
    %c18 = arith.constant 18 : index
    %c0_156 = arith.constant 0 : index
    %165 = vector.load %arg13[%c18, %c0_156] : memref<34x544xf32, #tpu.memory_space<vmem>>, vector<1x544xf32>
    tpu.vector_store %arg13[%c18, %c0_156], %164 {strides = array<i32>} : memref<34x544xf32, #tpu.memory_space<vmem>>, vector<1x544xf32>,
    %166 = vector.extract_strided_slice %145 {offsets = [10, 0], sizes = [1, 544], strides = [1, 1]} : vector<17x544xf32> to vector<1x544xf32>
    %c20 = arith.constant 20 : index
    %c0_157 = arith.constant 0 : index
    %167 = vector.load %arg13[%c20, %c0_157] : memref<34x544xf32, #tpu.memory_space<vmem>>, vector<1x544xf32>
    tpu.vector_store %arg13[%c20, %c0_157], %166 {strides = array<i32>} : memref<34x544xf32, #tpu.memory_space<vmem>>, vector<1x544xf32>,
    %168 = vector.extract_strided_slice %145 {offsets = [11, 0], sizes = [1, 544], strides = [1, 1]} : vector<17x544xf32> to vector<1x544xf32>
    %c22 = arith.constant 22 : index
    %c0_158 = arith.constant 0 : index
    %169 = vector.load %arg13[%c22, %c0_158] : memref<34x544xf32, #tpu.memory_space<vmem>>, vector<1x544xf32>
    tpu.vector_store %arg13[%c22, %c0_158], %168 {strides = array<i32>} : memref<34x544xf32, #tpu.memory_space<vmem>>, vector<1x544xf32>,
    %170 = vector.extract_strided_slice %145 {offsets = [12, 0], sizes = [1, 544], strides = [1, 1]} : vector<17x544xf32> to vector<1x544xf32>
    %c24 = arith.constant 24 : index
    %c0_159 = arith.constant 0 : index
    %171 = vector.load %arg13[%c24, %c0_159] : memref<34x544xf32, #tpu.memory_space<vmem>>, vector<1x544xf32>
    tpu.vector_store %arg13[%c24, %c0_159], %170 {strides = array<i32>} : memref<34x544xf32, #tpu.memory_space<vmem>>, vector<1x544xf32>,
    %172 = vector.extract_strided_slice %145 {offsets = [13, 0], sizes = [1, 544], strides = [1, 1]} : vector<17x544xf32> to vector<1x544xf32>
    %c26 = arith.constant 26 : index
    %c0_160 = arith.constant 0 : index
    %173 = vector.load %arg13[%c26, %c0_160] : memref<34x544xf32, #tpu.memory_space<vmem>>, vector<1x544xf32>
    tpu.vector_store %arg13[%c26, %c0_160], %172 {strides = array<i32>} : memref<34x544xf32, #tpu.memory_space<vmem>>, vector<1x544xf32>,
    %174 = vector.extract_strided_slice %145 {offsets = [14, 0], sizes = [1, 544], strides = [1, 1]} : vector<17x544xf32> to vector<1x544xf32>
    %c28 = arith.constant 28 : index
    %c0_161 = arith.constant 0 : index
    %175 = vector.load %arg13[%c28, %c0_161] : memref<34x544xf32, #tpu.memory_space<vmem>>, vector<1x544xf32>
    tpu.vector_store %arg13[%c28, %c0_161], %174 {strides = array<i32>} : memref<34x544xf32, #tpu.memory_space<vmem>>, vector<1x544xf32>,
    %176 = vector.extract_strided_slice %145 {offsets = [15, 0], sizes = [1, 544], strides = [1, 1]} : vector<17x544xf32> to vector<1x544xf32>
    %c30 = arith.constant 30 : index
    %c0_162 = arith.constant 0 : index
    %177 = vector.load %arg13[%c30, %c0_162] : memref<34x544xf32, #tpu.memory_space<vmem>>, vector<1x544xf32>
    tpu.vector_store %arg13[%c30, %c0_162], %176 {strides = array<i32>} : memref<34x544xf32, #tpu.memory_space<vmem>>, vector<1x544xf32>,
    %178 = vector.extract_strided_slice %145 {offsets = [16, 0], sizes = [1, 544], strides = [1, 1]} : vector<17x544xf32> to vector<1x544xf32>
    %c32 = arith.constant 32 : index
    %c0_163 = arith.constant 0 : index
    %179 = vector.load %arg13[%c32, %c0_163] : memref<34x544xf32, #tpu.memory_space<vmem>>, vector<1x544xf32>
    tpu.vector_store %arg13[%c32, %c0_163], %178 {strides = array<i32>} : memref<34x544xf32, #tpu.memory_space<vmem>>, vector<1x544xf32>,
    %c1_164 = arith.constant 1 : index
    %c0_165 = arith.constant 0 : index
    %c0_166 = arith.constant 0 : index
    %c0_167 = arith.constant 0 : index
    %180 = vector.load %arg6[%c1_164, %c0_165, %c0_166, %c0_167] : memref<2x2x512x544xbf16, #tpu.memory_space<vmem>>, vector<1x1x512x544xbf16>
    %181 = vector.shape_cast %180 : vector<1x1x512x544xbf16> to vector<512x544xbf16>
    %cst_168 = arith.constant dense<0.000000e+00> : vector<17x544xf32>
    %182 = tpu.matmul %131, %181, %cst_168 {dimension_numbers = #tpu.dot_dimension_numbers<[1], [0], [0], [1], [0, 0, 1, 1], [], []>} : vector<17x512xbf16>, vector<512x544xbf16>, vector<17x544xf32> -> vector<17x544xf32>
    %c1_169 = arith.constant 1 : index
    %c1_170 = arith.constant 1 : index
    %c0_171 = arith.constant 0 : index
    %c0_172 = arith.constant 0 : index
    %183 = vector.load %arg6[%c1_169, %c1_170, %c0_171, %c0_172] : memref<2x2x512x544xbf16, #tpu.memory_space<vmem>>, vector<1x1x512x544xbf16>
    %184 = vector.shape_cast %183 : vector<1x1x512x544xbf16> to vector<512x544xbf16>
    %cst_173 = arith.constant dense<0.000000e+00> : vector<17x544xf32>
    %185 = tpu.matmul %133, %184, %cst_173 {dimension_numbers = #tpu.dot_dimension_numbers<[1], [0], [0], [1], [0, 0, 1, 1], [], []>} : vector<17x512xbf16>, vector<512x544xbf16>, vector<17x544xf32> -> vector<17x544xf32>
    %186 = arith.addf %182, %185 : vector<17x544xf32>
    %c0_174 = arith.constant 0 : index
    %c0_175 = arith.constant 0 : index
    %187 = vector.load %arg7[%c0_174, %c0_175] : memref<1x544xf32, #tpu.memory_space<vmem>>, vector<1x544xf32>
    %188 = vector.broadcast %187 : vector<1x544xf32> to vector<17x544xf32>
    %189 = arith.addf %186, %188 : vector<17x544xf32>
    %cst_176 = arith.constant 0.000000e+00 : f32
    %190 = vector.broadcast %cst_176 : f32 to vector<17x544xf32>
    %191 = arith.maximumf %189, %190 : vector<17x544xf32>
    %192 = vector.extract_strided_slice %191 {offsets = [0, 0], sizes = [1, 544], strides = [1, 1]} : vector<17x544xf32> to vector<1x544xf32>
    %c1_177 = arith.constant 1 : index
    %c0_178 = arith.constant 0 : index
    %193 = vector.load %arg13[%c1_177, %c0_178] : memref<34x544xf32, #tpu.memory_space<vmem>>, vector<1x544xf32>
    tpu.vector_store %arg13[%c1_177, %c0_178], %192 {strides = array<i32>} : memref<34x544xf32, #tpu.memory_space<vmem>>, vector<1x544xf32>,
    %194 = vector.extract_strided_slice %191 {offsets = [1, 0], sizes = [1, 544], strides = [1, 1]} : vector<17x544xf32> to vector<1x544xf32>
    %c3_179 = arith.constant 3 : index
    %c0_180 = arith.constant 0 : index
    %195 = vector.load %arg13[%c3_179, %c0_180] : memref<34x544xf32, #tpu.memory_space<vmem>>, vector<1x544xf32>
    tpu.vector_store %arg13[%c3_179, %c0_180], %194 {strides = array<i32>} : memref<34x544xf32, #tpu.memory_space<vmem>>, vector<1x544xf32>,
    %196 = vector.extract_strided_slice %191 {offsets = [2, 0], sizes = [1, 544], strides = [1, 1]} : vector<17x544xf32> to vector<1x544xf32>
    %c5_181 = arith.constant 5 : index
    %c0_182 = arith.constant 0 : index
    %197 = vector.load %arg13[%c5_181, %c0_182] : memref<34x544xf32, #tpu.memory_space<vmem>>, vector<1x544xf32>
    tpu.vector_store %arg13[%c5_181, %c0_182], %196 {strides = array<i32>} : memref<34x544xf32, #tpu.memory_space<vmem>>, vector<1x544xf32>,
    %198 = vector.extract_strided_slice %191 {offsets = [3, 0], sizes = [1, 544], strides = [1, 1]} : vector<17x544xf32> to vector<1x544xf32>
    %c7_183 = arith.constant 7 : index
    %c0_184 = arith.constant 0 : index
    %199 = vector.load %arg13[%c7_183, %c0_184] : memref<34x544xf32, #tpu.memory_space<vmem>>, vector<1x544xf32>
    tpu.vector_store %arg13[%c7_183, %c0_184], %198 {strides = array<i32>} : memref<34x544xf32, #tpu.memory_space<vmem>>, vector<1x544xf32>,
    %200 = vector.extract_strided_slice %191 {offsets = [4, 0], sizes = [1, 544], strides = [1, 1]} : vector<17x544xf32> to vector<1x544xf32>
    %c9_185 = arith.constant 9 : index
    %c0_186 = arith.constant 0 : index
    %201 = vector.load %arg13[%c9_185, %c0_186] : memref<34x544xf32, #tpu.memory_space<vmem>>, vector<1x544xf32>
    tpu.vector_store %arg13[%c9_185, %c0_186], %200 {strides = array<i32>} : memref<34x544xf32, #tpu.memory_space<vmem>>, vector<1x544xf32>,
    %202 = vector.extract_strided_slice %191 {offsets = [5, 0], sizes = [1, 544], strides = [1, 1]} : vector<17x544xf32> to vector<1x544xf32>
    %c11_187 = arith.constant 11 : index
    %c0_188 = arith.constant 0 : index
    %203 = vector.load %arg13[%c11_187, %c0_188] : memref<34x544xf32, #tpu.memory_space<vmem>>, vector<1x544xf32>
    tpu.vector_store %arg13[%c11_187, %c0_188], %202 {strides = array<i32>} : memref<34x544xf32, #tpu.memory_space<vmem>>, vector<1x544xf32>,
    %204 = vector.extract_strided_slice %191 {offsets = [6, 0], sizes = [1, 544], strides = [1, 1]} : vector<17x544xf32> to vector<1x544xf32>
    %c13_189 = arith.constant 13 : index
    %c0_190 = arith.constant 0 : index
    %205 = vector.load %arg13[%c13_189, %c0_190] : memref<34x544xf32, #tpu.memory_space<vmem>>, vector<1x544xf32>
    tpu.vector_store %arg13[%c13_189, %c0_190], %204 {strides = array<i32>} : memref<34x544xf32, #tpu.memory_space<vmem>>, vector<1x544xf32>,
    %206 = vector.extract_strided_slice %191 {offsets = [7, 0], sizes = [1, 544], strides = [1, 1]} : vector<17x544xf32> to vector<1x544xf32>
    %c15_191 = arith.constant 15 : index
    %c0_192 = arith.constant 0 : index
    %207 = vector.load %arg13[%c15_191, %c0_192] : memref<34x544xf32, #tpu.memory_space<vmem>>, vector<1x544xf32>
    tpu.vector_store %arg13[%c15_191, %c0_192], %206 {strides = array<i32>} : memref<34x544xf32, #tpu.memory_space<vmem>>, vector<1x544xf32>,
    %208 = vector.extract_strided_slice %191 {offsets = [8, 0], sizes = [1, 544], strides = [1, 1]} : vector<17x544xf32> to vector<1x544xf32>
    %c17 = arith.constant 17 : index
    %c0_193 = arith.constant 0 : index
    %209 = vector.load %arg13[%c17, %c0_193] : memref<34x544xf32, #tpu.memory_space<vmem>>, vector<1x544xf32>
    tpu.vector_store %arg13[%c17, %c0_193], %208 {strides = array<i32>} : memref<34x544xf32, #tpu.memory_space<vmem>>, vector<1x544xf32>,
    %210 = vector.extract_strided_slice %191 {offsets = [9, 0], sizes = [1, 544], strides = [1, 1]} : vector<17x544xf32> to vector<1x544xf32>
    %c19 = arith.constant 19 : index
    %c0_194 = arith.constant 0 : index
    %211 = vector.load %arg13[%c19, %c0_194] : memref<34x544xf32, #tpu.memory_space<vmem>>, vector<1x544xf32>
    tpu.vector_store %arg13[%c19, %c0_194], %210 {strides = array<i32>} : memref<34x544xf32, #tpu.memory_space<vmem>>, vector<1x544xf32>,
    %212 = vector.extract_strided_slice %191 {offsets = [10, 0], sizes = [1, 544], strides = [1, 1]} : vector<17x544xf32> to vector<1x544xf32>
    %c21 = arith.constant 21 : index
    %c0_195 = arith.constant 0 : index
    %213 = vector.load %arg13[%c21, %c0_195] : memref<34x544xf32, #tpu.memory_space<vmem>>, vector<1x544xf32>
    tpu.vector_store %arg13[%c21, %c0_195], %212 {strides = array<i32>} : memref<34x544xf32, #tpu.memory_space<vmem>>, vector<1x544xf32>,
    %214 = vector.extract_strided_slice %191 {offsets = [11, 0], sizes = [1, 544], strides = [1, 1]} : vector<17x544xf32> to vector<1x544xf32>
    %c23 = arith.constant 23 : index
    %c0_196 = arith.constant 0 : index
    %215 = vector.load %arg13[%c23, %c0_196] : memref<34x544xf32, #tpu.memory_space<vmem>>, vector<1x544xf32>
    tpu.vector_store %arg13[%c23, %c0_196], %214 {strides = array<i32>} : memref<34x544xf32, #tpu.memory_space<vmem>>, vector<1x544xf32>,
    %216 = vector.extract_strided_slice %191 {offsets = [12, 0], sizes = [1, 544], strides = [1, 1]} : vector<17x544xf32> to vector<1x544xf32>
    %c25 = arith.constant 25 : index
    %c0_197 = arith.constant 0 : index
    %217 = vector.load %arg13[%c25, %c0_197] : memref<34x544xf32, #tpu.memory_space<vmem>>, vector<1x544xf32>
    tpu.vector_store %arg13[%c25, %c0_197], %216 {strides = array<i32>} : memref<34x544xf32, #tpu.memory_space<vmem>>, vector<1x544xf32>,
    %218 = vector.extract_strided_slice %191 {offsets = [13, 0], sizes = [1, 544], strides = [1, 1]} : vector<17x544xf32> to vector<1x544xf32>
    %c27 = arith.constant 27 : index
    %c0_198 = arith.constant 0 : index
    %219 = vector.load %arg13[%c27, %c0_198] : memref<34x544xf32, #tpu.memory_space<vmem>>, vector<1x544xf32>
    tpu.vector_store %arg13[%c27, %c0_198], %218 {strides = array<i32>} : memref<34x544xf32, #tpu.memory_space<vmem>>, vector<1x544xf32>,
    %220 = vector.extract_strided_slice %191 {offsets = [14, 0], sizes = [1, 544], strides = [1, 1]} : vector<17x544xf32> to vector<1x544xf32>
    %c29 = arith.constant 29 : index
    %c0_199 = arith.constant 0 : index
    %221 = vector.load %arg13[%c29, %c0_199] : memref<34x544xf32, #tpu.memory_space<vmem>>, vector<1x544xf32>
    tpu.vector_store %arg13[%c29, %c0_199], %220 {strides = array<i32>} : memref<34x544xf32, #tpu.memory_space<vmem>>, vector<1x544xf32>,
    %222 = vector.extract_strided_slice %191 {offsets = [15, 0], sizes = [1, 544], strides = [1, 1]} : vector<17x544xf32> to vector<1x544xf32>
    %c31 = arith.constant 31 : index
    %c0_200 = arith.constant 0 : index
    %223 = vector.load %arg13[%c31, %c0_200] : memref<34x544xf32, #tpu.memory_space<vmem>>, vector<1x544xf32>
    tpu.vector_store %arg13[%c31, %c0_200], %222 {strides = array<i32>} : memref<34x544xf32, #tpu.memory_space<vmem>>, vector<1x544xf32>,
    %224 = vector.extract_strided_slice %191 {offsets = [16, 0], sizes = [1, 544], strides = [1, 1]} : vector<17x544xf32> to vector<1x544xf32>
    %c33 = arith.constant 33 : index
    %c0_201 = arith.constant 0 : index
    %225 = vector.load %arg13[%c33, %c0_201] : memref<34x544xf32, #tpu.memory_space<vmem>>, vector<1x544xf32>
    tpu.vector_store %arg13[%c33, %c0_201], %224 {strides = array<i32>} : memref<34x544xf32, #tpu.memory_space<vmem>>, vector<1x544xf32>,
    %c0_202 = arith.constant 0 : index
    %c0_203 = arith.constant 0 : index
    %226 = vector.load %arg13[%c0_202, %c0_203] : memref<34x544xf32, #tpu.memory_space<vmem>>, vector<28x544xf32>
    %227 = arith.truncf %226 : vector<28x544xf32> to vector<28x544xbf16>
    %c0_204 = arith.constant 0 : index
    %c0_205 = arith.constant 0 : index
    %c0_206 = arith.constant 0 : index
    %228 = vector.load %arg8[%c0_204, %c0_205, %c0_206] : memref<7x544x28xbf16, #tpu.memory_space<vmem>>, vector<1x544x28xbf16>
    %229 = vector.shape_cast %228 : vector<1x544x28xbf16> to vector<544x28xbf16>
    %cst_207 = arith.constant dense<0.000000e+00> : vector<28x28xf32>
    %230 = tpu.matmul %227, %229, %cst_207 {dimension_numbers = #tpu.dot_dimension_numbers<[1], [0], [0], [1], [0, 0, 1, 1], [], []>} : vector<28x544xbf16>, vector<544x28xbf16>, vector<28x28xf32> -> vector<28x28xf32>
    %c1_208 = arith.constant 1 : index
    %c0_209 = arith.constant 0 : index
    %231 = vector.load %arg13[%c1_208, %c0_209] : memref<34x544xf32, #tpu.memory_space<vmem>>, vector<28x544xf32>
    %232 = arith.truncf %231 : vector<28x544xf32> to vector<28x544xbf16>
    %c1_210 = arith.constant 1 : index
    %c0_211 = arith.constant 0 : index
    %c0_212 = arith.constant 0 : index
    %233 = vector.load %arg8[%c1_210, %c0_211, %c0_212] : memref<7x544x28xbf16, #tpu.memory_space<vmem>>, vector<1x544x28xbf16>
    %234 = vector.shape_cast %233 : vector<1x544x28xbf16> to vector<544x28xbf16>
    %cst_213 = arith.constant dense<0.000000e+00> : vector<28x28xf32>
    %235 = tpu.matmul %232, %234, %cst_213 {dimension_numbers = #tpu.dot_dimension_numbers<[1], [0], [0], [1], [0, 0, 1, 1], [], []>} : vector<28x544xbf16>, vector<544x28xbf16>, vector<28x28xf32> -> vector<28x28xf32>
    %236 = arith.addf %230, %235 : vector<28x28xf32>
    %c2_214 = arith.constant 2 : index
    %c0_215 = arith.constant 0 : index
    %237 = vector.load %arg13[%c2_214, %c0_215] : memref<34x544xf32, #tpu.memory_space<vmem>>, vector<28x544xf32>
    %238 = arith.truncf %237 : vector<28x544xf32> to vector<28x544xbf16>
    %c2_216 = arith.constant 2 : index
    %c0_217 = arith.constant 0 : index
    %c0_218 = arith.constant 0 : index
    %239 = vector.load %arg8[%c2_216, %c0_217, %c0_218] : memref<7x544x28xbf16, #tpu.memory_space<vmem>>, vector<1x544x28xbf16>
    %240 = vector.shape_cast %239 : vector<1x544x28xbf16> to vector<544x28xbf16>
    %cst_219 = arith.constant dense<0.000000e+00> : vector<28x28xf32>
    %241 = tpu.matmul %238, %240, %cst_219 {dimension_numbers = #tpu.dot_dimension_numbers<[1], [0], [0], [1], [0, 0, 1, 1], [], []>} : vector<28x544xbf16>, vector<544x28xbf16>, vector<28x28xf32> -> vector<28x28xf32>
    %242 = arith.addf %236, %241 : vector<28x28xf32>
    %c3_220 = arith.constant 3 : index
    %c0_221 = arith.constant 0 : index
    %243 = vector.load %arg13[%c3_220, %c0_221] : memref<34x544xf32, #tpu.memory_space<vmem>>, vector<28x544xf32>
    %244 = arith.truncf %243 : vector<28x544xf32> to vector<28x544xbf16>
    %c3_222 = arith.constant 3 : index
    %c0_223 = arith.constant 0 : index
    %c0_224 = arith.constant 0 : index
    %245 = vector.load %arg8[%c3_222, %c0_223, %c0_224] : memref<7x544x28xbf16, #tpu.memory_space<vmem>>, vector<1x544x28xbf16>
    %246 = vector.shape_cast %245 : vector<1x544x28xbf16> to vector<544x28xbf16>
    %cst_225 = arith.constant dense<0.000000e+00> : vector<28x28xf32>
    %247 = tpu.matmul %244, %246, %cst_225 {dimension_numbers = #tpu.dot_dimension_numbers<[1], [0], [0], [1], [0, 0, 1, 1], [], []>} : vector<28x544xbf16>, vector<544x28xbf16>, vector<28x28xf32> -> vector<28x28xf32>
    %248 = arith.addf %242, %247 : vector<28x28xf32>
    %c4_226 = arith.constant 4 : index
    %c0_227 = arith.constant 0 : index
    %249 = vector.load %arg13[%c4_226, %c0_227] : memref<34x544xf32, #tpu.memory_space<vmem>>, vector<28x544xf32>
    %250 = arith.truncf %249 : vector<28x544xf32> to vector<28x544xbf16>
    %c4_228 = arith.constant 4 : index
    %c0_229 = arith.constant 0 : index
    %c0_230 = arith.constant 0 : index
    %251 = vector.load %arg8[%c4_228, %c0_229, %c0_230] : memref<7x544x28xbf16, #tpu.memory_space<vmem>>, vector<1x544x28xbf16>
    %252 = vector.shape_cast %251 : vector<1x544x28xbf16> to vector<544x28xbf16>
    %cst_231 = arith.constant dense<0.000000e+00> : vector<28x28xf32>
    %253 = tpu.matmul %250, %252, %cst_231 {dimension_numbers = #tpu.dot_dimension_numbers<[1], [0], [0], [1], [0, 0, 1, 1], [], []>} : vector<28x544xbf16>, vector<544x28xbf16>, vector<28x28xf32> -> vector<28x28xf32>
    %254 = arith.addf %248, %253 : vector<28x28xf32>
    %c5_232 = arith.constant 5 : index
    %c0_233 = arith.constant 0 : index
    %255 = vector.load %arg13[%c5_232, %c0_233] : memref<34x544xf32, #tpu.memory_space<vmem>>, vector<28x544xf32>
    %256 = arith.truncf %255 : vector<28x544xf32> to vector<28x544xbf16>
    %c5_234 = arith.constant 5 : index
    %c0_235 = arith.constant 0 : index
    %c0_236 = arith.constant 0 : index
    %257 = vector.load %arg8[%c5_234, %c0_235, %c0_236] : memref<7x544x28xbf16, #tpu.memory_space<vmem>>, vector<1x544x28xbf16>
    %258 = vector.shape_cast %257 : vector<1x544x28xbf16> to vector<544x28xbf16>
    %cst_237 = arith.constant dense<0.000000e+00> : vector<28x28xf32>
    %259 = tpu.matmul %256, %258, %cst_237 {dimension_numbers = #tpu.dot_dimension_numbers<[1], [0], [0], [1], [0, 0, 1, 1], [], []>} : vector<28x544xbf16>, vector<544x28xbf16>, vector<28x28xf32> -> vector<28x28xf32>
    %260 = arith.addf %254, %259 : vector<28x28xf32>
    %c6_238 = arith.constant 6 : index
    %c0_239 = arith.constant 0 : index
    %261 = vector.load %arg13[%c6_238, %c0_239] : memref<34x544xf32, #tpu.memory_space<vmem>>, vector<28x544xf32>
    %262 = arith.truncf %261 : vector<28x544xf32> to vector<28x544xbf16>
    %c6_240 = arith.constant 6 : index
    %c0_241 = arith.constant 0 : index
    %c0_242 = arith.constant 0 : index
    %263 = vector.load %arg8[%c6_240, %c0_241, %c0_242] : memref<7x544x28xbf16, #tpu.memory_space<vmem>>, vector<1x544x28xbf16>
    %264 = vector.shape_cast %263 : vector<1x544x28xbf16> to vector<544x28xbf16>
    %cst_243 = arith.constant dense<0.000000e+00> : vector<28x28xf32>
    %265 = tpu.matmul %262, %264, %cst_243 {dimension_numbers = #tpu.dot_dimension_numbers<[1], [0], [0], [1], [0, 0, 1, 1], [], []>} : vector<28x544xbf16>, vector<544x28xbf16>, vector<28x28xf32> -> vector<28x28xf32>
    %266 = arith.addf %260, %265 : vector<28x28xf32>
    %c0_244 = arith.constant 0 : index
    %c0_245 = arith.constant 0 : index
    %267 = vector.load %arg9[%c0_244, %c0_245] : memref<1x1xf32, #tpu.memory_space<vmem>>, vector<1x1xf32>
    %268 = vector.broadcast %267 : vector<1x1xf32> to vector<28x28xf32>
    %269 = arith.addf %266, %268 : vector<28x28xf32>
    %c0_246 = arith.constant 0 : index
    %c0_247 = arith.constant 0 : index
    %c0_248 = arith.constant 0 : index
    %c0_249 = arith.constant 0 : index
    %270 = vector.load %arg10[%c0_246, %c0_247, %c0_248, %c0_249] : memref<1x1x28x28xf32, #tpu.memory_space<vmem>>, vector<1x1x28x28xf32>
    %271 = vector.shape_cast %270 : vector<1x1x28x28xf32> to vector<28x28xf32>
    %272 = vector.shape_cast %269 : vector<28x28xf32> to vector<1x1x28x28xf32>
    tpu.vector_store %arg10[%c0_246, %c0_247, %c0_248, %c0_249], %272 {strides = array<i32>} : memref<1x1x28x28xf32, #tpu.memory_space<vmem>>, vector<1x1x28x28xf32>,
    return
  }
  func.func @transform_0(%arg0: i32) -> (i32, i32) {
    %c0_i32 = arith.constant 0 : i32
    %c0_i32_0 = arith.constant 0 : i32
    %c0_i32_1 = arith.constant 0 : i32
    return %c0_i32, %c0_i32_0 : i32, i32
  }
  func.func @transform_1(%arg0: i32) -> (i32, i32, i32) {
    %c0_i32 = arith.constant 0 : i32
    %c0_i32_0 = arith.constant 0 : i32
    %c0_i32_1 = arith.constant 0 : i32
    %c0_i32_2 = arith.constant 0 : i32
    return %c0_i32, %c0_i32_0, %c0_i32_1 : i32, i32, i32
  }
  func.func @transform_2(%arg0: i32) -> (i32, i32, i32) {
    %c0_i32 = arith.constant 0 : i32
    %c0_i32_0 = arith.constant 0 : i32
    %c0_i32_1 = arith.constant 0 : i32
    %c0_i32_2 = arith.constant 0 : i32
    return %c0_i32, %c0_i32_0, %c0_i32_1 : i32, i32, i32
  }
  func.func @transform_3(%arg0: i32) -> (i32, i32, i32, i32) {
    %c0_i32 = arith.constant 0 : i32
    %c0_i32_0 = arith.constant 0 : i32
    %c0_i32_1 = arith.constant 0 : i32
    %c0_i32_2 = arith.constant 0 : i32
    %c0_i32_3 = arith.constant 0 : i32
    return %c0_i32, %c0_i32_0, %c0_i32_1, %c0_i32_2 : i32, i32, i32, i32
  }
  func.func @transform_4(%arg0: i32) -> (i32, i32) {
    %c0_i32 = arith.constant 0 : i32
    %c0_i32_0 = arith.constant 0 : i32
    %c0_i32_1 = arith.constant 0 : i32
    return %c0_i32, %c0_i32_0 : i32, i32
  }
  func.func @transform_5(%arg0: i32) -> (i32, i32, i32, i32) {
    %c0_i32 = arith.constant 0 : i32
    %c0_i32_0 = arith.constant 0 : i32
    %c0_i32_1 = arith.constant 0 : i32
    %c0_i32_2 = arith.constant 0 : i32
    %c0_i32_3 = arith.constant 0 : i32
    return %c0_i32, %c0_i32_0, %c0_i32_1, %c0_i32_2 : i32, i32, i32, i32
  }
  func.func @transform_6(%arg0: i32) -> (i32, i32) {
    %c0_i32 = arith.constant 0 : i32
    %c0_i32_0 = arith.constant 0 : i32
    %c0_i32_1 = arith.constant 0 : i32
    return %c0_i32, %c0_i32_0 : i32, i32
  }
  func.func @transform_7(%arg0: i32) -> (i32, i32, i32) {
    %c0_i32 = arith.constant 0 : i32
    %c0_i32_0 = arith.constant 0 : i32
    %c0_i32_1 = arith.constant 0 : i32
    %c0_i32_2 = arith.constant 0 : i32
    return %c0_i32, %c0_i32_0, %c0_i32_1 : i32, i32, i32
  }
  func.func @transform_8(%arg0: i32) -> (i32, i32) {
    %c0_i32 = arith.constant 0 : i32
    %c0_i32_0 = arith.constant 0 : i32
    %c0_i32_1 = arith.constant 0 : i32
    return %c0_i32, %c0_i32_0 : i32, i32
  }
  func.func @transform_9(%arg0: i32) -> (i32, i32, i32, i32) {
    %c0_i32 = arith.constant 0 : i32
    %c0_i32_0 = arith.constant 0 : i32
    %c0_i32_1 = arith.constant 0 : i32
    %c0_i32_2 = arith.constant 0 : i32
    return %arg0, %c0_i32, %c0_i32_0, %c0_i32_1 : i32, i32, i32, i32
  }
}

</mosaic_0001>

<bundles_post_ra>
// kernel: generator_forward.1
= control target key start
LH: loop header
LB: loop body
LE: loop exit
PB: predicated region body
PF: predicated region fallthrough
CT: control target
= control target key end

     0   :  { %s21322_s11 = smov 0   ;;  %s26962_s0 = inlined_call_operand.vmem [shape: f32[2,64], index: 0, kind: input, shape index: {}]   ;;  %s26963_s1 = inlined_call_operand.vmem [shape: bf16[7,64,448], index: 1, kind: input, shape index: {}]   ;;  %s26964_s2 = inlined_call_operand.vmem [shape: f32[7,1,448], index: 2, kind: input, shape index: {}]   ;;  %s26965_s3 = inlined_call_operand.vmem [shape: bf16[2,2,448,512], index: 3, kind: input, shape index: {}]   ;;  %s26966_s4 = inlined_call_operand.vmem [shape: f32[1,512], index: 4, kind: input, shape index: {}]   ;;  %s26967_s5 = inlined_call_operand.vmem [shape: bf16[2,2,512,544], index: 5, kind: input, shape index: {}]   ;;  %s26968_s6 = inlined_call_operand.vmem [shape: f32[1,544], index: 6, kind: input, shape index: {}]   ;;  %s26969_s7 = inlined_call_operand.vmem [shape: bf16[7,544,28], index: 7, kind: input, shape index: {}]   ;;  %s26970_s8 = inlined_call_operand.<no memory space> [shape: f32[1,1], index: 8, kind: input, shape index: {}]   ;;  %s26971_s9 = inlined_call_operand.vmem [shape: f32[2,1,28,28], index: 9, kind: output, shape index: {}]  }
   0x1   :  { %v14_v0 = vstv %s26970_s8 }
   0x2   :  { %15 = vst [vmem:[#allocation5] sm:$0x1] %v14_v0 }
   0x3 LB: > { %s21328_s12 = sadd.s32 4294967295, %s21264_s11   ;;  %p15565_p0 = scmp.ge.s32.totalorder %s21264_s11, 1  ;;  %s21264_s11 = sphi %s21322_s11, %s21_s11  }
   0x4   : > { %p279_p1 = scmp.lt.s32.totalorder %s21264_s11, 3 }
   0x6   : > { %p280_p2 = pnand %p15565_p0, %p279_p1 }
   0x7   : > { %v19284_v1 = vld [vmem:[%s26963_s1 + $0x4] ss:$16 sps:$4 sm:$0xff] (!%p280_p2)   ;;  %v19286_v2 = vld [vmem:[%s26963_s1] ss:$16 sps:$4 sm:$0xff] (!%p280_p2)   ;;  %v21266_v3 = vmov (!%p280_p2), 0   ;;  %s338_s26 = scalar_lea.vmem (!%p280_p2), %s26962_s0, %s21328_s12  ;;  %vm319_vm0 = vcmask (!%p280_p2), 523264  }
   0x8   : > { %283 = sbr.rel (%p280_p2) target bundleno = 2355 (0x933), region = 56  ;;  %494 = vmatprep.mubr.bf16.mxu1 (!%p280_p2), %v21266_v3  ;;  %736 = vmatprep.mubr.bf16.mxu0 (!%p280_p2), %v21266_v3  ;;  %v19287_v4 = vld [vmem:[%s26963_s1 + $0x24] ss:$16 sps:$4 sm:$0xff] (!%p280_p2)   ;;  %v19289_v5 = vld [vmem:[%s26963_s1 + $0x20] ss:$16 sps:$4 sm:$0xff] (!%p280_p2)   ;;  %vm324_vm1 = vcmask (!%p280_p2), 516096  }
   0x9   : > { %462 = vmatprep.subr.bf16.mxu1 (!%p280_p2), %v19284_v1  ;;  %19283 = vset.pattern.permute.xlu0 (!%p280_p2), %v21266_v3  ;;  %v19290_v6 = vld [vmem:[%s26963_s1 + $0x44] ss:$16 sps:$4 sm:$0xff] (!%p280_p2)   ;;  %v19292_v7 = vld [vmem:[%s26963_s1 + $0x40] ss:$16 sps:$4 sm:$0xff] (!%p280_p2)   ;;  %v19298_v11 = vld [vmem:[%s26963_s1 + $0xc] ss:$16 sps:$4 sm:$0xff] (!%p280_p2)  }
   0xa   : > { %463 = vmatpush1.bf16.msra.mxu1 (!%p280_p2), %v19286_v2  ;;  %v19293_v8 = vld [vmem:[%s26963_s1 + $0x64] ss:$16 sps:$4 sm:$0xff] (!%p280_p2)   ;;  %v19295_v9 = vld [vmem:[%s26963_s1 + $0x60] ss:$16 sps:$4 sm:$0xff] (!%p280_p2)   ;;  %v19296_v17 = vld [vmem:[%s26963_s1 + $0x8] ss:$16 sps:$4 sm:$0xff] (!%p280_p2)  }
   0xb   : > { %464 = vmatprep.subr.bf16.mxu1 (!%p280_p2), %v19287_v4  ;;  %v339_v10 = vld [vmem:[%s338_s26] sm:$0x1] (!%p280_p2)  ;;  %v19308_v12 = vld [vmem:[%s26963_s1 + $0x84] ss:$16 sps:$4 sm:$0xff] (!%p280_p2)   ;;  %v19301_v18 = vld [vmem:[%s26963_s1 + $0x2c] ss:$16 sps:$4 sm:$0xff] (!%p280_p2)  }
   0xc   : > { %v19310_v13 = vld [vmem:[%s26963_s1 + $0x80] ss:$16 sps:$4 sm:$0xff] (!%p280_p2)   ;;  %704 = vmatprep.subr.bf16.mxu0 (!%p280_p2), %v19308_v12  ;;  %v21372_v14 = vpack.c.bf16 (!%p280_p2), %v339_v10, %v339_v10  ;;  %v19314_v15 = vld [vmem:[%s26963_s1 + $0xa4] ss:$16 sps:$4 sm:$0xff] (!%p280_p2)   ;;  %v19299_v20 = vld [vmem:[%s26963_s1 + $0x28] ss:$16 sps:$4 sm:$0xff] (!%p280_p2)  }
   0xd   : > { %705 = vmatpush1.bf16.msra.mxu0 (!%p280_p2), %v19310_v13  ;;  %v19316_v16 = vld [vmem:[%s26963_s1 + $0xa0] ss:$16 sps:$4 sm:$0xff] (!%p280_p2)   ;;  %v19320_v19 = vld [vmem:[%s26963_s1 + $0xc4] ss:$16 sps:$4 sm:$0xff] (!%p280_p2)   ;;  %v19304_v23 = vld [vmem:[%s26963_s1 + $0x4c] ss:$16 sps:$4 sm:$0xff] (!%p280_p2)  }
   0xe   : > { %465 = vmatpush1.bf16.msra.mxu1 (!%p280_p2), %v19289_v5  ;;  %706 = vmatprep.subr.bf16.mxu0 (!%p280_p2), %v19314_v15  ;;  %v19322_v21 = vld [vmem:[%s26963_s1 + $0xc0] ss:$16 sps:$4 sm:$0xff] (!%p280_p2)   ;;  %v19326_v22 = vld [vmem:[%s26963_s1 + $0xe4] ss:$16 sps:$4 sm:$0xff] (!%p280_p2)   ;;  %v19302_v24 = vld [vmem:[%s26963_s1 + $0x48] ss:$16 sps:$4 sm:$0xff] (!%p280_p2)  }
   0xf   : > { %466 = vmatprep.subr.bf16.mxu1 %v19290_v6  ;;  %v19328_v25 = vld [vmem:[%s26963_s1 + $0xe0] ss:$16 sps:$4 sm:$0xff]   ;;  %v19334_v26 = vld [vmem:[%s26963_s1 + $0x104] ss:$16 sps:$4 sm:$0xff]   ;;  %v19307_v27 = vld [vmem:[%s26963_s1 + $0x6c] ss:$16 sps:$4 sm:$0xff]  }
  0x10   : > { %v19305_v28 = vld [vmem:[%s26963_s1 + $0x68] ss:$16 sps:$4 sm:$0xff]   ;;  %v19332_v29 = vld [vmem:[%s26963_s1 + $0x100] ss:$16 sps:$4 sm:$0xff]   ;;  %v19340_v30 = vld [vmem:[%s26963_s1 + $0x124] ss:$16 sps:$4 sm:$0xff]  }
  0x11   : > { %707 = vmatpush1.bf16.msra.mxu0 %v19316_v16  ;;  %v19313_v31 = vld [vmem:[%s26963_s1 + $0x8c] ss:$16 sps:$4 sm:$0xff]   ;;  %v19311_v32 = vld [vmem:[%s26963_s1 + $0x88] ss:$16 sps:$4 sm:$0xff]   ;;  %v19338_v33 = vld [vmem:[%s26963_s1 + $0x120] ss:$16 sps:$4 sm:$0xff]  }
  0x12   : > { %467 = vmatpush1.bf16.msra.mxu1 %v19292_v7  ;;  %708 = vmatprep.subr.bf16.mxu0 %v19320_v19  ;;  %v19319_v34 = vld [vmem:[%s26963_s1 + $0xac] ss:$16 sps:$4 sm:$0xff]   ;;  %v19346_v35 = vld [vmem:[%s26963_s1 + $0x144] ss:$16 sps:$4 sm:$0xff]   ;;  %v19317_v36 = vld [vmem:[%s26963_s1 + $0xa8] ss:$16 sps:$4 sm:$0xff]  }
  0x13   : > { %468 = vmatprep.subr.bf16.mxu1 %v19293_v8  ;;  %v19344_v37 = vld [vmem:[%s26963_s1 + $0x140] ss:$16 sps:$4 sm:$0xff]   ;;  %v19352_v38 = vld [vmem:[%s26963_s1 + $0x164] ss:$16 sps:$4 sm:$0xff]   ;;  %v19325_v39 = vld [vmem:[%s26963_s1 + $0xcc] ss:$16 sps:$4 sm:$0xff]  }
  0x14   : > { %v19323_v40 = vld [vmem:[%s26963_s1 + $0xc8] ss:$16 sps:$4 sm:$0xff]   ;;  %v19350_v41 = vld [vmem:[%s26963_s1 + $0x160] ss:$16 sps:$4 sm:$0xff]   ;;  %v19358_v42 = vld [vmem:[%s26963_s1 + $0x184] ss:$16 sps:$4 sm:$0xff]  }
  0x15   : > { %709 = vmatpush1.bf16.msra.mxu0 %v19322_v21  ;;  %v19331_v43 = vld [vmem:[%s26963_s1 + $0xec] ss:$16 sps:$4 sm:$0xff]   ;;  %v19329_v44 = vld [vmem:[%s26963_s1 + $0xe8] ss:$16 sps:$4 sm:$0xff]   ;;  %v19356_v45 = vld [vmem:[%s26963_s1 + $0x180] ss:$16 sps:$4 sm:$0xff]  }
  0x16   : > { %469 = vmatpush1.bf16.msra.mxu1 %v19295_v9  ;;  %710 = vmatprep.subr.bf16.mxu0 %v19326_v22  ;;  %v19364_v46 = vld [vmem:[%s26963_s1 + $0x1a4] ss:$16 sps:$4 sm:$0xff]   ;;  %v19337_v47 = vld [vmem:[%s26963_s1 + $0x10c] ss:$16 sps:$4 sm:$0xff]   ;;  %v19335_v48 = vld [vmem:[%s26963_s1 + $0x108] ss:$16 sps:$4 sm:$0xff]  }
  0x17   : > { %503 = vmatprep.subr.bf16.mxu1 %v19298_v11  ;;  %v19362_v49 = vld [vmem:[%s26963_s1 + $0x1a0] ss:$16 sps:$4 sm:$0xff]   ;;  %v19343_v50 = vld [vmem:[%s26963_s1 + $0x12c] ss:$16 sps:$4 sm:$0xff]   ;;  %v19370_v51 = vld [vmem:[%s26963_s1 + $0x1c4] ss:$16 sps:$4 sm:$0xff]  }
  0x18   : > { %v19341_v52 = vld [vmem:[%s26963_s1 + $0x128] ss:$16 sps:$4 sm:$0xff]   ;;  %v19368_v53 = vld [vmem:[%s26963_s1 + $0x1c0] ss:$16 sps:$4 sm:$0xff]   ;;  %v19376_v54 = vld [vmem:[%s26963_s1 + $0x1e4] ss:$16 sps:$4 sm:$0xff]  }
  0x19   : > { %15584 = vmatmul.mubr.msk.bf16.vlgmr.msra.gmra.mrb[0].mxu1 %vm319_vm0, %v21372_v14  ;;  %711 = vmatpush1.bf16.msra.mxu0 %v19328_v25  ;;  %v19349_v55 = vld [vmem:[%s26963_s1 + $0x14c] ss:$16 sps:$4 sm:$0xff]   ;;  %v19347_v56 = vld [vmem:[%s26963_s1 + $0x148] ss:$16 sps:$4 sm:$0xff]   ;;  %v19374_v57 = vld [vmem:[%s26963_s1 + $0x1e0] ss:$16 sps:$4 sm:$0xff]  }
  0x1a   : > { %504 = vmatpush1.bf16.msra.mxu1 %v19296_v17  ;;  %535 = vmatprep.mubr.bf16.mxu1 %v21266_v3  ;;  %v19382_v58 = vld [vmem:[%s26963_s1 + $0x204] ss:$16 sps:$4 sm:$0xff]   ;;  %v19355_v59 = vld [vmem:[%s26963_s1 + $0x16c] ss:$16 sps:$4 sm:$0xff]   ;;  %v19353_v60 = vld [vmem:[%s26963_s1 + $0x168] ss:$16 sps:$4 sm:$0xff]  }
  0x1b   : > { %505 = vmatprep.subr.bf16.mxu1 %v19301_v18  ;;  %942 = vmatprep.subr.bf16.mxu0 %v19334_v26  ;;  %v19380_v61 = vld [vmem:[%s26963_s1 + $0x200] ss:$16 sps:$4 sm:$0xff]   ;;  %v19388_v62 = vld [vmem:[%s26963_s1 + $0x224] ss:$16 sps:$4 sm:$0xff]   ;;  %v19361_v63 = vld [vmem:[%s26963_s1 + $0x18c] ss:$16 sps:$4 sm:$0xff]  }
  0x1c   : > { %15619 = vmatmul.mubr.msk.bf16.vlgmr.msra.gmra.mrb[0].mxu0 %vm319_vm0, %v21372_v14  ;;  %v19359_v0 = vld [vmem:[%s26963_s1 + $0x188] ss:$16 sps:$4 sm:$0xff]   ;;  %v19386_v1 = vld [vmem:[%s26963_s1 + $0x220] ss:$16 sps:$4 sm:$0xff]   ;;  %v19367_v2 = vld [vmem:[%s26963_s1 + $0x1ac] ss:$16 sps:$4 sm:$0xff]  }
  0x1d   : > { %943 = vmatpush1.bf16.msra.mxu0 %v19332_v29  ;;  %974 = vmatprep.mubr.bf16.mxu0 %v21266_v3  ;;  %v19394_v4 = vld [vmem:[%s26963_s1 + $0x244] ss:$16 sps:$4 sm:$0xff]   ;;  %v19365_v5 = vld [vmem:[%s26963_s1 + $0x1a8] ss:$16 sps:$4 sm:$0xff]   ;;  %v19392_v6 = vld [vmem:[%s26963_s1 + $0x240] ss:$16 sps:$4 sm:$0xff]  }
  0x1e   : > { %506 = vmatpush1.bf16.msra.mxu1 %v19299_v20  ;;  %944 = vmatprep.subr.bf16.mxu0 %v19340_v30  ;;  %v19400_v7 = vld [vmem:[%s26963_s1 + $0x264] ss:$16 sps:$4 sm:$0xff]   ;;  %v19373_v8 = vld [vmem:[%s26963_s1 + $0x1cc] ss:$16 sps:$4 sm:$0xff]   ;;  %v19371_v9 = vld [vmem:[%s26963_s1 + $0x1c8] ss:$16 sps:$4 sm:$0xff]  }
  0x1f   : > { %507 = vmatprep.subr.bf16.mxu1 %v19304_v23  ;;  %v19398_v10 = vld [vmem:[%s26963_s1 + $0x260] ss:$16 sps:$4 sm:$0xff]   ;;  %v19406_v11 = vld [vmem:[%s26963_s1 + $0x284] ss:$16 sps:$4 sm:$0xff]   ;;  %v19379_v12 = vld [vmem:[%s26963_s1 + $0x1ec] ss:$16 sps:$4 sm:$0xff]  }
  0x20   : > { %v19377_v13 = vld [vmem:[%s26963_s1 + $0x1e8] ss:$16 sps:$4 sm:$0xff]   ;;  %v19385_v15 = vld [vmem:[%s26963_s1 + $0x20c] ss:$16 sps:$4 sm:$0xff]   ;;  %v19404_v16 = vld [vmem:[%s26963_s1 + $0x280] ss:$16 sps:$4 sm:$0xff]  }
  0x21   : > { %945 = vmatpush1.bf16.msra.mxu0 %v19338_v33  ;;  %v19412_v17 = vld [vmem:[%s26963_s1 + $0x2a4] ss:$16 sps:$4 sm:$0xff]   ;;  %v19410_v18 = vld [vmem:[%s26963_s1 + $0x2a0] ss:$16 sps:$4 sm:$0xff]   ;;  %v19383_v19 = vld [vmem:[%s26963_s1 + $0x208] ss:$16 sps:$4 sm:$0xff]  }
  0x22   : > { %508 = vmatpush1.bf16.msra.mxu1 %v19302_v24  ;;  %946 = vmatprep.subr.bf16.mxu0 %v19346_v35  ;;  %v19391_v20 = vld [vmem:[%s26963_s1 + $0x22c] ss:$16 sps:$4 sm:$0xff]   ;;  %v19418_v21 = vld [vmem:[%s26963_s1 + $0x2c4] ss:$16 sps:$4 sm:$0xff]   ;;  %v19416_v22 = vld [vmem:[%s26963_s1 + $0x2c0] ss:$16 sps:$4 sm:$0xff]  }
  0x23   : > { %509 = vmatprep.subr.bf16.mxu1 %v19307_v27  ;;  %v19389_v23 = vld [vmem:[%s26963_s1 + $0x228] ss:$16 sps:$4 sm:$0xff]   ;;  %v19424_v24 = vld [vmem:[%s26963_s1 + $0x2e4] ss:$16 sps:$4 sm:$0xff]   ;;  %v19397_v25 = vld [vmem:[%s26963_s1 + $0x24c] ss:$16 sps:$4 sm:$0xff]  }
  0x24   : > { %v19422_v26 = vld [vmem:[%s26963_s1 + $0x2e0] ss:$16 sps:$4 sm:$0xff]   ;;  %v19395_v27 = vld [vmem:[%s26963_s1 + $0x248] ss:$16 sps:$4 sm:$0xff]   ;;  %v19403_v29 = vld [vmem:[%s26963_s1 + $0x26c] ss:$16 sps:$4 sm:$0xff]  }
  0x25   : > { %947 = vmatpush1.bf16.msra.mxu0 %v19344_v37  ;;  %v19428_v30 = vld [vmem:[%s26963_s1 + $0x300] ss:$16 sps:$4 sm:$0xff]   ;;  %v19409_v33 = vld [vmem:[%s26963_s1 + $0x28c] ss:$16 sps:$4 sm:$0xff]   ;;  %v19407_v35 = vld [vmem:[%s26963_s1 + $0x288] ss:$16 sps:$4 sm:$0xff]  }
  0x26   : > { %510 = vmatpush1.bf16.msra.mxu1 %v19305_v28  ;;  %948 = vmatprep.subr.bf16.mxu0 %v19352_v38  ;;  %v19430_v28 = vld [vmem:[%s26963_s1 + $0x304] ss:$16 sps:$4 sm:$0xff]   ;;  %v19440_v38 = vld [vmem:[%s26963_s1 + $0x340] ss:$16 sps:$4 sm:$0xff]   ;;  %vm7239_vm4 = vsmask.f32 7424 }
  0x27   : > { %745 = vmatprep.subr.bf16.mxu1 %v19313_v31  ;;  %v19401_v31 = vld [vmem:[%s26963_s1 + $0x268] ss:$16 sps:$4 sm:$0xff]   ;;  %v19442_v37 = vld [vmem:[%s26963_s1 + $0x344] ss:$16 sps:$4 sm:$0xff]   ;;  %vm12387_vm6 = vcmask 261120   ;;  %vm12997_vm7 = vcmask 1046528  }
  0x28   : > { %vm13471_vm8 = vsmask.f32 6400  ;;  %vm14025_vm9 = vcmask 1045504   ;;  %vm14519_vm10 = vsmask.f32 5376  ;;  %vm15103_vm11 = vcmask 1044480  }
  0x29   : > { %15585 = vmatmul.mubr.msk.bf16.vlgmr.msra.gmra.mrb[4].mxu1 %vm319_vm0, %v21372_v14  ;;  %949 = vmatpush1.bf16.msra.mxu0 %v19350_v41  ;;  %v19421_v41 = vld [vmem:[%s26963_s1 + $0x2cc] ss:$16 sps:$4 sm:$0xff]   ;;  %p310_p3 = scmp.lt.s32.totalorder %s21328_s12, 1  ;;  %vm15512_vm12 = vcmask 228352   ;;  %vm15516_vm13 = vcmask 224256  }
  0x2a   : > { %746 = vmatpush1.bf16.msra.mxu1 %v19311_v32  ;;  %777 = vmatprep.mubr.bf16.mxu1 %v21266_v3  ;;  %v19436_v32 = vld [vmem:[%s26963_s1 + $0x324] ss:$16 sps:$4 sm:$0xff]  }
  0x2b   : > { %747 = vmatprep.subr.bf16.mxu1 %v19319_v34  ;;  %1180 = vmatprep.subr.bf16.mxu0 %v19358_v42  ;;  %v19434_v34 = vld [vmem:[%s26963_s1 + $0x320] ss:$16 sps:$4 sm:$0xff]   ;;  %s26979_s12 = smov (!%p310_p3, %s21328_s12), 1 }
  0x2c   : > { %15654 = vmatmul.mubr.msk.bf16.vlgmr.msra.gmra.mrb[4].mxu0 %vm319_vm0, %v21372_v14  ;;  %v19446_v42 = vld [vmem:[%s26963_s1 + $0x360] ss:$16 sps:$4 sm:$0xff]   ;;  %s18467_s14 = sshll.u32 %s26979_s12, 5 }
  0x2d   : > { %1181 = vmatpush1.bf16.msra.mxu0 %v19356_v45  ;;  %1212 = vmatprep.mubr.bf16.mxu0 %v21266_v3  ;;  %v19425_v45 = vld [vmem:[%s26963_s1 + $0x2e8] ss:$16 sps:$4 sm:$0xff]   ;;  %s314_s16 = scalar_lea.vmem %s26971_s9, %s18467_s14 }
  0x2e   : > { %748 = vmatpush1.bf16.msra.mxu1 %v19317_v36  ;;  %1182 = vmatprep.subr.bf16.mxu0 %v19364_v46  ;;  %v19415_v36 = vld [vmem:[%s26963_s1 + $0x2ac] ss:$16 sps:$4 sm:$0xff]  }
  0x2f   : > { %749 = vmatprep.subr.bf16.mxu1 %v19325_v39  ;;  %v19413_v39 = vld [vmem:[%s26963_s1 + $0x2a8] ss:$16 sps:$4 sm:$0xff]   ;;  %v19433_v46 = vld [vmem:[%s26963_s1 + $0x30c] ss:$16 sps:$4 sm:$0xff]  }
  0x31   : > { %1183 = vmatpush1.bf16.msra.mxu0 %v19362_v49  ;;  %v19437_v49 = vld [vmem:[%s26963_s1 + $0x328] ss:$16 sps:$4 sm:$0xff]  }
  0x32   : > { %750 = vmatpush1.bf16.msra.mxu1 %v19323_v40  ;;  %1184 = vmatprep.subr.bf16.mxu0 %v19370_v51  ;;  %v19448_v40 = vld [vmem:[%s26963_s1 + $0x364] ss:$16 sps:$4 sm:$0xff]   ;;  %v19443_v51 = vld [vmem:[%s26963_s1 + $0x348] ss:$16 sps:$4 sm:$0xff]  }
  0x33   : > { %751 = vmatprep.subr.bf16.mxu1 %v19331_v43  ;;  %v19419_v43 = vld [vmem:[%s26963_s1 + $0x2c8] ss:$16 sps:$4 sm:$0xff]  }
  0x35   : > { %1185 = vmatpush1.bf16.msra.mxu0 %v19368_v53  ;;  %v19449_v53 = vld [vmem:[%s26963_s1 + $0x368] ss:$16 sps:$4 sm:$0xff]  }
  0x36   : > { %752 = vmatpush1.bf16.msra.mxu1 %v19329_v44  ;;  %1186 = vmatprep.subr.bf16.mxu0 %v19376_v54  ;;  %v19427_v44 = vld [vmem:[%s26963_s1 + $0x2ec] ss:$16 sps:$4 sm:$0xff]   ;;  %v21267_v54 = vmov 0.0  }
  0x37   : > { %983 = vmatprep.subr.bf16.mxu1 %v19337_v47  ;;  %v19431_v47 = vld [vmem:[%s26963_s1 + $0x308] ss:$16 sps:$4 sm:$0xff]   ;;  %316 = vst [vmem:[#allocation2] sm:$0xff] %v21267_v54  ;;  %317 = vst [vmem:[#allocation2 + $0x8] sm:$0xff] %v21267_v54 }
  0x38   : > { %318 = vst [vmem:[#allocation2 + $0x10] sm:$0xff] %v21267_v54  ;;  %320 = vst.msk [vmem:[#allocation2 + $0x18] sm:$0xff] %vm319_vm0, %v21267_v54 }
  0x39   : > { %15620 = vmatmul.mubr.msk.bf16.vlgmr.msra.gmra.mrb[8].mxu1 %vm319_vm0, %v21372_v14  ;;  %1187 = vmatpush1.bf16.msra.mxu0 %v19374_v57  ;;  %321 = vst [vmem:[#allocation2 + $0x20] sm:$0x1] %v21267_v54  ;;  %322 = vst [vmem:[#allocation2 + $0x28] sm:$0x1] %v21267_v54  ;;  %v19455_v57 = vld [vmem:[%s26965_s3 + $0x3a0] ss:$16 sps:$4 sm:$0xff]  }
  0x3a   : > { %984 = vmatpush1.bf16.msra.mxu1 %v19335_v48  ;;  %1015 = vmatprep.mubr.bf16.mxu1 %v21266_v3  ;;  %v19439_v48 = vld [vmem:[%s26963_s1 + $0x32c] ss:$16 sps:$4 sm:$0xff]   ;;  %323 = vst [vmem:[#allocation2 + $0x30] sm:$0x1] %v21267_v54  ;;  %326 = vst [vmem:[#allocation3] sm:$0xff] %v21267_v54 }
  0x3b   : > { %985 = vmatprep.subr.bf16.mxu1 %v19343_v50  ;;  %1418 = vmatprep.subr.bf16.mxu0 %v19382_v58  ;;  %v19445_v50 = vld [vmem:[%s26963_s1 + $0x34c] ss:$16 sps:$4 sm:$0xff]   ;;  %327 = vst [vmem:[#allocation3 + $0x8] sm:$0xff] %v21267_v54  ;;  %328 = vst [vmem:[#allocation3 + $0x10] sm:$0xff] %v21267_v54  ;;  %v19458_v58 = vld [vmem:[%s26965_s3 + $0x3c0] ss:$16 sps:$4 sm:$0xff]  }
  0x3c   : > { %15689 = vmatmul.mubr.msk.bf16.vlgmr.msra.gmra.mrb[8].mxu0 %vm319_vm0, %v21372_v14  ;;  %329 = vst [vmem:[#allocation3 + $0x18] sm:$0xff] %v21267_v54  ;;  %330 = vst [vmem:[#allocation3 + $0x20] sm:$0xff] %v21267_v54 }
  0x3d   : > { %1419 = vmatpush1.bf16.msra.mxu0 %v19380_v61  ;;  %1450 = vmatprep.mubr.bf16.mxu0 %v21266_v3  ;;  %331 = vst [vmem:[#allocation3 + $0x28] sm:$0xff] %v21267_v54  ;;  %332 = vst [vmem:[#allocation3 + $0x30] sm:$0xff] %v21267_v54  ;;  %v19466_v61 = vld [vmem:[%s26965_s3 + $0x404] ss:$16 sps:$4 sm:$0xff]  }
  0x3e   : > { %986 = vmatpush1.bf16.msra.mxu1 %v19341_v52  ;;  %1420 = vmatprep.subr.bf16.mxu0 %v19388_v62  ;;  %v19451_v52 = vld [vmem:[%s26963_s1 + $0x36c] ss:$16 sps:$4 sm:$0xff]   ;;  %333 = vst [vmem:[#allocation3 + $0x38] sm:$0xff] %v21267_v54  ;;  %334 = vst [vmem:[#allocation3 + $0x40] sm:$0x3] %v21267_v54 }
  0x3f   : > { %987 = vmatprep.subr.bf16.mxu1 %v19349_v55  ;;  %335 = vst [vmem:[#allocation3 + $0x48] sm:$0x3] %v21267_v54  ;;  %336 = vst [vmem:[#allocation3 + $0x50] sm:$0x3] %v21267_v54  ;;  %v19452_v55 = vld [vmem:[%s26965_s3 + $0x380] ss:$16 sps:$4 sm:$0xff]  }
  0x40   : > { %337 = vst [vmem:[#allocation3 + $0x58] sm:$0x3] %v21267_v54  ;;  %v19469_v62 = vld [vmem:[%s26965_s3 + $0x584] ss:$16 sps:$4 sm:$0xff]   ;;  %325 = vst.msk [vmem:[#allocation2 + $0x38] sm:$0x1] %vm324_vm1, %v21267_v54 }
  0x41   : > { %1421 = vmatpush1.bf16.msra.mxu0 %v19386_v1  ;;  %v19472_v1 = vld [vmem:[%s26965_s3 + $0x424] ss:$16 sps:$4 sm:$0xff]   ;;  %v19541_v54 = vld [vmem:[%s26965_s3 + $0x58c] ss:$16 sps:$4 sm:$0xff]  }
  0x42   : > { %988 = vmatpush1.bf16.msra.mxu1 %v19347_v56  ;;  %1422 = vmatprep.subr.bf16.mxu0 %v19394_v4  ;;  %v19457_v56 = vld [vmem:[%s26965_s3 + $0x3a4] ss:$16 sps:$4 sm:$0xff]   ;;  %v19470_v4 = vld [vmem:[%s26965_s3 + $0x420] ss:$16 sps:$4 sm:$0xff]  }
  0x43   : > { %989 = vmatprep.subr.bf16.mxu1 %v19355_v59  ;;  %v19463_v59 = vld [vmem:[%s26965_s3 + $0x3e4] ss:$16 sps:$4 sm:$0xff]  }
  0x45   : > { %1423 = vmatpush1.bf16.msra.mxu0 %v19392_v6  ;;  %v19478_v6 = vld [vmem:[%s26965_s3 + $0x444] ss:$16 sps:$4 sm:$0xff]  }
  0x46   : > { %990 = vmatpush1.bf16.msra.mxu1 %v19353_v60  ;;  %1424 = vmatprep.subr.bf16.mxu0 %v19400_v7  ;;  %v19461_v60 = vld [vmem:[%s26965_s3 + $0x3e0] ss:$16 sps:$4 sm:$0xff]   ;;  %v19481_v7 = vld [vmem:[%s26965_s3 + $0x5c4] ss:$16 sps:$4 sm:$0xff]  }
  0x47   : > { %1221 = vmatprep.subr.bf16.mxu1 %v19361_v63  ;;  %v19464_v63 = vld [vmem:[%s26965_s3 + $0x400] ss:$16 sps:$4 sm:$0xff]  }
  0x49   : > { %15655 = vmatmul.mubr.msk.bf16.vlgmr.msra.gmra.mrb[12].mxu1 %vm319_vm0, %v21372_v14  ;;  %1425 = vmatpush1.bf16.msra.mxu0 %v19398_v10  ;;  %v19484_v10 = vld [vmem:[%s26965_s3 + $0x464] ss:$16 sps:$4 sm:$0xff]  }
  0x4a   : > { %1222 = vmatpush1.bf16.msra.mxu1 %v19359_v0  ;;  %1253 = vmatprep.mubr.bf16.mxu1 %v21266_v3  ;;  %v19467_v0 = vld [vmem:[%s26965_s3 + $0x580] ss:$16 sps:$4 sm:$0xff]  }
  0x4b   : > { %1223 = vmatprep.subr.bf16.mxu1 %v19367_v2  ;;  %1656 = vmatprep.subr.bf16.mxu0 %v19406_v11  ;;  %v19475_v2 = vld [vmem:[%s26965_s3 + $0x5a4] ss:$16 sps:$4 sm:$0xff]  }
  0x4c   : > { %15724 = vmatmul.mubr.msk.bf16.vlgmr.msra.gmra.mrb[12].mxu0 %vm319_vm0, %v21372_v14  ;;  %v19487_v11 = vld [vmem:[%s26965_s3 + $0x5e4] ss:$16 sps:$4 sm:$0xff]  }
  0x4d   : > { %1657 = vmatpush1.bf16.msra.mxu0 %v19404_v16  ;;  %1688 = vmatprep.mubr.bf16.mxu0 %v21266_v3  ;;  %v19493_v16 = vld [vmem:[%s26965_s3 + $0x604] ss:$16 sps:$4 sm:$0xff]  }
  0x4e   : > { %1224 = vmatpush1.bf16.msra.mxu1 %v19365_v5  ;;  %1658 = vmatprep.subr.bf16.mxu0 %v19412_v17  ;;  %v19473_v5 = vld [vmem:[%s26965_s3 + $0x5a0] ss:$16 sps:$4 sm:$0xff]  }
  0x4f   : > { %1225 = vmatprep.subr.bf16.mxu1 %v19373_v8  ;;  %v19476_v8 = vld [vmem:[%s26965_s3 + $0x440] ss:$16 sps:$4 sm:$0xff]  }
  0x50   : > { %v19488_v17 = vld [vmem:[%s26965_s3 + $0x480] ss:$16 sps:$4 sm:$0xff]  }
  0x51   : > { %1659 = vmatpush1.bf16.msra.mxu0 %v19410_v18  ;;  %v19491_v18 = vld [vmem:[%s26965_s3 + $0x600] ss:$16 sps:$4 sm:$0xff]  }
  0x52   : > { %1226 = vmatpush1.bf16.msra.mxu1 %v19371_v9  ;;  %1660 = vmatprep.subr.bf16.mxu0 %v19418_v21  ;;  %v19479_v9 = vld [vmem:[%s26965_s3 + $0x5c0] ss:$16 sps:$4 sm:$0xff]  }
  0x53   : > { %1227 = vmatprep.subr.bf16.mxu1 %v19379_v12  ;;  %v19482_v12 = vld [vmem:[%s26965_s3 + $0x460] ss:$16 sps:$4 sm:$0xff]  }
  0x54   : > { %v19494_v21 = vld [vmem:[%s26965_s3 + $0x4a0] ss:$16 sps:$4 sm:$0xff]  }
  0x55   : > { %1661 = vmatpush1.bf16.msra.mxu0 %v19416_v22  ;;  %v19497_v22 = vld [vmem:[%s26965_s3 + $0x620] ss:$16 sps:$4 sm:$0xff]  }
  0x56   : > { %1228 = vmatpush1.bf16.msra.mxu1 %v19377_v13  ;;  %1662 = vmatprep.subr.bf16.mxu0 %v19424_v24  ;;  %v19485_v13 = vld [vmem:[%s26965_s3 + $0x5e0] ss:$16 sps:$4 sm:$0xff]   ;;  %v19505_v24 = vld [vmem:[%s26965_s3 + $0x644] ss:$16 sps:$4 sm:$0xff]  }
  0x57   : > { %1459 = vmatprep.subr.bf16.mxu1 %v19385_v15  ;;  %v19490_v15 = vld [vmem:[%s26965_s3 + $0x484] ss:$16 sps:$4 sm:$0xff]  }
  0x59   : > { %15690 = vmatmul.mubr.msk.bf16.vlgmr.msra.gmra.mrb[16].mxu1 %vm319_vm0, %v21372_v14  ;;  %1663 = vmatpush1.bf16.msra.mxu0 %v19422_v26  ;;  %v19503_v26 = vld [vmem:[%s26965_s3 + $0x640] ss:$16 sps:$4 sm:$0xff]  }
  0x5a   : > { %1460 = vmatpush1.bf16.msra.mxu1 %v19383_v19  ;;  %1491 = vmatprep.mubr.bf16.mxu1 %v21266_v3  ;;  %v19496_v19 = vld [vmem:[%s26965_s3 + $0x4a4] ss:$16 sps:$4 sm:$0xff]  }
  0x5b   : > { %1461 = vmatprep.subr.bf16.mxu1 %v19391_v20  ;;  %1894 = vmatprep.subr.bf16.mxu0 %v19430_v28  ;;  %v19499_v20 = vld [vmem:[%s26965_s3 + $0x624] ss:$16 sps:$4 sm:$0xff]  }
  0x5c   : > { %15759 = vmatmul.mubr.msk.bf16.vlgmr.msra.gmra.mrb[16].mxu0 %vm319_vm0, %v21372_v14  ;;  %v19508_v28 = vld [vmem:[%s26965_s3 + $0x4e4] ss:$16 sps:$4 sm:$0xff]  }
  0x5d   : > { %1895 = vmatpush1.bf16.msra.mxu0 %v19428_v30  ;;  %1926 = vmatprep.mubr.bf16.mxu0 %v21266_v3  ;;  %v19506_v30 = vld [vmem:[%s26965_s3 + $0x4e0] ss:$16 sps:$4 sm:$0xff]  }
  0x5e   : > { %1462 = vmatpush1.bf16.msra.mxu1 %v19389_v23  ;;  %1896 = vmatprep.subr.bf16.mxu0 %v19436_v32  ;;  %v19502_v23 = vld [vmem:[%s26965_s3 + $0x4c4] ss:$16 sps:$4 sm:$0xff]  }
  0x5f   : > { %1463 = vmatprep.subr.bf16.mxu1 %v19397_v25  ;;  %v19500_v25 = vld [vmem:[%s26965_s3 + $0x4c0] ss:$16 sps:$4 sm:$0xff]  }
  0x61   : > { %1897 = vmatpush1.bf16.msra.mxu0 %v19434_v34  ;;  %v19517_v34 = vld [vmem:[%s26965_s3 + $0x684] ss:$16 sps:$4 sm:$0xff]  }
  0x62   : > { %1464 = vmatpush1.bf16.msra.mxu1 %v19395_v27  ;;  %1898 = vmatprep.subr.bf16.mxu0 %v19442_v37  ;;  %v439_v27 = vlaneseq  ;;  %v21875_v37 = vld [vmem:[%s26964_s2] sm:$0xf] }
  0x63   : > { %1465 = vmatprep.subr.bf16.mxu1 %v19403_v29  ;;  %v19511_v29 = vld [vmem:[%s26965_s3 + $0x664] ss:$16 sps:$4 sm:$0xff]  }
  0x64   : > { %v21858_v32 = vshrl.u32 %v439_v27, 7  ;;  %vm21956_vm2 = vcmp.lt.s32.totalorder %v439_v27, 448  ;;  %vm23280_vm3 = vcmp.lt.s32.totalorder %v439_v27, 512  ;;  %vm25291_vm5 = vcmp.lt.s32.totalorder %v439_v27, 544 }
  0x65   : > { %1899 = vmatpush1.bf16.msra.mxu0 %v19440_v38 }
  0x66   : > { %1466 = vmatpush1.bf16.msra.mxu1 %v19401_v31  ;;  %1900 = vmatprep.subr.bf16.mxu0 %v19448_v40  ;;  %v19509_v31 = vld [vmem:[%s26965_s3 + $0x660] ss:$16 sps:$4 sm:$0xff]   ;;  %v21878_v38 = vsub.s32 0, %v21858_v32  ;;  %v19520_v40 = vld [vmem:[%s26965_s3 + $0x524] ss:$16 sps:$4 sm:$0xff]  }
  0x67   : > { %1697 = vmatprep.subr.bf16.mxu1 %v19409_v33  ;;  %v19514_v33 = vld [vmem:[%s26965_s3 + $0x504] ss:$16 sps:$4 sm:$0xff]  }
  0x69   : > { %15725 = vmatmul.mubr.msk.bf16.vlgmr.msra.gmra.mrb[20].mxu1 %vm319_vm0, %v21372_v14  ;;  %1901 = vmatpush1.bf16.msra.mxu0 %v19446_v42  ;;  %v19518_v42 = vld [vmem:[%s26965_s3 + $0x520] ss:$16 sps:$4 sm:$0xff]  }
  0x6a   : > { %1698 = vmatpush1.bf16.msra.mxu1 %v19407_v35  ;;  %1729 = vmatprep.mubr.bf16.mxu1 %v21266_v3  ;;  %v19512_v35 = vld [vmem:[%s26965_s3 + $0x500] ss:$16 sps:$4 sm:$0xff]  }
  0x6b   : > { %1699 = vmatprep.subr.bf16.mxu1 %v19415_v36  ;;  %v19515_v36 = vld [vmem:[%s26965_s3 + $0x680] ss:$16 sps:$4 sm:$0xff]  }
  0x6c   : > { %15794 = vmatmul.mubr.msk.bf16.vlgmr.msra.gmra.mrb[20].mxu0 %vm319_vm0, %v21372_v14 }
  0x6e   : > { %1700 = vmatpush1.bf16.msra.mxu1 %v19413_v39  ;;  %v21881_v39 = vsub.s32 1, %v21858_v32 }
  0x6f   : > { %1701 = vmatprep.subr.bf16.mxu1 %v19421_v41  ;;  %v19523_v41 = vld [vmem:[%s26965_s3 + $0x6a4] ss:$16 sps:$4 sm:$0xff]  }
  0x72   : > { %1702 = vmatpush1.bf16.msra.mxu1 %v19419_v43  ;;  %v19521_v43 = vld [vmem:[%s26965_s3 + $0x6a0] ss:$16 sps:$4 sm:$0xff]  }
  0x73   : > { %1703 = vmatprep.subr.bf16.mxu1 %v19427_v44  ;;  %v442_v44 = vrot.slane %v21875_v37, %v21878_v38 }
  0x76   : > { %1704 = vmatpush1.bf16.msra.mxu1 %v19425_v45  ;;  %v446_v45 = vrot.slane %v21875_v37, %v21881_v39 }
  0x77   : > { %1935 = vmatprep.subr.bf16.mxu1 %v19433_v46  ;;  %v19524_v46 = vld [vmem:[%s26965_s3 + $0x540] ss:$16 sps:$4 sm:$0xff]  }
  0x79   : > { %15760 = vmatmul.mubr.msk.bf16.vlgmr.msra.gmra.mrb[24].mxu1 %vm319_vm0, %v21372_v14 }
  0x7a   : > { %1936 = vmatpush1.bf16.msra.mxu1 %v19431_v47  ;;  %1967 = vmatprep.mubr.bf16.mxu1 %v21266_v3  ;;  %v19454_v3 = vld [vmem:[%s26965_s3 + $0x384] ss:$16 sps:$4 sm:$0xff]  }
  0x7b   : > { %1937 = vmatprep.subr.bf16.mxu1 %v19439_v48  ;;  %2820 = vmatprep.subr.bf16.mxu0 %v19454_v3  ;;  %v19526_v47 = vld [vmem:[%s26965_s3 + $0x544] ss:$16 sps:$4 sm:$0xff]   ;;  %v19527_v48 = vld [vmem:[%s26965_s3 + $0x6c0] ss:$16 sps:$4 sm:$0xff]  }
  0x7c   : > { %2821 = vmatpush1.bf16.msra.mxu0 %v19452_v55  ;;  %v19535_v3 = vld [vmem:[%s26965_s3 + $0x6e4] ss:$16 sps:$4 sm:$0xff]  }
  0x7d   : > { %2822 = vmatprep.subr.bf16.mxu0 %v19457_v56 }
  0x7e   : > { %1938 = vmatpush1.bf16.msra.mxu1 %v19437_v49  ;;  %v19529_v49 = vld [vmem:[%s26965_s3 + $0x6c4] ss:$16 sps:$4 sm:$0xff]  }
  0x7f   : > { %1939 = vmatprep.subr.bf16.mxu1 %v19445_v50  ;;  %v19530_v50 = vld [vmem:[%s26965_s3 + $0x560] ss:$16 sps:$4 sm:$0xff]  }
  0x80   : > { %2823 = vmatpush1.bf16.msra.mxu0 %v19455_v57 }
  0x82   : > { %1940 = vmatpush1.bf16.msra.mxu1 %v19443_v51  ;;  %v19532_v51 = vld [vmem:[%s26965_s3 + $0x564] ss:$16 sps:$4 sm:$0xff]  }
  0x83   : > { %1941 = vmatprep.subr.bf16.mxu1 %v19451_v52 }
  0x86   : > { %1942 = vmatpush1.bf16.msra.mxu1 %v19449_v53  ;;  %v19533_v53 = vld [vmem:[%s26965_s3 + $0x6e0] ss:$16 sps:$4 sm:$0xff]  }
  0x87   : > { %2861 = vmatprep.subr.bf16.mxu1 %v19469_v62 }
  0x89   : > { %15795 = vmatmul.mubr.msk.bf16.vlgmr.msra.gmra.mrb[28].mxu1 %vm319_vm0, %v21372_v14  ;;  %v19460_v14 = vld [vmem:[%s26965_s3 + $0x3c4] ss:$16 sps:$4 sm:$0xff]  }
  0x8a   : > { %2824 = vmatprep.subr.bf16.mxu0 %v19460_v14  ;;  %2862 = vmatpush1.bf16.msra.mxu1 %v19467_v0 }
  0x8b   : > { %2825 = vmatpush1.bf16.msra.mxu0 %v19458_v58  ;;  %2863 = vmatprep.subr.bf16.mxu1 %v19475_v2 }
  0x8c   : > { %2826 = vmatprep.subr.bf16.mxu0 %v19463_v59 }
  0x8e   : > { %2864 = vmatpush1.bf16.msra.mxu1 %v19473_v5 }
  0x8f   : > { %2827 = vmatpush1.bf16.msra.mxu0 %v19461_v60  ;;  %2865 = vmatprep.subr.bf16.mxu1 %v19481_v7  ;;  %v15602_v60 = vld [vmem:[%s26964_s2 + $0x4] sm:$0xf] }
  0x90   : > { %2828 = vmatprep.subr.bf16.mxu0 %v19466_v61  ;;  %v687_v0 = vrot.slane %v15602_v60, %v21878_v38  ;;  %v691_v2 = vrot.slane %v15602_v60, %v21881_v39 }
  0x92   : > { %2866 = vmatpush1.bf16.msra.mxu1 %v19479_v9 }
  0x93   : > { %2829 = vmatpush1.bf16.msra.mxu0 %v19464_v63  ;;  %2867 = vmatprep.subr.bf16.mxu1 %v19487_v11  ;;  %v19538_v63 = vld [vmem:[%s26965_s3 + $0x38c] ss:$16 sps:$4 sm:$0xff]  }
  0x94   : > { %2830 = vmatprep.subr.bf16.mxu0 %v19472_v1  ;;  %v21935_v1 = vsub.s32 2, %v21858_v32 }
  0x96   : > { %2868 = vmatpush1.bf16.msra.mxu1 %v19485_v13 }
  0x97   : > { %2831 = vmatpush1.bf16.msra.mxu0 %v19470_v4  ;;  %2869 = vmatprep.subr.bf16.mxu1 %v19493_v16  ;;  %v21939_v4 = vsub.s32 3, %v21858_v32 }
  0x98   : > { %2832 = vmatprep.subr.bf16.mxu0 %v19478_v6  ;;  %v21268_v6 = vmov 1966171168  }
  0x99   : > { %v555_v7 = vunpack.c.l.s4 %v21268_v6  ;;  %v454_v13 = vrot.slane %v21875_v37, %v21939_v4 }
  0x9a   : > { %2870 = vmatpush1.bf16.msra.mxu1 %v19491_v18 }
  0x9b   : > { %2833 = vmatpush1.bf16.msra.mxu0 %v19476_v8  ;;  %2871 = vmatprep.subr.bf16.mxu1 %v19499_v20  ;;  %v556_v18 = vunpack.c.0.s8 %v555_v7 }
  0x9c   : > { %2834 = vmatprep.subr.bf16.mxu0 %v19484_v10  ;;  %v450_v10 = vrot.slane %v21875_v37, %v21935_v1 }
  0x9e   : > { %2872 = vmatpush1.bf16.msra.mxu1 %v19497_v22 }
  0x9f   : > { %2835 = vmatpush1.bf16.msra.mxu0 %v19482_v12  ;;  %2873 = vmatprep.subr.bf16.mxu1 %v19505_v24 }
  0xa0   : > { %2836 = vmatprep.subr.bf16.mxu0 %v19490_v15 }
  0xa2   : > { %2874 = vmatpush1.bf16.msra.mxu1 %v19503_v26 }
  0xa3   : > { %2837 = vmatpush1.bf16.msra.mxu0 %v19488_v17  ;;  %2875 = vmatprep.subr.bf16.mxu1 %v19511_v29  ;;  %v21949_v29 = vsub.s32 %v556_v18, %v21858_v32 }
  0xa4   : > { %2838 = vmatprep.subr.bf16.mxu0 %v19496_v19 }
  0xa6   : > { %2876 = vmatpush1.bf16.msra.mxu1 %v19509_v31 }
  0xa7   : > { %2839 = vmatpush1.bf16.msra.mxu0 %v19494_v21  ;;  %2877 = vmatprep.subr.bf16.mxu1 %v19517_v34 }
  0xa8   : > { %2840 = vmatprep.subr.bf16.mxu0 %v19502_v23 }
  0xaa   : > { %2878 = vmatpush1.bf16.msra.mxu1 %v19515_v36 }
  0xab   : > { %2841 = vmatpush1.bf16.msra.mxu0 %v19500_v25  ;;  %2879 = vmatprep.subr.bf16.mxu1 %v19523_v41 }
  0xac   : > { %2842 = vmatprep.subr.bf16.mxu0 %v19508_v28  ;;  %v15637_v28 = vld [vmem:[%s26964_s2 + $0x8] sm:$0xf] }
  0xad   : > { %v929_v36 = vrot.slane %v15637_v28, %v21881_v39 }
  0xae   : > { %2880 = vmatpush1.bf16.msra.mxu1 %v19521_v43 }
  0xaf   : > { %2843 = vmatpush1.bf16.msra.mxu0 %v19506_v30  ;;  %2881 = vmatprep.subr.bf16.mxu1 %v19529_v49 }
  0xb0   : > { %2844 = vmatprep.subr.bf16.mxu0 %v19514_v33 }
  0xb2   : > { %2882 = vmatpush1.bf16.msra.mxu1 %v19527_v48  ;;  %v699_v48 = vrot.slane %v15602_v60, %v21939_v4 }
  0xb3   : > { %2845 = vmatpush1.bf16.msra.mxu0 %v19512_v35  ;;  %2883 = vmatprep.subr.bf16.mxu1 %v19535_v3  ;;  %v925_v35 = vrot.slane %v15637_v28, %v21878_v38 }
  0xb4   : > { %2846 = vmatprep.subr.bf16.mxu0 %v19520_v40 }
  0xb6   : > { %2884 = vmatpush1.bf16.msra.mxu1 %v19533_v53 }
  0xb7   : > { %2847 = vmatpush1.bf16.msra.mxu0 %v19518_v42  ;;  %2902 = vmatprep.subr.bf16.mxu1 %v19538_v63 }
  0xb8   : > { %2848 = vmatprep.subr.bf16.mxu0 %v19526_v47 }
  0xbb   : > { %2849 = vmatpush1.bf16.msra.mxu0 %v19524_v46 }
  0xbc   : > { %2850 = vmatprep.subr.bf16.mxu0 %v19532_v51 }
  0xbf   : > { %2851 = vmatpush1.bf16.msra.mxu0 %v19530_v50 }
  0xc0   : > { %2943 = vmatprep.subr.bf16.mxu0 %v19541_v54 }
  0xec   : > { %v496_v52 = vpop.f32.mrb[0].mxu1 }
  0xed   : > { %v497_v55 = vadd.f32 %v496_v52, %v442_v44  ;;  %v498_v56 = vpop.f32.mrb[1].mxu1 }
  0xee   : > { %v499_v57 = vadd.f32 %v498_v56, %v446_v45  ;;  %v500_v14 = vpop.f32.mrb[2].mxu1  ;;  %v695_v45 = vrot.slane %v15602_v60, %v21935_v1 }
  0xef   : > { %v544_v58 = vmax.f32 %v497_v55, 0.0  ;;  %v501_v59 = vpop.f32.mrb[3].mxu1  ;;  %v738_v5 = vpop.f32.mrb[0].mxu0 }
  0xf0   : > { %v545_v61 = vmax.f32 %v499_v57, 0.0  ;;  %v739_v8 = vadd.f32 %v738_v5, %v687_v0  ;;  %v740_v9 = vpop.f32.mrb[1].mxu0  ;;  %v15672_v59 = vld [vmem:[%s26964_s2 + $0xc] sm:$0xf] }
  0xf1   : > { %v741_v11 = vadd.f32 %v740_v9, %v691_v2  ;;  %v742_v12 = vpop.f32.mrb[2].mxu0  ;;  %v1163_v54 = vrot.slane %v15672_v59, %v21878_v38  ;;  %v1167_v0 = vrot.slane %v15672_v59, %v21881_v39  ;;  %v933_v9 = vrot.slane %v15637_v28, %v21935_v1 }
  0xf2   : > { %v552_v62 = vcombine.low %v544_v58, %v545_v61  ;;  %v786_v15 = vmax.f32 %v739_v8, 0.0  ;;  %v743_v16 = vpop.f32.mrb[3].mxu0  ;;  %v937_v12 = vrot.slane %v15637_v28, %v21939_v4 }
  0xf3   : > { %v787_v17 = vmax.f32 %v741_v11, 0.0 }
  0xf4   : > { %v560_v33 = vrot.slane %v552_v62, %v21949_v29 }
  0xf5   : > { %v794_v22 = vcombine.low %v786_v15, %v787_v17 }
  0xf7   : > { %v802_v62 = vrot.slane %v794_v22, %v21949_v29 }
  0xfc   : > { %v537_v19 = vpop.f32.mrb[4].mxu1 }
  0xfd   : > { %v538_v20 = vadd.f32 %v537_v19, %v450_v10  ;;  %v539_v21 = vpop.f32.mrb[5].mxu1 }
  0xfe   : > { %v540_v23 = vadd.f32 %v539_v21, %v454_v13  ;;  %v541_v24 = vpop.f32.mrb[6].mxu1 }
  0xff   : > { %v546_v25 = vmax.f32 %v538_v20, 0.0  ;;  %v542_v26 = vpop.f32.mrb[7].mxu1  ;;  %v976_v41 = vpop.f32.mrb[4].mxu0 }
 0x100   : > { %v547_v30 = vmax.f32 %v540_v23, 0.0  ;;  %v977_v43 = vadd.f32 %v976_v41, %v925_v35  ;;  %v978_v44 = vpop.f32.mrb[5].mxu0 }
 0x101   : > { %v979_v46 = vadd.f32 %v978_v44, %v929_v36  ;;  %v980_v47 = vpop.f32.mrb[6].mxu0 }
 0x102   : > { %v553_v31 = vcombine.low %v546_v25, %v547_v30  ;;  %v1024_v49 = vmax.f32 %v977_v43, 0.0  ;;  %v981_v50 = vpop.f32.mrb[7].mxu0  ;;  %v15707_v25 = vld [vmem:[%s26964_s2 + $0x10] sm:$0xf]  ;;  %v1171_v43 = vrot.slane %v15672_v59, %v21935_v1 }
 0x103   : > { %v1025_v51 = vmax.f32 %v979_v46, 0.0  ;;  %v1175_v46 = vrot.slane %v15672_v59, %v21939_v4 }
 0x104   : > { %v567_v34 = vrot.slane %v553_v31, %v21949_v29 }
 0x105   : > { %v1032_v55 = vcombine.low %v1024_v49, %v1025_v51 }
 0x106   : > { %v568_v37 = vcombine.low %v560_v33, %v567_v34  ;;  %v1401_v33 = vrot.slane %v15707_v25, %v21878_v38  ;;  %v1405_v34 = vrot.slane %v15707_v25, %v21881_v39 }
 0x107   : > { %v1040_v30 = vrot.slane %v1032_v55, %v21949_v29 }
 0x108   : > { %v575_v42 = vrot.slane %v568_v37, %v21949_v29 }
 0x10a   : > { %582 = vst.msk [vmem:[#allocation2 + $0x1] ss:$8 sm:$0xf] %vm21956_vm2, %v575_v42 }
 0x10c   : > { %v779_v52 = vpop.f32.mrb[8].mxu1 }
 0x10d   : > { %v780_v53 = vadd.f32 %v779_v52, %v695_v45  ;;  %v781_v3 = vpop.f32.mrb[9].mxu1 }
 0x10e   : > { %v782_v56 = vadd.f32 %v781_v3, %v699_v48  ;;  %v783_v57 = vpop.f32.mrb[10].mxu1 }
 0x10f   : > { %v788_v14 = vmax.f32 %v780_v53, 0.0  ;;  %v784_v58 = vpop.f32.mrb[11].mxu1  ;;  %v1214_v5 = vpop.f32.mrb[8].mxu0 }
 0x110   : > { %v789_v61 = vmax.f32 %v782_v56, 0.0  ;;  %v1215_v7 = vadd.f32 %v1214_v5, %v1163_v54  ;;  %v1216_v8 = vpop.f32.mrb[9].mxu0 }
 0x111   : > { %v1217_v10 = vadd.f32 %v1216_v8, %v1167_v0  ;;  %v1218_v11 = vpop.f32.mrb[10].mxu0 }
 0x112   : > { %v795_v63 = vcombine.low %v788_v14, %v789_v61  ;;  %v1262_v13 = vmax.f32 %v1215_v7, 0.0  ;;  %v1219_v15 = vpop.f32.mrb[11].mxu0  ;;  %v15742_v14 = vld [vmem:[%s26964_s2 + $0x14] sm:$0xf]  ;;  %v1409_v7 = vrot.slane %v15707_v25, %v21935_v1 }
 0x113   : > { %v1263_v16 = vmax.f32 %v1217_v10, 0.0  ;;  %v1413_v10 = vrot.slane %v15707_v25, %v21939_v4 }
 0x114   : > { %v809_v60 = vrot.slane %v795_v63, %v21949_v29  ;;  %v1639_v63 = vrot.slane %v15742_v14, %v21878_v38 }
 0x115   : > { %v1270_v20 = vcombine.low %v1262_v13, %v1263_v16 }
 0x116   : > { %v810_v2 = vcombine.low %v802_v62, %v809_v60  ;;  %v1643_v60 = vrot.slane %v15742_v14, %v21881_v39 }
 0x117   : > { %v1278_v61 = vrot.slane %v1270_v20, %v21949_v29 }
 0x118   : > { %v817_v6 = vrot.slane %v810_v2, %v21949_v29 }
 0x11a   : > { %820 = vst.msk [vmem:[#allocation2 + $0x2] ss:$8 sm:$0xf] %vm21956_vm2, %v817_v6 }
 0x11c   : > { %v1017_v17 = vpop.f32.mrb[12].mxu1 }
 0x11d   : > { %v1018_v18 = vadd.f32 %v1017_v17, %v933_v9  ;;  %v1019_v19 = vpop.f32.mrb[13].mxu1 }
 0x11e   : > { %v1020_v21 = vadd.f32 %v1019_v19, %v937_v12  ;;  %v1021_v22 = vpop.f32.mrb[14].mxu1 }
 0x11f   : > { %v1026_v23 = vmax.f32 %v1018_v18, 0.0  ;;  %v1022_v24 = vpop.f32.mrb[15].mxu1  ;;  %v1452_v36 = vpop.f32.mrb[12].mxu0 }
 0x120   : > { %v1027_v26 = vmax.f32 %v1020_v21, 0.0  ;;  %v1453_v41 = vadd.f32 %v1452_v36, %v1401_v33  ;;  %v1454_v42 = vpop.f32.mrb[13].mxu0 }
 0x121   : > { %v1455_v44 = vadd.f32 %v1454_v42, %v1405_v34  ;;  %v1456_v45 = vpop.f32.mrb[14].mxu0 }
 0x122   : > { %v1033_v31 = vcombine.low %v1026_v23, %v1027_v26  ;;  %v1500_v47 = vmax.f32 %v1453_v41, 0.0  ;;  %v1457_v48 = vpop.f32.mrb[15].mxu0  ;;  %v15777_v23 = vld [vmem:[%s26964_s2 + $0x18] sm:$0xf]  ;;  %v1647_v41 = vrot.slane %v15742_v14, %v21935_v1 }
 0x123   : > { %v1501_v49 = vmax.f32 %v1455_v44, 0.0  ;;  %v1651_v44 = vrot.slane %v15742_v14, %v21939_v4 }
 0x124   : > { %v1047_v28 = vrot.slane %v1033_v31, %v21949_v29  ;;  %v1877_v31 = vrot.slane %v15777_v23, %v21878_v38 }
 0x125   : > { %v1508_v53 = vcombine.low %v1500_v47, %v1501_v49 }
 0x126   : > { %v1048_v35 = vcombine.low %v1040_v30, %v1047_v28  ;;  %v1881_v28 = vrot.slane %v15777_v23, %v21881_v39 }
 0x127   : > { %v1516_v26 = vrot.slane %v1508_v53, %v21949_v29 }
 0x128   : > { %v1055_v37 = vrot.slane %v1048_v35, %v21949_v29 }
 0x12a   : > { %1058 = vst.msk [vmem:[#allocation2 + $0x3] ss:$8 sm:$0xf] %vm21956_vm2, %v1055_v37 }
 0x12c   : > { %v1255_v50 = vpop.f32.mrb[16].mxu1 }
 0x12d   : > { %v1256_v51 = vadd.f32 %v1255_v50, %v1171_v43  ;;  %v1257_v52 = vpop.f32.mrb[17].mxu1 }
 0x12e   : > { %v1258_v3 = vadd.f32 %v1257_v52, %v1175_v46  ;;  %v1259_v55 = vpop.f32.mrb[18].mxu1 }
 0x12f   : > { %v1264_v56 = vmax.f32 %v1256_v51, 0.0  ;;  %v1260_v57 = vpop.f32.mrb[19].mxu1  ;;  %v1690_v0 = vpop.f32.mrb[16].mxu0 }
 0x130   : > { %v1265_v58 = vmax.f32 %v1258_v3, 0.0  ;;  %v1691_v5 = vadd.f32 %v1690_v0, %v1639_v63  ;;  %v1692_v6 = vpop.f32.mrb[17].mxu0  ;;  %v1889_v63 = vrot.slane %v15777_v23, %v21939_v4 }
 0x131   : > { %v1693_v8 = vadd.f32 %v1692_v6, %v1643_v60  ;;  %v1694_v9 = vpop.f32.mrb[18].mxu0 }
 0x132   : > { %v1271_v62 = vcombine.low %v1264_v56, %v1265_v58  ;;  %v1738_v11 = vmax.f32 %v1691_v5, 0.0  ;;  %v1695_v12 = vpop.f32.mrb[19].mxu0 }
 0x133   : > { %v1739_v13 = vmax.f32 %v1693_v8, 0.0 }
 0x134   : > { %v1285_v59 = vrot.slane %v1271_v62, %v21949_v29 }
 0x135   : > { %v1746_v18 = vcombine.low %v1738_v11, %v1739_v13 }
 0x136   : > { %v1286_v54 = vcombine.low %v1278_v61, %v1285_v59  ;;  %v1885_v59 = vrot.slane %v15777_v23, %v21935_v1 }
 0x137   : > { %v1754_v57 = vrot.slane %v1746_v18, %v21949_v29 }
 0x138   : > { %v1293_v2 = vrot.slane %v1286_v54, %v21949_v29 }
 0x13a   : > { %1296 = vst.msk [vmem:[#allocation2 + $0x4] ss:$8 sm:$0xf] %vm21956_vm2, %v1293_v2 }
 0x13c   : > { %v1493_v15 = vpop.f32.mrb[20].mxu1 }
 0x13d   : > { %v1494_v16 = vadd.f32 %v1493_v15, %v1409_v7  ;;  %v1495_v17 = vpop.f32.mrb[21].mxu1 }
 0x13e   : > { %v1496_v19 = vadd.f32 %v1495_v17, %v1413_v10  ;;  %v1497_v20 = vpop.f32.mrb[22].mxu1 }
 0x13f   : > { %v1502_v21 = vmax.f32 %v1494_v16, 0.0  ;;  %v1498_v22 = vpop.f32.mrb[23].mxu1  ;;  %v1928_v34 = vpop.f32.mrb[20].mxu0  ;;  %v19536_v20 = vld [vmem:[%s26965_s3 + $0x388] ss:$16 sps:$4 sm:$0xff]  }
 0x140   : > { %v1503_v24 = vmax.f32 %v1496_v19, 0.0  ;;  %v1929_v36 = vadd.f32 %v1928_v34, %v1877_v31  ;;  %v1930_v37 = vpop.f32.mrb[21].mxu0  ;;  %v19550_v31 = vld [vmem:[%s26965_s3 + $0x3cc] ss:$16 sps:$4 sm:$0xff]   ;;  %v19551_v34 = vld [vmem:[%s26965_s3 + $0x5c8] ss:$16 sps:$4 sm:$0xff]  }
 0x141   : > { %v1931_v42 = vadd.f32 %v1930_v37, %v1881_v28  ;;  %v1932_v43 = vpop.f32.mrb[22].mxu0  ;;  %v19553_v28 = vld [vmem:[%s26965_s3 + $0x5cc] ss:$16 sps:$4 sm:$0xff]   ;;  %v19554_v37 = vld [vmem:[%s26965_s3 + $0x3e8] ss:$16 sps:$4 sm:$0xff]  }
 0x142   : > { %v1509_v30 = vcombine.low %v1502_v21, %v1503_v24  ;;  %v1976_v45 = vmax.f32 %v1929_v36, 0.0  ;;  %v1933_v46 = vpop.f32.mrb[23].mxu0  ;;  %v19539_v21 = vld [vmem:[%s26965_s3 + $0x588] ss:$16 sps:$4 sm:$0xff]   ;;  %v19544_v24 = vld [vmem:[%s26965_s3 + $0x3ac] ss:$16 sps:$4 sm:$0xff]  }
 0x143   : > { %v1977_v47 = vmax.f32 %v1931_v42, 0.0  ;;  %v19559_v36 = vld [vmem:[%s26965_s3 + $0x5ec] ss:$16 sps:$4 sm:$0xff]  }
 0x144   : > { %v1523_v25 = vrot.slane %v1509_v30, %v21949_v29  ;;  %v19542_v30 = vld [vmem:[%s26965_s3 + $0x3a8] ss:$16 sps:$4 sm:$0xff]   ;;  %v19562_v42 = vld [vmem:[%s26965_s3 + $0x40c] ss:$16 sps:$4 sm:$0xff]  }
 0x145   : > { %v1984_v51 = vcombine.low %v1976_v45, %v1977_v47  ;;  %v19565_v43 = vld [vmem:[%s26965_s3 + $0x60c] ss:$16 sps:$4 sm:$0xff]   ;;  %v19563_v45 = vld [vmem:[%s26965_s3 + $0x608] ss:$16 sps:$4 sm:$0xff]  }
 0x146   : > { %v1524_v33 = vcombine.low %v1516_v26, %v1523_v25  ;;  %v19547_v26 = vld [vmem:[%s26965_s3 + $0x5ac] ss:$16 sps:$4 sm:$0xff]   ;;  %v19545_v25 = vld [vmem:[%s26965_s3 + $0x5a8] ss:$16 sps:$4 sm:$0xff]  }
 0x147   : > { %v1992_v9 = vrot.slane %v1984_v51, %v21949_v29  ;;  %v19568_v46 = vld [vmem:[%s26965_s3 + $0x42c] ss:$16 sps:$4 sm:$0xff]  }
 0x148   : > { %v1531_v35 = vrot.slane %v1524_v33, %v21949_v29  ;;  %v19548_v33 = vld [vmem:[%s26965_s3 + $0x3c8] ss:$16 sps:$4 sm:$0xff]   ;;  %v19571_v47 = vld [vmem:[%s26965_s3 + $0x62c] ss:$16 sps:$4 sm:$0xff]  }
 0x149   : > { %v19577_v51 = vld [vmem:[%s26965_s3 + $0x64c] ss:$16 sps:$4 sm:$0xff]  }
 0x14a   : > { %1534 = vst.msk [vmem:[#allocation2 + $0x5] ss:$8 sm:$0xf] %vm21956_vm2, %v1531_v35  ;;  %v19556_v35 = vld [vmem:[%s26965_s3 + $0x3ec] ss:$16 sps:$4 sm:$0xff]  }
 0x14c   : > { %v1731_v48 = vpop.f32.mrb[24].mxu1 }
 0x14d   : > { %v1732_v49 = vadd.f32 %v1731_v48, %v1647_v41  ;;  %v1733_v50 = vpop.f32.mrb[25].mxu1  ;;  %v19557_v41 = vld [vmem:[%s26965_s3 + $0x5e8] ss:$16 sps:$4 sm:$0xff]  }
 0x14e   : > { %v1734_v52 = vadd.f32 %v1733_v50, %v1651_v44  ;;  %v1735_v53 = vpop.f32.mrb[26].mxu1  ;;  %v19560_v44 = vld [vmem:[%s26965_s3 + $0x408] ss:$16 sps:$4 sm:$0xff]   ;;  %v19574_v50 = vld [vmem:[%s26965_s3 + $0x44c] ss:$16 sps:$4 sm:$0xff]  }
 0x14f   : > { %v1740_v3 = vmax.f32 %v1732_v49, 0.0  ;;  %v1736_v55 = vpop.f32.mrb[27].mxu1  ;;  %v19566_v48 = vld [vmem:[%s26965_s3 + $0x428] ss:$16 sps:$4 sm:$0xff]  }
 0x150   : > { %v1741_v56 = vmax.f32 %v1734_v52, 0.0  ;;  %v19569_v49 = vld [vmem:[%s26965_s3 + $0x628] ss:$16 sps:$4 sm:$0xff]   ;;  %v19583_v55 = vld [vmem:[%s26965_s3 + $0x66c] ss:$16 sps:$4 sm:$0xff]  }
 0x151   : > { %v19572_v52 = vld [vmem:[%s26965_s3 + $0x448] ss:$16 sps:$4 sm:$0xff]  }
 0x152   : > { %v1747_v58 = vcombine.low %v1740_v3, %v1741_v56  ;;  %v19575_v53 = vld [vmem:[%s26965_s3 + $0x648] ss:$16 sps:$4 sm:$0xff]   ;;  %v19580_v3 = vld [vmem:[%s26965_s3 + $0x46c] ss:$16 sps:$4 sm:$0xff]  }
 0x153   : > { %v19578_v56 = vld [vmem:[%s26965_s3 + $0x468] ss:$16 sps:$4 sm:$0xff]  }
 0x154   : > { %v1761_v61 = vrot.slane %v1747_v58, %v21949_v29  ;;  %v19586_v58 = vld [vmem:[%s26965_s3 + $0x48c] ss:$16 sps:$4 sm:$0xff]  }
 0x156   : > { %v1762_v62 = vcombine.low %v1754_v57, %v1761_v61  ;;  %v19581_v57 = vld [vmem:[%s26965_s3 + $0x668] ss:$16 sps:$4 sm:$0xff]   ;;  %v19589_v61 = vld [vmem:[%s26965_s3 + $0x68c] ss:$16 sps:$4 sm:$0xff]  }
 0x158   : > { %v1769_v14 = vrot.slane %v1762_v62, %v21949_v29  ;;  %v19584_v62 = vld [vmem:[%s26965_s3 + $0x488] ss:$16 sps:$4 sm:$0xff]  }
 0x15a   : > { %1772 = vst.msk [vmem:[#allocation2 + $0x6] ss:$8 sm:$0xf] %vm21956_vm2, %v1769_v14  ;;  %v19587_v14 = vld [vmem:[%s26965_s3 + $0x688] ss:$16 sps:$4 sm:$0xff]  }
 0x15c   : > { %v1969_v60 = vpop.f32.mrb[28].mxu1 }
 0x15d   : > { %v1970_v54 = vadd.f32 %v1969_v60, %v1885_v59  ;;  %v1971_v0 = vpop.f32.mrb[29].mxu1  ;;  %v19592_v59 = vld [vmem:[%s26965_s3 + $0x4ac] ss:$16 sps:$4 sm:$0xff]   ;;  %v19590_v60 = vld [vmem:[%s26965_s3 + $0x4a8] ss:$16 sps:$4 sm:$0xff]  }
 0x15e   : > { %v1972_v2 = vadd.f32 %v1971_v0, %v1889_v63  ;;  %v1973_v5 = vpop.f32.mrb[30].mxu1  ;;  %v19595_v63 = vld [vmem:[%s26965_s3 + $0x6ac] ss:$16 sps:$4 sm:$0xff]   ;;  %v2017_v0 = vld [vmem:[#allocation2 + $0x28] sm:$0x1] }
 0x15f   : > { %v1978_v6 = vmax.f32 %v1970_v54, 0.0  ;;  %v1974_v7 = vpop.f32.mrb[31].mxu1  ;;  %v19593_v54 = vld [vmem:[%s26965_s3 + $0x6a8] ss:$16 sps:$4 sm:$0xff]   ;;  %v19598_v5 = vld [vmem:[%s26965_s3 + $0x4cc] ss:$16 sps:$4 sm:$0xff]  }
 0x160   : > { %v1979_v8 = vmax.f32 %v1972_v2, 0.0  ;;  %v19596_v7 = vld [vmem:[%s26965_s3 + $0x4c8] ss:$16 sps:$4 sm:$0xff]  }
 0x162   : > { %v1985_v10 = vcombine.low %v1978_v6, %v1979_v8  ;;  %v19601_v6 = vld [vmem:[%s26965_s3 + $0x6cc] ss:$16 sps:$4 sm:$0xff]   ;;  %v19599_v8 = vld [vmem:[%s26965_s3 + $0x6c8] ss:$16 sps:$4 sm:$0xff]  }
 0x164   : > { %v1999_v11 = vrot.slane %v1985_v10, %v21949_v29  ;;  %v19604_v10 = vld [vmem:[%s26965_s3 + $0x4ec] ss:$16 sps:$4 sm:$0xff]  }
 0x166   : > { %v2000_v12 = vcombine.low %v1992_v9, %v1999_v11  ;;  %v19607_v11 = vld [vmem:[%s26965_s3 + $0x6ec] ss:$16 sps:$4 sm:$0xff]  }
 0x168   : > { %v2007_v13 = vrot.slane %v2000_v12, %v21949_v29  ;;  %v19602_v12 = vld [vmem:[%s26965_s3 + $0x4e8] ss:$16 sps:$4 sm:$0xff]  }
 0x16a   : > { %2010 = vst.msk [vmem:[#allocation2 + $0x7] ss:$8 sm:$0xf] %vm21956_vm2, %v2007_v13  ;;  %v19605_v13 = vld [vmem:[%s26965_s3 + $0x6e8] ss:$16 sps:$4 sm:$0xff]  }
 0x171   : > { %v2025_v15 = vld [vmem:[#allocation2 + $0x8] sm:$0xff]  ;;  %v2027_v16 = vld [vmem:[#allocation2 + $0x18] sm:$0xff]  ;;  %v2024_v17 = vld [vmem:[#allocation2] sm:$0xff] }
 0x172   : > { %v22025_v18 = vpack.c.bf16 %v2025_v15, %v2025_v15  ;;  %v22027_v19 = vpack.c.bf16 %v2027_v16, %v2027_v16  ;;  %v22035_v22 = vpack.c.bf16 %v2024_v17, %v2024_v17  ;;  %v2026_v23 = vld [vmem:[#allocation2 + $0x10] sm:$0xff]  ;;  %v2013_v2 = vld [vmem:[#allocation2 + $0x8] sm:$0xfe] }
 0x173   : > { %v22037_v40 = vpack.c.bf16 %v2026_v23, %v2026_v23  ;;  %v2021_v9 = vpack.c.bf16 %v2017_v0, %v2013_v2  ;;  %v19610_v16 = vld [vmem:[%s26965_s3 + $0x50c] ss:$16 sps:$4 sm:$0xff]   ;;  %v19613_v17 = vld [vmem:[%s26965_s3 + $0x4] ss:$16 sps:$4 sm:$0xff]   ;;  %v19653_v0 = vld [vmem:[%s26965_s3 + $0x260] ss:$16 sps:$4 sm:$0xff]  }
 0x174   : > { %2852 = vmatprep.mubr.bf16.mxu0 %v22025_v18  ;;  %16020 = vmatprep.mubr.msk.bf16.mxu1 %vm319_vm0, %v22027_v19  ;;  %v19658_v2 = vld [vmem:[%s26965_s3 + $0x104] ss:$16 sps:$4 sm:$0xff]  }
 0x175   : > { %2853 = vmatmul.mubr.bf16.vlgmr.msra.gmra.mrb[24].mxu0 %v22035_v22  ;;  %2894 = vmatmul.mubr.bf16.vlgmr.msra.gmra.mrb[32].mxu1 %v22037_v40  ;;  %v2994_v15 = vshll.u32 %v2021_v9, 16 }
 0x176   : > { %2903 = vmatpush1.bf16.msra.mxu1 %v19536_v20  ;;  %2944 = vmatpush1.bf16.msra.mxu0 %v19539_v21  ;;  %v19608_v20 = vld [vmem:[%s26965_s3 + $0x508] ss:$16 sps:$4 sm:$0xff]   ;;  %v19611_v21 = vld [vmem:[%s26965_s3] ss:$16 sps:$4 sm:$0xff]  }
 0x177   : > { %2934 = vmatprep.mubr.bf16.mxu1 %v22025_v18  ;;  %16021 = vmatprep.mubr.msk.bf16.mxu0 %vm319_vm0, %v22027_v19  ;;  %v2996_v23 = vrot.slane %v2994_v15, 1  ;;  %v19668_v15 = vld [vmem:[%s26965_s3 + $0x140] ss:$16 sps:$4 sm:$0xff]  }
 0x178   : > { %2904 = vmatprep.subr.bf16.mxu1 %v19544_v24  ;;  %2945 = vmatprep.subr.bf16.mxu0 %v19547_v26  ;;  %v19616_v24 = vld [vmem:[%s26965_s3 + $0x52c] ss:$16 sps:$4 sm:$0xff]   ;;  %v2992_v26 = vshrl.u32 %v2021_v9, 16  ;;  %v19667_v9 = vld [vmem:[%s26965_s3 + $0x2a4] ss:$16 sps:$4 sm:$0xff]  }
 0x17a   : > { %2905 = vmatpush1.bf16.msra.mxu1 %v19542_v30  ;;  %2946 = vmatpush1.bf16.msra.mxu0 %v19545_v25  ;;  %v2019_v30 = vld [vmem:[#allocation2 + $0x38] sm:$0x1] }
 0x17b   : > { %2906 = vmatprep.subr.bf16.mxu1 %v19550_v31  ;;  %2947 = vmatprep.subr.bf16.mxu0 %v19553_v28  ;;  %v19614_v25 = vld [vmem:[%s26965_s3 + $0x528] ss:$16 sps:$4 sm:$0xff]   ;;  %v19619_v31 = vld [vmem:[%s26965_s3 + $0x24] ss:$16 sps:$4 sm:$0xff]   ;;  %v22201_v28 = vor.u32 %v2996_v23, %v2992_v26  ;;  %v19677_v23 = vld [vmem:[%s26965_s3 + $0x2e0] ss:$16 sps:$4 sm:$0xff]  }
 0x17c   : > { %v19685_v26 = vld [vmem:[%s26965_s3 + $0x304] ss:$16 sps:$4 sm:$0xff]  }
 0x17e   : > { %2907 = vmatpush1.bf16.msra.mxu1 %v19548_v33  ;;  %2948 = vmatpush1.bf16.msra.mxu0 %v19551_v34  ;;  %v19617_v33 = vld [vmem:[%s26965_s3 + $0x20] ss:$16 sps:$4 sm:$0xff]   ;;  %v2015_v34 = vld [vmem:[#allocation2 + $0x18] sm:$0xfe] }
 0x17f   : > { %2908 = vmatprep.subr.bf16.mxu1 %v19556_v35  ;;  %2949 = vmatprep.subr.bf16.mxu0 %v19559_v36  ;;  %v19622_v35 = vld [vmem:[%s26965_s3 + $0x54c] ss:$16 sps:$4 sm:$0xff]   ;;  %v19625_v36 = vld [vmem:[%s26965_s3 + $0x44] ss:$16 sps:$4 sm:$0xff]  }
 0x182   : > { %2909 = vmatpush1.bf16.msra.mxu1 %v19554_v37  ;;  %2950 = vmatpush1.bf16.msra.mxu0 %v19557_v41  ;;  %v19620_v37 = vld [vmem:[%s26965_s3 + $0x548] ss:$16 sps:$4 sm:$0xff]   ;;  %v19623_v41 = vld [vmem:[%s26965_s3 + $0x40] ss:$16 sps:$4 sm:$0xff]  }
 0x183   : > { %2910 = vmatprep.subr.bf16.mxu1 %v19562_v42  ;;  %2951 = vmatprep.subr.bf16.mxu0 %v19565_v43  ;;  %v2023_v42 = vpack.c.bf16 %v2019_v30, %v2015_v34  ;;  %v19628_v43 = vld [vmem:[%s26965_s3 + $0x56c] ss:$16 sps:$4 sm:$0xff]   ;;  %v19680_v30 = vld [vmem:[%s26965_s3 + $0x180] ss:$16 sps:$4 sm:$0xff]  }
 0x184   : > { %v2016_v34 = vld [vmem:[#allocation2 + $0x20] sm:$0x1] }
 0x186   : > { %2911 = vmatpush1.bf16.msra.mxu1 %v19560_v44  ;;  %2952 = vmatpush1.bf16.msra.mxu0 %v19563_v45  ;;  %v19631_v44 = vld [vmem:[%s26965_s3 + $0x64] ss:$16 sps:$4 sm:$0xff]   ;;  %v19626_v45 = vld [vmem:[%s26965_s3 + $0x568] ss:$16 sps:$4 sm:$0xff]  }
 0x187   : > { %2912 = vmatprep.subr.bf16.mxu1 %v19568_v46  ;;  %2953 = vmatprep.subr.bf16.mxu0 %v19571_v47  ;;  %v19629_v46 = vld [vmem:[%s26965_s3 + $0x60] ss:$16 sps:$4 sm:$0xff]   ;;  %v3008_v47 = vshll.u32 %v2023_v42, 16 }
 0x18a   : > { %2913 = vmatpush1.bf16.msra.mxu1 %v19566_v48  ;;  %2954 = vmatpush1.bf16.msra.mxu0 %v19569_v49  ;;  %v19634_v48 = vld [vmem:[%s26965_s3 + $0x84] ss:$16 sps:$4 sm:$0xff]  }
 0x18b   : > { %2914 = vmatprep.subr.bf16.mxu1 %v19574_v50  ;;  %2955 = vmatprep.subr.bf16.mxu0 %v19577_v51  ;;  %v19637_v49 = vld [vmem:[%s26965_s3 + $0x204] ss:$16 sps:$4 sm:$0xff]   ;;  %v19632_v50 = vld [vmem:[%s26965_s3 + $0x80] ss:$16 sps:$4 sm:$0xff]  }
 0x18c   : > { %v19635_v51 = vld [vmem:[%s26965_s3 + $0x200] ss:$16 sps:$4 sm:$0xff]  }
 0x18e   : > { %2915 = vmatpush1.bf16.msra.mxu1 %v19572_v52  ;;  %2956 = vmatpush1.bf16.msra.mxu0 %v19575_v53  ;;  %v3010_v52 = vrot.slane %v3008_v47, 1  ;;  %v3006_v53 = vshrl.u32 %v2023_v42, 16  ;;  %v2014_v42 = vld [vmem:[#allocation2 + $0x10] sm:$0xfe] }
 0x18f   : > { %2916 = vmatprep.subr.bf16.mxu1 %v19580_v3  ;;  %2957 = vmatprep.subr.bf16.mxu0 %v19583_v55  ;;  %v19640_v3 = vld [vmem:[%s26965_s3 + $0xa4] ss:$16 sps:$4 sm:$0xff]   ;;  %v19638_v55 = vld [vmem:[%s26965_s3 + $0xa0] ss:$16 sps:$4 sm:$0xff]  }
 0x190   : > { %v19692_v47 = vld [vmem:[%s26965_s3 + $0x1c0] ss:$16 sps:$4 sm:$0xff]  }
 0x192   : > { %2917 = vmatpush1.bf16.msra.mxu1 %v19578_v56  ;;  %2958 = vmatpush1.bf16.msra.mxu0 %v19581_v57  ;;  %v19641_v56 = vld [vmem:[%s26965_s3 + $0x220] ss:$16 sps:$4 sm:$0xff]   ;;  %v19643_v57 = vld [vmem:[%s26965_s3 + $0x224] ss:$16 sps:$4 sm:$0xff]  }
 0x193   : > { %2918 = vmatprep.subr.bf16.mxu1 %v19586_v58  ;;  %2959 = vmatprep.subr.bf16.mxu0 %v19589_v61  ;;  %v22256_v58 = vor.u32 %v3010_v52, %v3006_v53  ;;  %v19646_v61 = vld [vmem:[%s26965_s3 + $0xc4] ss:$16 sps:$4 sm:$0xff]   ;;  %v19698_v53 = vld [vmem:[%s26965_s3 + $0x1e0] ss:$16 sps:$4 sm:$0xff]  }
 0x196   : > { %2919 = vmatpush1.bf16.msra.mxu1 %v19584_v62  ;;  %2960 = vmatpush1.bf16.msra.mxu0 %v19587_v14  ;;  %v19649_v62 = vld [vmem:[%s26965_s3 + $0x244] ss:$16 sps:$4 sm:$0xff]   ;;  %v19644_v14 = vld [vmem:[%s26965_s3 + $0xc0] ss:$16 sps:$4 sm:$0xff]  }
 0x197   : > { %2920 = vmatprep.subr.bf16.mxu1 %v19592_v59  ;;  %2961 = vmatprep.subr.bf16.mxu0 %v19595_v63  ;;  %v19647_v59 = vld [vmem:[%s26965_s3 + $0x240] ss:$16 sps:$4 sm:$0xff]   ;;  %v19652_v63 = vld [vmem:[%s26965_s3 + $0xe4] ss:$16 sps:$4 sm:$0xff]  }
 0x19a   : > { %2921 = vmatpush1.bf16.msra.mxu1 %v19590_v60  ;;  %2962 = vmatpush1.bf16.msra.mxu0 %v19593_v54  ;;  %v19655_v60 = vld [vmem:[%s26965_s3 + $0x264] ss:$16 sps:$4 sm:$0xff]   ;;  %v19650_v54 = vld [vmem:[%s26965_s3 + $0xe0] ss:$16 sps:$4 sm:$0xff]  }
 0x19b   : > { %2922 = vmatprep.subr.bf16.mxu1 %v19598_v5  ;;  %2963 = vmatprep.subr.bf16.mxu0 %v19601_v6  ;;  %v19661_v5 = vld [vmem:[%s26965_s3 + $0x284] ss:$16 sps:$4 sm:$0xff]   ;;  %v19656_v6 = vld [vmem:[%s26965_s3 + $0x100] ss:$16 sps:$4 sm:$0xff]  }
 0x19e   : > { %2923 = vmatpush1.bf16.msra.mxu1 %v19596_v7  ;;  %2964 = vmatpush1.bf16.msra.mxu0 %v19599_v8  ;;  %v19659_v7 = vld [vmem:[%s26965_s3 + $0x280] ss:$16 sps:$4 sm:$0xff]   ;;  %v19664_v8 = vld [vmem:[%s26965_s3 + $0x124] ss:$16 sps:$4 sm:$0xff]  }
 0x19f   : > { %2924 = vmatprep.subr.bf16.mxu1 %v19604_v10  ;;  %2965 = vmatprep.subr.bf16.mxu0 %v19607_v11  ;;  %v19662_v10 = vld [vmem:[%s26965_s3 + $0x120] ss:$16 sps:$4 sm:$0xff]  }
 0x1a0   : > { %v19665_v11 = vld [vmem:[%s26965_s3 + $0x2a0] ss:$16 sps:$4 sm:$0xff]  }
 0x1a2   : > { %2925 = vmatpush1.bf16.msra.mxu1 %v19602_v12  ;;  %2966 = vmatpush1.bf16.msra.mxu0 %v19605_v13  ;;  %v19670_v12 = vld [vmem:[%s26965_s3 + $0x144] ss:$16 sps:$4 sm:$0xff]  }
 0x1a3   : > { %2926 = vmatprep.subr.bf16.mxu1 %v19610_v16  ;;  %3578 = vmatprep.subr.bf16.mxu0 %v19613_v17  ;;  %v19673_v13 = vld [vmem:[%s26965_s3 + $0x2c4] ss:$16 sps:$4 sm:$0xff]   ;;  %v19671_v16 = vld [vmem:[%s26965_s3 + $0x2c0] ss:$16 sps:$4 sm:$0xff]  }
 0x1a4   : > { %v19676_v17 = vld [vmem:[%s26965_s3 + $0x164] ss:$16 sps:$4 sm:$0xff]  }
 0x1a5   : > { %2976 = vmatmul.mubr.bf16.vlgmr.msra.gmra.mrb[28].mxu0 %v22037_v40 }
 0x1a6   : > { %2927 = vmatpush1.bf16.msra.mxu1 %v19608_v20  ;;  %3579 = vmatpush1.bf16.msra.mxu0 %v19611_v21  ;;  %v19679_v20 = vld [vmem:[%s26965_s3 + $0x2e4] ss:$16 sps:$4 sm:$0xff]   ;;  %v19674_v21 = vld [vmem:[%s26965_s3 + $0x160] ss:$16 sps:$4 sm:$0xff]  }
 0x1a7   : > { %3610 = vmatprep.mubr.bf16.mxu0 %v22201_v28  ;;  %2928 = vmatprep.subr.bf16.mxu1 %v19616_v24  ;;  %v19682_v24 = vld [vmem:[%s26965_s3 + $0x184] ss:$16 sps:$4 sm:$0xff]  }
 0x1a8   : > { %3580 = vmatprep.subr.bf16.mxu0 %v19619_v31  ;;  %v19688_v31 = vld [vmem:[%s26965_s3 + $0x1a4] ss:$16 sps:$4 sm:$0xff]  }
 0x1aa   : > { %2929 = vmatpush1.bf16.msra.mxu1 %v19614_v25  ;;  %3581 = vmatpush1.bf16.msra.mxu0 %v19617_v33  ;;  %v19683_v25 = vld [vmem:[%s26965_s3 + $0x300] ss:$16 sps:$4 sm:$0xff]   ;;  %v19691_v33 = vld [vmem:[%s26965_s3 + $0x324] ss:$16 sps:$4 sm:$0xff]  }
 0x1ab   : > { %2930 = vmatprep.subr.bf16.mxu1 %v19622_v35  ;;  %3582 = vmatprep.subr.bf16.mxu0 %v19625_v36  ;;  %v2018_v35 = vld [vmem:[#allocation2 + $0x30] sm:$0x1] }
 0x1ac   : > { %v19686_v36 = vld [vmem:[%s26965_s3 + $0x1a0] ss:$16 sps:$4 sm:$0xff]  }
 0x1ae   : > { %2931 = vmatpush1.bf16.msra.mxu1 %v19620_v37  ;;  %3583 = vmatpush1.bf16.msra.mxu0 %v19623_v41  ;;  %v19689_v37 = vld [vmem:[%s26965_s3 + $0x320] ss:$16 sps:$4 sm:$0xff]  }
 0x1af   : > { %2932 = vmatprep.subr.bf16.mxu1 %v19628_v43  ;;  %3584 = vmatprep.subr.bf16.mxu0 %v19631_v44  ;;  %v2012_v41 = vld [vmem:[#allocation2] sm:$0xfe] }
 0x1b0   : > { %v19694_v43 = vld [vmem:[%s26965_s3 + $0x1c4] ss:$16 sps:$4 sm:$0xff]  }
 0x1b1   : > { %v19697_v44 = vld [vmem:[%s26965_s3 + $0x344] ss:$16 sps:$4 sm:$0xff]  }
 0x1b2   : > { %2933 = vmatpush1.bf16.msra.mxu1 %v19626_v45  ;;  %3585 = vmatpush1.bf16.msra.mxu0 %v19629_v46  ;;  %v2020_v45 = vpack.c.bf16 %v2016_v34, %v2012_v41  ;;  %v2022_v46 = vpack.c.bf16 %v2018_v35, %v2014_v42  ;;  %v19743_v34 = vld [vmem:[%s26965_s3 + $0x2c8] ss:$16 sps:$4 sm:$0xff]   ;;  %v19748_v35 = vld [vmem:[%s26965_s3 + $0xec] ss:$16 sps:$4 sm:$0xff]  }
 0x1b3   : > { %3586 = vmatprep.subr.bf16.mxu0 %v19634_v48  ;;  %3619 = vmatprep.subr.bf16.mxu1 %v19637_v49  ;;  %v19695_v48 = vld [vmem:[%s26965_s3 + $0x340] ss:$16 sps:$4 sm:$0xff]   ;;  %v19700_v49 = vld [vmem:[%s26965_s3 + $0x1e4] ss:$16 sps:$4 sm:$0xff]   ;;  %v19749_v41 = vld [vmem:[%s26965_s3 + $0x2e8] ss:$16 sps:$4 sm:$0xff]  }
 0x1b4   : > { %v3001_v52 = vshll.u32 %v2022_v46, 16  ;;  %v19754_v42 = vld [vmem:[%s26965_s3 + $0x10c] ss:$16 sps:$4 sm:$0xff]  }
 0x1b5   : > { %2935 = vmatmul.mubr.bf16.vlgmr.msra.gmra.mrb[36].mxu1 %v22035_v22 }
 0x1b6   : > { %3587 = vmatpush1.bf16.msra.mxu0 %v19632_v50  ;;  %3620 = vmatpush1.bf16.msra.mxu1 %v19635_v51  ;;  %v19703_v50 = vld [vmem:[%s26965_s3 + $0x364] ss:$16 sps:$4 sm:$0xff]   ;;  %v2987_v51 = vshll.u32 %v2020_v45, 16 }
 0x1b7   : > { %16134 = vmatprep.mubr.msk.bf16.mxu1 %vm319_vm0, %v22256_v58  ;;  %3588 = vmatprep.subr.bf16.mxu0 %v19640_v3  ;;  %v19701_v3 = vld [vmem:[%s26965_s3 + $0x360] ss:$16 sps:$4 sm:$0xff]  }
 0x1b8   : > { %3621 = vmatprep.subr.bf16.mxu1 %v19643_v57  ;;  %v19706_v57 = vld [vmem:[%s26965_s3 + $0xc] ss:$16 sps:$4 sm:$0xff]  }
 0x1ba   : > { %3589 = vmatpush1.bf16.msra.mxu0 %v19638_v55  ;;  %3622 = vmatpush1.bf16.msra.mxu1 %v19641_v56  ;;  %v2989_v55 = vrot.slane %v2987_v51, 1  ;;  %v3003_v56 = vrot.slane %v3001_v52, 1  ;;  %v19769_v51 = vld [vmem:[%s26965_s3 + $0x34c] ss:$16 sps:$4 sm:$0xff]   ;;  %v19764_v52 = vld [vmem:[%s26965_s3 + $0x148] ss:$16 sps:$4 sm:$0xff]  }
 0x1bb   : > { %3590 = vmatprep.subr.bf16.mxu0 %v19646_v61  ;;  %3623 = vmatprep.subr.bf16.mxu1 %v19649_v62  ;;  %v19709_v61 = vld [vmem:[%s26965_s3 + $0x20c] ss:$16 sps:$4 sm:$0xff]   ;;  %v19704_v62 = vld [vmem:[%s26965_s3 + $0x8] ss:$16 sps:$4 sm:$0xff]  }
 0x1be   : > { %3591 = vmatpush1.bf16.msra.mxu0 %v19644_v14  ;;  %3624 = vmatpush1.bf16.msra.mxu1 %v19647_v59  ;;  %v2985_v14 = vshrl.u32 %v2020_v45, 16  ;;  %v2999_v59 = vshrl.u32 %v2022_v46, 16  ;;  %v19755_v45 = vld [vmem:[%s26965_s3 + $0x308] ss:$16 sps:$4 sm:$0xff]   ;;  %v19760_v46 = vld [vmem:[%s26965_s3 + $0x12c] ss:$16 sps:$4 sm:$0xff]  }
 0x1bf   : > { %3592 = vmatprep.subr.bf16.mxu0 %v19652_v63  ;;  %3625 = vmatprep.subr.bf16.mxu1 %v19655_v60 }
 0x1c0   : > { %v22389_v63 = vor.u32 %v2989_v55, %v2985_v14  ;;  %v22391_v60 = vor.u32 %v3003_v56, %v2999_v59  ;;  %v19770_v55 = vld [vmem:[%s26965_s3 + $0x168] ss:$16 sps:$4 sm:$0xff]   ;;  %v19775_v56 = vld [vmem:[%s26965_s3 + $0x36c] ss:$16 sps:$4 sm:$0xff]   ;;  %v19781_v14 = vld [vmem:[%s26965_s3 + $0xa84] ss:$16 sps:$4 sm:$0xff]  }
 0x1c1   : > { %v19779_v59 = vld [vmem:[%s26965_s3 + $0xa80] ss:$16 sps:$4 sm:$0xff]  }
 0x1c2   : > { %3593 = vmatpush1.bf16.msra.mxu0 %v19650_v54  ;;  %3626 = vmatpush1.bf16.msra.mxu1 %v19653_v0  ;;  %v19707_v54 = vld [vmem:[%s26965_s3 + $0x208] ss:$16 sps:$4 sm:$0xff]   ;;  %v19712_v0 = vld [vmem:[%s26965_s3 + $0x2c] ss:$16 sps:$4 sm:$0xff]  }
 0x1c3   : > { %3594 = vmatprep.subr.bf16.mxu0 %v19658_v2  ;;  %3627 = vmatprep.subr.bf16.mxu1 %v19661_v5  ;;  %v19710_v2 = vld [vmem:[%s26965_s3 + $0x28] ss:$16 sps:$4 sm:$0xff]   ;;  %v19715_v5 = vld [vmem:[%s26965_s3 + $0x22c] ss:$16 sps:$4 sm:$0xff]  }
 0x1c6   : > { %3595 = vmatpush1.bf16.msra.mxu0 %v19656_v6  ;;  %3628 = vmatpush1.bf16.msra.mxu1 %v19659_v7  ;;  %v19713_v6 = vld [vmem:[%s26965_s3 + $0x228] ss:$16 sps:$4 sm:$0xff]   ;;  %v19718_v7 = vld [vmem:[%s26965_s3 + $0x4c] ss:$16 sps:$4 sm:$0xff]  }
 0x1c7   : > { %3596 = vmatprep.subr.bf16.mxu0 %v19664_v8  ;;  %3629 = vmatprep.subr.bf16.mxu1 %v19667_v9  ;;  %v19716_v8 = vld [vmem:[%s26965_s3 + $0x48] ss:$16 sps:$4 sm:$0xff]   ;;  %v19721_v9 = vld [vmem:[%s26965_s3 + $0x24c] ss:$16 sps:$4 sm:$0xff]  }
 0x1ca   : > { %3597 = vmatpush1.bf16.msra.mxu0 %v19662_v10  ;;  %3630 = vmatpush1.bf16.msra.mxu1 %v19665_v11  ;;  %v19719_v10 = vld [vmem:[%s26965_s3 + $0x248] ss:$16 sps:$4 sm:$0xff]   ;;  %v19724_v11 = vld [vmem:[%s26965_s3 + $0x6c] ss:$16 sps:$4 sm:$0xff]  }
 0x1cb   : > { %3598 = vmatprep.subr.bf16.mxu0 %v19670_v12  ;;  %3631 = vmatprep.subr.bf16.mxu1 %v19673_v13  ;;  %v19722_v12 = vld [vmem:[%s26965_s3 + $0x68] ss:$16 sps:$4 sm:$0xff]   ;;  %v19727_v13 = vld [vmem:[%s26965_s3 + $0x26c] ss:$16 sps:$4 sm:$0xff]  }
 0x1ce   : > { %3599 = vmatpush1.bf16.msra.mxu0 %v19668_v15  ;;  %3632 = vmatpush1.bf16.msra.mxu1 %v19671_v16  ;;  %v19725_v15 = vld [vmem:[%s26965_s3 + $0x268] ss:$16 sps:$4 sm:$0xff]   ;;  %v19730_v16 = vld [vmem:[%s26965_s3 + $0x8c] ss:$16 sps:$4 sm:$0xff]  }
 0x1cf   : > { %3600 = vmatprep.subr.bf16.mxu0 %v19676_v17  ;;  %3633 = vmatprep.subr.bf16.mxu1 %v19679_v20  ;;  %v19728_v17 = vld [vmem:[%s26965_s3 + $0x88] ss:$16 sps:$4 sm:$0xff]   ;;  %v19733_v20 = vld [vmem:[%s26965_s3 + $0x28c] ss:$16 sps:$4 sm:$0xff]  }
 0x1d2   : > { %3601 = vmatpush1.bf16.msra.mxu0 %v19674_v21  ;;  %3634 = vmatpush1.bf16.msra.mxu1 %v19677_v23  ;;  %v19731_v21 = vld [vmem:[%s26965_s3 + $0x288] ss:$16 sps:$4 sm:$0xff]   ;;  %v19736_v23 = vld [vmem:[%s26965_s3 + $0xac] ss:$16 sps:$4 sm:$0xff]  }
 0x1d3   : > { %3602 = vmatprep.subr.bf16.mxu0 %v19682_v24  ;;  %3635 = vmatprep.subr.bf16.mxu1 %v19685_v26  ;;  %v19734_v24 = vld [vmem:[%s26965_s3 + $0xa8] ss:$16 sps:$4 sm:$0xff]   ;;  %v19739_v26 = vld [vmem:[%s26965_s3 + $0x2ac] ss:$16 sps:$4 sm:$0xff]  }
 0x1d6   : > { %3603 = vmatpush1.bf16.msra.mxu0 %v19680_v30  ;;  %3636 = vmatpush1.bf16.msra.mxu1 %v19683_v25  ;;  %v19737_v30 = vld [vmem:[%s26965_s3 + $0x2a8] ss:$16 sps:$4 sm:$0xff]   ;;  %v19742_v25 = vld [vmem:[%s26965_s3 + $0xcc] ss:$16 sps:$4 sm:$0xff]  }
 0x1d7   : > { %3604 = vmatprep.subr.bf16.mxu0 %v19688_v31  ;;  %3637 = vmatprep.subr.bf16.mxu1 %v19691_v33  ;;  %v19745_v31 = vld [vmem:[%s26965_s3 + $0x2cc] ss:$16 sps:$4 sm:$0xff]   ;;  %v19740_v33 = vld [vmem:[%s26965_s3 + $0xc8] ss:$16 sps:$4 sm:$0xff]  }
 0x1da   : > { %3605 = vmatpush1.bf16.msra.mxu0 %v19686_v36  ;;  %3638 = vmatpush1.bf16.msra.mxu1 %v19689_v37  ;;  %v19746_v36 = vld [vmem:[%s26965_s3 + $0xe8] ss:$16 sps:$4 sm:$0xff]   ;;  %v19751_v37 = vld [vmem:[%s26965_s3 + $0x2ec] ss:$16 sps:$4 sm:$0xff]  }
 0x1db   : > { %3606 = vmatprep.subr.bf16.mxu0 %v19694_v43  ;;  %3639 = vmatprep.subr.bf16.mxu1 %v19697_v44  ;;  %v19752_v43 = vld [vmem:[%s26965_s3 + $0x108] ss:$16 sps:$4 sm:$0xff]   ;;  %v19757_v44 = vld [vmem:[%s26965_s3 + $0x30c] ss:$16 sps:$4 sm:$0xff]  }
 0x1de   : > { %3607 = vmatpush1.bf16.msra.mxu0 %v19692_v47  ;;  %3640 = vmatpush1.bf16.msra.mxu1 %v19695_v48  ;;  %v19763_v47 = vld [vmem:[%s26965_s3 + $0x32c] ss:$16 sps:$4 sm:$0xff]   ;;  %v19758_v48 = vld [vmem:[%s26965_s3 + $0x128] ss:$16 sps:$4 sm:$0xff]  }
 0x1df   : > { %3608 = vmatprep.subr.bf16.mxu0 %v19700_v49  ;;  %3641 = vmatprep.subr.bf16.mxu1 %v19703_v50  ;;  %v19761_v49 = vld [vmem:[%s26965_s3 + $0x328] ss:$16 sps:$4 sm:$0xff]   ;;  %v19766_v50 = vld [vmem:[%s26965_s3 + $0x14c] ss:$16 sps:$4 sm:$0xff]  }
 0x1e2   : > { %3609 = vmatpush1.bf16.msra.mxu0 %v19698_v53  ;;  %3642 = vmatpush1.bf16.msra.mxu1 %v19701_v3  ;;  %v19767_v53 = vld [vmem:[%s26965_s3 + $0x348] ss:$16 sps:$4 sm:$0xff]   ;;  %v19772_v3 = vld [vmem:[%s26965_s3 + $0x16c] ss:$16 sps:$4 sm:$0xff]  }
 0x1e3   : > { %3660 = vmatprep.subr.bf16.mxu1 %v19706_v57  ;;  %3701 = vmatprep.subr.bf16.mxu0 %v19709_v61  ;;  %v19773_v57 = vld [vmem:[%s26965_s3 + $0x368] ss:$16 sps:$4 sm:$0xff]   ;;  %v19778_v61 = vld [vmem:[%s26965_s3 + $0x18c] ss:$16 sps:$4 sm:$0xff]  }
 0x1e5   : > { %3611 = vmatmul.mubr.bf16.vlgmr.msra.gmra.mrb[32].mxu0 %v22389_v63  ;;  %3652 = vmatmul.mubr.bf16.vlgmr.msra.gmra.mrb[40].mxu1 %v22391_v60 }
 0x1e6   : > { %3661 = vmatpush1.bf16.msra.mxu1 %v19704_v62  ;;  %3692 = vmatprep.mubr.bf16.mxu1 %v22201_v28  ;;  %v19776_v62 = vld [vmem:[%s26965_s3 + $0x188] ss:$16 sps:$4 sm:$0xff]  }
 0x1e7   : > { %3702 = vmatpush1.bf16.msra.mxu0 %v19707_v54  ;;  %16135 = vmatprep.mubr.msk.bf16.mxu0 %vm319_vm0, %v22256_v58  ;;  %v19784_v54 = vld [vmem:[%s26965_s3 + $0x1ac] ss:$16 sps:$4 sm:$0xff]  }
 0x1e8   : > { %3662 = vmatprep.subr.bf16.mxu1 %v19712_v0  ;;  %3703 = vmatprep.subr.bf16.mxu0 %v19715_v5  ;;  %v19787_v0 = vld [vmem:[%s26965_s3 + $0xaa4] ss:$16 sps:$4 sm:$0xff]   ;;  %v19785_v5 = vld [vmem:[%s26965_s3 + $0xaa0] ss:$16 sps:$4 sm:$0xff]  }
 0x1ea   : > { %3663 = vmatpush1.bf16.msra.mxu1 %v19710_v2  ;;  %v19782_v2 = vld [vmem:[%s26965_s3 + $0x1a8] ss:$16 sps:$4 sm:$0xff]  }
 0x1eb   : > { %3704 = vmatpush1.bf16.msra.mxu0 %v19713_v6  ;;  %3664 = vmatprep.subr.bf16.mxu1 %v19718_v7  ;;  %v19790_v6 = vld [vmem:[%s26965_s3 + $0x1cc] ss:$16 sps:$4 sm:$0xff]   ;;  %v19788_v7 = vld [vmem:[%s26965_s3 + $0x1c8] ss:$16 sps:$4 sm:$0xff]  }
 0x1ec   : > { %3705 = vmatprep.subr.bf16.mxu0 %v19721_v9  ;;  %v19791_v9 = vld [vmem:[%s26965_s3 + $0xac0] ss:$16 sps:$4 sm:$0xff]  }
 0x1ee   : > { %3665 = vmatpush1.bf16.msra.mxu1 %v19716_v8  ;;  %v19793_v8 = vld [vmem:[%s26965_s3 + $0xac4] ss:$16 sps:$4 sm:$0xff]  }
 0x1ef   : > { %3706 = vmatpush1.bf16.msra.mxu0 %v19719_v10  ;;  %3666 = vmatprep.subr.bf16.mxu1 %v19724_v11  ;;  %v19796_v10 = vld [vmem:[%s26965_s3 + $0x1ec] ss:$16 sps:$4 sm:$0xff]   ;;  %v19794_v11 = vld [vmem:[%s26965_s3 + $0x1e8] ss:$16 sps:$4 sm:$0xff]  }
 0x1f0   : > { %3707 = vmatprep.subr.bf16.mxu0 %v19727_v13  ;;  %v19797_v13 = vld [vmem:[%s26965_s3 + $0xae0] ss:$16 sps:$4 sm:$0xff]  }
 0x1f2   : > { %3667 = vmatpush1.bf16.msra.mxu1 %v19722_v12  ;;  %v19799_v12 = vld [vmem:[%s26965_s3 + $0xae4] ss:$16 sps:$4 sm:$0xff]  }
 0x1f3   : > { %3708 = vmatpush1.bf16.msra.mxu0 %v19725_v15  ;;  %3668 = vmatprep.subr.bf16.mxu1 %v19730_v16  ;;  %v19805_v15 = vld [vmem:[%s26965_s3 + $0xc84] ss:$16 sps:$4 sm:$0xff]  }
 0x1f4   : > { %3709 = vmatprep.subr.bf16.mxu0 %v19733_v20  ;;  %v19802_v16 = vld [vmem:[%s26965_s3 + $0xb04] ss:$16 sps:$4 sm:$0xff]   ;;  %v19800_v20 = vld [vmem:[%s26965_s3 + $0xb00] ss:$16 sps:$4 sm:$0xff]  }
 0x1f6   : > { %3669 = vmatpush1.bf16.msra.mxu1 %v19728_v17  ;;  %v19803_v17 = vld [vmem:[%s26965_s3 + $0xc80] ss:$16 sps:$4 sm:$0xff]  }
 0x1f7   : > { %3710 = vmatpush1.bf16.msra.mxu0 %v19731_v21  ;;  %3670 = vmatprep.subr.bf16.mxu1 %v19736_v23  ;;  %v19811_v21 = vld [vmem:[%s26965_s3 + $0xca4] ss:$16 sps:$4 sm:$0xff]  }
 0x1f8   : > { %3711 = vmatprep.subr.bf16.mxu0 %v19739_v26  ;;  %v19808_v23 = vld [vmem:[%s26965_s3 + $0xb24] ss:$16 sps:$4 sm:$0xff]   ;;  %v19806_v26 = vld [vmem:[%s26965_s3 + $0xb20] ss:$16 sps:$4 sm:$0xff]  }
 0x1fa   : > { %3671 = vmatpush1.bf16.msra.mxu1 %v19734_v24  ;;  %v19809_v24 = vld [vmem:[%s26965_s3 + $0xca0] ss:$16 sps:$4 sm:$0xff]  }
 0x1fb   : > { %3712 = vmatpush1.bf16.msra.mxu0 %v19737_v30  ;;  %3672 = vmatprep.subr.bf16.mxu1 %v19742_v25  ;;  %v19817_v30 = vld [vmem:[%s26965_s3 + $0xcc4] ss:$16 sps:$4 sm:$0xff]  }
 0x1fc   : > { %3713 = vmatprep.subr.bf16.mxu0 %v19745_v31  ;;  %v19814_v25 = vld [vmem:[%s26965_s3 + $0xb44] ss:$16 sps:$4 sm:$0xff]   ;;  %v19815_v31 = vld [vmem:[%s26965_s3 + $0xcc0] ss:$16 sps:$4 sm:$0xff]  }
 0x1fe   : > { %3673 = vmatpush1.bf16.msra.mxu1 %v19740_v33  ;;  %v19812_v33 = vld [vmem:[%s26965_s3 + $0xb40] ss:$16 sps:$4 sm:$0xff]  }
 0x1ff   : > { %3714 = vmatpush1.bf16.msra.mxu0 %v19743_v34  ;;  %3674 = vmatprep.subr.bf16.mxu1 %v19748_v35  ;;  %v19823_v34 = vld [vmem:[%s26965_s3 + $0xce4] ss:$16 sps:$4 sm:$0xff]  }
 0x200   : > { %3715 = vmatprep.subr.bf16.mxu0 %v19751_v37  ;;  %v19820_v35 = vld [vmem:[%s26965_s3 + $0xb64] ss:$16 sps:$4 sm:$0xff]   ;;  %v19818_v37 = vld [vmem:[%s26965_s3 + $0xb60] ss:$16 sps:$4 sm:$0xff]  }
 0x202   : > { %3675 = vmatpush1.bf16.msra.mxu1 %v19746_v36  ;;  %v19821_v36 = vld [vmem:[%s26965_s3 + $0xce0] ss:$16 sps:$4 sm:$0xff]  }
 0x203   : > { %3716 = vmatpush1.bf16.msra.mxu0 %v19749_v41  ;;  %3676 = vmatprep.subr.bf16.mxu1 %v19754_v42  ;;  %v19829_v41 = vld [vmem:[%s26965_s3 + $0xd04] ss:$16 sps:$4 sm:$0xff]  }
 0x204   : > { %3717 = vmatprep.subr.bf16.mxu0 %v19757_v44  ;;  %v19826_v42 = vld [vmem:[%s26965_s3 + $0xb84] ss:$16 sps:$4 sm:$0xff]   ;;  %v19824_v44 = vld [vmem:[%s26965_s3 + $0xb80] ss:$16 sps:$4 sm:$0xff]  }
 0x206   : > { %3677 = vmatpush1.bf16.msra.mxu1 %v19752_v43  ;;  %v19827_v43 = vld [vmem:[%s26965_s3 + $0xd00] ss:$16 sps:$4 sm:$0xff]  }
 0x207   : > { %3718 = vmatpush1.bf16.msra.mxu0 %v19755_v45  ;;  %3678 = vmatprep.subr.bf16.mxu1 %v19760_v46  ;;  %v19835_v45 = vld [vmem:[%s26965_s3 + $0xd24] ss:$16 sps:$4 sm:$0xff]  }
 0x208   : > { %3719 = vmatprep.subr.bf16.mxu0 %v19763_v47  ;;  %v19832_v46 = vld [vmem:[%s26965_s3 + $0xba4] ss:$16 sps:$4 sm:$0xff]   ;;  %v19833_v47 = vld [vmem:[%s26965_s3 + $0xd20] ss:$16 sps:$4 sm:$0xff]  }
 0x20a   : > { %3679 = vmatpush1.bf16.msra.mxu1 %v19758_v48  ;;  %v19830_v48 = vld [vmem:[%s26965_s3 + $0xba0] ss:$16 sps:$4 sm:$0xff]  }
 0x20b   : > { %3720 = vmatpush1.bf16.msra.mxu0 %v19761_v49  ;;  %3680 = vmatprep.subr.bf16.mxu1 %v19766_v50  ;;  %v19841_v49 = vld [vmem:[%s26965_s3 + $0xd44] ss:$16 sps:$4 sm:$0xff]  }
 0x20c   : > { %3721 = vmatprep.subr.bf16.mxu0 %v19769_v51  ;;  %v19838_v50 = vld [vmem:[%s26965_s3 + $0xbc4] ss:$16 sps:$4 sm:$0xff]   ;;  %v19836_v51 = vld [vmem:[%s26965_s3 + $0xbc0] ss:$16 sps:$4 sm:$0xff]  }
 0x20e   : > { %3681 = vmatpush1.bf16.msra.mxu1 %v19764_v52  ;;  %v19839_v52 = vld [vmem:[%s26965_s3 + $0xd40] ss:$16 sps:$4 sm:$0xff]  }
 0x20f   : > { %3722 = vmatpush1.bf16.msra.mxu0 %v19767_v53  ;;  %3682 = vmatprep.subr.bf16.mxu1 %v19772_v3  ;;  %v19844_v53 = vld [vmem:[%s26965_s3 + $0xbe4] ss:$16 sps:$4 sm:$0xff]  }
 0x210   : > { %3723 = vmatprep.subr.bf16.mxu0 %v19775_v56  ;;  %v19847_v3 = vld [vmem:[%s26965_s3 + $0xd64] ss:$16 sps:$4 sm:$0xff]   ;;  %v19845_v56 = vld [vmem:[%s26965_s3 + $0xd60] ss:$16 sps:$4 sm:$0xff]  }
 0x212   : > { %3683 = vmatpush1.bf16.msra.mxu1 %v19770_v55  ;;  %v19842_v55 = vld [vmem:[%s26965_s3 + $0xbe0] ss:$16 sps:$4 sm:$0xff]  }
 0x213   : > { %3724 = vmatpush1.bf16.msra.mxu0 %v19773_v57  ;;  %3684 = vmatprep.subr.bf16.mxu1 %v19778_v61  ;;  %v19850_v57 = vld [vmem:[%s26965_s3 + $0xc04] ss:$16 sps:$4 sm:$0xff]  }
 0x214   : > { %4664 = vmatprep.subr.bf16.mxu0 %v19781_v14  ;;  %v19853_v61 = vld [vmem:[%s26965_s3 + $0xd84] ss:$16 sps:$4 sm:$0xff]   ;;  %v19851_v14 = vld [vmem:[%s26965_s3 + $0xd80] ss:$16 sps:$4 sm:$0xff]  }
 0x216   : > { %3734 = vmatmul.mubr.bf16.vlgmr.msra.gmra.mrb[36].mxu0 %v22391_v60  ;;  %3685 = vmatpush1.bf16.msra.mxu1 %v19776_v62  ;;  %v19848_v62 = vld [vmem:[%s26965_s3 + $0xc00] ss:$16 sps:$4 sm:$0xff]  }
 0x217   : > { %4665 = vmatpush1.bf16.msra.mxu0 %v19779_v59  ;;  %4696 = vmatprep.mubr.bf16.mxu0 %v22025_v18  ;;  %v19856_v59 = vld [vmem:[%s26965_s3 + $0xc24] ss:$16 sps:$4 sm:$0xff]  }
 0x218   : > { %3686 = vmatprep.subr.bf16.mxu1 %v19784_v54  ;;  %4666 = vmatprep.subr.bf16.mxu0 %v19787_v0  ;;  %v19859_v54 = vld [vmem:[%s26965_s3 + $0xda4] ss:$16 sps:$4 sm:$0xff]   ;;  %v19854_v0 = vld [vmem:[%s26965_s3 + $0xc20] ss:$16 sps:$4 sm:$0xff]  }
 0x21a   : > { %3687 = vmatpush1.bf16.msra.mxu1 %v19782_v2  ;;  %v19857_v2 = vld [vmem:[%s26965_s3 + $0xda0] ss:$16 sps:$4 sm:$0xff]  }
 0x21b   : > { %4667 = vmatpush1.bf16.msra.mxu0 %v19785_v5  ;;  %3688 = vmatprep.subr.bf16.mxu1 %v19790_v6  ;;  %v19865_v5 = vld [vmem:[%s26965_s3 + $0xdc4] ss:$16 sps:$4 sm:$0xff]  }
 0x21c   : > { %4668 = vmatprep.subr.bf16.mxu0 %v19793_v8  ;;  %v19862_v8 = vld [vmem:[%s26965_s3 + $0xc44] ss:$16 sps:$4 sm:$0xff]  }
 0x21e   : > { %3689 = vmatpush1.bf16.msra.mxu1 %v19788_v7 }
 0x21f   : > { %4669 = vmatpush1.bf16.msra.mxu0 %v19791_v9  ;;  %3690 = vmatprep.subr.bf16.mxu1 %v19796_v10 }
 0x220   : > { %4670 = vmatprep.subr.bf16.mxu0 %v19799_v12  ;;  %v19863_v12 = vld [vmem:[%s26965_s3 + $0xdc0] ss:$16 sps:$4 sm:$0xff]  }
 0x222   : > { %3691 = vmatpush1.bf16.msra.mxu1 %v19794_v11 }
 0x223   : > { %4671 = vmatpush1.bf16.msra.mxu0 %v19797_v13  ;;  %4705 = vmatprep.subr.bf16.mxu1 %v19805_v15 }
 0x224   : > { %4672 = vmatprep.subr.bf16.mxu0 %v19802_v16 }
 0x225   : > { %3693 = vmatmul.mubr.bf16.vlgmr.msra.gmra.mrb[44].mxu1 %v22389_v63 }
 0x226   : > { %4706 = vmatpush1.bf16.msra.mxu1 %v19803_v17  ;;  %16472 = vmatprep.mubr.msk.bf16.mxu1 %vm319_vm0, %v22027_v19 }
 0x227   : > { %4673 = vmatpush1.bf16.msra.mxu0 %v19800_v20  ;;  %4707 = vmatprep.subr.bf16.mxu1 %v19811_v21  ;;  %v19860_v21 = vld [vmem:[%s26965_s3 + $0xc40] ss:$16 sps:$4 sm:$0xff]  }
 0x228   : > { %4674 = vmatprep.subr.bf16.mxu0 %v19808_v23  ;;  %v19871_v23 = vld [vmem:[%s26965_s3 + $0xde4] ss:$16 sps:$4 sm:$0xff]  }
 0x22a   : > { %4708 = vmatpush1.bf16.msra.mxu1 %v19809_v24  ;;  %v19868_v24 = vld [vmem:[%s26965_s3 + $0xc64] ss:$16 sps:$4 sm:$0xff]  }
 0x22b   : > { %4675 = vmatpush1.bf16.msra.mxu0 %v19806_v26  ;;  %4709 = vmatprep.subr.bf16.mxu1 %v19817_v30  ;;  %v19869_v26 = vld [vmem:[%s26965_s3 + $0xde0] ss:$16 sps:$4 sm:$0xff]  }
 0x22c   : > { %4676 = vmatprep.subr.bf16.mxu0 %v19814_v25  ;;  %v19866_v30 = vld [vmem:[%s26965_s3 + $0xc60] ss:$16 sps:$4 sm:$0xff]   ;;  %v19874_v25 = vld [vmem:[%s26965_s3 + $0xa8c] ss:$16 sps:$4 sm:$0xff]  }
 0x22e   : > { %4710 = vmatpush1.bf16.msra.mxu1 %v19815_v31  ;;  %v19877_v31 = vld [vmem:[%s26965_s3 + $0xc8c] ss:$16 sps:$4 sm:$0xff]  }
 0x22f   : > { %4677 = vmatpush1.bf16.msra.mxu0 %v19812_v33  ;;  %4711 = vmatprep.subr.bf16.mxu1 %v19823_v34  ;;  %v19872_v33 = vld [vmem:[%s26965_s3 + $0xa88] ss:$16 sps:$4 sm:$0xff]  }
 0x230   : > { %4678 = vmatprep.subr.bf16.mxu0 %v19820_v35  ;;  %v19875_v34 = vld [vmem:[%s26965_s3 + $0xc88] ss:$16 sps:$4 sm:$0xff]   ;;  %v19880_v35 = vld [vmem:[%s26965_s3 + $0xaac] ss:$16 sps:$4 sm:$0xff]  }
 0x232   : > { %4712 = vmatpush1.bf16.msra.mxu1 %v19821_v36  ;;  %v19878_v36 = vld [vmem:[%s26965_s3 + $0xaa8] ss:$16 sps:$4 sm:$0xff]  }
 0x233   : > { %4679 = vmatpush1.bf16.msra.mxu0 %v19818_v37  ;;  %4713 = vmatprep.subr.bf16.mxu1 %v19829_v41  ;;  %v19883_v37 = vld [vmem:[%s26965_s3 + $0xcac] ss:$16 sps:$4 sm:$0xff]   ;;  %v19881_v41 = vld [vmem:[%s26965_s3 + $0xca8] ss:$16 sps:$4 sm:$0xff]  }
 0x234   : > { %4680 = vmatprep.subr.bf16.mxu0 %v19826_v42  ;;  %v19886_v42 = vld [vmem:[%s26965_s3 + $0xacc] ss:$16 sps:$4 sm:$0xff]  }
 0x236   : > { %4714 = vmatpush1.bf16.msra.mxu1 %v19827_v43  ;;  %v19884_v43 = vld [vmem:[%s26965_s3 + $0xac8] ss:$16 sps:$4 sm:$0xff]  }
 0x237   : > { %4681 = vmatpush1.bf16.msra.mxu0 %v19824_v44  ;;  %4715 = vmatprep.subr.bf16.mxu1 %v19835_v45  ;;  %v19887_v44 = vld [vmem:[%s26965_s3 + $0xcc8] ss:$16 sps:$4 sm:$0xff]  }
 0x238   : > { %4682 = vmatprep.subr.bf16.mxu0 %v19832_v46  ;;  %v19890_v45 = vld [vmem:[%s26965_s3 + $0xae8] ss:$16 sps:$4 sm:$0xff]   ;;  %v19895_v46 = vld [vmem:[%s26965_s3 + $0xcec] ss:$16 sps:$4 sm:$0xff]  }
 0x23a   : > { %4716 = vmatpush1.bf16.msra.mxu1 %v19833_v47  ;;  %v19893_v47 = vld [vmem:[%s26965_s3 + $0xce8] ss:$16 sps:$4 sm:$0xff]  }
 0x23b   : > { %4683 = vmatpush1.bf16.msra.mxu0 %v19830_v48  ;;  %4717 = vmatprep.subr.bf16.mxu1 %v19841_v49  ;;  %v19898_v48 = vld [vmem:[%s26965_s3 + $0xb0c] ss:$16 sps:$4 sm:$0xff]   ;;  %v19896_v49 = vld [vmem:[%s26965_s3 + $0xb08] ss:$16 sps:$4 sm:$0xff]  }
 0x23c   : > { %4684 = vmatprep.subr.bf16.mxu0 %v19838_v50  ;;  %v19901_v50 = vld [vmem:[%s26965_s3 + $0xd0c] ss:$16 sps:$4 sm:$0xff]  }
 0x23e   : > { %4718 = vmatpush1.bf16.msra.mxu1 %v19839_v52  ;;  %v19904_v52 = vld [vmem:[%s26965_s3 + $0xb2c] ss:$16 sps:$4 sm:$0xff]  }
 0x23f   : > { %4685 = vmatpush1.bf16.msra.mxu0 %v19836_v51  ;;  %4719 = vmatprep.subr.bf16.mxu1 %v19847_v3  ;;  %v19899_v51 = vld [vmem:[%s26965_s3 + $0xd08] ss:$16 sps:$4 sm:$0xff]   ;;  %v19907_v3 = vld [vmem:[%s26965_s3 + $0xd2c] ss:$16 sps:$4 sm:$0xff]  }
 0x240   : > { %4686 = vmatprep.subr.bf16.mxu0 %v19844_v53  ;;  %v19902_v53 = vld [vmem:[%s26965_s3 + $0xb28] ss:$16 sps:$4 sm:$0xff]  }
 0x242   : > { %4720 = vmatpush1.bf16.msra.mxu1 %v19845_v56  ;;  %v19910_v56 = vld [vmem:[%s26965_s3 + $0xb4c] ss:$16 sps:$4 sm:$0xff]  }
 0x243   : > { %4687 = vmatpush1.bf16.msra.mxu0 %v19842_v55  ;;  %4721 = vmatprep.subr.bf16.mxu1 %v19853_v61  ;;  %v19905_v55 = vld [vmem:[%s26965_s3 + $0xd28] ss:$16 sps:$4 sm:$0xff]  }
 0x244   : > { %4688 = vmatprep.subr.bf16.mxu0 %v19850_v57  ;;  %v19913_v57 = vld [vmem:[%s26965_s3 + $0xd4c] ss:$16 sps:$4 sm:$0xff]   ;;  %v19908_v61 = vld [vmem:[%s26965_s3 + $0xb48] ss:$16 sps:$4 sm:$0xff]  }
 0x246   : > { %4722 = vmatpush1.bf16.msra.mxu1 %v19851_v14  ;;  %v19916_v14 = vld [vmem:[%s26965_s3 + $0xb6c] ss:$16 sps:$4 sm:$0xff]  }
 0x247   : > { %4689 = vmatpush1.bf16.msra.mxu0 %v19848_v62  ;;  %4723 = vmatprep.subr.bf16.mxu1 %v19859_v54  ;;  %v19911_v62 = vld [vmem:[%s26965_s3 + $0xd48] ss:$16 sps:$4 sm:$0xff]  }
 0x248   : > { %v2854_v6 = vpop.f32.mrb[24].mxu0  ;;  %v2895_v7 = vpop.f32.mrb[32].mxu1  ;;  %4690 = vmatprep.subr.bf16.mxu0 %v19856_v59  ;;  %v19919_v59 = vld [vmem:[%s26965_s3 + $0xd6c] ss:$16 sps:$4 sm:$0xff]   ;;  %v19914_v54 = vld [vmem:[%s26965_s3 + $0xb68] ss:$16 sps:$4 sm:$0xff]  }
 0x249   : > { %v22712_v9 = vadd.f32 %v2895_v7, %v2854_v6  ;;  %v2856_v10 = vpop.f32.mrb[25].mxu0  ;;  %v2897_v11 = vpop.f32.mrb[33].mxu1  ;;  %v19925_v6 = vld [vmem:[%s26965_s3 + $0xd8c] ss:$16 sps:$4 sm:$0xff]   ;;  %v19923_v7 = vld [vmem:[%s26965_s3 + $0xd88] ss:$16 sps:$4 sm:$0xff]  }
 0x24a   : > { %v22717_v13 = vadd.f32 %v2897_v11, %v2856_v10  ;;  %4724 = vmatpush1.bf16.msra.mxu1 %v19857_v2  ;;  %v2858_v15 = vpop.f32.mrb[26].mxu0  ;;  %v2899_v16 = vpop.f32.mrb[34].mxu1  ;;  %v19922_v2 = vld [vmem:[%s26965_s3 + $0xb8c] ss:$16 sps:$4 sm:$0xff]   ;;  %v19926_v11 = vld [vmem:[%s26965_s3 + $0xba8] ss:$16 sps:$4 sm:$0xff]  }
 0x24b   : > { %4691 = vmatpush1.bf16.msra.mxu0 %v19854_v0  ;;  %v2859_v17 = vpop.f32.mrb[27].mxu0  ;;  %v2900_v20 = vpop.f32.mrb[35].mxu1  ;;  %4725 = vmatprep.subr.bf16.mxu1 %v19865_v5  ;;  %v19917_v0 = vld [vmem:[%s26965_s3 + $0xd68] ss:$16 sps:$4 sm:$0xff]   ;;  %v19931_v10 = vld [vmem:[%s26965_s3 + $0xdac] ss:$16 sps:$4 sm:$0xff]  }
 0x24c   : > { %4692 = vmatprep.subr.bf16.mxu0 %v19862_v8  ;;  %v19920_v5 = vld [vmem:[%s26965_s3 + $0xb88] ss:$16 sps:$4 sm:$0xff]   ;;  %v19928_v8 = vld [vmem:[%s26965_s3 + $0xbac] ss:$16 sps:$4 sm:$0xff]  }
 0x24d   : > { %v19934_v15 = vld [vmem:[%s26965_s3 + $0xbcc] ss:$16 sps:$4 sm:$0xff]   ;;  %v19932_v20 = vld [vmem:[%s26965_s3 + $0xbc8] ss:$16 sps:$4 sm:$0xff]  }
 0x24e   : > { %4726 = vmatpush1.bf16.msra.mxu1 %v19863_v12  ;;  %v19929_v12 = vld [vmem:[%s26965_s3 + $0xda8] ss:$16 sps:$4 sm:$0xff]   ;;  %v19937_v16 = vld [vmem:[%s26965_s3 + $0xdcc] ss:$16 sps:$4 sm:$0xff]  }
 0x24f   : > { %4693 = vmatpush1.bf16.msra.mxu0 %v19860_v21  ;;  %4727 = vmatprep.subr.bf16.mxu1 %v19871_v23  ;;  %v19935_v23 = vld [vmem:[%s26965_s3 + $0xdc8] ss:$16 sps:$4 sm:$0xff]  }
 0x250   : > { %4694 = vmatprep.subr.bf16.mxu0 %v19868_v24  ;;  %v19940_v24 = vld [vmem:[%s26965_s3 + $0xbec] ss:$16 sps:$4 sm:$0xff]  }
 0x252   : > { %4728 = vmatpush1.bf16.msra.mxu1 %v19869_v26 }
 0x253   : > { %4695 = vmatpush1.bf16.msra.mxu0 %v19866_v30  ;;  %4746 = vmatprep.subr.bf16.mxu1 %v19874_v25  ;;  %v19943_v30 = vld [vmem:[%s26965_s3 + $0xdec] ss:$16 sps:$4 sm:$0xff]  }
 0x254   : > { %4787 = vmatprep.subr.bf16.mxu0 %v19877_v31  ;;  %v19938_v31 = vld [vmem:[%s26965_s3 + $0xbe8] ss:$16 sps:$4 sm:$0xff]  }
 0x255   : > { %4738 = vmatmul.mubr.bf16.vlgmr.msra.gmra.mrb[48].mxu1 %v22037_v40 }
 0x256   : > { %4697 = vmatmul.mubr.bf16.vlgmr.msra.gmra.mrb[40].mxu0 %v22035_v22  ;;  %4747 = vmatpush1.bf16.msra.mxu1 %v19872_v33  ;;  %v19941_v33 = vld [vmem:[%s26965_s3 + $0xde8] ss:$16 sps:$4 sm:$0xff]  }
 0x257   : > { %4778 = vmatprep.mubr.bf16.mxu1 %v22025_v18  ;;  %4788 = vmatpush1.bf16.msra.mxu0 %v19875_v34  ;;  %v19889_v18 = vld [vmem:[%s26965_s3 + $0xccc] ss:$16 sps:$4 sm:$0xff]  }
 0x258   : > { %16473 = vmatprep.mubr.msk.bf16.mxu0 %vm319_vm0, %v22027_v19  ;;  %4748 = vmatprep.subr.bf16.mxu1 %v19880_v35  ;;  %v19892_v19 = vld [vmem:[%s26965_s3 + $0xaec] ss:$16 sps:$4 sm:$0xff]   ;;  %v19949_v35 = vld [vmem:[%s26965_s3 + $0x704] ss:$16 sps:$4 sm:$0xff]  }
 0x259   : > { %4789 = vmatprep.subr.bf16.mxu0 %v19883_v37  ;;  %v19946_v34 = vld [vmem:[%s26965_s3 + $0xc0c] ss:$16 sps:$4 sm:$0xff]   ;;  %v19947_v37 = vld [vmem:[%s26965_s3 + $0x700] ss:$16 sps:$4 sm:$0xff]  }
 0x25a   : > { %4749 = vmatpush1.bf16.msra.mxu1 %v19878_v36  ;;  %v19944_v36 = vld [vmem:[%s26965_s3 + $0xc08] ss:$16 sps:$4 sm:$0xff]  }
 0x25b   : > { %4790 = vmatpush1.bf16.msra.mxu0 %v19881_v41  ;;  %4750 = vmatprep.subr.bf16.mxu1 %v19886_v42  ;;  %v19952_v41 = vld [vmem:[%s26965_s3 + $0xc2c] ss:$16 sps:$4 sm:$0xff]   ;;  %v19955_v42 = vld [vmem:[%s26965_s3 + $0x724] ss:$16 sps:$4 sm:$0xff]  }
 0x25c   : > { %4791 = vmatprep.subr.bf16.mxu0 %v19889_v18  ;;  %v19953_v18 = vld [vmem:[%s26965_s3 + $0x720] ss:$16 sps:$4 sm:$0xff]  }
 0x25e   : > { %4751 = vmatpush1.bf16.msra.mxu1 %v19884_v43  ;;  %v19950_v43 = vld [vmem:[%s26965_s3 + $0xc28] ss:$16 sps:$4 sm:$0xff]  }
 0x25f   : > { %4792 = vmatpush1.bf16.msra.mxu0 %v19887_v44  ;;  %4752 = vmatprep.subr.bf16.mxu1 %v19892_v19  ;;  %v19958_v44 = vld [vmem:[%s26965_s3 + $0xc4c] ss:$16 sps:$4 sm:$0xff]   ;;  %v19961_v19 = vld [vmem:[%s26965_s3 + $0x744] ss:$16 sps:$4 sm:$0xff]  }
 0x260   : > { %4793 = vmatprep.subr.bf16.mxu0 %v19895_v46  ;;  %v19956_v46 = vld [vmem:[%s26965_s3 + $0xc48] ss:$16 sps:$4 sm:$0xff]  }
 0x262   : > { %4753 = vmatpush1.bf16.msra.mxu1 %v19890_v45 }
 0x263   : > { %4794 = vmatpush1.bf16.msra.mxu0 %v19893_v47  ;;  %4754 = vmatprep.subr.bf16.mxu1 %v19898_v48 }
 0x264   : > { %4795 = vmatprep.subr.bf16.mxu0 %v19901_v50 }
 0x266   : > { %4755 = vmatpush1.bf16.msra.mxu1 %v19896_v49  ;;  %v19964_v49 = vld [vmem:[%s26965_s3 + $0xc6c] ss:$16 sps:$4 sm:$0xff]  }
 0x267   : > { %4796 = vmatpush1.bf16.msra.mxu0 %v19899_v51  ;;  %4756 = vmatprep.subr.bf16.mxu1 %v19904_v52  ;;  %v19967_v52 = vld [vmem:[%s26965_s3 + $0x764] ss:$16 sps:$4 sm:$0xff]  }
 0x268   : > { %4797 = vmatprep.subr.bf16.mxu0 %v19907_v3  ;;  %v19962_v3 = vld [vmem:[%s26965_s3 + $0xc68] ss:$16 sps:$4 sm:$0xff]  }
 0x26a   : > { %4757 = vmatpush1.bf16.msra.mxu1 %v19902_v53 }
 0x26b   : > { %4798 = vmatpush1.bf16.msra.mxu0 %v19905_v55  ;;  %4758 = vmatprep.subr.bf16.mxu1 %v19910_v56  ;;  %v19965_v55 = vld [vmem:[%s26965_s3 + $0x760] ss:$16 sps:$4 sm:$0xff]   ;;  %v19973_v56 = vld [vmem:[%s26965_s3 + $0x904] ss:$16 sps:$4 sm:$0xff]  }
 0x26c   : > { %4799 = vmatprep.subr.bf16.mxu0 %v19913_v57  ;;  %v19970_v57 = vld [vmem:[%s26965_s3 + $0x784] ss:$16 sps:$4 sm:$0xff]  }
 0x26e   : > { %4759 = vmatpush1.bf16.msra.mxu1 %v19908_v61  ;;  %v19971_v61 = vld [vmem:[%s26965_s3 + $0x900] ss:$16 sps:$4 sm:$0xff]  }
 0x26f   : > { %4800 = vmatpush1.bf16.msra.mxu0 %v19911_v62  ;;  %4760 = vmatprep.subr.bf16.mxu1 %v19916_v14  ;;  %v19968_v62 = vld [vmem:[%s26965_s3 + $0x780] ss:$16 sps:$4 sm:$0xff]   ;;  %v19979_v14 = vld [vmem:[%s26965_s3 + $0x924] ss:$16 sps:$4 sm:$0xff]  }
 0x270   : > { %4801 = vmatprep.subr.bf16.mxu0 %v19919_v59  ;;  %v19976_v59 = vld [vmem:[%s26965_s3 + $0x7a4] ss:$16 sps:$4 sm:$0xff]  }
 0x272   : > { %4761 = vmatpush1.bf16.msra.mxu1 %v19914_v54  ;;  %v19977_v54 = vld [vmem:[%s26965_s3 + $0x920] ss:$16 sps:$4 sm:$0xff]  }
 0x273   : > { %4802 = vmatpush1.bf16.msra.mxu0 %v19917_v0  ;;  %4762 = vmatprep.subr.bf16.mxu1 %v19922_v2  ;;  %v19974_v0 = vld [vmem:[%s26965_s3 + $0x7a0] ss:$16 sps:$4 sm:$0xff]   ;;  %v19985_v2 = vld [vmem:[%s26965_s3 + $0x944] ss:$16 sps:$4 sm:$0xff]  }
 0x274   : > { %4803 = vmatprep.subr.bf16.mxu0 %v19925_v6  ;;  %v19980_v6 = vld [vmem:[%s26965_s3 + $0x7c0] ss:$16 sps:$4 sm:$0xff]  }
 0x276   : > { %4763 = vmatpush1.bf16.msra.mxu1 %v19920_v5  ;;  %v19982_v5 = vld [vmem:[%s26965_s3 + $0x7c4] ss:$16 sps:$4 sm:$0xff]  }
 0x277   : > { %4804 = vmatpush1.bf16.msra.mxu0 %v19923_v7  ;;  %4764 = vmatprep.subr.bf16.mxu1 %v19928_v8  ;;  %v19991_v7 = vld [vmem:[%s26965_s3 + $0x964] ss:$16 sps:$4 sm:$0xff]  }
 0x278   : > { %v2977_v17 = vpop.f32.mrb[28].mxu0  ;;  %4805 = vmatprep.subr.bf16.mxu0 %v19931_v10  ;;  %v19988_v8 = vld [vmem:[%s26965_s3 + $0x7e4] ss:$16 sps:$4 sm:$0xff]   ;;  %v19989_v10 = vld [vmem:[%s26965_s3 + $0x960] ss:$16 sps:$4 sm:$0xff]  }
 0x279   : > { %v2979_v21 = vpop.f32.mrb[29].mxu0 }
 0x27a   : > { %v2981_v26 = vpop.f32.mrb[30].mxu0  ;;  %4765 = vmatpush1.bf16.msra.mxu1 %v19926_v11  ;;  %v19986_v11 = vld [vmem:[%s26965_s3 + $0x7e0] ss:$16 sps:$4 sm:$0xff]  }
 0x27b   : > { %4806 = vmatpush1.bf16.msra.mxu0 %v19929_v12  ;;  %v2982_v25 = vpop.f32.mrb[31].mxu0  ;;  %4766 = vmatprep.subr.bf16.mxu1 %v19934_v15  ;;  %v19997_v12 = vld [vmem:[%s26965_s3 + $0x984] ss:$16 sps:$4 sm:$0xff]  }
 0x27c   : > { %4807 = vmatprep.subr.bf16.mxu0 %v19937_v16  ;;  %v19994_v15 = vld [vmem:[%s26965_s3 + $0x804] ss:$16 sps:$4 sm:$0xff]   ;;  %v19995_v16 = vld [vmem:[%s26965_s3 + $0x980] ss:$16 sps:$4 sm:$0xff]  }
 0x27d   : > { %v20009_v26 = vld [vmem:[%s26965_s3 + $0x9c4] ss:$16 sps:$4 sm:$0xff]   ;;  %v20007_v25 = vld [vmem:[%s26965_s3 + $0x9c0] ss:$16 sps:$4 sm:$0xff]  }
 0x27e   : > { %4767 = vmatpush1.bf16.msra.mxu1 %v19932_v20  ;;  %v20003_v20 = vld [vmem:[%s26965_s3 + $0x9a4] ss:$16 sps:$4 sm:$0xff]  }
 0x27f   : > { %4808 = vmatpush1.bf16.msra.mxu0 %v19935_v23  ;;  %4768 = vmatprep.subr.bf16.mxu1 %v19940_v24  ;;  %v20001_v23 = vld [vmem:[%s26965_s3 + $0x9a0] ss:$16 sps:$4 sm:$0xff]  }
 0x280   : > { %4809 = vmatprep.subr.bf16.mxu0 %v19943_v30  ;;  %v19998_v24 = vld [vmem:[%s26965_s3 + $0x820] ss:$16 sps:$4 sm:$0xff]   ;;  %v20006_v30 = vld [vmem:[%s26965_s3 + $0x844] ss:$16 sps:$4 sm:$0xff]  }
 0x282   : > { %4769 = vmatpush1.bf16.msra.mxu1 %v19938_v31  ;;  %v20004_v31 = vld [vmem:[%s26965_s3 + $0x840] ss:$16 sps:$4 sm:$0xff]  }
 0x283   : > { %4810 = vmatpush1.bf16.msra.mxu0 %v19941_v33  ;;  %4770 = vmatprep.subr.bf16.mxu1 %v19946_v34  ;;  %v20015_v33 = vld [vmem:[%s26965_s3 + $0x9e4] ss:$16 sps:$4 sm:$0xff]  }
 0x284   : > { %5388 = vmatprep.subr.bf16.mxu0 %v19949_v35  ;;  %v20012_v34 = vld [vmem:[%s26965_s3 + $0x864] ss:$16 sps:$4 sm:$0xff]   ;;  %v20013_v35 = vld [vmem:[%s26965_s3 + $0x9e0] ss:$16 sps:$4 sm:$0xff]  }
 0x286   : > { %4820 = vmatmul.mubr.bf16.vlgmr.msra.gmra.mrb[44].mxu0 %v22037_v40  ;;  %4771 = vmatpush1.bf16.msra.mxu1 %v19944_v36  ;;  %v19959_v40 = vld [vmem:[%s26965_s3 + $0x740] ss:$16 sps:$4 sm:$0xff]  }
 0x287   : > { %5389 = vmatpush1.bf16.msra.mxu0 %v19947_v37  ;;  %5420 = vmatprep.mubr.bf16.mxu0 %v22201_v28  ;;  %v20010_v36 = vld [vmem:[%s26965_s3 + $0x860] ss:$16 sps:$4 sm:$0xff]   ;;  %v20021_v37 = vld [vmem:[%s26965_s3 + $0xa04] ss:$16 sps:$4 sm:$0xff]  }
 0x288   : > { %v2936_v45 = vpop.f32.mrb[36].mxu1  ;;  %4772 = vmatprep.subr.bf16.mxu1 %v19952_v41  ;;  %5390 = vmatprep.subr.bf16.mxu0 %v19955_v42  ;;  %v20018_v41 = vld [vmem:[%s26965_s3 + $0x884] ss:$16 sps:$4 sm:$0xff]   ;;  %v20019_v42 = vld [vmem:[%s26965_s3 + $0xa00] ss:$16 sps:$4 sm:$0xff]  }
 0x289   : > { %v22918_v47 = vadd.f32 %v2977_v17, %v2936_v45  ;;  %v2938_v48 = vpop.f32.mrb[37].mxu1  ;;  %v19992_v17 = vld [vmem:[%s26965_s3 + $0x800] ss:$16 sps:$4 sm:$0xff]  }
 0x28a   : > { %v22926_v50 = vadd.f32 %v2979_v21, %v2938_v48  ;;  %v2940_v51 = vpop.f32.mrb[38].mxu1  ;;  %4773 = vmatpush1.bf16.msra.mxu1 %v19950_v43  ;;  %v20000_v21 = vld [vmem:[%s26965_s3 + $0x824] ss:$16 sps:$4 sm:$0xff]   ;;  %v20016_v43 = vld [vmem:[%s26965_s3 + $0x880] ss:$16 sps:$4 sm:$0xff]  }
 0x28b   : > { %5391 = vmatpush1.bf16.msra.mxu0 %v19953_v18  ;;  %v2941_v53 = vpop.f32.mrb[39].mxu1  ;;  %4774 = vmatprep.subr.bf16.mxu1 %v19958_v44  ;;  %v20027_v18 = vld [vmem:[%s26965_s3 + $0xa24] ss:$16 sps:$4 sm:$0xff]   ;;  %v20025_v45 = vld [vmem:[%s26965_s3 + $0xa20] ss:$16 sps:$4 sm:$0xff]  }
 0x28c   : > { %5392 = vmatprep.subr.bf16.mxu0 %v19961_v19  ;;  %v20024_v44 = vld [vmem:[%s26965_s3 + $0x8a4] ss:$16 sps:$4 sm:$0xff]   ;;  %v23057_v19 = vld [vmem:[%s26966_s4] sm:$0xf] }
 0x28d   : > { %v20033_v48 = vld [vmem:[%s26965_s3 + $0xa44] ss:$16 sps:$4 sm:$0xff]  }
 0x28e   : > { %4775 = vmatpush1.bf16.msra.mxu1 %v19956_v46  ;;  %v20022_v46 = vld [vmem:[%s26965_s3 + $0x8a0] ss:$16 sps:$4 sm:$0xff]  }
 0x28f   : > { %5393 = vmatpush1.bf16.msra.mxu0 %v19959_v40  ;;  %4776 = vmatprep.subr.bf16.mxu1 %v19964_v49  ;;  %v20030_v40 = vld [vmem:[%s26965_s3 + $0x8c4] ss:$16 sps:$4 sm:$0xff]  }
 0x290   : > { %5394 = vmatprep.subr.bf16.mxu0 %v19967_v52  ;;  %v20031_v52 = vld [vmem:[%s26965_s3 + $0xa40] ss:$16 sps:$4 sm:$0xff]  }
 0x292   : > { %4777 = vmatpush1.bf16.msra.mxu1 %v19962_v3  ;;  %v3747_v3 = vrot.slane %v23057_v19, %v21878_v38 }
 0x293   : > { %5395 = vmatpush1.bf16.msra.mxu0 %v19965_v55  ;;  %5429 = vmatprep.subr.bf16.mxu1 %v19973_v56 }
 0x294   : > { %5396 = vmatprep.subr.bf16.mxu0 %v19970_v57  ;;  %v20028_v57 = vld [vmem:[%s26965_s3 + $0x8c0] ss:$16 sps:$4 sm:$0xff]  }
 0x295   : > { %4779 = vmatmul.mubr.bf16.vlgmr.msra.gmra.mrb[52].mxu1 %v22035_v22  ;;  %v19983_v22 = vld [vmem:[%s26965_s3 + $0x940] ss:$16 sps:$4 sm:$0xff]  }
 0x296   : > { %5430 = vmatpush1.bf16.msra.mxu1 %v19971_v61  ;;  %16586 = vmatprep.mubr.msk.bf16.mxu1 %vm319_vm0, %v22256_v58  ;;  %v20039_v61 = vld [vmem:[%s26965_s3 + $0xa64] ss:$16 sps:$4 sm:$0xff]  }
 0x297   : > { %5397 = vmatpush1.bf16.msra.mxu0 %v19968_v62  ;;  %5431 = vmatprep.subr.bf16.mxu1 %v19979_v14  ;;  %v3751_v14 = vrot.slane %v23057_v19, %v21881_v39 }
 0x298   : > { %5398 = vmatprep.subr.bf16.mxu0 %v19976_v59 }
 0x29a   : > { %5432 = vmatpush1.bf16.msra.mxu1 %v19977_v54  ;;  %v20036_v54 = vld [vmem:[%s26965_s3 + $0x8e4] ss:$16 sps:$4 sm:$0xff]  }
 0x29b   : > { %5399 = vmatpush1.bf16.msra.mxu0 %v19974_v0  ;;  %5433 = vmatprep.subr.bf16.mxu1 %v19985_v2 }
 0x29c   : > { %5400 = vmatprep.subr.bf16.mxu0 %v19982_v5 }
 0x29e   : > { %5434 = vmatpush1.bf16.msra.mxu1 %v19983_v22 }
 0x29f   : > { %5401 = vmatpush1.bf16.msra.mxu0 %v19980_v6  ;;  %5435 = vmatprep.subr.bf16.mxu1 %v19991_v7  ;;  %v20034_v7 = vld [vmem:[%s26965_s3 + $0x8e0] ss:$16 sps:$4 sm:$0xff]  }
 0x2a0   : > { %5402 = vmatprep.subr.bf16.mxu0 %v19988_v8  ;;  %v20042_v8 = vld [vmem:[%s26965_s3 + $0x70c] ss:$16 sps:$4 sm:$0xff]  }
 0x2a2   : > { %5436 = vmatpush1.bf16.msra.mxu1 %v19989_v10 }
 0x2a3   : > { %5403 = vmatpush1.bf16.msra.mxu0 %v19986_v11  ;;  %5437 = vmatprep.subr.bf16.mxu1 %v19997_v12  ;;  %v20045_v11 = vld [vmem:[%s26965_s3 + $0x90c] ss:$16 sps:$4 sm:$0xff]  }
 0x2a4   : > { %5404 = vmatprep.subr.bf16.mxu0 %v19994_v15 }
 0x2a6   : > { %5438 = vmatpush1.bf16.msra.mxu1 %v19995_v16  ;;  %v20040_v16 = vld [vmem:[%s26965_s3 + $0x708] ss:$16 sps:$4 sm:$0xff]  }
 0x2a7   : > { %5405 = vmatpush1.bf16.msra.mxu0 %v19992_v17  ;;  %5439 = vmatprep.subr.bf16.mxu1 %v20003_v20  ;;  %v20043_v17 = vld [vmem:[%s26965_s3 + $0x908] ss:$16 sps:$4 sm:$0xff]  }
 0x2a8   : > { %5406 = vmatprep.subr.bf16.mxu0 %v20000_v21 }
 0x2aa   : > { %5440 = vmatpush1.bf16.msra.mxu1 %v20001_v23  ;;  %v20048_v23 = vld [vmem:[%s26965_s3 + $0x72c] ss:$16 sps:$4 sm:$0xff]  }
 0x2ab   : > { %5407 = vmatpush1.bf16.msra.mxu0 %v19998_v24  ;;  %5441 = vmatprep.subr.bf16.mxu1 %v20009_v26  ;;  %v20051_v24 = vld [vmem:[%s26965_s3 + $0x92c] ss:$16 sps:$4 sm:$0xff]   ;;  %v20046_v26 = vld [vmem:[%s26965_s3 + $0x728] ss:$16 sps:$4 sm:$0xff]  }
 0x2ac   : > { %5408 = vmatprep.subr.bf16.mxu0 %v20006_v30  ;;  %v20049_v30 = vld [vmem:[%s26965_s3 + $0x928] ss:$16 sps:$4 sm:$0xff]  }
 0x2ae   : > { %5442 = vmatpush1.bf16.msra.mxu1 %v20007_v25  ;;  %v20054_v25 = vld [vmem:[%s26965_s3 + $0x74c] ss:$16 sps:$4 sm:$0xff]  }
 0x2af   : > { %5409 = vmatpush1.bf16.msra.mxu0 %v20004_v31  ;;  %5443 = vmatprep.subr.bf16.mxu1 %v20015_v33  ;;  %v20057_v31 = vld [vmem:[%s26965_s3 + $0x94c] ss:$16 sps:$4 sm:$0xff]   ;;  %v20052_v33 = vld [vmem:[%s26965_s3 + $0x748] ss:$16 sps:$4 sm:$0xff]  }
 0x2b0   : > { %5410 = vmatprep.subr.bf16.mxu0 %v20012_v34  ;;  %v20055_v34 = vld [vmem:[%s26965_s3 + $0x948] ss:$16 sps:$4 sm:$0xff]  }
 0x2b2   : > { %5444 = vmatpush1.bf16.msra.mxu1 %v20013_v35  ;;  %v20060_v35 = vld [vmem:[%s26965_s3 + $0x76c] ss:$16 sps:$4 sm:$0xff]  }
 0x2b3   : > { %5411 = vmatpush1.bf16.msra.mxu0 %v20010_v36  ;;  %5445 = vmatprep.subr.bf16.mxu1 %v20021_v37  ;;  %v20061_v36 = vld [vmem:[%s26965_s3 + $0x968] ss:$16 sps:$4 sm:$0xff]   ;;  %v20066_v37 = vld [vmem:[%s26965_s3 + $0x78c] ss:$16 sps:$4 sm:$0xff]  }
 0x2b4   : > { %5412 = vmatprep.subr.bf16.mxu0 %v20018_v41  ;;  %v20069_v41 = vld [vmem:[%s26965_s3 + $0x98c] ss:$16 sps:$4 sm:$0xff]  }
 0x2b6   : > { %5446 = vmatpush1.bf16.msra.mxu1 %v20019_v42  ;;  %v20064_v42 = vld [vmem:[%s26965_s3 + $0x788] ss:$16 sps:$4 sm:$0xff]  }
 0x2b7   : > { %5413 = vmatpush1.bf16.msra.mxu0 %v20016_v43  ;;  %5447 = vmatprep.subr.bf16.mxu1 %v20027_v18  ;;  %v20067_v43 = vld [vmem:[%s26965_s3 + $0x988] ss:$16 sps:$4 sm:$0xff]   ;;  %v20072_v18 = vld [vmem:[%s26965_s3 + $0x7ac] ss:$16 sps:$4 sm:$0xff]  }
 0x2b8   : > { %v3612_v49 = vpop.f32.mrb[32].mxu0  ;;  %v3653_v51 = vpop.f32.mrb[40].mxu1  ;;  %5414 = vmatprep.subr.bf16.mxu0 %v20024_v44  ;;  %v20075_v44 = vld [vmem:[%s26965_s3 + $0x9ac] ss:$16 sps:$4 sm:$0xff]  }
 0x2b9   : > { %v3613_v53 = vadd.f32 %v3612_v49, %v22712_v9  ;;  %v3614_v55 = vpop.f32.mrb[33].mxu0  ;;  %v3655_v56 = vpop.f32.mrb[41].mxu1  ;;  %v20076_v49 = vld [vmem:[%s26965_s3 + $0x7c8] ss:$16 sps:$4 sm:$0xff]  }
 0x2ba   : > { %v3615_v62 = vadd.f32 %v3614_v55, %v22717_v13  ;;  %v3616_v59 = vpop.f32.mrb[34].mxu0  ;;  %v3657_v9 = vpop.f32.mrb[42].mxu1  ;;  %5448 = vmatpush1.bf16.msra.mxu1 %v20025_v45  ;;  %v20037_v13 = vld [vmem:[%s26965_s3 + $0xa60] ss:$16 sps:$4 sm:$0xff]   ;;  %v20070_v45 = vld [vmem:[%s26965_s3 + $0x7a8] ss:$16 sps:$4 sm:$0xff]  }
 0x2bb   : > { %v3654_v0 = vadd.f32 %v3653_v51, %v3613_v53  ;;  %5415 = vmatpush1.bf16.msra.mxu0 %v20022_v46  ;;  %v3617_v2 = vpop.f32.mrb[35].mxu0  ;;  %v3658_v5 = vpop.f32.mrb[43].mxu1  ;;  %5449 = vmatprep.subr.bf16.mxu1 %v20033_v48  ;;  %v20073_v46 = vld [vmem:[%s26965_s3 + $0x9a8] ss:$16 sps:$4 sm:$0xff]   ;;  %v20078_v48 = vld [vmem:[%s26965_s3 + $0x7cc] ss:$16 sps:$4 sm:$0xff]  }
 0x2bc   : > { %v3656_v22 = vadd.f32 %v3655_v56, %v3615_v62  ;;  %5416 = vmatprep.subr.bf16.mxu0 %v20030_v40  ;;  %v20081_v40 = vld [vmem:[%s26965_s3 + $0x9cc] ss:$16 sps:$4 sm:$0xff]   ;;  %v20079_v51 = vld [vmem:[%s26965_s3 + $0x9c8] ss:$16 sps:$4 sm:$0xff]  }
 0x2bd   : > { %v3764_v6 = vadd.f32 %v3747_v3, %v3654_v0  ;;  %v20087_v53 = vld [vmem:[%s26965_s3 + $0x9ec] ss:$16 sps:$4 sm:$0xff]   ;;  %v20082_v3 = vld [vmem:[%s26965_s3 + $0x7e8] ss:$16 sps:$4 sm:$0xff]  }
 0x2be   : > { %v3765_v10 = vadd.f32 %v3751_v14, %v3656_v22  ;;  %5450 = vmatpush1.bf16.msra.mxu1 %v20031_v52  ;;  %v20084_v52 = vld [vmem:[%s26965_s3 + $0x7ec] ss:$16 sps:$4 sm:$0xff]   ;;  %v20085_v55 = vld [vmem:[%s26965_s3 + $0x9e8] ss:$16 sps:$4 sm:$0xff]  }
 0x2bf   : > { %v3768_v12 = vmax.f32 %v3764_v6, 0.0  ;;  %5417 = vmatpush1.bf16.msra.mxu0 %v20028_v57  ;;  %5451 = vmatprep.subr.bf16.mxu1 %v20039_v61  ;;  %v20090_v56 = vld [vmem:[%s26965_s3 + $0x80c] ss:$16 sps:$4 sm:$0xff]   ;;  %v20088_v61 = vld [vmem:[%s26965_s3 + $0x808] ss:$16 sps:$4 sm:$0xff]  }
 0x2c0   : > { %v3769_v15 = vmax.f32 %v3765_v10, 0.0  ;;  %5418 = vmatprep.subr.bf16.mxu0 %v20036_v54  ;;  %v20093_v57 = vld [vmem:[%s26965_s3 + $0xa0c] ss:$16 sps:$4 sm:$0xff]   ;;  %v20091_v62 = vld [vmem:[%s26965_s3 + $0xa08] ss:$16 sps:$4 sm:$0xff]  }
 0x2c1   : > { %v20096_v14 = vld [vmem:[%s26965_s3 + $0x82c] ss:$16 sps:$4 sm:$0xff]   ;;  %v20094_v9 = vld [vmem:[%s26965_s3 + $0x828] ss:$16 sps:$4 sm:$0xff]  }
 0x2c2   : > { %v23107_v20 = vcombine.low %v3768_v12, %v3769_v15  ;;  %v23109_v21 = vcombine.high %v3768_v12, %v3769_v15  ;;  %5452 = vmatpush1.bf16.msra.mxu1 %v20037_v13  ;;  %v20099_v59 = vld [vmem:[%s26965_s3 + $0xa2c] ss:$16 sps:$4 sm:$0xff]   ;;  %v20097_v54 = vld [vmem:[%s26965_s3 + $0xa28] ss:$16 sps:$4 sm:$0xff]  }
 0x2c3   : > { %5419 = vmatpush1.bf16.msra.mxu0 %v20034_v7  ;;  %5470 = vmatprep.subr.bf16.mxu1 %v20042_v8  ;;  %v20102_v0 = vld [vmem:[%s26965_s3 + $0x84c] ss:$16 sps:$4 sm:$0xff]   ;;  %v20100_v5 = vld [vmem:[%s26965_s3 + $0x848] ss:$16 sps:$4 sm:$0xff]  }
 0x2c4   : > { %5511 = vmatprep.subr.bf16.mxu0 %v20045_v11  ;;  %v20105_v2 = vld [vmem:[%s26965_s3 + $0xa4c] ss:$16 sps:$4 sm:$0xff]   ;;  %v20103_v13 = vld [vmem:[%s26965_s3 + $0xa48] ss:$16 sps:$4 sm:$0xff]  }
 0x2c5   : > { %5462 = vmatmul.mubr.bf16.vlgmr.msra.gmra.mrb[56].mxu1 %v22391_v60  ;;  %v20108_v6 = vld [vmem:[%s26965_s3 + $0x86c] ss:$16 sps:$4 sm:$0xff]   ;;  %v20106_v12 = vld [vmem:[%s26965_s3 + $0x868] ss:$16 sps:$4 sm:$0xff]  }
 0x2c6   : > { %5421 = vmatmul.mubr.bf16.vlgmr.msra.gmra.mrb[48].mxu0 %v22389_v63  ;;  %5471 = vmatpush1.bf16.msra.mxu1 %v20040_v16  ;;  %v20111_v8 = vld [vmem:[%s26965_s3 + $0xa6c] ss:$16 sps:$4 sm:$0xff]   ;;  %v20109_v15 = vld [vmem:[%s26965_s3 + $0xa68] ss:$16 sps:$4 sm:$0xff]  }
 0x2c7   : > { %5502 = vmatprep.mubr.bf16.mxu1 %v22201_v28  ;;  %5512 = vmatpush1.bf16.msra.mxu0 %v20043_v17  ;;  %v20063_v28 = vld [vmem:[%s26965_s3 + $0x96c] ss:$16 sps:$4 sm:$0xff]   ;;  %v20112_v17 = vld [vmem:[%s26965_s3 + $0x888] ss:$16 sps:$4 sm:$0xff]  }
 0x2c8   : > { %16587 = vmatprep.mubr.msk.bf16.mxu0 %vm319_vm0, %v22256_v58  ;;  %5472 = vmatprep.subr.bf16.mxu1 %v20048_v23  ;;  %v20058_v58 = vld [vmem:[%s26965_s3 + $0x768] ss:$16 sps:$4 sm:$0xff]   ;;  %v20114_v16 = vld [vmem:[%s26965_s3 + $0x88c] ss:$16 sps:$4 sm:$0xff]  }
 0x2c9   : > { %5513 = vmatprep.subr.bf16.mxu0 %v20051_v24  ;;  %v20117_v23 = vld [vmem:[%s26965_s3 + $0x8ac] ss:$16 sps:$4 sm:$0xff]   ;;  %v20115_v24 = vld [vmem:[%s26965_s3 + $0x8a8] ss:$16 sps:$4 sm:$0xff]  }
 0x2ca   : > { %5473 = vmatpush1.bf16.msra.mxu1 %v20046_v26  ;;  %v20120_v26 = vld [vmem:[%s26965_s3 + $0x8cc] ss:$16 sps:$4 sm:$0xff]  }
 0x2cb   : > { %5514 = vmatpush1.bf16.msra.mxu0 %v20049_v30  ;;  %5474 = vmatprep.subr.bf16.mxu1 %v20054_v25  ;;  %v20118_v25 = vld [vmem:[%s26965_s3 + $0x8c8] ss:$16 sps:$4 sm:$0xff]  }
 0x2cc   : > { %5515 = vmatprep.subr.bf16.mxu0 %v20057_v31 }
 0x2ce   : > { %5475 = vmatpush1.bf16.msra.mxu1 %v20052_v33  ;;  %v3755_v33 = vrot.slane %v23057_v19, %v21935_v1 }
 0x2cf   : > { %5516 = vmatpush1.bf16.msra.mxu0 %v20055_v34  ;;  %5476 = vmatprep.subr.bf16.mxu1 %v20060_v35  ;;  %v20123_v35 = vld [vmem:[%s26965_s3 + $0x8ec] ss:$16 sps:$4 sm:$0xff]  }
 0x2d0   : > { %5517 = vmatprep.subr.bf16.mxu0 %v20063_v28 }
 0x2d2   : > { %5477 = vmatpush1.bf16.msra.mxu1 %v20058_v58 }
 0x2d3   : > { %5518 = vmatpush1.bf16.msra.mxu0 %v20061_v36  ;;  %5478 = vmatprep.subr.bf16.mxu1 %v20066_v37 }
 0x2d4   : > { %5519 = vmatprep.subr.bf16.mxu0 %v20069_v41 }
 0x2d6   : > { %5479 = vmatpush1.bf16.msra.mxu1 %v20064_v42 }
 0x2d7   : > { %5520 = vmatpush1.bf16.msra.mxu0 %v20067_v43  ;;  %5480 = vmatprep.subr.bf16.mxu1 %v20072_v18 }
 0x2d8   : > { %5521 = vmatprep.subr.bf16.mxu0 %v20075_v44 }
 0x2da   : > { %5481 = vmatpush1.bf16.msra.mxu1 %v20070_v45 }
 0x2db   : > { %5522 = vmatpush1.bf16.msra.mxu0 %v20073_v46  ;;  %5482 = vmatprep.subr.bf16.mxu1 %v20078_v48  ;;  %v3784_v46 = vrot.slane %v23107_v20, %v21949_v29  ;;  %v3836_v48 = vrot.slane %v23109_v21, %v21949_v29 }
 0x2dc   : > { %5523 = vmatprep.subr.bf16.mxu0 %v20081_v40 }
 0x2de   : > { %5483 = vmatpush1.bf16.msra.mxu1 %v20076_v49 }
 0x2df   : > { %5524 = vmatpush1.bf16.msra.mxu0 %v20079_v51  ;;  %5484 = vmatprep.subr.bf16.mxu1 %v20084_v52 }
 0x2e0   : > { %5525 = vmatprep.subr.bf16.mxu0 %v20087_v53 }
 0x2e2   : > { %5485 = vmatpush1.bf16.msra.mxu1 %v20082_v3 }
 0x2e3   : > { %5526 = vmatpush1.bf16.msra.mxu0 %v20085_v55  ;;  %5486 = vmatprep.subr.bf16.mxu1 %v20090_v56 }
 0x2e4   : > { %5527 = vmatprep.subr.bf16.mxu0 %v20093_v57 }
 0x2e6   : > { %5487 = vmatpush1.bf16.msra.mxu1 %v20088_v61 }
 0x2e7   : > { %5528 = vmatpush1.bf16.msra.mxu0 %v20091_v62  ;;  %5488 = vmatprep.subr.bf16.mxu1 %v20096_v14  ;;  %v20124_v14 = vld [vmem:[%s26967_s5 + $0x500] ss:$20 sps:$4 sm:$0xff]  }
 0x2e8   : > { %5529 = vmatprep.subr.bf16.mxu0 %v20099_v59  ;;  %v20126_v59 = vld [vmem:[%s26967_s5 + $0x504] ss:$20 sps:$4 sm:$0xff]  }
 0x2e9   : > { %v3735_v22 = vpop.f32.mrb[36].mxu0 }
 0x2ea   : > { %v3737_v7 = vpop.f32.mrb[37].mxu0  ;;  %5489 = vmatpush1.bf16.msra.mxu1 %v20094_v9  ;;  %v20127_v9 = vld [vmem:[%s26967_s5 + $0x508] ss:$20 sps:$4 sm:$0xff]  }
 0x2eb   : > { %v3739_v10 = vpop.f32.mrb[38].mxu0  ;;  %5530 = vmatpush1.bf16.msra.mxu0 %v20097_v54  ;;  %5490 = vmatprep.subr.bf16.mxu1 %v20102_v0  ;;  %v20129_v54 = vld [vmem:[%s26967_s5 + $0x50c] ss:$20 sps:$4 sm:$0xff]  }
 0x2ec   : > { %v3740_v11 = vpop.f32.mrb[39].mxu0  ;;  %5531 = vmatprep.subr.bf16.mxu0 %v20105_v2  ;;  %v20132_v0 = vld [vmem:[%s26967_s5 + $0x52c] ss:$20 sps:$4 sm:$0xff]   ;;  %v20135_v2 = vld [vmem:[%s26967_s5 + $0x534] ss:$20 sps:$4 sm:$0xff]  }
 0x2ee   : > { %5491 = vmatpush1.bf16.msra.mxu1 %v20100_v5 }
 0x2ef   : > { %5532 = vmatpush1.bf16.msra.mxu0 %v20103_v13  ;;  %5492 = vmatprep.subr.bf16.mxu1 %v20108_v6 }
 0x2f0   : > { %5533 = vmatprep.subr.bf16.mxu0 %v20111_v8  ;;  %v20138_v8 = vld [vmem:[%s26967_s5 + $0x554] ss:$20 sps:$4 sm:$0xff]  }
 0x2f2   : > { %5493 = vmatpush1.bf16.msra.mxu1 %v20106_v12 }
 0x2f3   : > { %5534 = vmatpush1.bf16.msra.mxu0 %v20109_v15  ;;  %5494 = vmatprep.subr.bf16.mxu1 %v20114_v16  ;;  %v20141_v15 = vld [vmem:[%s26967_s5 + $0x55c] ss:$20 sps:$4 sm:$0xff]  }
 0x2f4   : > { %6939 = vmatprep.subr.bf16.mxu0 %v20126_v59  ;;  %v20187_v59 = vld [vmem:[%s26967_s5 + $0x698] ss:$20 sps:$4 sm:$0xff]  }
 0x2f6   : > { %5544 = vmatmul.mubr.bf16.vlgmr.msra.gmra.mrb[52].mxu0 %v22391_v60  ;;  %5495 = vmatpush1.bf16.msra.mxu1 %v20112_v17  ;;  %v3759_v60 = vrot.slane %v23057_v19, %v21939_v4 }
 0x2f7   : > { %5496 = vmatprep.subr.bf16.mxu1 %v20117_v23  ;;  %6940 = vmatpush1.bf16.msra.mxu0 %v20124_v14  ;;  %v20184_v14 = vld [vmem:[%s26967_s5 + $0x690] ss:$20 sps:$4 sm:$0xff]  }
 0x2f8   : > { %v3694_v30 = vpop.f32.mrb[44].mxu1  ;;  %6941 = vmatprep.subr.bf16.mxu0 %v20132_v0  ;;  %v20190_v0 = vld [vmem:[%s26967_s5 + $0x6b8] ss:$20 sps:$4 sm:$0xff]  }
 0x2f9   : > { %v3695_v31 = vadd.f32 %v3694_v30, %v22918_v47  ;;  %v3696_v34 = vpop.f32.mrb[45].mxu1  ;;  %v20121_v47 = vld [vmem:[%s26965_s3 + $0x8e8] ss:$16 sps:$4 sm:$0xff]  }
 0x2fa   : > { %v3697_v28 = vadd.f32 %v3696_v34, %v22926_v50  ;;  %v3698_v58 = vpop.f32.mrb[46].mxu1  ;;  %5497 = vmatpush1.bf16.msra.mxu1 %v20115_v24  ;;  %v20136_v24 = vld [vmem:[%s26967_s5 + $0x550] ss:$20 sps:$4 sm:$0xff]   ;;  %v20139_v30 = vld [vmem:[%s26967_s5 + $0x558] ss:$20 sps:$4 sm:$0xff]  }
 0x2fb   : > { %v3736_v36 = vadd.f32 %v3735_v22, %v3695_v31  ;;  %v3699_v37 = vpop.f32.mrb[47].mxu1  ;;  %5498 = vmatprep.subr.bf16.mxu1 %v20120_v26  ;;  %v20130_v22 = vld [vmem:[%s26967_s5 + $0x528] ss:$20 sps:$4 sm:$0xff]   ;;  %v20147_v31 = vld [vmem:[%s26967_s5 + $0x584] ss:$20 sps:$4 sm:$0xff]  }
 0x2fc   : > { %v3738_v41 = vadd.f32 %v3737_v7, %v3697_v28  ;;  %v20133_v7 = vld [vmem:[%s26967_s5 + $0x530] ss:$20 sps:$4 sm:$0xff]   ;;  %6942 = vmatpush1.bf16.msra.mxu0 %v20130_v22  ;;  %v20145_v34 = vld [vmem:[%s26967_s5 + $0x580] ss:$20 sps:$4 sm:$0xff]   ;;  %v20151_v58 = vld [vmem:[%s26967_s5 + $0x5a8] ss:$20 sps:$4 sm:$0xff]  }
 0x2fd   : > { %v3766_v42 = vadd.f32 %v3755_v33, %v3736_v36  ;;  %6943 = vmatprep.subr.bf16.mxu0 %v20138_v8  ;;  %v20142_v33 = vld [vmem:[%s26967_s5 + $0x578] ss:$20 sps:$4 sm:$0xff]   ;;  %v20159_v37 = vld [vmem:[%s26967_s5 + $0x5d4] ss:$20 sps:$4 sm:$0xff]  }
 0x2fe   : > { %v3767_v43 = vadd.f32 %v3759_v60, %v3738_v41  ;;  %5499 = vmatpush1.bf16.msra.mxu1 %v20118_v25  ;;  %v20144_v25 = vld [vmem:[%s26967_s5 + $0x57c] ss:$20 sps:$4 sm:$0xff]   ;;  %v20153_v28 = vld [vmem:[%s26967_s5 + $0x5ac] ss:$20 sps:$4 sm:$0xff]  }
 0x2ff   : > { %v3770_v18 = vmax.f32 %v3766_v42, 0.0  ;;  %5500 = vmatprep.subr.bf16.mxu1 %v20123_v35  ;;  %v20150_v35 = vld [vmem:[%s26967_s5 + $0x5a4] ss:$20 sps:$4 sm:$0xff]   ;;  %v20148_v60 = vld [vmem:[%s26967_s5 + $0x5a0] ss:$20 sps:$4 sm:$0xff]  }
 0x300   : > { %v3771_v44 = vmax.f32 %v3767_v43, 0.0  ;;  %6944 = vmatpush1.bf16.msra.mxu0 %v20136_v24  ;;  %v20156_v36 = vld [vmem:[%s26967_s5 + $0x5cc] ss:$20 sps:$4 sm:$0xff]   ;;  %v20154_v41 = vld [vmem:[%s26967_s5 + $0x5c8] ss:$20 sps:$4 sm:$0xff]  }
 0x301   : > { %6945 = vmatprep.subr.bf16.mxu0 %v20144_v25  ;;  %v20162_v42 = vld [vmem:[%s26967_s5 + $0x5f4] ss:$20 sps:$4 sm:$0xff]   ;;  %v20160_v43 = vld [vmem:[%s26967_s5 + $0x5f0] ss:$20 sps:$4 sm:$0xff]   ;;  %v20201_v22 = vld [vmem:[%s26967_s5 + $0x6ec] ss:$20 sps:$4 sm:$0xff]  }
 0x302   : > { %v3777_v19 = vcombine.low %v3770_v18, %v3771_v44  ;;  %v3829_v45 = vcombine.high %v3770_v18, %v3771_v44  ;;  %5501 = vmatpush1.bf16.msra.mxu1 %v20121_v47  ;;  %v20157_v47 = vld [vmem:[%s26967_s5 + $0x5d0] ss:$20 sps:$4 sm:$0xff]   ;;  %v20163_v18 = vld [vmem:[%s26967_s5 + $0x5f8] ss:$20 sps:$4 sm:$0xff]   ;;  %v20210_v25 = vld [vmem:[%s26967_s5 + $0x734] ss:$20 sps:$4 sm:$0xff]  }
 0x303   : > { %7041 = vmatprep.subr.bf16.mxu1 %v20129_v54  ;;  %v20165_v44 = vld [vmem:[%s26967_s5 + $0x5fc] ss:$20 sps:$4 sm:$0xff]   ;;  %v20195_v54 = vld [vmem:[%s26967_s5 + $0x6c4] ss:$20 sps:$4 sm:$0xff]  }
 0x304   : > { %v3791_v40 = vrot.slane %v3777_v19, %v21949_v29  ;;  %v3843_v49 = vrot.slane %v3829_v45, %v21949_v29  ;;  %6946 = vmatpush1.bf16.msra.mxu0 %v20142_v33  ;;  %v20168_v19 = vld [vmem:[%s26967_s5 + $0x61c] ss:$20 sps:$4 sm:$0xff]   ;;  %v20171_v45 = vld [vmem:[%s26967_s5 + $0x624] ss:$20 sps:$4 sm:$0xff]  }
 0x305   : > { %5503 = vmatmul.mubr.bf16.vlgmr.msra.gmra.mrb[60].mxu1 %v22389_v63  ;;  %6947 = vmatprep.subr.bf16.mxu0 %v20150_v35  ;;  %v20211_v33 = vld [vmem:[%s26967_s5 + $0x738] ss:$20 sps:$4 sm:$0xff]   ;;  %v20216_v35 = vld [vmem:[%s26967_s5 + $0x75c] ss:$20 sps:$4 sm:$0xff]  }
 0x306   : > { %v3792_v51 = vcombine.low %v3784_v46, %v3791_v40  ;;  %v3806_v52 = vcombine.high %v3784_v46, %v3791_v40  ;;  %v3844_v53 = vcombine.low %v3836_v48, %v3843_v49  ;;  %v3856_v3 = vcombine.high %v3836_v48, %v3843_v49  ;;  %7042 = vmatpush1.bf16.msra.mxu1 %v20127_v9  ;;  %v20166_v46 = vld [vmem:[%s26967_s5 + $0x618] ss:$20 sps:$4 sm:$0xff]   ;;  %v20169_v48 = vld [vmem:[%s26967_s5 + $0x620] ss:$20 sps:$4 sm:$0xff]   ;;  %v20192_v9 = vld [vmem:[%s26967_s5 + $0x6bc] ss:$20 sps:$4 sm:$0xff]  }
 0x307   : > { %7043 = vmatprep.subr.bf16.mxu1 %v20135_v2  ;;  %v20174_v40 = vld [vmem:[%s26967_s5 + $0x644] ss:$20 sps:$4 sm:$0xff]   ;;  %v20177_v49 = vld [vmem:[%s26967_s5 + $0x64c] ss:$20 sps:$4 sm:$0xff]  }
 0x308   : > { %v3799_v55 = vrot.slane %v3792_v51, %v21949_v29  ;;  %v3813_v56 = vrot.slane %v3806_v52, %v21949_v29  ;;  %v3851_v57 = vrot.slane %v3844_v53, %v21949_v29  ;;  %v3863_v20 = vrot.slane %v3856_v3, %v21949_v29  ;;  %6948 = vmatpush1.bf16.msra.mxu0 %v20148_v60  ;;  %v20172_v51 = vld [vmem:[%s26967_s5 + $0x640] ss:$20 sps:$4 sm:$0xff]   ;;  %v20175_v52 = vld [vmem:[%s26967_s5 + $0x648] ss:$20 sps:$4 sm:$0xff]   ;;  %v20214_v60 = vld [vmem:[%s26967_s5 + $0x758] ss:$20 sps:$4 sm:$0xff]  }
 0x309   : > { %6949 = vmatprep.subr.bf16.mxu0 %v20156_v36  ;;  %v20193_v2 = vld [vmem:[%s26967_s5 + $0x6c0] ss:$20 sps:$4 sm:$0xff]   ;;  %v20222_v36 = vld [vmem:[%s26967_s5 + $0x784] ss:$20 sps:$4 sm:$0xff]  }
 0x30a   : > { %3804 = vst.msk [vmem:[#allocation3 + $0x1] ss:$8 sm:$0xf] %vm23280_vm3, %v3799_v55  ;;  %3816 = vst.msk [vmem:[#allocation3 + $0x3] ss:$8 sm:$0xf] %vm23280_vm3, %v3813_v56  ;;  %v3818_v21 = vcombine.high %v3799_v55, %v3799_v55  ;;  %v3823_v63 = vcombine.high %v3813_v56, %v3813_v56  ;;  %v3868_v61 = vcombine.high %v3851_v57, %v3851_v57  ;;  %7044 = vmatpush1.bf16.msra.mxu1 %v20133_v7 }
 0x30b   : > { %3854 = vst.msk [vmem:[#allocation3 + $0x21] ss:$8 sm:$0xf] %vm23280_vm3, %v3851_v57  ;;  %3866 = vst.msk [vmem:[#allocation3 + $0x23] ss:$8 sm:$0xf] %vm23280_vm3, %v3863_v20  ;;  %v3873_v62 = vcombine.high %v3863_v20, %v3863_v20  ;;  %7045 = vmatprep.subr.bf16.mxu1 %v20141_v15 }
 0x30c   : > { %3821 = vst.msk [vmem:[#allocation3 + $0x5] ss:$8 sm:$0xf] %vm23280_vm3, %v3818_v21  ;;  %3826 = vst.msk [vmem:[#allocation3 + $0x7] ss:$8 sm:$0xf] %vm23280_vm3, %v3823_v63  ;;  %6950 = vmatpush1.bf16.msra.mxu0 %v20154_v41 }
 0x30d   : > { %3871 = vst.msk [vmem:[#allocation3 + $0x25] ss:$8 sm:$0xf] %vm23280_vm3, %v3868_v61  ;;  %3876 = vst.msk [vmem:[#allocation3 + $0x27] ss:$8 sm:$0xf] %vm23280_vm3, %v3873_v62  ;;  %6951 = vmatprep.subr.bf16.mxu0 %v20162_v42 }
 0x30e   : > { %7046 = vmatpush1.bf16.msra.mxu1 %v20139_v30  ;;  %v20180_v55 = vld [vmem:[%s26967_s5 + $0x66c] ss:$20 sps:$4 sm:$0xff]   ;;  %v20183_v56 = vld [vmem:[%s26967_s5 + $0x674] ss:$20 sps:$4 sm:$0xff]   ;;  %v20181_v21 = vld [vmem:[%s26967_s5 + $0x670] ss:$20 sps:$4 sm:$0xff]  }
 0x30f   : > { %7047 = vmatprep.subr.bf16.mxu1 %v20147_v31  ;;  %v20178_v20 = vld [vmem:[%s26967_s5 + $0x668] ss:$20 sps:$4 sm:$0xff]   ;;  %v20205_v30 = vld [vmem:[%s26967_s5 + $0x710] ss:$20 sps:$4 sm:$0xff]   ;;  %v5552_v41 = vld [vmem:[%s26966_s4] sm:$0xf] }
 0x310   : > { %6952 = vmatpush1.bf16.msra.mxu0 %v20160_v43  ;;  %v20186_v61 = vld [vmem:[%s26967_s5 + $0x694] ss:$20 sps:$4 sm:$0xff]   ;;  %v20189_v62 = vld [vmem:[%s26967_s5 + $0x69c] ss:$20 sps:$4 sm:$0xff]  }
 0x311   : > { %6953 = vmatprep.subr.bf16.mxu0 %v20168_v19  ;;  %v20208_v31 = vld [vmem:[%s26967_s5 + $0x730] ss:$20 sps:$4 sm:$0xff]  }
 0x312   : > { %7048 = vmatpush1.bf16.msra.mxu1 %v20145_v34  ;;  %v20213_v34 = vld [vmem:[%s26967_s5 + $0x73c] ss:$20 sps:$4 sm:$0xff]  }
 0x313   : > { %7049 = vmatprep.subr.bf16.mxu1 %v20153_v28  ;;  %v20219_v28 = vld [vmem:[%s26967_s5 + $0x764] ss:$20 sps:$4 sm:$0xff]  }
 0x314   : > { %6954 = vmatpush1.bf16.msra.mxu0 %v20166_v46 }
 0x315   : > { %6955 = vmatprep.subr.bf16.mxu0 %v20174_v40 }
 0x316   : > { %7050 = vmatpush1.bf16.msra.mxu1 %v20151_v58  ;;  %v20217_v58 = vld [vmem:[%s26967_s5 + $0x760] ss:$20 sps:$4 sm:$0xff]  }
 0x317   : > { %7051 = vmatprep.subr.bf16.mxu1 %v20159_v37  ;;  %v20225_v37 = vld [vmem:[%s26967_s5 + $0x78c] ss:$20 sps:$4 sm:$0xff]  }
 0x318   : > { %6956 = vmatpush1.bf16.msra.mxu0 %v20172_v51 }
 0x319   : > { %6957 = vmatprep.subr.bf16.mxu0 %v20180_v55 }
 0x31a   : > { %7052 = vmatpush1.bf16.msra.mxu1 %v20157_v47 }
 0x31b   : > { %7053 = vmatprep.subr.bf16.mxu1 %v20165_v44  ;;  %v5557_v44 = vrot.slane %v5552_v41, %v21878_v38 }
 0x31c   : > { %6958 = vmatpush1.bf16.msra.mxu0 %v20178_v20 }
 0x31d   : > { %6959 = vmatprep.subr.bf16.mxu0 %v20186_v61 }
 0x31e   : > { %7054 = vmatpush1.bf16.msra.mxu1 %v20163_v18 }
 0x31f   : > { %7055 = vmatprep.subr.bf16.mxu1 %v20171_v45 }
 0x320   : > { %6960 = vmatpush1.bf16.msra.mxu0 %v20184_v14 }
 0x321   : > { %6961 = vmatprep.subr.bf16.mxu0 %v20192_v9 }
 0x322   : > { %7056 = vmatpush1.bf16.msra.mxu1 %v20169_v48  ;;  %v5561_v48 = vrot.slane %v5552_v41, %v21881_v39 }
 0x323   : > { %7057 = vmatprep.subr.bf16.mxu1 %v20177_v49 }
 0x324   : > { %6962 = vmatpush1.bf16.msra.mxu0 %v20190_v0  ;;  %v5569_v0 = vrot.slane %v5552_v41, %v21939_v4 }
 0x326   : > { %7058 = vmatpush1.bf16.msra.mxu1 %v20175_v52 }
 0x327   : > { %7059 = vmatprep.subr.bf16.mxu1 %v20183_v56 }
 0x328   : > { %v4739_v5 = vpop.f32.mrb[48].mxu1 }
 0x329   : > { %v4698_v13 = vpop.f32.mrb[40].mxu0  ;;  %v4741_v6 = vpop.f32.mrb[49].mxu1 }
 0x32a   : > { %v23338_v10 = vadd.f32 %v4739_v5, %v4698_v13  ;;  %v4700_v11 = vpop.f32.mrb[41].mxu0  ;;  %v4743_v12 = vpop.f32.mrb[50].mxu1  ;;  %7060 = vmatpush1.bf16.msra.mxu1 %v20181_v21  ;;  %v20198_v5 = vld [vmem:[%s26967_s5 + $0x6e4] ss:$20 sps:$4 sm:$0xff]   ;;  %v20196_v13 = vld [vmem:[%s26967_s5 + $0x6e0] ss:$20 sps:$4 sm:$0xff]  }
 0x32b   : > { %v23343_v16 = vadd.f32 %v4741_v6, %v4700_v11  ;;  %v4702_v17 = vpop.f32.mrb[42].mxu0  ;;  %v4744_v23 = vpop.f32.mrb[51].mxu1  ;;  %7061 = vmatprep.subr.bf16.mxu1 %v20189_v62  ;;  %v20199_v6 = vld [vmem:[%s26967_s5 + $0x6e8] ss:$20 sps:$4 sm:$0xff]   ;;  %6963 = vmatprep.subr.bf16.mxu0 %v20198_v5 }
 0x32c   : > { %v4703_v26 = vpop.f32.mrb[43].mxu0  ;;  %6964 = vmatpush1.bf16.msra.mxu0 %v20196_v13  ;;  %v20204_v17 = vld [vmem:[%s26967_s5 + $0x70c] ss:$20 sps:$4 sm:$0xff]   ;;  %v20207_v23 = vld [vmem:[%s26967_s5 + $0x714] ss:$20 sps:$4 sm:$0xff]  }
 0x32d   : > { %v20202_v26 = vld [vmem:[%s26967_s5 + $0x708] ss:$20 sps:$4 sm:$0xff]   ;;  %6965 = vmatprep.subr.bf16.mxu0 %v20204_v17 }
 0x32e   : > { %7062 = vmatpush1.bf16.msra.mxu1 %v20187_v59 }
 0x32f   : > { %7063 = vmatprep.subr.bf16.mxu1 %v20195_v54 }
 0x330   : > { %6966 = vmatpush1.bf16.msra.mxu0 %v20202_v26 }
 0x331   : > { %6967 = vmatprep.subr.bf16.mxu0 %v20210_v25 }
 0x332   : > { %7064 = vmatpush1.bf16.msra.mxu1 %v20193_v2 }
 0x333   : > { %7065 = vmatprep.subr.bf16.mxu1 %v20201_v22 }
 0x334   : > { %6968 = vmatpush1.bf16.msra.mxu0 %v20208_v31 }
 0x335   : > { %6969 = vmatprep.subr.bf16.mxu0 %v20216_v35 }
 0x336   : > { %7066 = vmatpush1.bf16.msra.mxu1 %v20199_v6 }
 0x337   : > { %7067 = vmatprep.subr.bf16.mxu1 %v20207_v23 }
 0x338   : > { %6970 = vmatpush1.bf16.msra.mxu0 %v20214_v60 }
 0x339   : > { %6990 = vmatprep.subr.bf16.mxu0 %v20222_v36 }
 0x33a   : > { %7068 = vmatpush1.bf16.msra.mxu1 %v20205_v30 }
 0x33b   : > { %7069 = vmatprep.subr.bf16.mxu1 %v20213_v34 }
 0x33e   : > { %7070 = vmatpush1.bf16.msra.mxu1 %v20211_v33 }
 0x33f   : > { %7071 = vmatprep.subr.bf16.mxu1 %v20219_v28 }
 0x342   : > { %7072 = vmatpush1.bf16.msra.mxu1 %v20217_v58 }
 0x343   : > { %7092 = vmatprep.subr.bf16.mxu1 %v20225_v37 }
 0x359   : > { %v4821_v53 = vpop.f32.mrb[44].mxu0 }
 0x35a   : > { %v4823_v3 = vpop.f32.mrb[45].mxu0 }
 0x35b   : > { %v4825_v57 = vpop.f32.mrb[46].mxu0 }
 0x35c   : > { %v4826_v63 = vpop.f32.mrb[47].mxu0 }
 0x368   : > { %v4780_v7 = vpop.f32.mrb[52].mxu1 }
 0x369   : > { %v4822_v8 = vadd.f32 %v4821_v53, %v4780_v7  ;;  %v4782_v11 = vpop.f32.mrb[53].mxu1 }
 0x36a   : > { %v4824_v12 = vadd.f32 %v4823_v3, %v4782_v11  ;;  %v4784_v15 = vpop.f32.mrb[54].mxu1 }
 0x36b   : > { %v4785_v24 = vpop.f32.mrb[55].mxu1 }
 0x398   : > { %v5463_v47 = vpop.f32.mrb[56].mxu1 }
 0x399   : > { %v5422_v42 = vpop.f32.mrb[48].mxu0  ;;  %v5465_v43 = vpop.f32.mrb[57].mxu1 }
 0x39a   : > { %v5423_v18 = vadd.f32 %v5422_v42, %v23338_v10  ;;  %v5424_v19 = vpop.f32.mrb[49].mxu0  ;;  %v5467_v45 = vpop.f32.mrb[58].mxu1 }
 0x39b   : > { %v5425_v46 = vadd.f32 %v5424_v19, %v23343_v16  ;;  %v5426_v40 = vpop.f32.mrb[50].mxu0  ;;  %v5468_v49 = vpop.f32.mrb[59].mxu1  ;;  %v5565_v16 = vrot.slane %v5552_v41, %v21935_v1  ;;  %v20223_v19 = vld [vmem:[%s26967_s5 + $0x788] ss:$20 sps:$4 sm:$0xff]  }
 0x39c   : > { %v5464_v51 = vadd.f32 %v5463_v47, %v5423_v18  ;;  %v5427_v52 = vpop.f32.mrb[51].mxu0  ;;  %v20220_v47 = vld [vmem:[%s26967_s5 + $0x780] ss:$20 sps:$4 sm:$0xff]  }
 0x39d   : > { %v5466_v53 = vadd.f32 %v5465_v43, %v5425_v46  ;;  %v20231_v40 = vld [vmem:[%s26967_s5 + $0x7b4] ss:$20 sps:$4 sm:$0xff]   ;;  %v20229_v52 = vld [vmem:[%s26967_s5 + $0x7b0] ss:$20 sps:$4 sm:$0xff]  }
 0x39e   : > { %v5574_v3 = vadd.f32 %v5557_v44, %v5464_v51  ;;  %v20226_v51 = vld [vmem:[%s26967_s5 + $0x7a8] ss:$20 sps:$4 sm:$0xff]  }
 0x39f   : > { %v5575_v55 = vadd.f32 %v5561_v48, %v5466_v53  ;;  %v20228_v48 = vld [vmem:[%s26967_s5 + $0x7ac] ss:$20 sps:$4 sm:$0xff]   ;;  %v20234_v53 = vld [vmem:[%s26967_s5 + $0x7d4] ss:$20 sps:$4 sm:$0xff]  }
 0x3a0   : > { %v5578_v56 = vmax.f32 %v5574_v3, 0.0  ;;  %v20237_v3 = vld [vmem:[%s26967_s5 + $0x7dc] ss:$20 sps:$4 sm:$0xff]  }
 0x3a1   : > { %v5579_v57 = vmax.f32 %v5575_v55, 0.0 }
 0x3a3   : > { %v5586_v20 = vcombine.low %v5578_v56, %v5579_v57  ;;  %v5636_v21 = vcombine.high %v5578_v56, %v5579_v57  ;;  %v20232_v56 = vld [vmem:[%s26967_s5 + $0x7d0] ss:$20 sps:$4 sm:$0xff]   ;;  %v20235_v57 = vld [vmem:[%s26967_s5 + $0x7d8] ss:$20 sps:$4 sm:$0xff]  }
 0x3a5   : > { %v5594_v24 = vrot.slane %v5586_v20, %v21949_v29 }
 0x3c9   : > { %v5545_v10 = vpop.f32.mrb[52].mxu0 }
 0x3ca   : > { %v5547_v63 = vpop.f32.mrb[53].mxu0 }
 0x3cb   : > { %v5549_v61 = vpop.f32.mrb[54].mxu0 }
 0x3cc   : > { %v5550_v62 = vpop.f32.mrb[55].mxu0  ;;  %v20243_v61 = vld [vmem:[%s26967_s5 + $0x804] ss:$20 sps:$4 sm:$0xff]  }
 0x3d8   : > { %v5504_v14 = vpop.f32.mrb[60].mxu1 }
 0x3d9   : > { %v5505_v59 = vadd.f32 %v5504_v14, %v4822_v8  ;;  %v5506_v9 = vpop.f32.mrb[61].mxu1  ;;  %v5644_v8 = vrot.slane %v5636_v21, %v21949_v29  ;;  %v20238_v14 = vld [vmem:[%s26967_s5 + $0x7f8] ss:$20 sps:$4 sm:$0xff]  }
 0x3da   : > { %v5507_v54 = vadd.f32 %v5506_v9, %v4824_v12  ;;  %v5508_v2 = vpop.f32.mrb[62].mxu1  ;;  %v20249_v9 = vld [vmem:[%s26967_s5 + $0x82c] ss:$20 sps:$4 sm:$0xff]  }
 0x3db   : > { %v5546_v5 = vadd.f32 %v5545_v10, %v5505_v59  ;;  %v5509_v22 = vpop.f32.mrb[63].mxu1  ;;  %v20241_v59 = vld [vmem:[%s26967_s5 + $0x800] ss:$20 sps:$4 sm:$0xff]  }
 0x3dc   : > { %v5548_v13 = vadd.f32 %v5547_v63, %v5507_v54  ;;  %v20240_v63 = vld [vmem:[%s26967_s5 + $0x7fc] ss:$20 sps:$4 sm:$0xff]   ;;  %v20244_v54 = vld [vmem:[%s26967_s5 + $0x820] ss:$20 sps:$4 sm:$0xff]  }
 0x3dd   : > { %v5576_v6 = vadd.f32 %v5565_v16, %v5546_v5  ;;  %v20246_v16 = vld [vmem:[%s26967_s5 + $0x824] ss:$20 sps:$4 sm:$0xff]   ;;  %v20252_v2 = vld [vmem:[%s26967_s5 + $0x84c] ss:$20 sps:$4 sm:$0xff]   ;;  %v20255_v5 = vld [vmem:[%s26967_s5 + $0x854] ss:$20 sps:$4 sm:$0xff]  }
 0x3de   : > { %v5577_v7 = vadd.f32 %v5569_v0, %v5548_v13  ;;  %v20247_v0 = vld [vmem:[%s26967_s5 + $0x828] ss:$20 sps:$4 sm:$0xff]   ;;  %v20253_v13 = vld [vmem:[%s26967_s5 + $0x850] ss:$20 sps:$4 sm:$0xff]  }
 0x3df   : > { %v5580_v11 = vmax.f32 %v5576_v6, 0.0  ;;  %v20250_v22 = vld [vmem:[%s26967_s5 + $0x848] ss:$20 sps:$4 sm:$0xff]  }
 0x3e0   : > { %v5581_v15 = vmax.f32 %v5577_v7, 0.0  ;;  %v20258_v6 = vld [vmem:[%s26967_s5 + $0x874] ss:$20 sps:$4 sm:$0xff]   ;;  %v20261_v7 = vld [vmem:[%s26967_s5 + $0x87c] ss:$20 sps:$4 sm:$0xff]  }
 0x3e2   : > { %v5587_v17 = vcombine.low %v5580_v11, %v5581_v15  ;;  %v5637_v23 = vcombine.high %v5580_v11, %v5581_v15  ;;  %v20256_v11 = vld [vmem:[%s26967_s5 + $0x870] ss:$20 sps:$4 sm:$0xff]   ;;  %v20259_v15 = vld [vmem:[%s26967_s5 + $0x878] ss:$20 sps:$4 sm:$0xff]  }
 0x3e4   : > { %v5601_v26 = vrot.slane %v5587_v17, %v21949_v29  ;;  %v5651_v12 = vrot.slane %v5637_v23, %v21949_v29  ;;  %v20264_v17 = vld [vmem:[%s26967_s5 + $0x89c] ss:$20 sps:$4 sm:$0xff]   ;;  %v20267_v23 = vld [vmem:[%s26967_s5 + $0x8a4] ss:$20 sps:$4 sm:$0xff]  }
 0x3e6   : > { %v5602_v30 = vcombine.low %v5594_v24, %v5601_v26  ;;  %v5614_v25 = vcombine.high %v5594_v24, %v5601_v26  ;;  %v5652_v31 = vcombine.low %v5644_v8, %v5651_v12  ;;  %v5664_v33 = vcombine.high %v5644_v8, %v5651_v12  ;;  %v20262_v24 = vld [vmem:[%s26967_s5 + $0x898] ss:$20 sps:$4 sm:$0xff]   ;;  %v20265_v8 = vld [vmem:[%s26967_s5 + $0x8a0] ss:$20 sps:$4 sm:$0xff]  }
 0x3e7   : > { %v20270_v26 = vld [vmem:[%s26967_s5 + $0x8c4] ss:$20 sps:$4 sm:$0xff]   ;;  %v20273_v12 = vld [vmem:[%s26967_s5 + $0x8cc] ss:$20 sps:$4 sm:$0xff]  }
 0x3e8   : > { %v5609_v34 = vrot.slane %v5602_v30, %v21949_v29  ;;  %v5621_v35 = vrot.slane %v5614_v25, %v21949_v29  ;;  %v5659_v28 = vrot.slane %v5652_v31, %v21949_v29  ;;  %v5671_v60 = vrot.slane %v5664_v33, %v21949_v29  ;;  %v20268_v30 = vld [vmem:[%s26967_s5 + $0x8c0] ss:$20 sps:$4 sm:$0xff]   ;;  %v20271_v25 = vld [vmem:[%s26967_s5 + $0x8c8] ss:$20 sps:$4 sm:$0xff]  }
 0x3e9   : > { %v20276_v31 = vld [vmem:[%s26967_s5 + $0x8ec] ss:$20 sps:$4 sm:$0xff]   ;;  %v20279_v33 = vld [vmem:[%s26967_s5 + $0x8f4] ss:$20 sps:$4 sm:$0xff]  }
 0x3ea   : > { %5612 = vst.msk [vmem:[#allocation3 + $0x2] ss:$8 sm:$0xf] %vm23280_vm3, %v5609_v34  ;;  %5624 = vst.msk [vmem:[#allocation3 + $0x4] ss:$8 sm:$0xf] %vm23280_vm3, %v5621_v35  ;;  %v5626_v58 = vcombine.high %v5609_v34, %v5609_v34  ;;  %v5631_v36 = vcombine.high %v5621_v35, %v5621_v35  ;;  %v5676_v37 = vcombine.high %v5659_v28, %v5659_v28 }
 0x3eb   : > { %5662 = vst.msk [vmem:[#allocation3 + $0x22] ss:$8 sm:$0xf] %vm23280_vm3, %v5659_v28  ;;  %5674 = vst.msk [vmem:[#allocation3 + $0x24] ss:$8 sm:$0xf] %vm23280_vm3, %v5671_v60  ;;  %v5681_v41 = vcombine.high %v5671_v60, %v5671_v60 }
 0x3ec   : > { %5629 = vst.msk [vmem:[#allocation3 + $0x6] ss:$8 sm:$0xf] %vm23280_vm3, %v5626_v58  ;;  %5634 = vst.msk [vmem:[#allocation3 + $0x20] ss:$8 sm:$0xf] %vm23280_vm3, %v5631_v36 }
 0x3ed   : > { %5679 = vst.msk [vmem:[#allocation3 + $0x26] ss:$8 sm:$0xf] %vm23280_vm3, %v5676_v37  ;;  %5684 = vst.msk [vmem:[#allocation3 + $0x40] ss:$8 sm:$0xf] %vm23280_vm3, %v5681_v41 }
 0x3ee   : > { %v20274_v34 = vld [vmem:[%s26967_s5 + $0x8e8] ss:$20 sps:$4 sm:$0xff]   ;;  %v20277_v35 = vld [vmem:[%s26967_s5 + $0x8f0] ss:$20 sps:$4 sm:$0xff]   ;;  %v20283_v36 = vld [vmem:[%s26967_s5 + $0x918] ss:$20 sps:$4 sm:$0xff]  }
 0x3ef   : > { %v20282_v28 = vld [vmem:[%s26967_s5 + $0x914] ss:$20 sps:$4 sm:$0xff]   ;;  %v20285_v60 = vld [vmem:[%s26967_s5 + $0x91c] ss:$20 sps:$4 sm:$0xff]   ;;  %v20291_v41 = vld [vmem:[%s26967_s5 + $0x944] ss:$20 sps:$4 sm:$0xff]  }
 0x3f0   : > { %v20280_v58 = vld [vmem:[%s26967_s5 + $0x910] ss:$20 sps:$4 sm:$0xff]  }
 0x3f1   : > { %v20288_v37 = vld [vmem:[%s26967_s5 + $0x93c] ss:$20 sps:$4 sm:$0xff]  }
 0x3f3   : > { %v5707_v43 = vld [vmem:[#allocation3 + $0x8] sm:$0xff]  ;;  %v5706_v45 = vld [vmem:[#allocation3] sm:$0xff]  ;;  %v5709_v21 = vld [vmem:[#allocation3 + $0x18] sm:$0xff] }
 0x3f4   : > { %v23549_v42 = vld [vmem:[#allocation3 + $0x28] sm:$0xff]  ;;  %v23551_v18 = vld [vmem:[#allocation3 + $0x20] sm:$0xff]  ;;  %v23594_v20 = vld [vmem:[#allocation3 + $0x38] sm:$0xff] }
 0x3f5   : > { %v23554_v44 = vpack.c.bf16 %v23549_v42, %v5707_v43  ;;  %v5711_v46 = vld [vmem:[#allocation3 + $0x48] sm:$0x1]  ;;  %v23560_v50 = vpack.c.bf16 %v23551_v18, %v5706_v45  ;;  %v5710_v55 = vld [vmem:[#allocation3 + $0x40] sm:$0x1]  ;;  %v23607_v62 = vpack.c.bf16 %v23594_v20, %v5709_v21  ;;  %v20312_v21 = vld [vmem:[%s26967_s5 + $0x9dc] ss:$20 sps:$4 sm:$0xff]  }
 0x3f6   : > { %v23572_v49 = vpack.c.bf16 %v5711_v46, %v5711_v46  ;;  %v23596_v10 = vpack.c.bf16 %v5710_v55, %v5710_v55  ;;  %v20289_v43 = vld [vmem:[%s26967_s5 + $0x940] ss:$20 sps:$4 sm:$0xff]   ;;  %v20309_v55 = vld [vmem:[%s26967_s5 + $0x9bc] ss:$20 sps:$4 sm:$0xff]  }
 0x3f7   : > { %6971 = vmatprep.mubr.bf16.mxu0 %v23554_v44  ;;  %7073 = vmatprep.mubr.bf16.mxu1 %v23554_v44  ;;  %v20297_v45 = vld [vmem:[%s26967_s5 + $0x96c] ss:$20 sps:$4 sm:$0xff]  }
 0x3f8   : > { %6972 = vmatmul.mubr.bf16.vlgmr.msra.gmra.mrb[56].mxu0 %v23560_v50  ;;  %7074 = vmatmul.mubr.bf16.vlgmr.msra.gmra.mrb[64].mxu1 %v23560_v50  ;;  %v20292_v46 = vld [vmem:[%s26967_s5 + $0x960] ss:$20 sps:$4 sm:$0xff]  }
 0x3f9   : > { %6991 = vmatpush1.bf16.msra.mxu0 %v20220_v47  ;;  %7093 = vmatpush1.bf16.msra.mxu1 %v20223_v19  ;;  %v20286_v47 = vld [vmem:[%s26967_s5 + $0x938] ss:$20 sps:$4 sm:$0xff]  }
 0x3fa   : > { %6981 = vmatprep.mubr.bf16.mxu0 %v23572_v49  ;;  %7083 = vmatprep.mubr.bf16.mxu1 %v23572_v49  ;;  %v20294_v19 = vld [vmem:[%s26967_s5 + $0x964] ss:$20 sps:$4 sm:$0xff]  }
 0x3fb   : > { %6992 = vmatprep.subr.bf16.mxu0 %v20228_v48  ;;  %7094 = vmatprep.subr.bf16.mxu1 %v20231_v40  ;;  %v20295_v48 = vld [vmem:[%s26967_s5 + $0x968] ss:$20 sps:$4 sm:$0xff]   ;;  %v20300_v40 = vld [vmem:[%s26967_s5 + $0x98c] ss:$20 sps:$4 sm:$0xff]  }
 0x3fd   : > { %6993 = vmatpush1.bf16.msra.mxu0 %v20226_v51  ;;  %7095 = vmatpush1.bf16.msra.mxu1 %v20229_v52  ;;  %v20303_v51 = vld [vmem:[%s26967_s5 + $0x994] ss:$20 sps:$4 sm:$0xff]  }
 0x3fe   : > { %6994 = vmatprep.subr.bf16.mxu0 %v20234_v53  ;;  %7096 = vmatprep.subr.bf16.mxu1 %v20237_v3  ;;  %v20298_v52 = vld [vmem:[%s26967_s5 + $0x988] ss:$20 sps:$4 sm:$0xff]   ;;  %v20301_v53 = vld [vmem:[%s26967_s5 + $0x990] ss:$20 sps:$4 sm:$0xff]  }
 0x3ff   : > { %v20306_v3 = vld [vmem:[%s26967_s5 + $0x9b4] ss:$20 sps:$4 sm:$0xff]  }
 0x400   : > { %6982 = vmatmul.mubr.bf16.gmra.mrb[60].mxu0 %v23596_v10  ;;  %7084 = vmatmul.mubr.bf16.gmra.mrb[68].mxu1 %v23596_v10 }
 0x401   : > { %6995 = vmatpush1.bf16.msra.mxu0 %v20232_v56  ;;  %7097 = vmatpush1.bf16.msra.mxu1 %v20235_v57  ;;  %v20304_v56 = vld [vmem:[%s26967_s5 + $0x9b0] ss:$20 sps:$4 sm:$0xff]   ;;  %v20307_v57 = vld [vmem:[%s26967_s5 + $0x9b8] ss:$20 sps:$4 sm:$0xff]  }
 0x402   : > { %7022 = vmatprep.mubr.bf16.mxu0 %v23607_v62  ;;  %7124 = vmatprep.mubr.bf16.mxu1 %v23607_v62 }
 0x403   : > { %6996 = vmatprep.subr.bf16.mxu0 %v20240_v63  ;;  %7098 = vmatprep.subr.bf16.mxu1 %v20243_v61  ;;  %v20315_v63 = vld [vmem:[%s26967_s5 + $0x9e4] ss:$20 sps:$4 sm:$0xff]  }
 0x404   : > { %v20310_v61 = vld [vmem:[%s26967_s5 + $0x9d8] ss:$20 sps:$4 sm:$0xff]  }
 0x405   : > { %6997 = vmatpush1.bf16.msra.mxu0 %v20238_v14  ;;  %7099 = vmatpush1.bf16.msra.mxu1 %v20241_v59  ;;  %v20313_v14 = vld [vmem:[%s26967_s5 + $0x9e0] ss:$20 sps:$4 sm:$0xff]   ;;  %v20316_v59 = vld [vmem:[%s26967_s5 + $0x650] ss:$20 sps:$4 sm:$0xff]  }
 0x406   : > { %6998 = vmatprep.subr.bf16.mxu0 %v20246_v16  ;;  %7100 = vmatprep.subr.bf16.mxu1 %v20249_v9  ;;  %v20317_v16 = vld [vmem:[%s26967_s5 + $0x8d0] ss:$20 sps:$4 sm:$0xff]  }
 0x407   : > { %v23767_v9 = vld [vmem:[#allocation3 + $0x30] sm:$0xff] }
 0x409   : > { %6999 = vmatpush1.bf16.msra.mxu0 %v20244_v54  ;;  %7101 = vmatpush1.bf16.msra.mxu1 %v20247_v0  ;;  %v5708_v54 = vld [vmem:[#allocation3 + $0x10] sm:$0xff]  ;;  %v5713_v0 = vld [vmem:[#allocation3 + $0x58] sm:$0x1] }
 0x40a   : > { %7000 = vmatprep.subr.bf16.mxu0 %v20252_v2  ;;  %7102 = vmatprep.subr.bf16.mxu1 %v20255_v5  ;;  %v23770_v2 = vpack.c.bf16 %v23767_v9, %v5708_v54  ;;  %v20318_v5 = vld [vmem:[%s26967_s5 + $0x510] ss:$20 sps:$4 sm:$0xff]  }
 0x40b   : > { %v20357_v54 = vld [vmem:[%s26967_s5 + $0x30] ss:$20 sps:$4 sm:$0xff]  }
 0x40d   : > { %7001 = vmatpush1.bf16.msra.mxu0 %v20250_v22  ;;  %7103 = vmatpush1.bf16.msra.mxu1 %v20253_v13  ;;  %v20319_v22 = vld [vmem:[%s26967_s5 + $0x790] ss:$20 sps:$4 sm:$0xff]   ;;  %v23778_v13 = vpack.c.bf16 %v5713_v0, %v5713_v0 }
 0x40e   : > { %7002 = vmatprep.subr.bf16.mxu0 %v20258_v6  ;;  %7104 = vmatprep.subr.bf16.mxu1 %v20261_v7  ;;  %v20320_v6 = vld [vmem:[%s26967_s5 + $0x678] ss:$20 sps:$4 sm:$0xff]  }
 0x40f   : > { %v20321_v7 = vld [vmem:[%s26967_s5 + $0x8f8] ss:$20 sps:$4 sm:$0xff]  }
 0x411   : > { %7003 = vmatpush1.bf16.msra.mxu0 %v20256_v11  ;;  %7105 = vmatpush1.bf16.msra.mxu1 %v20259_v15  ;;  %v20322_v11 = vld [vmem:[%s26967_s5 + $0x538] ss:$20 sps:$4 sm:$0xff]  }
 0x412   : > { %7004 = vmatprep.subr.bf16.mxu0 %v20264_v17  ;;  %7106 = vmatprep.subr.bf16.mxu1 %v20267_v23  ;;  %v20323_v15 = vld [vmem:[%s26967_s5 + $0x7b8] ss:$20 sps:$4 sm:$0xff]   ;;  %v5712_v17 = vld [vmem:[#allocation3 + $0x50] sm:$0x1]  ;;  %v20324_v23 = vld [vmem:[%s26967_s5 + $0x6a0] ss:$20 sps:$4 sm:$0xff]  }
 0x415   : > { %7005 = vmatpush1.bf16.msra.mxu0 %v20262_v24  ;;  %7107 = vmatpush1.bf16.msra.mxu1 %v20265_v8  ;;  %v20325_v24 = vld [vmem:[%s26967_s5 + $0x920] ss:$20 sps:$4 sm:$0xff]   ;;  %v23802_v8 = vpack.c.bf16 %v5712_v17, %v5712_v17 }
 0x416   : > { %7006 = vmatprep.subr.bf16.mxu0 %v20270_v26  ;;  %7108 = vmatprep.subr.bf16.mxu1 %v20273_v12  ;;  %v20326_v26 = vld [vmem:[%s26967_s5 + $0x560] ss:$20 sps:$4 sm:$0xff]  }
 0x417   : > { %v20327_v12 = vld [vmem:[%s26967_s5 + $0x7e0] ss:$20 sps:$4 sm:$0xff]  }
 0x419   : > { %7007 = vmatpush1.bf16.msra.mxu0 %v20268_v30  ;;  %7109 = vmatpush1.bf16.msra.mxu1 %v20271_v25  ;;  %v20328_v30 = vld [vmem:[%s26967_s5 + $0x6c8] ss:$20 sps:$4 sm:$0xff]  }
 0x41a   : > { %7008 = vmatprep.subr.bf16.mxu0 %v20276_v31  ;;  %7110 = vmatprep.subr.bf16.mxu1 %v20279_v33  ;;  %v20329_v25 = vld [vmem:[%s26967_s5 + $0x948] ss:$20 sps:$4 sm:$0xff]  }
 0x41b   : > { %v20330_v31 = vld [vmem:[%s26967_s5 + $0x588] ss:$20 sps:$4 sm:$0xff]  }
 0x41c   : > { %v20331_v33 = vld [vmem:[%s26967_s5 + $0x808] ss:$20 sps:$4 sm:$0xff]  }
 0x41d   : > { %7009 = vmatpush1.bf16.msra.mxu0 %v20274_v34  ;;  %7111 = vmatpush1.bf16.msra.mxu1 %v20277_v35  ;;  %v20332_v34 = vld [vmem:[%s26967_s5 + $0x6f0] ss:$20 sps:$4 sm:$0xff]  }
 0x41e   : > { %7010 = vmatprep.subr.bf16.mxu0 %v20282_v28  ;;  %7112 = vmatprep.subr.bf16.mxu1 %v20285_v60  ;;  %v20333_v35 = vld [vmem:[%s26967_s5 + $0x970] ss:$20 sps:$4 sm:$0xff]  }
 0x41f   : > { %v20334_v28 = vld [vmem:[%s26967_s5 + $0x5b0] ss:$20 sps:$4 sm:$0xff]  }
 0x420   : > { %v20335_v60 = vld [vmem:[%s26967_s5 + $0x830] ss:$20 sps:$4 sm:$0xff]  }
 0x421   : > { %7011 = vmatpush1.bf16.msra.mxu0 %v20280_v58  ;;  %7113 = vmatpush1.bf16.msra.mxu1 %v20283_v36  ;;  %v20336_v58 = vld [vmem:[%s26967_s5 + $0x718] ss:$20 sps:$4 sm:$0xff]  }
 0x422   : > { %7012 = vmatprep.subr.bf16.mxu0 %v20288_v37  ;;  %7114 = vmatprep.subr.bf16.mxu1 %v20291_v41  ;;  %v20337_v36 = vld [vmem:[%s26967_s5 + $0x998] ss:$20 sps:$4 sm:$0xff]  }
 0x423   : > { %v20338_v37 = vld [vmem:[%s26967_s5 + $0x5d8] ss:$20 sps:$4 sm:$0xff]  }
 0x424   : > { %v20339_v41 = vld [vmem:[%s26967_s5 + $0x858] ss:$20 sps:$4 sm:$0xff]  }
 0x425   : > { %7013 = vmatpush1.bf16.msra.mxu0 %v20286_v47  ;;  %7115 = vmatpush1.bf16.msra.mxu1 %v20289_v43  ;;  %v20340_v47 = vld [vmem:[%s26967_s5 + $0x740] ss:$20 sps:$4 sm:$0xff]  }
 0x426   : > { %7014 = vmatprep.subr.bf16.mxu0 %v20294_v19  ;;  %7116 = vmatprep.subr.bf16.mxu1 %v20297_v45  ;;  %v20341_v43 = vld [vmem:[%s26967_s5 + $0x9c0] ss:$20 sps:$4 sm:$0xff]  }
 0x427   : > { %v20342_v19 = vld [vmem:[%s26967_s5 + $0x600] ss:$20 sps:$4 sm:$0xff]  }
 0x428   : > { %v20343_v45 = vld [vmem:[%s26967_s5 + $0x880] ss:$20 sps:$4 sm:$0xff]  }
 0x429   : > { %7015 = vmatpush1.bf16.msra.mxu0 %v20292_v46  ;;  %7117 = vmatpush1.bf16.msra.mxu1 %v20295_v48  ;;  %v5687_v46 = vld [vmem:[#allocation3 + $0x8] sm:$0xfe] }
 0x42a   : > { %7016 = vmatprep.subr.bf16.mxu0 %v20300_v40  ;;  %7118 = vmatprep.subr.bf16.mxu1 %v20303_v51  ;;  %v20344_v48 = vld [vmem:[%s26967_s5 + $0x768] ss:$20 sps:$4 sm:$0xff]   ;;  %v5699_v51 = vpack.c.bf16 %v23549_v42, %v5687_v46  ;;  %v20353_v42 = vld [vmem:[%s26967_s5 + $0xc] ss:$20 sps:$4 sm:$0xff]  }
 0x42b   : > { %v20345_v40 = vld [vmem:[%s26967_s5 + $0x9e8] ss:$20 sps:$4 sm:$0xff]   ;;  %v20393_v46 = vld [vmem:[%s26967_s5 + $0x120] ss:$20 sps:$4 sm:$0xff]  }
 0x42c   : > { %v7253_v0 = vshrl.u32 %v5699_v51, 16 }
 0x42d   : > { %7017 = vmatpush1.bf16.msra.mxu0 %v20298_v52  ;;  %7119 = vmatpush1.bf16.msra.mxu1 %v20301_v53  ;;  %v20346_v52 = vld [vmem:[%s26967_s5 + $0x628] ss:$20 sps:$4 sm:$0xff]  }
 0x42e   : > { %7018 = vmatprep.subr.bf16.mxu0 %v20306_v3  ;;  %7120 = vmatprep.subr.bf16.mxu1 %v20309_v55  ;;  %v20347_v53 = vld [vmem:[%s26967_s5 + $0x8a8] ss:$20 sps:$4 sm:$0xff]   ;;  %v20350_v3 = vld [vmem:[%s26967_s5 + $0x4] ss:$20 sps:$4 sm:$0xff]  }
 0x42f   : > { %v5695_v55 = vld [vmem:[#allocation3 + $0x48] sm:$0x3] }
 0x431   : > { %7019 = vmatpush1.bf16.msra.mxu0 %v20304_v56  ;;  %7121 = vmatpush1.bf16.msra.mxu1 %v20307_v57  ;;  %v7255_v56 = vshll.u32 %v5699_v51, 16  ;;  %v20348_v57 = vld [vmem:[%s26967_s5] ss:$20 sps:$4 sm:$0xff]  }
 0x432   : > { %7020 = vmatprep.subr.bf16.mxu0 %v20312_v21  ;;  %7122 = vmatprep.subr.bf16.mxu1 %v20315_v63  ;;  %v20351_v21 = vld [vmem:[%s26967_s5 + $0x8] ss:$20 sps:$4 sm:$0xff]   ;;  %v23887_v63 = vpack.c.bf16 %v5695_v55, %v5695_v55  ;;  %v20396_v51 = vld [vmem:[%s26967_s5 + $0x140] ss:$20 sps:$4 sm:$0xff]   ;;  %v20405_v55 = vld [vmem:[%s26967_s5 + $0x170] ss:$20 sps:$4 sm:$0xff]  }
 0x435   : > { %7021 = vmatpush1.bf16.msra.mxu0 %v20310_v61  ;;  %7123 = vmatpush1.bf16.msra.mxu1 %v20313_v14  ;;  %v20356_v61 = vld [vmem:[%s26967_s5 + $0x2c] ss:$20 sps:$4 sm:$0xff]   ;;  %v20359_v14 = vld [vmem:[%s26967_s5 + $0x34] ss:$20 sps:$4 sm:$0xff]  }
 0x436   : > { %18468 = vmatprep.subr.bf16.mxu0 %v20316_v59  ;;  %18496 = vmatprep.subr.bf16.mxu1 %v20317_v16  ;;  %v7257_v59 = vrot.slane %v7255_v56, 1  ;;  %v20354_v16 = vld [vmem:[%s26967_s5 + $0x28] ss:$20 sps:$4 sm:$0xff]  }
 0x437   : > { %v20410_v56 = vld [vmem:[%s26967_s5 + $0x194] ss:$20 sps:$4 sm:$0xff]  }
 0x438   : > { %7023 = vmatmul.mubr.bf16.vlgmr.msra.gmra.mrb[56].mxu0 %v23770_v2  ;;  %7125 = vmatmul.mubr.bf16.vlgmr.msra.gmra.mrb[64].mxu1 %v23770_v2 }
 0x439   : > { %7032 = vmatprep.mubr.bf16.mxu0 %v23778_v13  ;;  %7134 = vmatprep.mubr.bf16.mxu1 %v23778_v13 }
 0x43a   : > { %18469 = vmatpush3.bf16.msra.mxu0 %v20318_v5  ;;  %18497 = vmatpush3.bf16.msra.mxu1 %v20319_v22  ;;  %v7260_v5 = vshll.u32 %v23887_v63, 16  ;;  %v20362_v22 = vld [vmem:[%s26967_s5 + $0x54] ss:$20 sps:$4 sm:$0xff]  }
 0x43b   : > { %18470 = vmatprep.subr.bf16.mxu0 %v20320_v6  ;;  %18498 = vmatprep.subr.bf16.mxu1 %v20321_v7  ;;  %v20365_v6 = vld [vmem:[%s26967_s5 + $0x5c] ss:$20 sps:$4 sm:$0xff]   ;;  %v7258_v7 = vor.u32 %v7257_v59, %v7253_v0  ;;  %v20419_v59 = vld [vmem:[%s26967_s5 + $0x1c4] ss:$20 sps:$4 sm:$0xff]  }
 0x43c   : > { %v7262_v17 = vrot.slane %v7260_v5, 1  ;;  %v20422_v0 = vld [vmem:[%s26967_s5 + $0x1e4] ss:$20 sps:$4 sm:$0xff]   ;;  %v20425_v5 = vld [vmem:[%s26967_s5 + $0x1ec] ss:$20 sps:$4 sm:$0xff]  }
 0x43e   : > { %18471 = vmatpush3.bf16.msra.mxu0 %v20322_v11  ;;  %18499 = vmatpush3.bf16.msra.mxu1 %v20323_v15  ;;  %v20360_v11 = vld [vmem:[%s26967_s5 + $0x50] ss:$20 sps:$4 sm:$0xff]   ;;  %v20363_v15 = vld [vmem:[%s26967_s5 + $0x58] ss:$20 sps:$4 sm:$0xff]  }
 0x43f   : > { %18472 = vmatprep.subr.bf16.mxu0 %v20324_v23  ;;  %18500 = vmatprep.subr.bf16.mxu1 %v20325_v24  ;;  %v20368_v23 = vld [vmem:[%s26967_s5 + $0x7c] ss:$20 sps:$4 sm:$0xff]   ;;  %v20371_v24 = vld [vmem:[%s26967_s5 + $0x84] ss:$20 sps:$4 sm:$0xff]  }
 0x440   : > { %7033 = vmatmul.mubr.bf16.gmra.mrb[64].mxu0 %v23802_v8  ;;  %7135 = vmatmul.mubr.bf16.gmra.mrb[72].mxu1 %v23802_v8 }
 0x441   : > { %7175 = vmatprep.mubr.bf16.mxu0 %v23554_v44  ;;  %7223 = vmatprep.mubr.bf16.mxu1 %v23607_v62 }
 0x442   : > { %18473 = vmatpush3.bf16.msra.mxu0 %v20326_v26  ;;  %18501 = vmatpush3.bf16.msra.mxu1 %v20327_v12  ;;  %v23927_v26 = vsel %vm7239_vm4, %v7258_v7, %v7262_v17  ;;  %v20366_v12 = vld [vmem:[%s26967_s5 + $0x78] ss:$20 sps:$4 sm:$0xff]   ;;  %v20423_v7 = vld [vmem:[%s26967_s5 + $0x1e8] ss:$20 sps:$4 sm:$0xff]  }
 0x443   : > { %18474 = vmatprep.subr.bf16.mxu0 %v20328_v30  ;;  %18502 = vmatprep.subr.bf16.mxu1 %v20329_v25  ;;  %v20369_v30 = vld [vmem:[%s26967_s5 + $0x80] ss:$20 sps:$4 sm:$0xff]   ;;  %v20374_v25 = vld [vmem:[%s26967_s5 + $0xa4] ss:$20 sps:$4 sm:$0xff]  }
 0x446   : > { %18475 = vmatpush3.bf16.msra.mxu0 %v20330_v31  ;;  %18503 = vmatpush3.bf16.msra.mxu1 %v20331_v33  ;;  %v20377_v31 = vld [vmem:[%s26967_s5 + $0xac] ss:$20 sps:$4 sm:$0xff]  }
 0x447   : > { %18476 = vmatprep.subr.bf16.mxu0 %v20332_v34  ;;  %18504 = vmatprep.subr.bf16.mxu1 %v20333_v35  ;;  %v20372_v33 = vld [vmem:[%s26967_s5 + $0xa0] ss:$20 sps:$4 sm:$0xff]   ;;  %v20375_v34 = vld [vmem:[%s26967_s5 + $0xa8] ss:$20 sps:$4 sm:$0xff]  }
 0x448   : > { %v20380_v35 = vld [vmem:[%s26967_s5 + $0xcc] ss:$20 sps:$4 sm:$0xff]  }
 0x44a   : > { %18477 = vmatpush3.bf16.msra.mxu0 %v20334_v28  ;;  %18505 = vmatpush3.bf16.msra.mxu1 %v20335_v60  ;;  %v20383_v28 = vld [vmem:[%s26967_s5 + $0xd4] ss:$20 sps:$4 sm:$0xff]  }
 0x44b   : > { %18478 = vmatprep.subr.bf16.mxu0 %v20336_v58  ;;  %18506 = vmatprep.subr.bf16.mxu1 %v20337_v36  ;;  %v20378_v60 = vld [vmem:[%s26967_s5 + $0xc8] ss:$20 sps:$4 sm:$0xff]   ;;  %v20381_v58 = vld [vmem:[%s26967_s5 + $0xd0] ss:$20 sps:$4 sm:$0xff]  }
 0x44c   : > { %v20386_v36 = vld [vmem:[%s26967_s5 + $0xf4] ss:$20 sps:$4 sm:$0xff]  }
 0x44e   : > { %18479 = vmatpush3.bf16.msra.mxu0 %v20338_v37  ;;  %18507 = vmatpush3.bf16.msra.mxu1 %v20339_v41  ;;  %v20389_v37 = vld [vmem:[%s26967_s5 + $0xfc] ss:$20 sps:$4 sm:$0xff]  }
 0x44f   : > { %18480 = vmatprep.subr.bf16.mxu0 %v20340_v47  ;;  %18508 = vmatprep.subr.bf16.mxu1 %v20341_v43  ;;  %v20384_v41 = vld [vmem:[%s26967_s5 + $0xf0] ss:$20 sps:$4 sm:$0xff]   ;;  %v20387_v47 = vld [vmem:[%s26967_s5 + $0xf8] ss:$20 sps:$4 sm:$0xff]  }
 0x450   : > { %v20392_v43 = vld [vmem:[%s26967_s5 + $0x11c] ss:$20 sps:$4 sm:$0xff]  }
 0x452   : > { %18481 = vmatpush3.bf16.msra.mxu0 %v20342_v19  ;;  %18509 = vmatpush3.bf16.msra.mxu1 %v20343_v45  ;;  %v20395_v19 = vld [vmem:[%s26967_s5 + $0x124] ss:$20 sps:$4 sm:$0xff]  }
 0x453   : > { %18482 = vmatprep.subr.bf16.mxu0 %v20344_v48  ;;  %18510 = vmatprep.subr.bf16.mxu1 %v20345_v40  ;;  %v20390_v45 = vld [vmem:[%s26967_s5 + $0x118] ss:$20 sps:$4 sm:$0xff]  }
 0x454   : > { %v20398_v48 = vld [vmem:[%s26967_s5 + $0x144] ss:$20 sps:$4 sm:$0xff]   ;;  %v20401_v40 = vld [vmem:[%s26967_s5 + $0x14c] ss:$20 sps:$4 sm:$0xff]  }
 0x456   : > { %18483 = vmatpush3.bf16.msra.mxu0 %v20346_v52  ;;  %18511 = vmatpush3.bf16.msra.mxu1 %v20347_v53  ;;  %v20399_v52 = vld [vmem:[%s26967_s5 + $0x148] ss:$20 sps:$4 sm:$0xff]   ;;  %v20404_v53 = vld [vmem:[%s26967_s5 + $0x16c] ss:$20 sps:$4 sm:$0xff]  }
 0x457   : > { %8136 = vmatprep.subr.bf16.mxu0 %v20350_v3  ;;  %8238 = vmatprep.subr.bf16.mxu1 %v20353_v42  ;;  %v20407_v3 = vld [vmem:[%s26967_s5 + $0x174] ss:$20 sps:$4 sm:$0xff]  }
 0x458   : > { %v20402_v42 = vld [vmem:[%s26967_s5 + $0x168] ss:$20 sps:$4 sm:$0xff]  }
 0x459   : > { %7176 = vmatmul.mubr.bf16.vlgmr.msra.gmra.mrb[68].mxu0 %v23560_v50  ;;  %7224 = vmatmul.mubr.bf16.vlgmr.msra.gmra.mrb[76].mxu1 %v23770_v2 }
 0x45a   : > { %7183 = vmatprep.mubr.bf16.mxu0 %v23572_v49  ;;  %7231 = vmatprep.mubr.bf16.mxu1 %v23778_v13 }
 0x45b   : > { %8137 = vmatpush1.bf16.msra.mxu0 %v20348_v57  ;;  %8239 = vmatpush1.bf16.msra.mxu1 %v20351_v21  ;;  %v20413_v57 = vld [vmem:[%s26967_s5 + $0x19c] ss:$20 sps:$4 sm:$0xff]  }
 0x45c   : > { %8138 = vmatprep.subr.bf16.mxu0 %v20356_v61  ;;  %8240 = vmatprep.subr.bf16.mxu1 %v20359_v14  ;;  %v20408_v21 = vld [vmem:[%s26967_s5 + $0x190] ss:$20 sps:$4 sm:$0xff]   ;;  %v20411_v61 = vld [vmem:[%s26967_s5 + $0x198] ss:$20 sps:$4 sm:$0xff]  }
 0x45d   : > { %v20416_v14 = vld [vmem:[%s26967_s5 + $0x1bc] ss:$20 sps:$4 sm:$0xff]  }
 0x45f   : > { %8139 = vmatpush1.bf16.msra.mxu0 %v20354_v16  ;;  %8241 = vmatpush1.bf16.msra.mxu1 %v20357_v54  ;;  %v20414_v16 = vld [vmem:[%s26967_s5 + $0x1b8] ss:$20 sps:$4 sm:$0xff]   ;;  %v20417_v54 = vld [vmem:[%s26967_s5 + $0x1c0] ss:$20 sps:$4 sm:$0xff]  }
 0x460   : > { %8140 = vmatprep.subr.bf16.mxu0 %v20362_v22  ;;  %8242 = vmatprep.subr.bf16.mxu1 %v20365_v6  ;;  %v5686_v22 = vld [vmem:[#allocation3] sm:$0xfe] }
 0x461   : > { %7184 = vmatmul.mubr.bf16.gmra.mrb[72].mxu0 %v23596_v10  ;;  %7232 = vmatmul.mubr.bf16.gmra.mrb[80].mxu1 %v23802_v8  ;;  %v20420_v6 = vld [vmem:[%s26967_s5 + $0x1e0] ss:$20 sps:$4 sm:$0xff]   ;;  %v5698_v17 = vpack.c.bf16 %v23551_v18, %v5686_v22  ;;  %v20437_v18 = vld [vmem:[%s26967_s5 + $0x23c] ss:$20 sps:$4 sm:$0xff]   ;;  %v20459_v22 = vld [vmem:[%s26967_s5 + $0x2d8] ss:$20 sps:$4 sm:$0xff]  }
 0x462   : > { %8168 = vmatprep.mubr.bf16.mxu0 %v23927_v26  ;;  %8270 = vmatprep.mubr.bf16.mxu1 %v23927_v26 }
 0x463   : > { %8141 = vmatpush1.bf16.msra.mxu0 %v20360_v11  ;;  %8243 = vmatpush1.bf16.msra.mxu1 %v20363_v15  ;;  %v20428_v11 = vld [vmem:[%s26967_s5 + $0x20c] ss:$20 sps:$4 sm:$0xff]   ;;  %v20431_v15 = vld [vmem:[%s26967_s5 + $0x214] ss:$20 sps:$4 sm:$0xff]  }
 0x464   : > { %8142 = vmatprep.subr.bf16.mxu0 %v20368_v23  ;;  %8244 = vmatprep.subr.bf16.mxu1 %v20371_v24  ;;  %v20426_v23 = vld [vmem:[%s26967_s5 + $0x208] ss:$20 sps:$4 sm:$0xff]   ;;  %v20429_v24 = vld [vmem:[%s26967_s5 + $0x210] ss:$20 sps:$4 sm:$0xff]  }
 0x467   : > { %8143 = vmatpush1.bf16.msra.mxu0 %v20366_v12  ;;  %8245 = vmatpush1.bf16.msra.mxu1 %v20369_v30  ;;  %v20434_v12 = vld [vmem:[%s26967_s5 + $0x234] ss:$20 sps:$4 sm:$0xff]   ;;  %v5694_v30 = vld [vmem:[#allocation3 + $0x40] sm:$0x3] }
 0x468   : > { %8144 = vmatprep.subr.bf16.mxu0 %v20374_v25  ;;  %8246 = vmatprep.subr.bf16.mxu1 %v20377_v31  ;;  %v7243_v25 = vshll.u32 %v5698_v17, 16  ;;  %v20432_v31 = vld [vmem:[%s26967_s5 + $0x230] ss:$20 sps:$4 sm:$0xff]  }
 0x46b   : > { %8145 = vmatpush1.bf16.msra.mxu0 %v20372_v33  ;;  %8247 = vmatpush1.bf16.msra.mxu1 %v20375_v34  ;;  %v20435_v33 = vld [vmem:[%s26967_s5 + $0x238] ss:$20 sps:$4 sm:$0xff]   ;;  %v5702_v34 = vpack.c.bf16 %v5694_v30, %v5694_v30  ;;  %v20471_v30 = vld [vmem:[%s26967_s5 + $0x328] ss:$20 sps:$4 sm:$0xff]  }
 0x46c   : > { %8146 = vmatprep.subr.bf16.mxu0 %v20380_v35  ;;  %8248 = vmatprep.subr.bf16.mxu1 %v20383_v28  ;;  %v5689_v35 = vld [vmem:[#allocation3 + $0x18] sm:$0xfe] }
 0x46d   : > { %v20440_v28 = vld [vmem:[%s26967_s5 + $0x25c] ss:$20 sps:$4 sm:$0xff]  }
 0x46f   : > { %8147 = vmatpush1.bf16.msra.mxu0 %v20378_v60  ;;  %8249 = vmatpush1.bf16.msra.mxu1 %v20381_v58  ;;  %v20443_v60 = vld [vmem:[%s26967_s5 + $0x264] ss:$20 sps:$4 sm:$0xff]   ;;  %v7245_v58 = vrot.slane %v7243_v25, 1  ;;  %v20476_v25 = vld [vmem:[%s26967_s5 + $0x34c] ss:$20 sps:$4 sm:$0xff]  }
 0x470   : > { %8148 = vmatprep.subr.bf16.mxu0 %v20386_v36  ;;  %8250 = vmatprep.subr.bf16.mxu1 %v20389_v37  ;;  %v5701_v36 = vpack.c.bf16 %v23594_v20, %v5689_v35  ;;  %v20438_v37 = vld [vmem:[%s26967_s5 + $0x258] ss:$20 sps:$4 sm:$0xff]   ;;  %v20482_v35 = vld [vmem:[%s26967_s5 + $0x374] ss:$20 sps:$4 sm:$0xff]  }
 0x471   : > { %v20449_v20 = vld [vmem:[%s26967_s5 + $0x28c] ss:$20 sps:$4 sm:$0xff]  }
 0x473   : > { %8149 = vmatpush1.bf16.msra.mxu0 %v20384_v41  ;;  %8251 = vmatpush1.bf16.msra.mxu1 %v20387_v47  ;;  %v20441_v41 = vld [vmem:[%s26967_s5 + $0x260] ss:$20 sps:$4 sm:$0xff]   ;;  %v7241_v47 = vshrl.u32 %v5698_v17, 16  ;;  %v20462_v17 = vld [vmem:[%s26967_s5 + $0x2f8] ss:$20 sps:$4 sm:$0xff]  }
 0x474   : > { %8150 = vmatprep.subr.bf16.mxu0 %v20392_v43  ;;  %8252 = vmatprep.subr.bf16.mxu1 %v20395_v19  ;;  %v7248_v43 = vshll.u32 %v5702_v34, 16  ;;  %v20446_v19 = vld [vmem:[%s26967_s5 + $0x284] ss:$20 sps:$4 sm:$0xff]  }
 0x477   : > { %8151 = vmatpush1.bf16.msra.mxu0 %v20390_v45  ;;  %8253 = vmatpush1.bf16.msra.mxu1 %v20393_v46  ;;  %v7246_v45 = vor.u32 %v7245_v58, %v7241_v47  ;;  %v5697_v46 = vld [vmem:[#allocation3 + $0x58] sm:$0x3]  ;;  %v20489_v47 = vld [vmem:[%s26967_s5 + $0x3a0] ss:$20 sps:$4 sm:$0xff]  }
 0x478   : > { %8152 = vmatprep.subr.bf16.mxu0 %v20398_v48  ;;  %8254 = vmatprep.subr.bf16.mxu1 %v20401_v40  ;;  %v7279_v48 = vshll.u32 %v5701_v36, 16  ;;  %v7250_v40 = vrot.slane %v7248_v43, 1  ;;  %v20483_v58 = vld [vmem:[%s26967_s5 + $0x378] ss:$20 sps:$4 sm:$0xff]  }
 0x479   : > { %v20494_v43 = vld [vmem:[%s26967_s5 + $0x3c4] ss:$20 sps:$4 sm:$0xff]  }
 0x47b   : > { %8153 = vmatpush1.bf16.msra.mxu0 %v20396_v51  ;;  %8255 = vmatpush1.bf16.msra.mxu1 %v20399_v52  ;;  %v20444_v51 = vld [vmem:[%s26967_s5 + $0x280] ss:$20 sps:$4 sm:$0xff]   ;;  %v20447_v52 = vld [vmem:[%s26967_s5 + $0x288] ss:$20 sps:$4 sm:$0xff]  }
 0x47c   : > { %8154 = vmatprep.subr.bf16.mxu0 %v20404_v53  ;;  %8256 = vmatprep.subr.bf16.mxu1 %v20407_v3  ;;  %v24095_v53 = vpack.c.bf16 %v5697_v46, %v5697_v46  ;;  %v24098_v3 = vsel %vm7239_vm4, %v7246_v45, %v7250_v40  ;;  %v20495_v45 = vld [vmem:[%s26967_s5 + $0x3c8] ss:$20 sps:$4 sm:$0xff]   ;;  %v20500_v46 = vld [vmem:[%s26967_s5 + $0x3ec] ss:$20 sps:$4 sm:$0xff]  }
 0x47d   : > { %v20498_v40 = vld [vmem:[%s26967_s5 + $0x3e8] ss:$20 sps:$4 sm:$0xff]  }
 0x47f   : > { %8155 = vmatpush1.bf16.msra.mxu0 %v20402_v42  ;;  %8257 = vmatpush1.bf16.msra.mxu1 %v20405_v55  ;;  %v24101_v42 = vshrl.u32 %v23887_v63, 16  ;;  %v20452_v55 = vld [vmem:[%s26967_s5 + $0x2ac] ss:$20 sps:$4 sm:$0xff]   ;;  %v20450_v63 = vld [vmem:[%s26967_s5 + $0x2a8] ss:$20 sps:$4 sm:$0xff]  }
 0x480   : > { %8156 = vmatprep.subr.bf16.mxu0 %v20410_v56  ;;  %8258 = vmatprep.subr.bf16.mxu1 %v20413_v57  ;;  %v20455_v56 = vld [vmem:[%s26967_s5 + $0x2b4] ss:$20 sps:$4 sm:$0xff]   ;;  %v7281_v57 = vrot.slane %v7279_v48, 1 }
 0x481   : > { %v20503_v48 = vld [vmem:[%s26967_s5 + $0x3f4] ss:$20 sps:$4 sm:$0xff]  }
 0x483   : > { %8157 = vmatpush1.bf16.msra.mxu0 %v20408_v21  ;;  %8259 = vmatpush1.bf16.msra.mxu1 %v20411_v61  ;;  %v20453_v21 = vld [vmem:[%s26967_s5 + $0x2b0] ss:$20 sps:$4 sm:$0xff]   ;;  %v20458_v61 = vld [vmem:[%s26967_s5 + $0x2d4] ss:$20 sps:$4 sm:$0xff]  }
 0x484   : > { %8158 = vmatprep.subr.bf16.mxu0 %v20416_v14  ;;  %8260 = vmatprep.subr.bf16.mxu1 %v20419_v59  ;;  %v7277_v14 = vshrl.u32 %v5701_v36, 16  ;;  %v7284_v59 = vshll.u32 %v24095_v53, 16  ;;  %v20488_v36 = vld [vmem:[%s26967_s5 + $0x39c] ss:$20 sps:$4 sm:$0xff]  }
 0x487   : > { %8159 = vmatpush1.bf16.msra.mxu0 %v20414_v16  ;;  %8261 = vmatpush1.bf16.msra.mxu1 %v20417_v54  ;;  %v20461_v16 = vld [vmem:[%s26967_s5 + $0x2dc] ss:$20 sps:$4 sm:$0xff]   ;;  %v7282_v54 = vor.u32 %v7281_v57, %v7277_v14  ;;  %v20507_v57 = vld [vmem:[%s26967_s5 + $0x418] ss:$20 sps:$4 sm:$0xff]   ;;  %v20513_v14 = vld [vmem:[%s26967_s5 + $0x440] ss:$20 sps:$4 sm:$0xff]  }
 0x488   : > { %8160 = vmatprep.subr.bf16.mxu0 %v20422_v0  ;;  %8262 = vmatprep.subr.bf16.mxu1 %v20425_v5  ;;  %v20456_v0 = vld [vmem:[%s26967_s5 + $0x2d0] ss:$20 sps:$4 sm:$0xff]   ;;  %v24129_v5 = vshrl.u32 %v5702_v34, 16 }
 0x489   : > { %v20477_v34 = vld [vmem:[%s26967_s5 + $0x350] ss:$20 sps:$4 sm:$0xff]  }
 0x48b   : > { %8161 = vmatpush1.bf16.msra.mxu0 %v20420_v6  ;;  %8263 = vmatpush1.bf16.msra.mxu1 %v20423_v7  ;;  %v7286_v6 = vrot.slane %v7284_v59, 1  ;;  %v20464_v7 = vld [vmem:[%s26967_s5 + $0x2fc] ss:$20 sps:$4 sm:$0xff]   ;;  %v20518_v59 = vld [vmem:[%s26967_s5 + $0x464] ss:$20 sps:$4 sm:$0xff]  }
 0x48c   : > { %8162 = vmatprep.subr.bf16.mxu0 %v20428_v11  ;;  %8264 = vmatprep.subr.bf16.mxu1 %v20431_v15  ;;  %v20467_v11 = vld [vmem:[%s26967_s5 + $0x304] ss:$20 sps:$4 sm:$0xff]  }
 0x48d   : > { %v24143_v15 = vsel %vm7239_vm4, %v7282_v54, %v7286_v6  ;;  %v5688_v54 = vld [vmem:[#allocation3 + $0x10] sm:$0xfe]  ;;  %v20524_v6 = vld [vmem:[%s26967_s5 + $0x48c] ss:$20 sps:$4 sm:$0xff]  }
 0x48f   : > { %8163 = vmatpush1.bf16.msra.mxu0 %v20426_v23  ;;  %8265 = vmatpush1.bf16.msra.mxu1 %v20429_v24  ;;  %v20465_v23 = vld [vmem:[%s26967_s5 + $0x300] ss:$20 sps:$4 sm:$0xff]   ;;  %v20470_v24 = vld [vmem:[%s26967_s5 + $0x324] ss:$20 sps:$4 sm:$0xff]  }
 0x490   : > { %8164 = vmatprep.subr.bf16.mxu0 %v20434_v12  ;;  %8266 = vmatprep.subr.bf16.mxu1 %v20437_v18  ;;  %v20473_v12 = vld [vmem:[%s26967_s5 + $0x32c] ss:$20 sps:$4 sm:$0xff]  }
 0x491   : > { %v20468_v18 = vld [vmem:[%s26967_s5 + $0x320] ss:$20 sps:$4 sm:$0xff]  }
 0x493   : > { %8165 = vmatpush1.bf16.msra.mxu0 %v20432_v31  ;;  %8267 = vmatpush1.bf16.msra.mxu1 %v20435_v33  ;;  %v20479_v31 = vld [vmem:[%s26967_s5 + $0x354] ss:$20 sps:$4 sm:$0xff]  }
 0x494   : > { %8166 = vmatprep.subr.bf16.mxu0 %v20440_v28  ;;  %8268 = vmatprep.subr.bf16.mxu1 %v20443_v60  ;;  %v20474_v33 = vld [vmem:[%s26967_s5 + $0x348] ss:$20 sps:$4 sm:$0xff]   ;;  %v20480_v60 = vld [vmem:[%s26967_s5 + $0x370] ss:$20 sps:$4 sm:$0xff]  }
 0x495   : > { %v20485_v28 = vld [vmem:[%s26967_s5 + $0x37c] ss:$20 sps:$4 sm:$0xff]  }
 0x497   : > { %8167 = vmatpush1.bf16.msra.mxu0 %v20438_v37  ;;  %8269 = vmatpush1.bf16.msra.mxu1 %v20441_v41  ;;  %v20491_v37 = vld [vmem:[%s26967_s5 + $0x3a4] ss:$20 sps:$4 sm:$0xff]  }
 0x498   : > { %8187 = vmatprep.subr.bf16.mxu0 %v20446_v19  ;;  %8289 = vmatprep.subr.bf16.mxu1 %v20449_v20  ;;  %v20486_v41 = vld [vmem:[%s26967_s5 + $0x398] ss:$20 sps:$4 sm:$0xff]   ;;  %v20492_v20 = vld [vmem:[%s26967_s5 + $0x3c0] ss:$20 sps:$4 sm:$0xff]  }
 0x499   : > { %v20497_v19 = vld [vmem:[%s26967_s5 + $0x3cc] ss:$20 sps:$4 sm:$0xff]  }
 0x49a   : > { %8169 = vmatmul.mubr.bf16.vlgmr.msra.gmra.mrb[56].mxu0 %v24098_v3  ;;  %8271 = vmatmul.mubr.bf16.vlgmr.msra.gmra.mrb[64].mxu1 %v24098_v3 }
 0x49b   : > { %8178 = vmatprep.mubr.bf16.mxu0 %v24101_v42  ;;  %8188 = vmatpush1.bf16.msra.mxu0 %v20444_v51  ;;  %v20501_v51 = vld [vmem:[%s26967_s5 + $0x3f0] ss:$20 sps:$4 sm:$0xff]  }
 0x49c   : > { %8280 = vmatprep.mubr.bf16.mxu1 %v24101_v42  ;;  %8290 = vmatpush1.bf16.msra.mxu1 %v20447_v52  ;;  %v20506_v52 = vld [vmem:[%s26967_s5 + $0x414] ss:$20 sps:$4 sm:$0xff]  }
 0x49d   : > { %8189 = vmatprep.subr.bf16.mxu0 %v20452_v55  ;;  %8291 = vmatprep.subr.bf16.mxu1 %v20455_v56  ;;  %v20509_v55 = vld [vmem:[%s26967_s5 + $0x41c] ss:$20 sps:$4 sm:$0xff]  }
 0x49e   : > { %v20504_v56 = vld [vmem:[%s26967_s5 + $0x410] ss:$20 sps:$4 sm:$0xff]  }
 0x49f   : > { %8190 = vmatpush1.bf16.msra.mxu0 %v20450_v63  ;;  %v20512_v63 = vld [vmem:[%s26967_s5 + $0x43c] ss:$20 sps:$4 sm:$0xff]  }
 0x4a0   : > { %8292 = vmatpush1.bf16.msra.mxu1 %v20453_v21  ;;  %8191 = vmatprep.subr.bf16.mxu0 %v20458_v61  ;;  %v20515_v21 = vld [vmem:[%s26967_s5 + $0x444] ss:$20 sps:$4 sm:$0xff]  }
 0x4a1   : > { %8293 = vmatprep.subr.bf16.mxu1 %v20461_v16  ;;  %v20510_v61 = vld [vmem:[%s26967_s5 + $0x438] ss:$20 sps:$4 sm:$0xff]  }
 0x4a2   : > { %8179 = vmatmul.mubr.bf16.gmra.mrb[76].mxu0 %v24129_v5  ;;  %8281 = vmatmul.mubr.bf16.gmra.mrb[84].mxu1 %v24129_v5  ;;  %v20521_v16 = vld [vmem:[%s26967_s5 + $0x46c] ss:$20 sps:$4 sm:$0xff]  }
 0x4a3   : > { %8192 = vmatpush1.bf16.msra.mxu0 %v20456_v0  ;;  %8219 = vmatprep.mubr.bf16.mxu0 %v24143_v15  ;;  %v20516_v0 = vld [vmem:[%s26967_s5 + $0x460] ss:$20 sps:$4 sm:$0xff]  }
 0x4a4   : > { %8294 = vmatpush1.bf16.msra.mxu1 %v20459_v22  ;;  %8321 = vmatprep.mubr.bf16.mxu1 %v24143_v15  ;;  %v20519_v22 = vld [vmem:[%s26967_s5 + $0x468] ss:$20 sps:$4 sm:$0xff]  }
 0x4a5   : > { %8193 = vmatprep.subr.bf16.mxu0 %v20464_v7  ;;  %8295 = vmatprep.subr.bf16.mxu1 %v20467_v11  ;;  %v20527_v7 = vld [vmem:[%s26967_s5 + $0x494] ss:$20 sps:$4 sm:$0xff]   ;;  %v5700_v11 = vpack.c.bf16 %v23767_v9, %v5688_v54  ;;  %v20533_v9 = vld [vmem:[%s26967_s5 + $0x4bc] ss:$20 sps:$4 sm:$0xff]  }
 0x4a7   : > { %8194 = vmatpush1.bf16.msra.mxu0 %v20462_v17  ;;  %v20522_v17 = vld [vmem:[%s26967_s5 + $0x488] ss:$20 sps:$4 sm:$0xff]  }
 0x4a8   : > { %8296 = vmatpush1.bf16.msra.mxu1 %v20465_v23  ;;  %8195 = vmatprep.subr.bf16.mxu0 %v20470_v24  ;;  %v20525_v23 = vld [vmem:[%s26967_s5 + $0x490] ss:$20 sps:$4 sm:$0xff]   ;;  %v20530_v24 = vld [vmem:[%s26967_s5 + $0x4b4] ss:$20 sps:$4 sm:$0xff]  }
 0x4a9   : > { %8297 = vmatprep.subr.bf16.mxu1 %v20473_v12  ;;  %v5696_v12 = vld [vmem:[#allocation3 + $0x50] sm:$0x3] }
 0x4ab   : > { %8196 = vmatpush1.bf16.msra.mxu0 %v20468_v18  ;;  %v7267_v18 = vshll.u32 %v5700_v11, 16 }
 0x4ac   : > { %8298 = vmatpush1.bf16.msra.mxu1 %v20471_v30  ;;  %8197 = vmatprep.subr.bf16.mxu0 %v20476_v25  ;;  %v20528_v30 = vld [vmem:[%s26967_s5 + $0x4b0] ss:$20 sps:$4 sm:$0xff]   ;;  %v5704_v25 = vpack.c.bf16 %v5696_v12, %v5696_v12 }
 0x4ad   : > { %8299 = vmatprep.subr.bf16.mxu1 %v20479_v31  ;;  %v20531_v31 = vld [vmem:[%s26967_s5 + $0x4b8] ss:$20 sps:$4 sm:$0xff]   ;;  %v20558_v12 = vld [vmem:[%s26967_s5 + $0xb0] ss:$20 sps:$4 sm:$0xff]  }
 0x4ae   : > { %v24346_v54 = vshrl.u32 %v5704_v25, 16 }
 0x4af   : > { %8198 = vmatpush1.bf16.msra.mxu0 %v20474_v33  ;;  %v20536_v33 = vld [vmem:[%s26967_s5 + $0x4dc] ss:$20 sps:$4 sm:$0xff]  }
 0x4b0   : > { %8300 = vmatpush1.bf16.msra.mxu1 %v20477_v34  ;;  %8199 = vmatprep.subr.bf16.mxu0 %v20482_v35  ;;  %v20539_v34 = vld [vmem:[%s26967_s5 + $0x4e4] ss:$20 sps:$4 sm:$0xff]   ;;  %v7269_v35 = vrot.slane %v7267_v18, 1 }
 0x4b1   : > { %8301 = vmatprep.subr.bf16.mxu1 %v20485_v28  ;;  %v20560_v18 = vld [vmem:[%s26967_s5 + $0x218] ss:$20 sps:$4 sm:$0xff]  }
 0x4b3   : > { %8200 = vmatpush1.bf16.msra.mxu0 %v20480_v60 }
 0x4b4   : > { %8302 = vmatpush1.bf16.msra.mxu1 %v20483_v58  ;;  %8201 = vmatprep.subr.bf16.mxu0 %v20488_v36  ;;  %v20534_v58 = vld [vmem:[%s26967_s5 + $0x4d8] ss:$20 sps:$4 sm:$0xff]   ;;  %v7265_v36 = vshrl.u32 %v5700_v11, 16  ;;  %v20554_v11 = vld [vmem:[%s26967_s5 + $0x88] ss:$20 sps:$4 sm:$0xff]  }
 0x4b5   : > { %8303 = vmatprep.subr.bf16.mxu1 %v20491_v37  ;;  %v7272_v37 = vshll.u32 %v5704_v25, 16  ;;  %v20562_v25 = vld [vmem:[%s26967_s5 + $0xd8] ss:$20 sps:$4 sm:$0xff]  }
 0x4b7   : > { %8202 = vmatpush1.bf16.msra.mxu0 %v20486_v41  ;;  %v20537_v41 = vld [vmem:[%s26967_s5 + $0x4e0] ss:$20 sps:$4 sm:$0xff]  }
 0x4b8   : > { %8304 = vmatpush1.bf16.msra.mxu1 %v20489_v47  ;;  %8203 = vmatprep.subr.bf16.mxu0 %v20494_v43 }
 0x4b9   : > { %8305 = vmatprep.subr.bf16.mxu1 %v20497_v19  ;;  %v20540_v19 = vld [vmem:[%s26967_s5 + $0x150] ss:$20 sps:$4 sm:$0xff]  }
 0x4bb   : > { %8204 = vmatpush1.bf16.msra.mxu0 %v20492_v20 }
 0x4bc   : > { %8306 = vmatpush1.bf16.msra.mxu1 %v20495_v45  ;;  %8205 = vmatprep.subr.bf16.mxu0 %v20500_v46  ;;  %v7270_v46 = vor.u32 %v7269_v35, %v7265_v36  ;;  %v20566_v35 = vld [vmem:[%s26967_s5 + $0x100] ss:$20 sps:$4 sm:$0xff]   ;;  %v20568_v36 = vld [vmem:[%s26967_s5 + $0x268] ss:$20 sps:$4 sm:$0xff]  }
 0x4bd   : > { %8307 = vmatprep.subr.bf16.mxu1 %v20503_v48  ;;  %v20541_v48 = vld [vmem:[%s26967_s5 + $0x3d0] ss:$20 sps:$4 sm:$0xff]  }
 0x4bf   : > { %8206 = vmatpush1.bf16.msra.mxu0 %v20498_v40 }
 0x4c0   : > { %8308 = vmatpush1.bf16.msra.mxu1 %v20501_v51  ;;  %8207 = vmatprep.subr.bf16.mxu0 %v20506_v52  ;;  %v7274_v52 = vrot.slane %v7272_v37, 1  ;;  %v20569_v37 = vld [vmem:[%s26967_s5 + $0x4e8] ss:$20 sps:$4 sm:$0xff]  }
 0x4c1   : > { %8309 = vmatprep.subr.bf16.mxu1 %v20509_v55  ;;  %v20542_v55 = vld [vmem:[%s26967_s5 + $0x10] ss:$20 sps:$4 sm:$0xff]  }
 0x4c3   : > { %8208 = vmatpush1.bf16.msra.mxu0 %v20504_v56  ;;  %v24316_v56 = vsel %vm7239_vm4, %v7270_v46, %v7274_v52  ;;  %v20572_v46 = vld [vmem:[%s26967_s5 + $0xf00] ss:$20 sps:$4 sm:$0xff]   ;;  %v20578_v52 = vld [vmem:[%s26967_s5 + $0xf28] ss:$20 sps:$4 sm:$0xff]  }
 0x4c4   : > { %8310 = vmatpush1.bf16.msra.mxu1 %v20507_v57  ;;  %8209 = vmatprep.subr.bf16.mxu0 %v20512_v63  ;;  %v24319_v57 = vshrl.u32 %v24095_v53, 16  ;;  %v20543_v63 = vld [vmem:[%s26967_s5 + $0x290] ss:$20 sps:$4 sm:$0xff]   ;;  %v20546_v53 = vld [vmem:[%s26967_s5 + $0x38] ss:$20 sps:$4 sm:$0xff]  }
 0x4c5   : > { %8311 = vmatprep.subr.bf16.mxu1 %v20515_v21  ;;  %v20544_v21 = vld [vmem:[%s26967_s5 + $0x178] ss:$20 sps:$4 sm:$0xff]  }
 0x4c7   : > { %8210 = vmatpush1.bf16.msra.mxu0 %v20510_v61  ;;  %v20545_v61 = vld [vmem:[%s26967_s5 + $0x3f8] ss:$20 sps:$4 sm:$0xff]  }
 0x4c8   : > { %8312 = vmatpush1.bf16.msra.mxu1 %v20513_v14  ;;  %8211 = vmatprep.subr.bf16.mxu0 %v20518_v59  ;;  %v20547_v14 = vld [vmem:[%s26967_s5 + $0x2b8] ss:$20 sps:$4 sm:$0xff]   ;;  %v20548_v59 = vld [vmem:[%s26967_s5 + $0x1a0] ss:$20 sps:$4 sm:$0xff]  }
 0x4c9   : > { %8313 = vmatprep.subr.bf16.mxu1 %v20521_v16  ;;  %v20549_v16 = vld [vmem:[%s26967_s5 + $0x420] ss:$20 sps:$4 sm:$0xff]  }
 0x4cb   : > { %8212 = vmatpush1.bf16.msra.mxu0 %v20516_v0  ;;  %v20550_v0 = vld [vmem:[%s26967_s5 + $0x60] ss:$20 sps:$4 sm:$0xff]  }
 0x4cc   : > { %8314 = vmatpush1.bf16.msra.mxu1 %v20519_v22  ;;  %8213 = vmatprep.subr.bf16.mxu0 %v20524_v6  ;;  %v20551_v22 = vld [vmem:[%s26967_s5 + $0x2e0] ss:$20 sps:$4 sm:$0xff]   ;;  %v20552_v6 = vld [vmem:[%s26967_s5 + $0x1c8] ss:$20 sps:$4 sm:$0xff]  }
 0x4cd   : > { %8315 = vmatprep.subr.bf16.mxu1 %v20527_v7  ;;  %v20553_v7 = vld [vmem:[%s26967_s5 + $0x448] ss:$20 sps:$4 sm:$0xff]  }
 0x4cf   : > { %8214 = vmatpush1.bf16.msra.mxu0 %v20522_v17  ;;  %v20555_v17 = vld [vmem:[%s26967_s5 + $0x308] ss:$20 sps:$4 sm:$0xff]  }
 0x4d0   : > { %8316 = vmatpush1.bf16.msra.mxu1 %v20525_v23  ;;  %8215 = vmatprep.subr.bf16.mxu0 %v20530_v24  ;;  %v20556_v23 = vld [vmem:[%s26967_s5 + $0x1f0] ss:$20 sps:$4 sm:$0xff]  }
 0x4d1   : > { %8317 = vmatprep.subr.bf16.mxu1 %v20533_v9  ;;  %v20557_v24 = vld [vmem:[%s26967_s5 + $0x470] ss:$20 sps:$4 sm:$0xff]  }
 0x4d2   : > { %v20559_v9 = vld [vmem:[%s26967_s5 + $0x330] ss:$20 sps:$4 sm:$0xff]  }
 0x4d3   : > { %8216 = vmatpush1.bf16.msra.mxu0 %v20528_v30  ;;  %v24292_v28 = vpop.f32.mrb[60].mxu0  ;;  %v24294_v60 = vpop.f32.mrb[68].mxu1  ;;  %v20561_v30 = vld [vmem:[%s26967_s5 + $0x498] ss:$20 sps:$4 sm:$0xff]  }
 0x4d4   : > { %8318 = vmatpush1.bf16.msra.mxu1 %v20531_v31  ;;  %8217 = vmatprep.subr.bf16.mxu0 %v20536_v33  ;;  %v24302_v47 = vpop.f32.mrb[61].mxu0  ;;  %v24304_v43 = vpop.f32.mrb[69].mxu1  ;;  %v20563_v31 = vld [vmem:[%s26967_s5 + $0x358] ss:$20 sps:$4 sm:$0xff]   ;;  %v20564_v33 = vld [vmem:[%s26967_s5 + $0x240] ss:$20 sps:$4 sm:$0xff]  }
 0x4d5   : > { %8319 = vmatprep.subr.bf16.mxu1 %v20539_v34  ;;  %v6987_v20 = vpop.f32.mrb[62].mxu0  ;;  %v7089_v45 = vpop.f32.mrb[70].mxu1  ;;  %v20565_v34 = vld [vmem:[%s26967_s5 + $0x4c0] ss:$20 sps:$4 sm:$0xff]  }
 0x4d6   : > { %v6988_v40 = vpop.f32.mrb[63].mxu0  ;;  %v7090_v51 = vpop.f32.mrb[71].mxu1  ;;  %v20574_v20 = vld [vmem:[%s26967_s5 + $0xf04] ss:$20 sps:$4 sm:$0xff]   ;;  %v20577_v45 = vld [vmem:[%s26967_s5 + $0xf0c] ss:$20 sps:$4 sm:$0xff]  }
 0x4d7   : > { %8218 = vmatpush1.bf16.msra.mxu0 %v20534_v58  ;;  %v20567_v58 = vld [vmem:[%s26967_s5 + $0x380] ss:$20 sps:$4 sm:$0xff]  }
 0x4d8   : > { %8320 = vmatpush1.bf16.msra.mxu1 %v20537_v41  ;;  %18524 = vmatprep.subr.bf16.mxu0 %v20540_v19  ;;  %v20570_v41 = vld [vmem:[%s26967_s5 + $0x128] ss:$20 sps:$4 sm:$0xff]   ;;  %v20580_v40 = vld [vmem:[%s26967_s5 + $0xf2c] ss:$20 sps:$4 sm:$0xff]  }
 0x4d9   : > { %18552 = vmatprep.subr.bf16.mxu1 %v20541_v48  ;;  %v20571_v19 = vld [vmem:[%s26967_s5 + $0x3a8] ss:$20 sps:$4 sm:$0xff]  }
 0x4da   : > { %8220 = vmatmul.mubr.bf16.vlgmr.msra.gmra.mrb[56].mxu0 %v24316_v56  ;;  %v20575_v48 = vld [vmem:[%s26967_s5 + $0xf08] ss:$20 sps:$4 sm:$0xff]  }
 0x4db   : > { %8322 = vmatmul.mubr.bf16.vlgmr.msra.gmra.mrb[64].mxu1 %v24316_v56  ;;  %8229 = vmatprep.mubr.bf16.mxu0 %v24319_v57  ;;  %v20583_v51 = vld [vmem:[%s26967_s5 + $0xf34] ss:$20 sps:$4 sm:$0xff]  }
 0x4dc   : > { %8331 = vmatprep.mubr.bf16.mxu1 %v24319_v57  ;;  %18525 = vmatpush3.bf16.msra.mxu0 %v20542_v55  ;;  %v20581_v55 = vld [vmem:[%s26967_s5 + $0xf30] ss:$20 sps:$4 sm:$0xff]  }
 0x4dd   : > { %18553 = vmatpush3.bf16.msra.mxu1 %v20543_v63  ;;  %18526 = vmatprep.subr.bf16.mxu0 %v20544_v21  ;;  %v20586_v63 = vld [vmem:[%s26967_s5 + $0xf54] ss:$20 sps:$4 sm:$0xff]   ;;  %v20589_v21 = vld [vmem:[%s26967_s5 + $0xf5c] ss:$20 sps:$4 sm:$0xff]  }
 0x4de   : > { %18554 = vmatprep.subr.bf16.mxu1 %v20545_v61  ;;  %v20584_v61 = vld [vmem:[%s26967_s5 + $0xf50] ss:$20 sps:$4 sm:$0xff]  }
 0x4e0   : > { %18527 = vmatpush3.bf16.msra.mxu0 %v20546_v53  ;;  %v20587_v53 = vld [vmem:[%s26967_s5 + $0xf58] ss:$20 sps:$4 sm:$0xff]  }
 0x4e1   : > { %18555 = vmatpush3.bf16.msra.mxu1 %v20547_v14  ;;  %18528 = vmatprep.subr.bf16.mxu0 %v20548_v59  ;;  %v20592_v14 = vld [vmem:[%s26967_s5 + $0xf7c] ss:$20 sps:$4 sm:$0xff]   ;;  %v20595_v59 = vld [vmem:[%s26967_s5 + $0xf84] ss:$20 sps:$4 sm:$0xff]  }
 0x4e2   : > { %8230 = vmatmul.mubr.bf16.gmra.mrb[80].mxu0 %v24346_v54  ;;  %18556 = vmatprep.subr.bf16.mxu1 %v20549_v16  ;;  %v20590_v16 = vld [vmem:[%s26967_s5 + $0xf78] ss:$20 sps:$4 sm:$0xff]  }
 0x4e3   : > { %8332 = vmatmul.mubr.bf16.gmra.mrb[88].mxu1 %v24346_v54  ;;  %8372 = vmatprep.mubr.bf16.mxu0 %v23927_v26 }
 0x4e4   : > { %18529 = vmatpush3.bf16.msra.mxu0 %v20550_v0  ;;  %8420 = vmatprep.mubr.bf16.mxu1 %v24143_v15  ;;  %v20593_v0 = vld [vmem:[%s26967_s5 + $0xf80] ss:$20 sps:$4 sm:$0xff]  }
 0x4e5   : > { %18557 = vmatpush3.bf16.msra.mxu1 %v20551_v22  ;;  %18530 = vmatprep.subr.bf16.mxu0 %v20552_v6  ;;  %v20598_v22 = vld [vmem:[%s26967_s5 + $0xfa4] ss:$20 sps:$4 sm:$0xff]   ;;  %v20601_v6 = vld [vmem:[%s26967_s5 + $0xfac] ss:$20 sps:$4 sm:$0xff]  }
 0x4e6   : > { %18558 = vmatprep.subr.bf16.mxu1 %v20553_v7  ;;  %v20596_v7 = vld [vmem:[%s26967_s5 + $0xfa0] ss:$20 sps:$4 sm:$0xff]  }
 0x4e8   : > { %18531 = vmatpush3.bf16.msra.mxu0 %v20554_v11  ;;  %v20599_v11 = vld [vmem:[%s26967_s5 + $0xfa8] ss:$20 sps:$4 sm:$0xff]  }
 0x4e9   : > { %18559 = vmatpush3.bf16.msra.mxu1 %v20555_v17  ;;  %18532 = vmatprep.subr.bf16.mxu0 %v20556_v23  ;;  %v20604_v17 = vld [vmem:[%s26967_s5 + $0xfcc] ss:$20 sps:$4 sm:$0xff]   ;;  %v20607_v23 = vld [vmem:[%s26967_s5 + $0xfd4] ss:$20 sps:$4 sm:$0xff]  }
 0x4ea   : > { %18560 = vmatprep.subr.bf16.mxu1 %v20557_v24  ;;  %v20602_v24 = vld [vmem:[%s26967_s5 + $0xfc8] ss:$20 sps:$4 sm:$0xff]  }
 0x4ec   : > { %18533 = vmatpush3.bf16.msra.mxu0 %v20558_v12  ;;  %v20605_v12 = vld [vmem:[%s26967_s5 + $0xfd0] ss:$20 sps:$4 sm:$0xff]  }
 0x4ed   : > { %18561 = vmatpush3.bf16.msra.mxu1 %v20559_v9  ;;  %18534 = vmatprep.subr.bf16.mxu0 %v20560_v18  ;;  %v20610_v9 = vld [vmem:[%s26967_s5 + $0xff4] ss:$20 sps:$4 sm:$0xff]   ;;  %v20613_v18 = vld [vmem:[%s26967_s5 + $0xffc] ss:$20 sps:$4 sm:$0xff]  }
 0x4ee   : > { %18562 = vmatprep.subr.bf16.mxu1 %v20561_v30  ;;  %v20608_v30 = vld [vmem:[%s26967_s5 + $0xff0] ss:$20 sps:$4 sm:$0xff]  }
 0x4f0   : > { %18535 = vmatpush3.bf16.msra.mxu0 %v20562_v25  ;;  %v20611_v25 = vld [vmem:[%s26967_s5 + $0xff8] ss:$20 sps:$4 sm:$0xff]  }
 0x4f1   : > { %18563 = vmatpush3.bf16.msra.mxu1 %v20563_v31  ;;  %18536 = vmatprep.subr.bf16.mxu0 %v20564_v33  ;;  %v20616_v31 = vld [vmem:[%s26967_s5 + $0x101c] ss:$20 sps:$4 sm:$0xff]  }
 0x4f2   : > { %18564 = vmatprep.subr.bf16.mxu1 %v20565_v34 }
 0x4f4   : > { %18537 = vmatpush3.bf16.msra.mxu0 %v20566_v35  ;;  %v20619_v35 = vld [vmem:[%s26967_s5 + $0x1024] ss:$20 sps:$4 sm:$0xff]  }
 0x4f5   : > { %18565 = vmatpush3.bf16.msra.mxu1 %v20567_v58  ;;  %18538 = vmatprep.subr.bf16.mxu0 %v20568_v36 }
 0x4f6   : > { %18566 = vmatprep.subr.bf16.mxu1 %v20569_v37 }
 0x4f8   : > { %18539 = vmatpush3.bf16.msra.mxu0 %v20570_v41 }
 0x4f9   : > { %18567 = vmatpush3.bf16.msra.mxu1 %v20571_v19  ;;  %10068 = vmatprep.subr.bf16.mxu0 %v20574_v20 }
 0x4fa   : > { %10170 = vmatprep.subr.bf16.mxu1 %v20577_v45  ;;  %v20614_v45 = vld [vmem:[%s26967_s5 + $0x1018] ss:$20 sps:$4 sm:$0xff]  }
 0x4fb   : > { %8373 = vmatmul.mubr.bf16.vlgmr.msra.gmra.mrb[84].mxu0 %v24098_v3 }
 0x4fc   : > { %8421 = vmatmul.mubr.bf16.vlgmr.msra.gmra.mrb[92].mxu1 %v24316_v56  ;;  %8380 = vmatprep.mubr.bf16.mxu0 %v24101_v42 }
 0x4fd   : > { %8428 = vmatprep.mubr.bf16.mxu1 %v24319_v57  ;;  %10069 = vmatpush1.bf16.msra.mxu0 %v20572_v46 }
 0x4fe   : > { %10171 = vmatpush1.bf16.msra.mxu1 %v20575_v48  ;;  %10070 = vmatprep.subr.bf16.mxu0 %v20580_v40 }
 0x4ff   : > { %10172 = vmatprep.subr.bf16.mxu1 %v20583_v51  ;;  %v20620_v51 = vld [vmem:[%s26967_s5 + $0x1040] ss:$20 sps:$4 sm:$0xff]  }
 0x501   : > { %10071 = vmatpush1.bf16.msra.mxu0 %v20578_v52  ;;  %v20623_v52 = vld [vmem:[%s26967_s5 + $0x1048] ss:$20 sps:$4 sm:$0xff]  }
 0x502   : > { %10173 = vmatpush1.bf16.msra.mxu1 %v20581_v55  ;;  %10072 = vmatprep.subr.bf16.mxu0 %v20586_v63  ;;  %v20628_v55 = vld [vmem:[%s26967_s5 + $0x106c] ss:$20 sps:$4 sm:$0xff]   ;;  %v20631_v63 = vld [vmem:[%s26967_s5 + $0x1074] ss:$20 sps:$4 sm:$0xff]  }
 0x503   : > { %8381 = vmatmul.mubr.bf16.gmra.mrb[88].mxu0 %v24129_v5  ;;  %10174 = vmatprep.subr.bf16.mxu1 %v20589_v21  ;;  %v20626_v21 = vld [vmem:[%s26967_s5 + $0x1068] ss:$20 sps:$4 sm:$0xff]  }
 0x504   : > { %8429 = vmatmul.mubr.bf16.gmra.mrb[96].mxu1 %v24346_v54  ;;  %10100 = vmatprep.mubr.bf16.mxu0 %v23554_v44 }
 0x505   : > { %10073 = vmatpush1.bf16.msra.mxu0 %v20584_v61  ;;  %10202 = vmatprep.mubr.bf16.mxu1 %v23554_v44  ;;  %v20629_v61 = vld [vmem:[%s26967_s5 + $0x1070] ss:$20 sps:$4 sm:$0xff]  }
 0x506   : > { %10175 = vmatpush1.bf16.msra.mxu1 %v20587_v53  ;;  %10074 = vmatprep.subr.bf16.mxu0 %v20592_v14  ;;  %v20634_v53 = vld [vmem:[%s26967_s5 + $0x1094] ss:$20 sps:$4 sm:$0xff]   ;;  %v20637_v14 = vld [vmem:[%s26967_s5 + $0x109c] ss:$20 sps:$4 sm:$0xff]  }
 0x507   : > { %10176 = vmatprep.subr.bf16.mxu1 %v20595_v59  ;;  %v20632_v59 = vld [vmem:[%s26967_s5 + $0x1090] ss:$20 sps:$4 sm:$0xff]  }
 0x509   : > { %10075 = vmatpush1.bf16.msra.mxu0 %v20590_v16  ;;  %v20635_v16 = vld [vmem:[%s26967_s5 + $0x1098] ss:$20 sps:$4 sm:$0xff]  }
 0x50a   : > { %10177 = vmatpush1.bf16.msra.mxu1 %v20593_v0  ;;  %10076 = vmatprep.subr.bf16.mxu0 %v20598_v22  ;;  %v20640_v0 = vld [vmem:[%s26967_s5 + $0x10bc] ss:$20 sps:$4 sm:$0xff]   ;;  %v20643_v22 = vld [vmem:[%s26967_s5 + $0x10c4] ss:$20 sps:$4 sm:$0xff]  }
 0x50b   : > { %10178 = vmatprep.subr.bf16.mxu1 %v20601_v6  ;;  %v20638_v6 = vld [vmem:[%s26967_s5 + $0x10b8] ss:$20 sps:$4 sm:$0xff]  }
 0x50d   : > { %10077 = vmatpush1.bf16.msra.mxu0 %v20596_v7  ;;  %v20641_v7 = vld [vmem:[%s26967_s5 + $0x10c0] ss:$20 sps:$4 sm:$0xff]  }
 0x50e   : > { %10179 = vmatpush1.bf16.msra.mxu1 %v20599_v11  ;;  %10078 = vmatprep.subr.bf16.mxu0 %v20604_v17  ;;  %v20646_v11 = vld [vmem:[%s26967_s5 + $0x10e4] ss:$20 sps:$4 sm:$0xff]   ;;  %v20649_v17 = vld [vmem:[%s26967_s5 + $0x10ec] ss:$20 sps:$4 sm:$0xff]  }
 0x50f   : > { %10180 = vmatprep.subr.bf16.mxu1 %v20607_v23  ;;  %v20644_v23 = vld [vmem:[%s26967_s5 + $0x10e0] ss:$20 sps:$4 sm:$0xff]  }
 0x511   : > { %10079 = vmatpush1.bf16.msra.mxu0 %v20602_v24  ;;  %v20647_v24 = vld [vmem:[%s26967_s5 + $0x10e8] ss:$20 sps:$4 sm:$0xff]  }
 0x512   : > { %10181 = vmatpush1.bf16.msra.mxu1 %v20605_v12  ;;  %10080 = vmatprep.subr.bf16.mxu0 %v20610_v9  ;;  %v20652_v12 = vld [vmem:[%s26967_s5 + $0x110c] ss:$20 sps:$4 sm:$0xff]   ;;  %v20655_v9 = vld [vmem:[%s26967_s5 + $0x1114] ss:$20 sps:$4 sm:$0xff]  }
 0x513   : > { %10182 = vmatprep.subr.bf16.mxu1 %v20613_v18  ;;  %v7034_v33 = vpop.f32.mrb[64].mxu0  ;;  %v7136_v34 = vpop.f32.mrb[72].mxu1 }
 0x514   : > { %v24517_v58 = vadd.f32 %v7034_v33, %v24292_v28  ;;  %v24520_v36 = vadd.f32 %v7136_v34, %v24294_v60  ;;  %v7036_v37 = vpop.f32.mrb[65].mxu0  ;;  %v7138_v41 = vpop.f32.mrb[73].mxu1  ;;  %v20617_v28 = vld [vmem:[%s26967_s5 + $0x1020] ss:$20 sps:$4 sm:$0xff]   ;;  %v20650_v33 = vld [vmem:[%s26967_s5 + $0x1108] ss:$20 sps:$4 sm:$0xff]  }
 0x515   : > { %10081 = vmatpush1.bf16.msra.mxu0 %v20608_v30  ;;  %v24523_v19 = vadd.f32 %v7036_v37, %v24302_v47  ;;  %v24526_v20 = vadd.f32 %v7138_v41, %v24304_v43  ;;  %v7038_v46 = vpop.f32.mrb[66].mxu0  ;;  %v7140_v48 = vpop.f32.mrb[74].mxu1  ;;  %v20622_v47 = vld [vmem:[%s26967_s5 + $0x1044] ss:$20 sps:$4 sm:$0xff]   ;;  %v20625_v43 = vld [vmem:[%s26967_s5 + $0x104c] ss:$20 sps:$4 sm:$0xff]  }
 0x516   : > { %10183 = vmatpush1.bf16.msra.mxu1 %v20611_v25  ;;  %10082 = vmatprep.subr.bf16.mxu0 %v20616_v31  ;;  %v7039_v60 = vpop.f32.mrb[67].mxu0  ;;  %v7141_v40 = vpop.f32.mrb[75].mxu1  ;;  %v20653_v37 = vld [vmem:[%s26967_s5 + $0x1110] ss:$20 sps:$4 sm:$0xff]   ;;  %v20658_v46 = vld [vmem:[%s26967_s5 + $0x1134] ss:$20 sps:$4 sm:$0xff]  }
 0x517   : > { %10184 = vmatprep.subr.bf16.mxu1 %v20619_v35  ;;  %v20661_v60 = vld [vmem:[%s26967_s5 + $0x113c] ss:$20 sps:$4 sm:$0xff]  }
 0x519   : > { %10083 = vmatpush1.bf16.msra.mxu0 %v20614_v45 }
 0x51a   : > { %10185 = vmatpush1.bf16.msra.mxu1 %v20617_v28  ;;  %10084 = vmatprep.subr.bf16.mxu0 %v20622_v47 }
 0x51b   : > { %10186 = vmatprep.subr.bf16.mxu1 %v20625_v43 }
 0x51d   : > { %10085 = vmatpush1.bf16.msra.mxu0 %v20620_v51  ;;  %v20656_v51 = vld [vmem:[%s26967_s5 + $0x1130] ss:$20 sps:$4 sm:$0xff]  }
 0x51e   : > { %10187 = vmatpush1.bf16.msra.mxu1 %v20623_v52  ;;  %10086 = vmatprep.subr.bf16.mxu0 %v20628_v55  ;;  %v20659_v55 = vld [vmem:[%s26967_s5 + $0x1138] ss:$20 sps:$4 sm:$0xff]  }
 0x51f   : > { %10188 = vmatprep.subr.bf16.mxu1 %v20631_v63  ;;  %v20664_v63 = vld [vmem:[%s26967_s5 + $0x115c] ss:$20 sps:$4 sm:$0xff]  }
 0x521   : > { %10087 = vmatpush1.bf16.msra.mxu0 %v20626_v21  ;;  %v20667_v21 = vld [vmem:[%s26967_s5 + $0x1164] ss:$20 sps:$4 sm:$0xff]  }
 0x522   : > { %10189 = vmatpush1.bf16.msra.mxu1 %v20629_v61  ;;  %10088 = vmatprep.subr.bf16.mxu0 %v20634_v53 }
 0x523   : > { %10190 = vmatprep.subr.bf16.mxu1 %v20637_v14 }
 0x525   : > { %10089 = vmatpush1.bf16.msra.mxu0 %v20632_v59 }
 0x526   : > { %10191 = vmatpush1.bf16.msra.mxu1 %v20635_v16  ;;  %10090 = vmatprep.subr.bf16.mxu0 %v20640_v0  ;;  %v20662_v16 = vld [vmem:[%s26967_s5 + $0x1158] ss:$20 sps:$4 sm:$0xff]  }
 0x527   : > { %10192 = vmatprep.subr.bf16.mxu1 %v20643_v22 }
 0x529   : > { %10091 = vmatpush1.bf16.msra.mxu0 %v20638_v6  ;;  %v20665_v6 = vld [vmem:[%s26967_s5 + $0x1160] ss:$20 sps:$4 sm:$0xff]  }
 0x52a   : > { %10193 = vmatpush1.bf16.msra.mxu1 %v20641_v7  ;;  %10092 = vmatprep.subr.bf16.mxu0 %v20646_v11 }
 0x52b   : > { %10194 = vmatprep.subr.bf16.mxu1 %v20649_v17  ;;  %v20670_v17 = vld [vmem:[%s26967_s5 + $0x1184] ss:$20 sps:$4 sm:$0xff]  }
 0x52c   : > { %v18484_v18 = vpop.f32.mrb[68].mxu0  ;;  %v18512_v30 = vpop.f32.mrb[76].mxu1 }
 0x52d   : > { %10093 = vmatpush1.bf16.msra.mxu0 %v20644_v23  ;;  %v18485_v25 = vpop.f32.mrb[69].mxu0  ;;  %v18513_v31 = vpop.f32.mrb[77].mxu1 }
 0x52e   : > { %10195 = vmatpush1.bf16.msra.mxu1 %v20647_v24  ;;  %v18486_v34 = vadd.f32 %v18485_v25, %v18484_v18  ;;  %v18514_v35 = vadd.f32 %v18513_v31, %v18512_v30  ;;  %10094 = vmatprep.subr.bf16.mxu0 %v20652_v12  ;;  %v18487_v41 = vpop.f32.mrb[70].mxu0  ;;  %v18515_v45 = vpop.f32.mrb[78].mxu1  ;;  %v20673_v12 = vld [vmem:[%s26967_s5 + $0x118c] ss:$20 sps:$4 sm:$0xff]   ;;  %v20671_v30 = vld [vmem:[%s26967_s5 + $0x1188] ss:$20 sps:$4 sm:$0xff]  }
 0x52f   : > { %10196 = vmatprep.subr.bf16.mxu1 %v20655_v9  ;;  %v18488_v48 = vpop.f32.mrb[71].mxu0  ;;  %v18516_v28 = vpop.f32.mrb[79].mxu1  ;;  %v20668_v18 = vld [vmem:[%s26967_s5 + $0x1180] ss:$20 sps:$4 sm:$0xff]  }
 0x530   : > { %v24612_v40 = vadd.f32 %v18514_v35, %v18486_v34  ;;  %v18489_v47 = vadd.f32 %v18488_v48, %v18487_v41  ;;  %v18517_v43 = vadd.f32 %v18516_v28, %v18515_v45  ;;  %v20676_v25 = vld [vmem:[%s26967_s5 + $0x11ac] ss:$20 sps:$4 sm:$0xff]   ;;  %v20679_v31 = vld [vmem:[%s26967_s5 + $0x11b4] ss:$20 sps:$4 sm:$0xff]   ;;  %v20677_v34 = vld [vmem:[%s26967_s5 + $0x11b0] ss:$20 sps:$4 sm:$0xff]  }
 0x531   : > { %10095 = vmatpush1.bf16.msra.mxu0 %v20650_v33  ;;  %v20674_v33 = vld [vmem:[%s26967_s5 + $0x11a8] ss:$20 sps:$4 sm:$0xff]   ;;  %v20680_v41 = vld [vmem:[%s26967_s5 + $0x11d0] ss:$20 sps:$4 sm:$0xff]   ;;  %v20683_v45 = vld [vmem:[%s26967_s5 + $0x11d8] ss:$20 sps:$4 sm:$0xff]  }
 0x532   : > { %10197 = vmatpush1.bf16.msra.mxu1 %v20653_v37  ;;  %v24617_v52 = vadd.f32 %v18517_v43, %v18489_v47  ;;  %10096 = vmatprep.subr.bf16.mxu0 %v20658_v46  ;;  %v20682_v35 = vld [vmem:[%s26967_s5 + $0x11d4] ss:$20 sps:$4 sm:$0xff]   ;;  %v20685_v37 = vld [vmem:[%s26967_s5 + $0x11dc] ss:$20 sps:$4 sm:$0xff]   ;;  %v20691_v48 = vld [vmem:[%s26967_s5 + $0x1204] ss:$20 sps:$4 sm:$0xff]  }
 0x533   : > { %10198 = vmatprep.subr.bf16.mxu1 %v20661_v60  ;;  %v20688_v46 = vld [vmem:[%s26967_s5 + $0x11fc] ss:$20 sps:$4 sm:$0xff]   ;;  %v20686_v28 = vld [vmem:[%s26967_s5 + $0x11f8] ss:$20 sps:$4 sm:$0xff]   ;;  %v20689_v60 = vld [vmem:[%s26967_s5 + $0x1200] ss:$20 sps:$4 sm:$0xff]  }
 0x534   : > { %v18490_v61 = vpop.f32.mrb[72].mxu0  ;;  %v18518_v53 = vpop.f32.mrb[80].mxu1  ;;  %v20694_v47 = vld [vmem:[%s26967_s5 + $0x1224] ss:$20 sps:$4 sm:$0xff]   ;;  %v20697_v43 = vld [vmem:[%s26967_s5 + $0x122c] ss:$20 sps:$4 sm:$0xff]  }
 0x535   : > { %10097 = vmatpush1.bf16.msra.mxu0 %v20656_v51  ;;  %v18491_v14 = vpop.f32.mrb[73].mxu0  ;;  %v18519_v59 = vpop.f32.mrb[81].mxu1  ;;  %v20692_v51 = vld [vmem:[%s26967_s5 + $0x1220] ss:$20 sps:$4 sm:$0xff]  }
 0x536   : > { %10199 = vmatpush1.bf16.msra.mxu1 %v20659_v55  ;;  %v18492_v0 = vadd.f32 %v18491_v14, %v18490_v61  ;;  %v18520_v22 = vadd.f32 %v18519_v59, %v18518_v53  ;;  %10098 = vmatprep.subr.bf16.mxu0 %v20664_v63  ;;  %v18493_v7 = vpop.f32.mrb[74].mxu0  ;;  %v18521_v11 = vpop.f32.mrb[82].mxu1  ;;  %v20695_v55 = vld [vmem:[%s26967_s5 + $0x1228] ss:$20 sps:$4 sm:$0xff]   ;;  %v20700_v63 = vld [vmem:[%s26967_s5 + $0x124c] ss:$20 sps:$4 sm:$0xff]  }
 0x537   : > { %10200 = vmatprep.subr.bf16.mxu1 %v20667_v21  ;;  %v18494_v23 = vpop.f32.mrb[75].mxu0  ;;  %v18522_v24 = vpop.f32.mrb[83].mxu1  ;;  %v20703_v21 = vld [vmem:[%s26967_s5 + $0x1254] ss:$20 sps:$4 sm:$0xff]   ;;  %v20701_v53 = vld [vmem:[%s26967_s5 + $0x1250] ss:$20 sps:$4 sm:$0xff]  }
 0x538   : > { %v24640_v9 = vadd.f32 %v18520_v22, %v18492_v0  ;;  %v20698_v61 = vld [vmem:[%s26967_s5 + $0x1248] ss:$20 sps:$4 sm:$0xff]   ;;  %v20707_v0 = vld [vmem:[%s26967_s5 + $0x1278] ss:$20 sps:$4 sm:$0xff]   ;;  %v20713_v11 = vld [vmem:[%s26967_s5 + $0x12a0] ss:$20 sps:$4 sm:$0xff]  }
 0x539   : > { %10099 = vmatpush1.bf16.msra.mxu0 %v20662_v16  ;;  %v20706_v14 = vld [vmem:[%s26967_s5 + $0x1274] ss:$20 sps:$4 sm:$0xff]   ;;  %v20709_v59 = vld [vmem:[%s26967_s5 + $0x127c] ss:$20 sps:$4 sm:$0xff]   ;;  %v20710_v7 = vld [vmem:[%s26967_s5 + $0x1298] ss:$20 sps:$4 sm:$0xff]  }
 0x53a   : > { %10201 = vmatpush1.bf16.msra.mxu1 %v20665_v6  ;;  %10119 = vmatprep.subr.bf16.mxu0 %v20670_v17  ;;  %v20704_v16 = vld [vmem:[%s26967_s5 + $0x1270] ss:$20 sps:$4 sm:$0xff]   ;;  %v20721_v23 = vld [vmem:[%s26967_s5 + $0x12cc] ss:$20 sps:$4 sm:$0xff]  }
 0x53b   : > { %10221 = vmatprep.subr.bf16.mxu1 %v20673_v12  ;;  %v20712_v22 = vld [vmem:[%s26967_s5 + $0x129c] ss:$20 sps:$4 sm:$0xff]   ;;  %v20715_v6 = vld [vmem:[%s26967_s5 + $0x12a4] ss:$20 sps:$4 sm:$0xff]   ;;  %v20716_v24 = vld [vmem:[%s26967_s5 + $0x12c0] ss:$20 sps:$4 sm:$0xff]  }
 0x53c   : > { %10101 = vmatmul.mubr.bf16.vlgmr.msra.gmra.mrb[92].mxu0 %v23560_v50  ;;  %v20718_v17 = vld [vmem:[%s26967_s5 + $0x12c4] ss:$20 sps:$4 sm:$0xff]   ;;  %v20719_v12 = vld [vmem:[%s26967_s5 + $0x12c8] ss:$20 sps:$4 sm:$0xff]  }
 0x53d   : > { %10203 = vmatmul.mubr.bf16.vlgmr.msra.gmra.mrb[100].mxu1 %v23560_v50  ;;  %10110 = vmatprep.mubr.bf16.mxu0 %v23572_v49 }
 0x53e   : > { %10120 = vmatpush1.bf16.msra.mxu0 %v20668_v18  ;;  %10212 = vmatprep.mubr.bf16.mxu1 %v23572_v49  ;;  %v20724_v18 = vld [vmem:[%s26967_s5 + $0x12ec] ss:$20 sps:$4 sm:$0xff]  }
 0x53f   : > { %10222 = vmatpush1.bf16.msra.mxu1 %v20671_v30  ;;  %10121 = vmatprep.subr.bf16.mxu0 %v20676_v25  ;;  %v20727_v30 = vld [vmem:[%s26967_s5 + $0x12f4] ss:$20 sps:$4 sm:$0xff]  }
 0x540   : > { %10223 = vmatprep.subr.bf16.mxu1 %v20679_v31  ;;  %v20722_v25 = vld [vmem:[%s26967_s5 + $0x12e8] ss:$20 sps:$4 sm:$0xff]   ;;  %v20725_v31 = vld [vmem:[%s26967_s5 + $0x12f0] ss:$20 sps:$4 sm:$0xff]  }
 0x542   : > { %10122 = vmatpush1.bf16.msra.mxu0 %v20674_v33  ;;  %v20730_v33 = vld [vmem:[%s26967_s5 + $0x1314] ss:$20 sps:$4 sm:$0xff]  }
 0x543   : > { %10224 = vmatpush1.bf16.msra.mxu1 %v20677_v34  ;;  %10123 = vmatprep.subr.bf16.mxu0 %v20682_v35  ;;  %v20733_v34 = vld [vmem:[%s26967_s5 + $0x131c] ss:$20 sps:$4 sm:$0xff]  }
 0x544   : > { %10111 = vmatmul.mubr.bf16.gmra.mrb[96].mxu0 %v23596_v10  ;;  %10225 = vmatprep.subr.bf16.mxu1 %v20685_v37  ;;  %v20728_v35 = vld [vmem:[%s26967_s5 + $0x1310] ss:$20 sps:$4 sm:$0xff]   ;;  %v20731_v37 = vld [vmem:[%s26967_s5 + $0x1318] ss:$20 sps:$4 sm:$0xff]  }
 0x545   : > { %10213 = vmatmul.mubr.bf16.gmra.mrb[104].mxu1 %v23596_v10  ;;  %10151 = vmatprep.mubr.bf16.mxu0 %v23607_v62 }
 0x546   : > { %10124 = vmatpush1.bf16.msra.mxu0 %v20680_v41  ;;  %10253 = vmatprep.mubr.bf16.mxu1 %v23607_v62  ;;  %v20736_v41 = vld [vmem:[%s26967_s5 + $0x133c] ss:$20 sps:$4 sm:$0xff]  }
 0x547   : > { %10226 = vmatpush1.bf16.msra.mxu1 %v20683_v45  ;;  %10125 = vmatprep.subr.bf16.mxu0 %v20688_v46  ;;  %v20739_v45 = vld [vmem:[%s26967_s5 + $0x1344] ss:$20 sps:$4 sm:$0xff]  }
 0x548   : > { %10227 = vmatprep.subr.bf16.mxu1 %v20691_v48  ;;  %v20734_v46 = vld [vmem:[%s26967_s5 + $0x1338] ss:$20 sps:$4 sm:$0xff]   ;;  %v20737_v48 = vld [vmem:[%s26967_s5 + $0x1340] ss:$20 sps:$4 sm:$0xff]  }
 0x54a   : > { %10126 = vmatpush1.bf16.msra.mxu0 %v20686_v28  ;;  %v20742_v28 = vld [vmem:[%s26967_s5 + $0x1364] ss:$20 sps:$4 sm:$0xff]  }
 0x54b   : > { %10228 = vmatpush1.bf16.msra.mxu1 %v20689_v60  ;;  %10127 = vmatprep.subr.bf16.mxu0 %v20694_v47  ;;  %v20745_v60 = vld [vmem:[%s26967_s5 + $0x136c] ss:$20 sps:$4 sm:$0xff]  }
 0x54c   : > { %10229 = vmatprep.subr.bf16.mxu1 %v20697_v43  ;;  %v20740_v47 = vld [vmem:[%s26967_s5 + $0x1360] ss:$20 sps:$4 sm:$0xff]   ;;  %v20743_v43 = vld [vmem:[%s26967_s5 + $0x1368] ss:$20 sps:$4 sm:$0xff]  }
 0x54e   : > { %10128 = vmatpush1.bf16.msra.mxu0 %v20692_v51  ;;  %v20748_v51 = vld [vmem:[%s26967_s5 + $0x138c] ss:$20 sps:$4 sm:$0xff]  }
 0x54f   : > { %10230 = vmatpush1.bf16.msra.mxu1 %v20695_v55  ;;  %10129 = vmatprep.subr.bf16.mxu0 %v20700_v63  ;;  %v20751_v55 = vld [vmem:[%s26967_s5 + $0x1394] ss:$20 sps:$4 sm:$0xff]  }
 0x550   : > { %10231 = vmatprep.subr.bf16.mxu1 %v20703_v21  ;;  %v20746_v63 = vld [vmem:[%s26967_s5 + $0x1388] ss:$20 sps:$4 sm:$0xff]   ;;  %v20749_v21 = vld [vmem:[%s26967_s5 + $0x1390] ss:$20 sps:$4 sm:$0xff]  }
 0x552   : > { %10130 = vmatpush1.bf16.msra.mxu0 %v20698_v61  ;;  %v20754_v61 = vld [vmem:[%s26967_s5 + $0x13b4] ss:$20 sps:$4 sm:$0xff]  }
 0x553   : > { %10232 = vmatpush1.bf16.msra.mxu1 %v20701_v53  ;;  %10131 = vmatprep.subr.bf16.mxu0 %v20706_v14  ;;  %v20757_v53 = vld [vmem:[%s26967_s5 + $0x13bc] ss:$20 sps:$4 sm:$0xff]  }
 0x554   : > { %10233 = vmatprep.subr.bf16.mxu1 %v20709_v59  ;;  %v20752_v14 = vld [vmem:[%s26967_s5 + $0x13b0] ss:$20 sps:$4 sm:$0xff]   ;;  %v20755_v59 = vld [vmem:[%s26967_s5 + $0x13b8] ss:$20 sps:$4 sm:$0xff]  }
 0x556   : > { %10132 = vmatpush1.bf16.msra.mxu0 %v20704_v16  ;;  %v20760_v16 = vld [vmem:[%s26967_s5 + $0x13dc] ss:$20 sps:$4 sm:$0xff]  }
 0x557   : > { %10234 = vmatpush1.bf16.msra.mxu1 %v20707_v0  ;;  %10133 = vmatprep.subr.bf16.mxu0 %v20712_v22  ;;  %v20763_v0 = vld [vmem:[%s26967_s5 + $0x13e4] ss:$20 sps:$4 sm:$0xff]  }
 0x558   : > { %10235 = vmatprep.subr.bf16.mxu1 %v20715_v6 }
 0x55a   : > { %10134 = vmatpush1.bf16.msra.mxu0 %v20710_v7 }
 0x55b   : > { %10236 = vmatpush1.bf16.msra.mxu1 %v20713_v11  ;;  %10135 = vmatprep.subr.bf16.mxu0 %v20718_v17 }
 0x55c   : > { %10237 = vmatprep.subr.bf16.mxu1 %v20721_v23 }
 0x55e   : > { %10136 = vmatpush1.bf16.msra.mxu0 %v20716_v24  ;;  %v20758_v24 = vld [vmem:[%s26967_s5 + $0x13d8] ss:$20 sps:$4 sm:$0xff]  }
 0x55f   : > { %10238 = vmatpush1.bf16.msra.mxu1 %v20719_v12  ;;  %10137 = vmatprep.subr.bf16.mxu0 %v20724_v18 }
 0x560   : > { %10239 = vmatprep.subr.bf16.mxu1 %v20727_v30 }
 0x562   : > { %10138 = vmatpush1.bf16.msra.mxu0 %v20722_v25  ;;  %v20764_v25 = vld [vmem:[%s26967_s5 + $0x1050] ss:$20 sps:$4 sm:$0xff]  }
 0x563   : > { %10240 = vmatpush1.bf16.msra.mxu1 %v20725_v31  ;;  %10139 = vmatprep.subr.bf16.mxu0 %v20730_v33 }
 0x564   : > { %10241 = vmatprep.subr.bf16.mxu1 %v20733_v34  ;;  %v20767_v34 = vld [vmem:[%s26967_s5 + $0x1190] ss:$20 sps:$4 sm:$0xff]  }
 0x566   : > { %10140 = vmatpush1.bf16.msra.mxu0 %v20728_v35  ;;  %v20768_v35 = vld [vmem:[%s26967_s5 + $0x1078] ss:$20 sps:$4 sm:$0xff]  }
 0x567   : > { %10242 = vmatpush1.bf16.msra.mxu1 %v20731_v37  ;;  %10141 = vmatprep.subr.bf16.mxu0 %v20736_v41  ;;  %v20769_v37 = vld [vmem:[%s26967_s5 + $0x12f8] ss:$20 sps:$4 sm:$0xff]  }
 0x568   : > { %10243 = vmatprep.subr.bf16.mxu1 %v20739_v45  ;;  %v20770_v41 = vld [vmem:[%s26967_s5 + $0xf38] ss:$20 sps:$4 sm:$0xff]  }
 0x569   : > { %v20771_v45 = vld [vmem:[%s26967_s5 + $0x11b8] ss:$20 sps:$4 sm:$0xff]  }
 0x56a   : > { %10142 = vmatpush1.bf16.msra.mxu0 %v20734_v46  ;;  %v20772_v46 = vld [vmem:[%s26967_s5 + $0x10a0] ss:$20 sps:$4 sm:$0xff]  }
 0x56b   : > { %10244 = vmatpush1.bf16.msra.mxu1 %v20737_v48  ;;  %10143 = vmatprep.subr.bf16.mxu0 %v20742_v28  ;;  %v20773_v48 = vld [vmem:[%s26967_s5 + $0x1320] ss:$20 sps:$4 sm:$0xff]  }
 0x56c   : > { %10245 = vmatprep.subr.bf16.mxu1 %v20745_v60  ;;  %v20774_v28 = vld [vmem:[%s26967_s5 + $0xf60] ss:$20 sps:$4 sm:$0xff]  }
 0x56d   : > { %v20775_v60 = vld [vmem:[%s26967_s5 + $0x11e0] ss:$20 sps:$4 sm:$0xff]  }
 0x56e   : > { %10144 = vmatpush1.bf16.msra.mxu0 %v20740_v47  ;;  %v20776_v47 = vld [vmem:[%s26967_s5 + $0x10c8] ss:$20 sps:$4 sm:$0xff]  }
 0x56f   : > { %10246 = vmatpush1.bf16.msra.mxu1 %v20743_v43  ;;  %10145 = vmatprep.subr.bf16.mxu0 %v20748_v51  ;;  %v20777_v43 = vld [vmem:[%s26967_s5 + $0x1348] ss:$20 sps:$4 sm:$0xff]  }
 0x570   : > { %10247 = vmatprep.subr.bf16.mxu1 %v20751_v55  ;;  %v20778_v51 = vld [vmem:[%s26967_s5 + $0xf88] ss:$20 sps:$4 sm:$0xff]  }
 0x571   : > { %v20779_v55 = vld [vmem:[%s26967_s5 + $0x1208] ss:$20 sps:$4 sm:$0xff]  }
 0x572   : > { %10146 = vmatpush1.bf16.msra.mxu0 %v20746_v63  ;;  %v20780_v63 = vld [vmem:[%s26967_s5 + $0x10f0] ss:$20 sps:$4 sm:$0xff]  }
 0x573   : > { %10248 = vmatpush1.bf16.msra.mxu1 %v20749_v21  ;;  %10147 = vmatprep.subr.bf16.mxu0 %v20754_v61  ;;  %v20783_v21 = vld [vmem:[%s26967_s5 + $0x1230] ss:$20 sps:$4 sm:$0xff]   ;;  %v20784_v61 = vld [vmem:[%s26967_s5 + $0x1118] ss:$20 sps:$4 sm:$0xff]  }
 0x574   : > { %10249 = vmatprep.subr.bf16.mxu1 %v20757_v53  ;;  %v20785_v53 = vld [vmem:[%s26967_s5 + $0x1398] ss:$20 sps:$4 sm:$0xff]  }
 0x575   : > { %v8180_v22 = vpop.f32.mrb[76].mxu0  ;;  %v8282_v6 = vpop.f32.mrb[84].mxu1 }
 0x576   : > { %10148 = vmatpush1.bf16.msra.mxu0 %v20752_v14  ;;  %v24831_v7 = vadd.f32 %v8180_v22, %v24517_v58  ;;  %v24834_v11 = vadd.f32 %v8282_v6, %v24520_v36  ;;  %v8182_v17 = vpop.f32.mrb[77].mxu0  ;;  %v8284_v23 = vpop.f32.mrb[85].mxu1  ;;  %v20761_v58 = vld [vmem:[%s26967_s5 + $0x13e0] ss:$20 sps:$4 sm:$0xff]   ;;  %v20786_v14 = vld [vmem:[%s26967_s5 + $0xfd8] ss:$20 sps:$4 sm:$0xff]  }
 0x577   : > { %10250 = vmatpush1.bf16.msra.mxu1 %v20755_v59  ;;  %v24840_v12 = vadd.f32 %v8182_v17, %v24523_v19  ;;  %v24843_v18 = vadd.f32 %v8284_v23, %v24526_v20  ;;  %10149 = vmatprep.subr.bf16.mxu0 %v20760_v16  ;;  %v8184_v36 = vpop.f32.mrb[78].mxu0  ;;  %v8286_v30 = vpop.f32.mrb[86].mxu1  ;;  %v20765_v19 = vld [vmem:[%s26967_s5 + $0x12d0] ss:$20 sps:$4 sm:$0xff]   ;;  %v20787_v59 = vld [vmem:[%s26967_s5 + $0x1258] ss:$20 sps:$4 sm:$0xff]  }
 0x578   : > { %10251 = vmatprep.subr.bf16.mxu1 %v20763_v0  ;;  %v8185_v31 = vpop.f32.mrb[79].mxu0  ;;  %v8287_v33 = vpop.f32.mrb[87].mxu1  ;;  %v20766_v20 = vld [vmem:[%s26967_s5 + $0xf10] ss:$20 sps:$4 sm:$0xff]   ;;  %v20788_v16 = vld [vmem:[%s26967_s5 + $0x1140] ss:$20 sps:$4 sm:$0xff]  }
 0x579   : > { %v20789_v0 = vld [vmem:[%s26967_s5 + $0x13c0] ss:$20 sps:$4 sm:$0xff]   ;;  %v20792_v17 = vld [vmem:[%s26967_s5 + $0x1168] ss:$20 sps:$4 sm:$0xff]   ;;  %v20798_v36 = vld [vmem:[%s26967_s5 + $0xa04] ss:$20 sps:$4 sm:$0xff]  }
 0x57a   : > { %10150 = vmatpush1.bf16.msra.mxu0 %v20758_v24  ;;  %v20790_v22 = vld [vmem:[%s26967_s5 + $0x1000] ss:$20 sps:$4 sm:$0xff]   ;;  %v20793_v23 = vld [vmem:[%s26967_s5 + $0x13e8] ss:$20 sps:$4 sm:$0xff]  }
 0x57b   : > { %10252 = vmatpush1.bf16.msra.mxu1 %v20761_v58  ;;  %18580 = vmatprep.subr.bf16.mxu0 %v20764_v25  ;;  %v20791_v6 = vld [vmem:[%s26967_s5 + $0x1280] ss:$20 sps:$4 sm:$0xff]   ;;  %v20794_v24 = vld [vmem:[%s26967_s5 + $0x1028] ss:$20 sps:$4 sm:$0xff]  }
 0x57c   : > { %18608 = vmatprep.subr.bf16.mxu1 %v20765_v19  ;;  %v20795_v58 = vld [vmem:[%s26967_s5 + $0x12a8] ss:$20 sps:$4 sm:$0xff]   ;;  %v20801_v30 = vld [vmem:[%s26967_s5 + $0xa0c] ss:$20 sps:$4 sm:$0xff]  }
 0x57d   : > { %10152 = vmatmul.mubr.bf16.vlgmr.msra.gmra.mrb[92].mxu0 %v23770_v2  ;;  %v20796_v25 = vld [vmem:[%s26967_s5 + $0xa00] ss:$20 sps:$4 sm:$0xff]   ;;  %v20799_v31 = vld [vmem:[%s26967_s5 + $0xa08] ss:$20 sps:$4 sm:$0xff]  }
 0x57e   : > { %10254 = vmatmul.mubr.bf16.vlgmr.msra.gmra.mrb[100].mxu1 %v23770_v2  ;;  %10161 = vmatprep.mubr.bf16.mxu0 %v23778_v13  ;;  %v20804_v33 = vld [vmem:[%s26967_s5 + $0xa2c] ss:$20 sps:$4 sm:$0xff]   ;;  %v20807_v19 = vld [vmem:[%s26967_s5 + $0xa34] ss:$20 sps:$4 sm:$0xff]  }
 0x57f   : > { %10263 = vmatprep.mubr.bf16.mxu1 %v23778_v13  ;;  %18581 = vmatpush3.bf16.msra.mxu0 %v20766_v20  ;;  %v20802_v20 = vld [vmem:[%s26967_s5 + $0xa28] ss:$20 sps:$4 sm:$0xff]  }
 0x580   : > { %18609 = vmatpush3.bf16.msra.mxu1 %v20767_v34  ;;  %18582 = vmatprep.subr.bf16.mxu0 %v20768_v35  ;;  %v20810_v34 = vld [vmem:[%s26967_s5 + $0xa54] ss:$20 sps:$4 sm:$0xff]   ;;  %v20816_v35 = vld [vmem:[%s26967_s5 + $0xa7c] ss:$20 sps:$4 sm:$0xff]  }
 0x581   : > { %18610 = vmatprep.subr.bf16.mxu1 %v20769_v37  ;;  %v20819_v37 = vld [vmem:[%s26967_s5 + $0xa84] ss:$20 sps:$4 sm:$0xff]  }
 0x583   : > { %18583 = vmatpush3.bf16.msra.mxu0 %v20770_v41  ;;  %v25004_v41 = vld [vmem:[%s26968_s6] sm:$0x1f] }
 0x584   : > { %18611 = vmatpush3.bf16.msra.mxu1 %v20771_v45  ;;  %18584 = vmatprep.subr.bf16.mxu0 %v20772_v46  ;;  %v20822_v45 = vld [vmem:[%s26967_s5 + $0xaa4] ss:$20 sps:$4 sm:$0xff]   ;;  %v20825_v46 = vld [vmem:[%s26967_s5 + $0xaac] ss:$20 sps:$4 sm:$0xff]  }
 0x585   : > { %10162 = vmatmul.mubr.bf16.gmra.mrb[100].mxu0 %v23802_v8  ;;  %18612 = vmatprep.subr.bf16.mxu1 %v20773_v48  ;;  %v25021_v48 = vrot.slane %v25004_v41, %v21878_v38 }
 0x586   : > { %10264 = vmatmul.mubr.bf16.gmra.mrb[108].mxu1 %v23802_v8  ;;  %10304 = vmatprep.mubr.bf16.mxu0 %v23554_v44  ;;  %v20781_v44 = vld [vmem:[%s26967_s5 + $0x1370] ss:$20 sps:$4 sm:$0xff]  }
 0x587   : > { %18585 = vmatpush3.bf16.msra.mxu0 %v20774_v28  ;;  %10352 = vmatprep.mubr.bf16.mxu1 %v23607_v62  ;;  %v20782_v62 = vld [vmem:[%s26967_s5 + $0xfb0] ss:$20 sps:$4 sm:$0xff]   ;;  %v25025_v28 = vrot.slane %v25004_v41, %v21935_v1 }
 0x588   : > { %18613 = vmatpush3.bf16.msra.mxu1 %v20775_v60  ;;  %18586 = vmatprep.subr.bf16.mxu0 %v20776_v47  ;;  %v25029_v60 = vrot.slane %v25004_v41, %v21881_v39  ;;  %v20820_v47 = vld [vmem:[%s26967_s5 + $0xaa0] ss:$20 sps:$4 sm:$0xff]  }
 0x589   : > { %18614 = vmatprep.subr.bf16.mxu1 %v20777_v43  ;;  %v25036_v43 = vrot.slane %v25004_v41, %v21939_v4 }
 0x58b   : > { %18587 = vmatpush3.bf16.msra.mxu0 %v20778_v51  ;;  %v20823_v51 = vld [vmem:[%s26967_s5 + $0xaa8] ss:$20 sps:$4 sm:$0xff]  }
 0x58c   : > { %18615 = vmatpush3.bf16.msra.mxu1 %v20779_v55  ;;  %18588 = vmatprep.subr.bf16.mxu0 %v20780_v63  ;;  %v20828_v63 = vld [vmem:[%s26967_s5 + $0xacc] ss:$20 sps:$4 sm:$0xff]  }
 0x58d   : > { %18616 = vmatprep.subr.bf16.mxu1 %v20781_v44 }
 0x58f   : > { %18589 = vmatpush3.bf16.msra.mxu0 %v20782_v62 }
 0x590   : > { %18617 = vmatpush3.bf16.msra.mxu1 %v20783_v21  ;;  %18590 = vmatprep.subr.bf16.mxu0 %v20784_v61  ;;  %v20831_v61 = vld [vmem:[%s26967_s5 + $0xad4] ss:$20 sps:$4 sm:$0xff]  }
 0x591   : > { %18618 = vmatprep.subr.bf16.mxu1 %v20785_v53 }
 0x593   : > { %18591 = vmatpush3.bf16.msra.mxu0 %v20786_v14 }
 0x594   : > { %18619 = vmatpush3.bf16.msra.mxu1 %v20787_v59  ;;  %18592 = vmatprep.subr.bf16.mxu0 %v20788_v16 }
 0x595   : > { %18620 = vmatprep.subr.bf16.mxu1 %v20789_v0 }
 0x597   : > { %18593 = vmatpush3.bf16.msra.mxu0 %v20790_v22 }
 0x598   : > { %18621 = vmatpush3.bf16.msra.mxu1 %v20791_v6  ;;  %18594 = vmatprep.subr.bf16.mxu0 %v20792_v17  ;;  %v20826_v6 = vld [vmem:[%s26967_s5 + $0xac8] ss:$20 sps:$4 sm:$0xff]  }
 0x599   : > { %18622 = vmatprep.subr.bf16.mxu1 %v20793_v23 }
 0x59b   : > { %18595 = vmatpush3.bf16.msra.mxu0 %v20794_v24 }
 0x59c   : > { %18623 = vmatpush3.bf16.msra.mxu1 %v20795_v58  ;;  %11200 = vmatprep.subr.bf16.mxu0 %v20798_v36 }
 0x59d   : > { %11302 = vmatprep.subr.bf16.mxu1 %v20801_v30  ;;  %v20829_v30 = vld [vmem:[%s26967_s5 + $0xad0] ss:$20 sps:$4 sm:$0xff]  }
 0x59e   : > { %10305 = vmatmul.mubr.bf16.vlgmr.msra.gmra.mrb[104].mxu0 %v23560_v50  ;;  %v20805_v50 = vld [vmem:[%s26967_s5 + $0xa30] ss:$20 sps:$4 sm:$0xff]  }
 0x59f   : > { %10353 = vmatmul.mubr.bf16.vlgmr.msra.gmra.mrb[112].mxu1 %v23770_v2  ;;  %10312 = vmatprep.mubr.bf16.mxu0 %v23572_v49  ;;  %v20813_v49 = vld [vmem:[%s26967_s5 + $0xa5c] ss:$20 sps:$4 sm:$0xff]  }
 0x5a0   : > { %10360 = vmatprep.mubr.bf16.mxu1 %v23778_v13  ;;  %11201 = vmatpush1.bf16.msra.mxu0 %v20796_v25  ;;  %v20808_v2 = vld [vmem:[%s26967_s5 + $0xa50] ss:$20 sps:$4 sm:$0xff]   ;;  %v20811_v13 = vld [vmem:[%s26967_s5 + $0xa58] ss:$20 sps:$4 sm:$0xff]  }
 0x5a1   : > { %11303 = vmatpush1.bf16.msra.mxu1 %v20799_v31  ;;  %11202 = vmatprep.subr.bf16.mxu0 %v20804_v33 }
 0x5a2   : > { %11304 = vmatprep.subr.bf16.mxu1 %v20807_v19 }
 0x5a4   : > { %11203 = vmatpush1.bf16.msra.mxu0 %v20802_v20 }
 0x5a5   : > { %11305 = vmatpush1.bf16.msra.mxu1 %v20805_v50  ;;  %11204 = vmatprep.subr.bf16.mxu0 %v20810_v34  ;;  %v20834_v34 = vld [vmem:[%s26967_s5 + $0xaf4] ss:$20 sps:$4 sm:$0xff]  }
 0x5a6   : > { %10313 = vmatmul.mubr.bf16.gmra.mrb[108].mxu0 %v23596_v10  ;;  %11306 = vmatprep.subr.bf16.mxu1 %v20813_v49  ;;  %v20814_v10 = vld [vmem:[%s26967_s5 + $0xa78] ss:$20 sps:$4 sm:$0xff]  }
 0x5a7   : > { %10361 = vmatmul.mubr.bf16.gmra.mrb[116].mxu1 %v23802_v8  ;;  %11232 = vmatprep.mubr.bf16.mxu0 %v23927_v26  ;;  %v20817_v8 = vld [vmem:[%s26967_s5 + $0xa80] ss:$20 sps:$4 sm:$0xff]  }
 0x5a8   : > { %11205 = vmatpush1.bf16.msra.mxu0 %v20808_v2  ;;  %11334 = vmatprep.mubr.bf16.mxu1 %v23927_v26 }
 0x5a9   : > { %11307 = vmatpush1.bf16.msra.mxu1 %v20811_v13  ;;  %11206 = vmatprep.subr.bf16.mxu0 %v20816_v35 }
 0x5aa   : > { %11308 = vmatprep.subr.bf16.mxu1 %v20819_v37  ;;  %v20837_v37 = vld [vmem:[%s26967_s5 + $0xafc] ss:$20 sps:$4 sm:$0xff]  }
 0x5ac   : > { %11207 = vmatpush1.bf16.msra.mxu0 %v20814_v10 }
 0x5ad   : > { %11309 = vmatpush1.bf16.msra.mxu1 %v20817_v8  ;;  %11208 = vmatprep.subr.bf16.mxu0 %v20822_v45  ;;  %v8221_v55 = vpop.f32.mrb[56].mxu0 }
 0x5ae   : > { %11310 = vmatprep.subr.bf16.mxu1 %v20825_v46  ;;  %v8463_v44 = vadd.f32 %v25021_v48, %v8221_v55  ;;  %v8323_v62 = vpop.f32.mrb[64].mxu1  ;;  %v8223_v21 = vpop.f32.mrb[57].mxu0  ;;  %v20832_v46 = vld [vmem:[%s26967_s5 + $0xaf0] ss:$20 sps:$4 sm:$0xff]  }
 0x5af   : > { %v8465_v53 = vadd.f32 %v25025_v28, %v8323_v62  ;;  %v8464_v14 = vadd.f32 %v25029_v60, %v8223_v21  ;;  %v8325_v59 = vpop.f32.mrb[65].mxu1  ;;  %v8225_v16 = vpop.f32.mrb[58].mxu0 }
 0x5b0   : > { %11209 = vmatpush1.bf16.msra.mxu0 %v20820_v47  ;;  %v8478_v0 = vmax.f32 %v8463_v44, 0.0  ;;  %v8466_v22 = vadd.f32 %v25036_v43, %v8325_v59  ;;  %v8468_v17 = vadd.f32 %v25021_v48, %v8225_v16  ;;  %v8327_v23 = vpop.f32.mrb[66].mxu1  ;;  %v8227_v24 = vpop.f32.mrb[59].mxu0  ;;  %v20835_v44 = vld [vmem:[%s26967_s5 + $0xaf8] ss:$20 sps:$4 sm:$0xff]  }
 0x5b1   : > { %11311 = vmatpush1.bf16.msra.mxu1 %v20823_v51  ;;  %v8480_v58 = vmax.f32 %v8465_v53, 0.0  ;;  %v8479_v36 = vmax.f32 %v8464_v14, 0.0  ;;  %11210 = vmatprep.subr.bf16.mxu0 %v20828_v63  ;;  %v8470_v25 = vadd.f32 %v25025_v28, %v8327_v23  ;;  %v8469_v31 = vadd.f32 %v25029_v60, %v8227_v24  ;;  %v8329_v33 = vpop.f32.mrb[67].mxu1 }
 0x5b2   : > { %v8481_v19 = vmax.f32 %v8466_v22, 0.0  ;;  %11312 = vmatprep.subr.bf16.mxu1 %v20831_v61  ;;  %v8483_v20 = vmax.f32 %v8468_v17, 0.0  ;;  %v8471_v50 = vadd.f32 %v25036_v43, %v8329_v33 }
 0x5b3   : > { %v8498_v49 = vcombine.low %v8478_v0, %v8479_v36  ;;  %v8573_v2 = vcombine.high %v8478_v0, %v8479_v36  ;;  %v8485_v13 = vmax.f32 %v8470_v25, 0.0  ;;  %v8484_v35 = vmax.f32 %v8469_v31, 0.0  ;;  %v20840_v0 = vld [vmem:[%s26967_s5 + $0xb1c] ss:$20 sps:$4 sm:$0xff]  }
 0x5b4   : > { %v8499_v10 = vcombine.low %v8480_v58, %v8481_v19  ;;  %v8574_v8 = vcombine.high %v8480_v58, %v8481_v19  ;;  %11211 = vmatpush1.bf16.msra.mxu0 %v20826_v6  ;;  %v8486_v45 = vmax.f32 %v8471_v50, 0.0  ;;  %v20843_v58 = vld [vmem:[%s26967_s5 + $0xb24] ss:$20 sps:$4 sm:$0xff]  }
 0x5b5   : > { %v25071_v47 = vrot.slane %v8498_v49, %v21949_v29  ;;  %v25074_v51 = vrot.slane %v8573_v2, %v21949_v29  ;;  %11313 = vmatpush1.bf16.msra.mxu1 %v20829_v30  ;;  %v8653_v55 = vcombine.low %v8483_v20, %v8484_v35  ;;  %v8727_v63 = vcombine.high %v8483_v20, %v8484_v35  ;;  %v8231_v62 = vpop.f32.mrb[80].mxu0  ;;  %v20846_v35 = vld [vmem:[%s26967_s5 + $0xb44] ss:$20 sps:$4 sm:$0xff]  }
 0x5b6   : > { %v25080_v21 = vrot.slane %v8499_v10, %v21949_v29  ;;  %v25083_v61 = vrot.slane %v8574_v8, %v21949_v29  ;;  %v8654_v53 = vcombine.low %v8485_v13, %v8486_v45  ;;  %v8728_v14 = vcombine.high %v8485_v13, %v8486_v45  ;;  %11212 = vmatprep.subr.bf16.mxu0 %v20834_v34  ;;  %v8333_v59 = vpop.f32.mrb[88].mxu1  ;;  %v8233_v16 = vpop.f32.mrb[81].mxu0  ;;  %v20841_v34 = vld [vmem:[%s26967_s5 + $0xb20] ss:$20 sps:$4 sm:$0xff]  }
 0x5b7   : > { %v25089_v22 = vrot.slane %v8653_v55, %v21949_v29  ;;  %v25092_v6 = vrot.slane %v8727_v63, %v21949_v29  ;;  %11314 = vmatprep.subr.bf16.mxu1 %v20837_v37  ;;  %v8232_v17 = vadd.f32 %v8231_v62, %v24831_v7  ;;  %v8334_v23 = vadd.f32 %v8333_v59, %v24834_v11  ;;  %v8335_v24 = vpop.f32.mrb[89].mxu1  ;;  %v8235_v36 = vpop.f32.mrb[82].mxu0  ;;  %v20838_v11 = vld [vmem:[%s26967_s5 + $0xb18] ss:$20 sps:$4 sm:$0xff]   ;;  %v20844_v55 = vld [vmem:[%s26967_s5 + $0xb40] ss:$20 sps:$4 sm:$0xff]  }
 0x5b8   : > { %v8521_v30 = vcombine.low %v25071_v47, %v25080_v21  ;;  %v8542_v25 = vcombine.high %v25071_v47, %v25080_v21  ;;  %v8597_v31 = vcombine.low %v25074_v51, %v25083_v61  ;;  %v8617_v7 = vcombine.high %v25074_v51, %v25083_v61  ;;  %11213 = vmatpush1.bf16.msra.mxu0 %v20832_v46  ;;  %v8337_v33 = vpop.f32.mrb[90].mxu1  ;;  %v8236_v19 = vpop.f32.mrb[83].mxu0  ;;  %v20849_v37 = vld [vmem:[%s26967_s5 + $0xb4c] ss:$20 sps:$4 sm:$0xff]   ;;  %v20847_v63 = vld [vmem:[%s26967_s5 + $0xb48] ss:$20 sps:$4 sm:$0xff]  }
 0x5b9   : > { %v25111_v20 = vrot.slane %v8654_v53, %v21949_v29  ;;  %v25114_v50 = vrot.slane %v8728_v14, %v21949_v29  ;;  %11315 = vmatpush1.bf16.msra.mxu1 %v20835_v44  ;;  %v8338_v49 = vpop.f32.mrb[91].mxu1  ;;  %v8473_v2 = vadd.f32 %v25021_v48, %v8232_v17  ;;  %v8475_v13 = vadd.f32 %v25025_v28, %v8334_v23  ;;  %v20852_v44 = vld [vmem:[%s26967_s5 + $0xb6c] ss:$20 sps:$4 sm:$0xff]   ;;  %v20855_v14 = vld [vmem:[%s26967_s5 + $0xb74] ss:$20 sps:$4 sm:$0xff]  }
 0x5ba   : > { %11214 = vmatprep.subr.bf16.mxu0 %v20840_v0  ;;  %11316 = vmatprep.subr.bf16.mxu1 %v20843_v58  ;;  %v8234_v45 = vadd.f32 %v8233_v16, %v24840_v12  ;;  %v8336_v46 = vadd.f32 %v8335_v24, %v24843_v18  ;;  %v20850_v0 = vld [vmem:[%s26967_s5 + $0xb68] ss:$20 sps:$4 sm:$0xff]   ;;  %v20859_v33 = vld [vmem:[%s26967_s5 + $0xb98] ss:$20 sps:$4 sm:$0xff]  }
 0x5bb   : > { %v8676_v10 = vcombine.low %v25089_v22, %v25111_v20  ;;  %v8696_v8 = vcombine.high %v25089_v22, %v25111_v20  ;;  %v8751_v48 = vcombine.low %v25092_v6, %v25114_v50  ;;  %v8771_v28 = vcombine.high %v25092_v6, %v25114_v50  ;;  %v20861_v24 = vld [vmem:[%s26967_s5 + $0xb9c] ss:$20 sps:$4 sm:$0xff]   ;;  %v20867_v49 = vld [vmem:[%s26967_s5 + $0xbc4] ss:$20 sps:$4 sm:$0xff]   ;;  %v20892_v6 = vld [vmem:[%s26967_s5 + $0xc80] ss:$20 sps:$4 sm:$0xff]  }
 0x5bc   : > { %11215 = vmatpush1.bf16.msra.mxu0 %v20838_v11  ;;  %v8488_v62 = vmax.f32 %v8473_v2, 0.0  ;;  %v8490_v53 = vmax.f32 %v8475_v13, 0.0  ;;  %v8474_v12 = vadd.f32 %v25029_v60, %v8234_v45  ;;  %v8476_v18 = vadd.f32 %v25036_v43, %v8336_v46  ;;  %v20853_v60 = vld [vmem:[%s26967_s5 + $0xb70] ss:$20 sps:$4 sm:$0xff]   ;;  %v20858_v43 = vld [vmem:[%s26967_s5 + $0xb94] ss:$20 sps:$4 sm:$0xff]  }
 0x5bd   : > { %11317 = vmatpush1.bf16.msra.mxu1 %v20841_v34  ;;  %11216 = vmatprep.subr.bf16.mxu0 %v20846_v35  ;;  %v20856_v11 = vld [vmem:[%s26967_s5 + $0xb90] ss:$20 sps:$4 sm:$0xff]   ;;  %v20862_v2 = vld [vmem:[%s26967_s5 + $0xbb8] ss:$20 sps:$4 sm:$0xff]   ;;  %v20865_v13 = vld [vmem:[%s26967_s5 + $0xbc0] ss:$20 sps:$4 sm:$0xff]   ;;  %v25288_v22 = vrot.slane %v8771_v28, %v21949_v29 }
 0x5be   : > { %11318 = vmatprep.subr.bf16.mxu1 %v20849_v37  ;;  %v8489_v59 = vmax.f32 %v8474_v12, 0.0  ;;  %v8491_v16 = vmax.f32 %v8476_v18, 0.0  ;;  %v20864_v19 = vld [vmem:[%s26967_s5 + $0xbbc] ss:$20 sps:$4 sm:$0xff]   ;;  %v20870_v35 = vld [vmem:[%s26967_s5 + $0xbe4] ss:$20 sps:$4 sm:$0xff]  }
 0x5bf   : > { %v20873_v37 = vld [vmem:[%s26967_s5 + $0xbec] ss:$20 sps:$4 sm:$0xff]   ;;  %v20871_v46 = vld [vmem:[%s26967_s5 + $0xbe8] ss:$20 sps:$4 sm:$0xff]  }
 0x5c0   : > { %11217 = vmatpush1.bf16.msra.mxu0 %v20844_v55  ;;  %v8807_v17 = vcombine.low %v8488_v62, %v8489_v59  ;;  %v8808_v23 = vcombine.low %v8490_v53, %v8491_v16  ;;  %v20868_v45 = vld [vmem:[%s26967_s5 + $0xbe0] ss:$20 sps:$4 sm:$0xff]   ;;  %v20874_v59 = vld [vmem:[%s26967_s5 + $0xc08] ss:$20 sps:$4 sm:$0xff]  }
 0x5c1   : > { %11319 = vmatpush1.bf16.msra.mxu1 %v20847_v63  ;;  %11218 = vmatprep.subr.bf16.mxu0 %v20852_v44  ;;  %v20876_v55 = vld [vmem:[%s26967_s5 + $0xc0c] ss:$20 sps:$4 sm:$0xff]   ;;  %v8456_v44 = vsub.s32 4, %v21858_v32  ;;  %v20879_v62 = vld [vmem:[%s26967_s5 + $0xc14] ss:$20 sps:$4 sm:$0xff]  }
 0x5c2   : > { %11320 = vmatprep.subr.bf16.mxu1 %v20855_v14  ;;  %v8815_v58 = vrot.slane %v8807_v17, %v21949_v29  ;;  %v8822_v36 = vrot.slane %v8808_v23, %v21949_v29  ;;  %v20882_v23 = vld [vmem:[%s26967_s5 + $0xc34] ss:$20 sps:$4 sm:$0xff]  }
 0x5c4   : > { %11219 = vmatpush1.bf16.msra.mxu0 %v20850_v0  ;;  %v25174_v34 = vcombine.low %v8815_v58, %v8822_v36  ;;  %v25217_v58 = vrot.slane %v25004_v41, %v8456_v44  ;;  %v20883_v41 = vld [vmem:[%s26967_s5 + $0xc38] ss:$20 sps:$4 sm:$0xff]  }
 0x5c5   : > { %11321 = vmatpush1.bf16.msra.mxu1 %v20853_v60  ;;  %11220 = vmatprep.subr.bf16.mxu0 %v20858_v43  ;;  %v20877_v60 = vld [vmem:[%s26967_s5 + $0xc10] ss:$20 sps:$4 sm:$0xff]  }
 0x5c6   : > { %11322 = vmatprep.subr.bf16.mxu1 %v20861_v24 }
 0x5c8   : > { %11221 = vmatpush1.bf16.msra.mxu0 %v20856_v11 }
 0x5c9   : > { %11323 = vmatpush1.bf16.msra.mxu1 %v20859_v33  ;;  %11222 = vmatprep.subr.bf16.mxu0 %v20864_v19  ;;  %v20885_v33 = vld [vmem:[%s26967_s5 + $0xc3c] ss:$20 sps:$4 sm:$0xff]  }
 0x5ca   : > { %11324 = vmatprep.subr.bf16.mxu1 %v20867_v49 }
 0x5cc   : > { %11223 = vmatpush1.bf16.msra.mxu0 %v20862_v2 }
 0x5cd   : > { %11325 = vmatpush1.bf16.msra.mxu1 %v20865_v13  ;;  %11224 = vmatprep.subr.bf16.mxu0 %v20870_v35  ;;  %v20888_v13 = vld [vmem:[%s26967_s5 + $0xc5c] ss:$20 sps:$4 sm:$0xff]  }
 0x5ce   : > { %11326 = vmatprep.subr.bf16.mxu1 %v20873_v37  ;;  %v18540_v63 = vpop.f32.mrb[84].mxu0 }
 0x5cf   : > { %v18568_v53 = vpop.f32.mrb[92].mxu1  ;;  %v18541_v12 = vpop.f32.mrb[85].mxu0 }
 0x5d0   : > { %11225 = vmatpush1.bf16.msra.mxu0 %v20868_v45  ;;  %v18542_v18 = vadd.f32 %v18541_v12, %v18540_v63  ;;  %v18569_v14 = vpop.f32.mrb[93].mxu1  ;;  %v18543_v16 = vpop.f32.mrb[86].mxu0  ;;  %v8528_v63 = vrot.slane %v8521_v30, %v21949_v29  ;;  %v8604_v30 = vrot.slane %v8597_v31, %v21949_v29 }
 0x5d1   : > { %11327 = vmatpush1.bf16.msra.mxu1 %v20871_v46  ;;  %v18570_v0 = vadd.f32 %v18569_v14, %v18568_v53  ;;  %11226 = vmatprep.subr.bf16.mxu0 %v20876_v55  ;;  %v18571_v43 = vpop.f32.mrb[94].mxu1  ;;  %v18544_v17 = vpop.f32.mrb[87].mxu0  ;;  %v20886_v14 = vld [vmem:[%s26967_s5 + $0xc58] ss:$20 sps:$4 sm:$0xff]  }
 0x5d2   : > { %v8375_v24 = vadd.f32 %v18542_v18, %v24612_v40  ;;  %11328 = vmatprep.subr.bf16.mxu1 %v20879_v62  ;;  %v18545_v36 = vadd.f32 %v18544_v17, %v18543_v16  ;;  %v18572_v11 = vpop.f32.mrb[95].mxu1  ;;  %v20880_v40 = vld [vmem:[%s26967_s5 + $0xc30] ss:$20 sps:$4 sm:$0xff]   ;;  %v8550_v16 = vrot.slane %v8542_v25, %v21949_v29 }
 0x5d3   : > { %v18573_v19 = vadd.f32 %v18572_v11, %v18571_v43  ;;  %v8625_v11 = vrot.slane %v8617_v7, %v21949_v29 }
 0x5d4   : > { %v8423_v49 = vadd.f32 %v18570_v0, %v8375_v24  ;;  %11227 = vmatpush1.bf16.msra.mxu0 %v20874_v59  ;;  %v8378_v2 = vadd.f32 %v18545_v36, %v24617_v52  ;;  %v20891_v52 = vld [vmem:[%s26967_s5 + $0xc64] ss:$20 sps:$4 sm:$0xff]   ;;  %v20897_v36 = vld [vmem:[%s26967_s5 + $0xc8c] ss:$20 sps:$4 sm:$0xff]  }
 0x5d5   : > { %11329 = vmatpush1.bf16.msra.mxu1 %v20877_v60  ;;  %11228 = vmatprep.subr.bf16.mxu0 %v20882_v23  ;;  %v20889_v60 = vld [vmem:[%s26967_s5 + $0xc60] ss:$20 sps:$4 sm:$0xff]   ;;  %v20894_v23 = vld [vmem:[%s26967_s5 + $0xc84] ss:$20 sps:$4 sm:$0xff]  }
 0x5d6   : > { %v8467_v35 = vadd.f32 %v25217_v58, %v8423_v49  ;;  %v8426_v37 = vadd.f32 %v18573_v19, %v8378_v2  ;;  %11330 = vmatprep.subr.bf16.mxu1 %v20885_v33  ;;  %v18546_v45 = vpop.f32.mrb[88].mxu0  ;;  %v8683_v33 = vrot.slane %v8676_v10, %v21949_v29  ;;  %v25279_v19 = vrot.slane %v8751_v48, %v21949_v29 }
 0x5d7   : > { %v18574_v46 = vpop.f32.mrb[96].mxu1  ;;  %v18547_v55 = vpop.f32.mrb[89].mxu0 }
 0x5d8   : > { %v8482_v62 = vmax.f32 %v8467_v35, 0.0  ;;  %v8472_v53 = vadd.f32 %v25217_v58, %v8426_v37  ;;  %11229 = vmatpush1.bf16.msra.mxu0 %v20880_v40  ;;  %v18548_v12 = vadd.f32 %v18547_v55, %v18546_v45  ;;  %v18575_v18 = vpop.f32.mrb[97].mxu1  ;;  %v18549_v59 = vpop.f32.mrb[90].mxu0  ;;  %v20895_v35 = vld [vmem:[%s26967_s5 + $0xc88] ss:$20 sps:$4 sm:$0xff]  }
 0x5d9   : > { %11331 = vmatpush1.bf16.msra.mxu1 %v20883_v41  ;;  %v18576_v0 = vadd.f32 %v18575_v18, %v18574_v46  ;;  %11230 = vmatprep.subr.bf16.mxu0 %v20888_v13  ;;  %v18577_v43 = vpop.f32.mrb[98].mxu1  ;;  %v18550_v17 = vpop.f32.mrb[91].mxu0  ;;  %v20900_v55 = vld [vmem:[%s26967_s5 + $0xcac] ss:$20 sps:$4 sm:$0xff]  }
 0x5da   : > { %v8520_v47 = vrot.slane %v8482_v62, %v21949_v29  ;;  %v8575_v21 = vcombine.high %v8482_v62, %v8482_v62  ;;  %v8487_v25 = vmax.f32 %v8472_v53, 0.0  ;;  %v8383_v24 = vadd.f32 %v18548_v12, %v24640_v9  ;;  %11332 = vmatprep.subr.bf16.mxu1 %v20891_v52  ;;  %v18578_v31 = vpop.f32.mrb[99].mxu1  ;;  %v20901_v17 = vld [vmem:[%s26967_s5 + $0xcb0] ss:$20 sps:$4 sm:$0xff]  }
 0x5db   : > { %v8704_v9 = vrot.slane %v8696_v8, %v21949_v29  ;;  %v20909_v31 = vld [vmem:[%s26967_s5 + $0xcdc] ss:$20 sps:$4 sm:$0xff]  }
 0x5dc   : > { %v8535_v49 = vrot.slane %v8520_v47, %v21949_v29  ;;  %v8543_v51 = vcombine.high %v8520_v47, %v8520_v47  ;;  %v8596_v61 = vrot.slane %v8575_v21, %v21949_v29  ;;  %v8675_v7 = vrot.slane %v8487_v25, %v21949_v29  ;;  %11231 = vmatpush1.bf16.msra.mxu0 %v20886_v14 }
 0x5dd   : > { %v8729_v10 = vcombine.high %v8487_v25, %v8487_v25  ;;  %v8431_v8 = vadd.f32 %v18576_v0, %v8383_v24  ;;  %11333 = vmatpush1.bf16.msra.mxu1 %v20889_v60  ;;  %11251 = vmatprep.subr.bf16.mxu0 %v20894_v23  ;;  %v20906_v24 = vld [vmem:[%s26967_s5 + $0xcd4] ss:$20 sps:$4 sm:$0xff]  }
 0x5de   : > { %v8536_v48 = vcombine.low %v8528_v63, %v8535_v49  ;;  %v8557_v2 = vrot.slane %v8543_v51, %v21949_v29  ;;  %v8563_v40 = vcombine.high %v8528_v63, %v8535_v49  ;;  %v8611_v41 = vrot.slane %v8596_v61, %v21949_v29  ;;  %11353 = vmatprep.subr.bf16.mxu1 %v20897_v36  ;;  %v20903_v63 = vld [vmem:[%s26967_s5 + $0xcb4] ss:$20 sps:$4 sm:$0xff]   ;;  %v20912_v49 = vld [vmem:[%s26967_s5 + $0xcfc] ss:$20 sps:$4 sm:$0xff]  }
 0x5df   : > { %v8618_v50 = vcombine.high %v8596_v61, %v8596_v61  ;;  %v8690_v27 = vrot.slane %v8675_v7, %v21949_v29  ;;  %v8697_v28 = vcombine.high %v8675_v7, %v8675_v7  ;;  %v8750_v13 = vrot.slane %v8729_v10, %v21949_v29  ;;  %11233 = vmatmul.mubr.bf16.vlgmr.msra.gmra.mrb[92].mxu0 %v24098_v3  ;;  %v20913_v10 = vld [vmem:[%s26967_s5 + $0xd00] ss:$20 sps:$4 sm:$0xff]  }
 0x5e0   : > { %8540 = vst.msk [vmem:[#allocation4] ss:$8 sm:$0xf] %vm25291_vm5, %v8536_v48  ;;  %8541 = vst.msk [vmem:[#allocation4] ss:$8 sm:$0x10] %vm25291_vm5, %v8536_v48  ;;  %v8558_v37 = vcombine.low %v8550_v16, %v8557_v2  ;;  %v8568_v45 = vcombine.high %v8550_v16, %v8557_v2  ;;  %v8612_v52 = vcombine.low %v8604_v30, %v8611_v41  ;;  %11335 = vmatmul.mubr.bf16.vlgmr.msra.gmra.mrb[100].mxu1 %v24098_v3 }
 0x5e1   : > { %8566 = vst.msk [vmem:[#allocation4 + $0x4] ss:$8 sm:$0xf] %vm25291_vm5, %v8563_v40  ;;  %8567 = vst.msk [vmem:[#allocation4 + $0x4] ss:$8 sm:$0x10] %vm25291_vm5, %v8563_v40  ;;  %v8638_v46 = vcombine.high %v8604_v30, %v8611_v41  ;;  %v8632_v62 = vrot.slane %v8618_v50, %v21949_v29  ;;  %v8691_v53 = vcombine.low %v8683_v33, %v8690_v27  ;;  %11242 = vmatprep.mubr.bf16.mxu0 %v24101_v42 }
 0x5e2   : > { %v8711_v12 = vrot.slane %v8697_v28, %v21949_v29  ;;  %v8717_v18 = vcombine.high %v8683_v33, %v8690_v27  ;;  %8561 = vst.msk [vmem:[#allocation4 + $0x2] ss:$8 sm:$0xf] %vm25291_vm5, %v8558_v37  ;;  %8562 = vst.msk [vmem:[#allocation4 + $0x2] ss:$8 sm:$0x10] %vm25291_vm5, %v8558_v37  ;;  %v8765_v14 = vrot.slane %v8750_v13, %v21949_v29  ;;  %11252 = vmatpush1.bf16.msra.mxu0 %v20892_v6 }
 0x5e3   : > { %8571 = vst.msk [vmem:[#allocation4 + $0x6] ss:$8 sm:$0xf] %vm25291_vm5, %v8568_v45  ;;  %8572 = vst.msk [vmem:[#allocation4 + $0x6] ss:$8 sm:$0x10] %vm25291_vm5, %v8568_v45  ;;  %v8772_v59 = vcombine.high %v8750_v13, %v8750_v13  ;;  %v8477_v16 = vadd.f32 %v25217_v58, %v8431_v8  ;;  %11344 = vmatprep.mubr.bf16.mxu1 %v24101_v42  ;;  %v8633_v0 = vcombine.low %v8625_v11, %v8632_v62 }
 0x5e4   : > { %8615 = vst.msk [vmem:[#allocation4 + $0x28] ss:$8 sm:$0xf] %vm25291_vm5, %v8612_v52  ;;  %8616 = vst.msk [vmem:[#allocation4 + $0x28] ss:$8 sm:$0x10] %vm25291_vm5, %v8612_v52  ;;  %v8643_v60 = vcombine.high %v8625_v11, %v8632_v62  ;;  %v8712_v43 = vcombine.low %v8704_v9, %v8711_v12  ;;  %v8722_v58 = vcombine.high %v8704_v9, %v8711_v12  ;;  %11354 = vmatpush1.bf16.msra.mxu1 %v20895_v35 }
 0x5e5   : > { %8641 = vst.msk [vmem:[#allocation4 + $0x2c] ss:$8 sm:$0xf] %vm25291_vm5, %v8638_v46  ;;  %8642 = vst.msk [vmem:[#allocation4 + $0x2c] ss:$8 sm:$0x10] %vm25291_vm5, %v8638_v46  ;;  %v8766_v23 = vcombine.low %v25279_v19, %v8765_v14  ;;  %v8786_v47 = vrot.slane %v8772_v59, %v21949_v29  ;;  %v8792_v21 = vcombine.high %v25279_v19, %v8765_v14  ;;  %11253 = vmatprep.subr.bf16.mxu0 %v20900_v55 }
 0x5e6   : > { %v20898_v30 = vld [vmem:[%s26967_s5 + $0xca8] ss:$20 sps:$4 sm:$0xff]   ;;  %8694 = vst.msk [vmem:[#allocation4 + $0x50] ss:$8 sm:$0xf] %vm25291_vm5, %v8691_v53  ;;  %v8492_v25 = vmax.f32 %v8477_v16, 0.0  ;;  %11355 = vmatprep.subr.bf16.mxu1 %v20903_v63  ;;  %v8837_v51 = vrot.slane %v25174_v34, %v21949_v29 }
 0x5e7   : > { %8695 = vst.msk [vmem:[#allocation4 + $0x50] ss:$8 sm:$0x10] %vm25291_vm5, %v8691_v53  ;;  %8720 = vst.msk [vmem:[#allocation4 + $0x54] ss:$8 sm:$0xf] %vm25291_vm5, %v8717_v18  ;;  %v8787_v36 = vcombine.low %v25288_v22, %v8786_v47  ;;  %v8797_v11 = vcombine.high %v25288_v22, %v8786_v47  ;;  %11254 = vmatpush1.bf16.msra.mxu0 %v20898_v30 }
 0x5e8   : > { %8721 = vst.msk [vmem:[#allocation4 + $0x54] ss:$8 sm:$0x10] %vm25291_vm5, %v8717_v18  ;;  %8636 = vst.msk [vmem:[#allocation4 + $0x2a] ss:$8 sm:$0xf] %vm25291_vm5, %v8633_v0  ;;  %v8829_v33 = vrot.slane %v8492_v25, %v21949_v29  ;;  %11356 = vmatpush1.bf16.msra.mxu1 %v20901_v17  ;;  %11243 = vmatmul.mubr.bf16.gmra.mrb[112].mxu0 %v24129_v5 }
 0x5e9   : > { %8637 = vst.msk [vmem:[#allocation4 + $0x2a] ss:$8 sm:$0x10] %vm25291_vm5, %v8633_v0  ;;  %8646 = vst.msk [vmem:[#allocation4 + $0x2e] ss:$8 sm:$0xf] %vm25291_vm5, %v8643_v60  ;;  %11255 = vmatprep.subr.bf16.mxu0 %v20906_v24  ;;  %11345 = vmatmul.mubr.bf16.gmra.mrb[120].mxu1 %v24129_v5 }
 0x5ea   : > { %8647 = vst.msk [vmem:[#allocation4 + $0x2e] ss:$8 sm:$0x10] %vm25291_vm5, %v8643_v60  ;;  %8715 = vst.msk [vmem:[#allocation4 + $0x52] ss:$8 sm:$0xf] %vm25291_vm5, %v8712_v43  ;;  %v8844_v61 = vrot.slane %v8829_v33, %v21949_v29  ;;  %11357 = vmatprep.subr.bf16.mxu1 %v20909_v31  ;;  %11283 = vmatprep.mubr.bf16.mxu0 %v24143_v15 }
 0x5eb   : > { %8716 = vst.msk [vmem:[#allocation4 + $0x52] ss:$8 sm:$0x10] %vm25291_vm5, %v8712_v43  ;;  %8725 = vst.msk [vmem:[#allocation4 + $0x56] ss:$8 sm:$0xf] %vm25291_vm5, %v8722_v58  ;;  %11385 = vmatprep.mubr.bf16.mxu1 %v24143_v15 }
 0x5ec   : > { %8726 = vst.msk [vmem:[#allocation4 + $0x56] ss:$8 sm:$0x10] %vm25291_vm5, %v8722_v58  ;;  %8769 = vst.msk [vmem:[#allocation4 + $0x78] ss:$8 sm:$0xf] %vm25291_vm5, %v8766_v23  ;;  %v8845_v7 = vcombine.low %v8837_v51, %v8844_v61 }
 0x5ed   : > { %8770 = vst.msk [vmem:[#allocation4 + $0x78] ss:$8 sm:$0x10] %vm25291_vm5, %v8766_v23  ;;  %8795 = vst.msk [vmem:[#allocation4 + $0x7c] ss:$8 sm:$0xf] %vm25291_vm5, %v8792_v21 }
 0x5ee   : > { %8796 = vst.msk [vmem:[#allocation4 + $0x7c] ss:$8 sm:$0x10] %vm25291_vm5, %v8792_v21  ;;  %v20904_v9 = vld [vmem:[%s26967_s5 + $0xcd0] ss:$20 sps:$4 sm:$0xff]  }
 0x5ef   : > { %v20907_v19 = vld [vmem:[%s26967_s5 + $0xcd8] ss:$20 sps:$4 sm:$0xff]   ;;  %8790 = vst.msk [vmem:[#allocation4 + $0x7a] ss:$8 sm:$0xf] %vm25291_vm5, %v8787_v36  ;;  %11256 = vmatpush1.bf16.msra.mxu0 %v20904_v9 }
 0x5f0   : > { %8791 = vst.msk [vmem:[#allocation4 + $0x7a] ss:$8 sm:$0x10] %vm25291_vm5, %v8787_v36  ;;  %8800 = vst.msk [vmem:[#allocation4 + $0x7e] ss:$8 sm:$0xf] %vm25291_vm5, %v8797_v11  ;;  %11358 = vmatpush1.bf16.msra.mxu1 %v20907_v19  ;;  %11257 = vmatprep.subr.bf16.mxu0 %v20912_v49 }
 0x5f1   : > { %8801 = vst.msk [vmem:[#allocation4 + $0x7e] ss:$8 sm:$0x10] %vm25291_vm5, %v8797_v11  ;;  %v20915_v34 = vld [vmem:[%s26967_s5 + $0xd04] ss:$20 sps:$4 sm:$0xff]  }
 0x5f2   : > { %v20910_v22 = vld [vmem:[%s26967_s5 + $0xcf8] ss:$20 sps:$4 sm:$0xff]   ;;  %8848 = vst.msk [vmem:[#allocation4 + $0xa0] ss:$8 sm:$0xf] %vm25291_vm5, %v8845_v7  ;;  %11359 = vmatprep.subr.bf16.mxu1 %v20915_v34 }
 0x5f3   : > { %v20918_v8 = vld [vmem:[%s26967_s5 + $0xd24] ss:$20 sps:$4 sm:$0xff]   ;;  %8849 = vst.msk [vmem:[#allocation4 + $0xa0] ss:$8 sm:$0x10] %vm25291_vm5, %v8845_v7  ;;  %11258 = vmatpush1.bf16.msra.mxu0 %v20910_v22 }
 0x5f4   : > { %v20921_v48 = vld [vmem:[%s26967_s5 + $0xd2c] ss:$20 sps:$4 sm:$0xff]   ;;  %11360 = vmatpush1.bf16.msra.mxu1 %v20913_v10  ;;  %11259 = vmatprep.subr.bf16.mxu0 %v20918_v8  ;;  %v20919_v40 = vld [vmem:[%s26967_s5 + $0xd28] ss:$20 sps:$4 sm:$0xff]   ;;  %v20925_v27 = vld [vmem:[%s26967_s5 + $0xd50] ss:$20 sps:$4 sm:$0xff]  }
 0x5f5   : > { %v20916_v2 = vld [vmem:[%s26967_s5 + $0xd20] ss:$20 sps:$4 sm:$0xff]   ;;  %11361 = vmatprep.subr.bf16.mxu1 %v20921_v48  ;;  %v20922_v50 = vld [vmem:[%s26967_s5 + $0xd48] ss:$20 sps:$4 sm:$0xff]   ;;  %v20928_v35 = vld [vmem:[%s26967_s5 + $0xd70] ss:$20 sps:$4 sm:$0xff]  }
 0x5f6   : > { %v20924_v41 = vld [vmem:[%s26967_s5 + $0xd4c] ss:$20 sps:$4 sm:$0xff]   ;;  %v20927_v6 = vld [vmem:[%s26967_s5 + $0xd54] ss:$20 sps:$4 sm:$0xff]   ;;  %v20933_v13 = vld [vmem:[%s26967_s5 + $0xd7c] ss:$20 sps:$4 sm:$0xff]  }
 0x5f7   : > { %11260 = vmatpush1.bf16.msra.mxu0 %v20916_v2  ;;  %v20930_v28 = vld [vmem:[%s26967_s5 + $0xd74] ss:$20 sps:$4 sm:$0xff]   ;;  %v20931_v37 = vld [vmem:[%s26967_s5 + $0xd78] ss:$20 sps:$4 sm:$0xff]   ;;  %v20936_v45 = vld [vmem:[%s26967_s5 + $0xd9c] ss:$20 sps:$4 sm:$0xff]  }
 0x5f8   : > { %11362 = vmatpush1.bf16.msra.mxu1 %v20919_v40  ;;  %11261 = vmatprep.subr.bf16.mxu0 %v20924_v41  ;;  %v20939_v52 = vld [vmem:[%s26967_s5 + $0xda4] ss:$20 sps:$4 sm:$0xff]   ;;  %v20937_v55 = vld [vmem:[%s26967_s5 + $0xda0] ss:$20 sps:$4 sm:$0xff]   ;;  %v20943_v12 = vld [vmem:[%s26967_s5 + $0xdc8] ss:$20 sps:$4 sm:$0xff]  }
 0x5f9   : > { %11363 = vmatprep.subr.bf16.mxu1 %v20927_v6  ;;  %v20934_v46 = vld [vmem:[%s26967_s5 + $0xd98] ss:$20 sps:$4 sm:$0xff]   ;;  %v20940_v53 = vld [vmem:[%s26967_s5 + $0xdc0] ss:$20 sps:$4 sm:$0xff]   ;;  %v20946_v59 = vld [vmem:[%s26967_s5 + $0xde8] ss:$20 sps:$4 sm:$0xff]  }
 0x5fa   : > { %v20942_v63 = vld [vmem:[%s26967_s5 + $0xdc4] ss:$20 sps:$4 sm:$0xff]   ;;  %v20945_v62 = vld [vmem:[%s26967_s5 + $0xdcc] ss:$20 sps:$4 sm:$0xff]   ;;  %v20951_v14 = vld [vmem:[%s26967_s5 + $0xdf4] ss:$20 sps:$4 sm:$0xff]  }
 0x5fb   : > { %11262 = vmatpush1.bf16.msra.mxu0 %v20922_v50  ;;  %v20948_v18 = vld [vmem:[%s26967_s5 + $0xdec] ss:$20 sps:$4 sm:$0xff]   ;;  %v20949_v16 = vld [vmem:[%s26967_s5 + $0xdf0] ss:$20 sps:$4 sm:$0xff]   ;;  %v20954_v30 = vld [vmem:[%s26967_s5 + $0xe14] ss:$20 sps:$4 sm:$0xff]  }
 0x5fc   : > { %11364 = vmatpush1.bf16.msra.mxu1 %v20925_v27  ;;  %11263 = vmatprep.subr.bf16.mxu0 %v20930_v28  ;;  %v20957_v0 = vld [vmem:[%s26967_s5 + $0xe1c] ss:$20 sps:$4 sm:$0xff]   ;;  %v20955_v43 = vld [vmem:[%s26967_s5 + $0xe18] ss:$20 sps:$4 sm:$0xff]   ;;  %v20961_v47 = vld [vmem:[%s26967_s5 + $0xe40] ss:$20 sps:$4 sm:$0xff]  }
 0x5fd   : > { %11365 = vmatprep.subr.bf16.mxu1 %v20933_v13  ;;  %v20952_v60 = vld [vmem:[%s26967_s5 + $0xe10] ss:$20 sps:$4 sm:$0xff]   ;;  %v20958_v23 = vld [vmem:[%s26967_s5 + $0xe38] ss:$20 sps:$4 sm:$0xff]   ;;  %v20964_v24 = vld [vmem:[%s26967_s5 + $0xe60] ss:$20 sps:$4 sm:$0xff]  }
 0x5fe   : > { %v20960_v58 = vld [vmem:[%s26967_s5 + $0xe3c] ss:$20 sps:$4 sm:$0xff]   ;;  %v20963_v17 = vld [vmem:[%s26967_s5 + $0xe44] ss:$20 sps:$4 sm:$0xff]   ;;  %v20969_v25 = vld [vmem:[%s26967_s5 + $0xe6c] ss:$20 sps:$4 sm:$0xff]  }
 0x5ff   : > { %11264 = vmatpush1.bf16.msra.mxu0 %v20928_v35  ;;  %v20966_v21 = vld [vmem:[%s26967_s5 + $0xe64] ss:$20 sps:$4 sm:$0xff]   ;;  %v20967_v31 = vld [vmem:[%s26967_s5 + $0xe68] ss:$20 sps:$4 sm:$0xff]   ;;  %v20972_v36 = vld [vmem:[%s26967_s5 + $0xe8c] ss:$20 sps:$4 sm:$0xff]  }
 0x600   : > { %11366 = vmatpush1.bf16.msra.mxu1 %v20931_v37  ;;  %11265 = vmatprep.subr.bf16.mxu0 %v20936_v45  ;;  %v20975_v11 = vld [vmem:[%s26967_s5 + $0xe94] ss:$20 sps:$4 sm:$0xff]   ;;  %v20973_v9 = vld [vmem:[%s26967_s5 + $0xe90] ss:$20 sps:$4 sm:$0xff]   ;;  %v20979_v61 = vld [vmem:[%s26967_s5 + $0xeb8] ss:$20 sps:$4 sm:$0xff]  }
 0x601   : > { %11367 = vmatprep.subr.bf16.mxu1 %v20939_v52  ;;  %v20970_v33 = vld [vmem:[%s26967_s5 + $0xe88] ss:$20 sps:$4 sm:$0xff]   ;;  %v20976_v51 = vld [vmem:[%s26967_s5 + $0xeb0] ss:$20 sps:$4 sm:$0xff]   ;;  %v20982_v40 = vld [vmem:[%s26967_s5 + $0xed8] ss:$20 sps:$4 sm:$0xff]  }
 0x602   : > { %v20978_v19 = vld [vmem:[%s26967_s5 + $0xeb4] ss:$20 sps:$4 sm:$0xff]   ;;  %v20981_v49 = vld [vmem:[%s26967_s5 + $0xebc] ss:$20 sps:$4 sm:$0xff]   ;;  %v20987_v8 = vld [vmem:[%s26967_s5 + $0xee4] ss:$20 sps:$4 sm:$0xff]  }
 0x603   : > { %11266 = vmatpush1.bf16.msra.mxu0 %v20934_v46  ;;  %v20984_v7 = vld [vmem:[%s26967_s5 + $0xedc] ss:$20 sps:$4 sm:$0xff]   ;;  %v20985_v50 = vld [vmem:[%s26967_s5 + $0xee0] ss:$20 sps:$4 sm:$0xff]   ;;  %v20992_v45 = vld [vmem:[%s26967_s5 + $0xb78] ss:$20 sps:$4 sm:$0xff]  }
 0x604   : > { %11368 = vmatpush1.bf16.msra.mxu1 %v20937_v55  ;;  %11267 = vmatprep.subr.bf16.mxu0 %v20942_v63  ;;  %v20988_v28 = vld [vmem:[%s26967_s5 + $0xb50] ss:$20 sps:$4 sm:$0xff]   ;;  %v20993_v52 = vld [vmem:[%s26967_s5 + $0xdf8] ss:$20 sps:$4 sm:$0xff]   ;;  %v20996_v63 = vld [vmem:[%s26967_s5 + $0xba0] ss:$20 sps:$4 sm:$0xff]  }
 0x605   : > { %11369 = vmatprep.subr.bf16.mxu1 %v20945_v62  ;;  %v20989_v13 = vld [vmem:[%s26967_s5 + $0xdd0] ss:$20 sps:$4 sm:$0xff]   ;;  %v20994_v46 = vld [vmem:[%s26967_s5 + $0xa38] ss:$20 sps:$4 sm:$0xff]   ;;  %v20997_v62 = vld [vmem:[%s26967_s5 + $0xe20] ss:$20 sps:$4 sm:$0xff]  }
 0x606   : > { %v20990_v35 = vld [vmem:[%s26967_s5 + $0xa10] ss:$20 sps:$4 sm:$0xff]   ;;  %v20995_v55 = vld [vmem:[%s26967_s5 + $0xcb8] ss:$20 sps:$4 sm:$0xff]  }
 0x607   : > { %11268 = vmatpush1.bf16.msra.mxu0 %v20940_v53  ;;  %v20991_v37 = vld [vmem:[%s26967_s5 + $0xc90] ss:$20 sps:$4 sm:$0xff]   ;;  %v20998_v53 = vld [vmem:[%s26967_s5 + $0xa60] ss:$20 sps:$4 sm:$0xff]  }
 0x608   : > { %11370 = vmatpush1.bf16.msra.mxu1 %v20943_v12  ;;  %11269 = vmatprep.subr.bf16.mxu0 %v20948_v18  ;;  %v20999_v12 = vld [vmem:[%s26967_s5 + $0xce0] ss:$20 sps:$4 sm:$0xff]   ;;  %v21000_v18 = vld [vmem:[%s26967_s5 + $0xbc8] ss:$20 sps:$4 sm:$0xff]  }
 0x609   : > { %11371 = vmatprep.subr.bf16.mxu1 %v20951_v14  ;;  %v21001_v14 = vld [vmem:[%s26967_s5 + $0xe48] ss:$20 sps:$4 sm:$0xff]  }
 0x60b   : > { %11270 = vmatpush1.bf16.msra.mxu0 %v20946_v59  ;;  %v21002_v59 = vld [vmem:[%s26967_s5 + $0xa88] ss:$20 sps:$4 sm:$0xff]  }
 0x60c   : > { %11372 = vmatpush1.bf16.msra.mxu1 %v20949_v16  ;;  %11271 = vmatprep.subr.bf16.mxu0 %v20954_v30  ;;  %v21003_v16 = vld [vmem:[%s26967_s5 + $0xd08] ss:$20 sps:$4 sm:$0xff]   ;;  %v21004_v30 = vld [vmem:[%s26967_s5 + $0xbf0] ss:$20 sps:$4 sm:$0xff]  }
 0x60d   : > { %11373 = vmatprep.subr.bf16.mxu1 %v20957_v0  ;;  %v21007_v0 = vld [vmem:[%s26967_s5 + $0xd30] ss:$20 sps:$4 sm:$0xff]  }
 0x60f   : > { %11272 = vmatpush1.bf16.msra.mxu0 %v20952_v60  ;;  %v21008_v60 = vld [vmem:[%s26967_s5 + $0xc18] ss:$20 sps:$4 sm:$0xff]  }
 0x610   : > { %11374 = vmatpush1.bf16.msra.mxu1 %v20955_v43  ;;  %11273 = vmatprep.subr.bf16.mxu0 %v20960_v58  ;;  %v21009_v43 = vld [vmem:[%s26967_s5 + $0xe98] ss:$20 sps:$4 sm:$0xff]  }
 0x611   : > { %11375 = vmatprep.subr.bf16.mxu1 %v20963_v17  ;;  %v21010_v58 = vld [vmem:[%s26967_s5 + $0xad8] ss:$20 sps:$4 sm:$0xff]  }
 0x612   : > { %v21011_v17 = vld [vmem:[%s26967_s5 + $0xd58] ss:$20 sps:$4 sm:$0xff]  }
 0x613   : > { %11274 = vmatpush1.bf16.msra.mxu0 %v20958_v23  ;;  %v21012_v23 = vld [vmem:[%s26967_s5 + $0xc40] ss:$20 sps:$4 sm:$0xff]  }
 0x614   : > { %11376 = vmatpush1.bf16.msra.mxu1 %v20961_v47  ;;  %11275 = vmatprep.subr.bf16.mxu0 %v20966_v21  ;;  %v21013_v47 = vld [vmem:[%s26967_s5 + $0xec0] ss:$20 sps:$4 sm:$0xff]  }
 0x615   : > { %11377 = vmatprep.subr.bf16.mxu1 %v20969_v25  ;;  %v21014_v21 = vld [vmem:[%s26967_s5 + $0xb00] ss:$20 sps:$4 sm:$0xff]  }
 0x616   : > { %v21015_v25 = vld [vmem:[%s26967_s5 + $0xd80] ss:$20 sps:$4 sm:$0xff]  }
 0x617   : > { %11276 = vmatpush1.bf16.msra.mxu0 %v20964_v24  ;;  %v25562_v34 = vpop.f32.mrb[96].mxu0  ;;  %v21016_v24 = vld [vmem:[%s26967_s5 + $0xc68] ss:$20 sps:$4 sm:$0xff]  }
 0x618   : > { %11378 = vmatpush1.bf16.msra.mxu1 %v20967_v31  ;;  %11277 = vmatprep.subr.bf16.mxu0 %v20972_v36  ;;  %v25567_v22 = vpop.f32.mrb[104].mxu1  ;;  %v25569_v10 = vpop.f32.mrb[97].mxu0  ;;  %v21017_v31 = vld [vmem:[%s26967_s5 + $0xee8] ss:$20 sps:$4 sm:$0xff]  }
 0x619   : > { %11379 = vmatprep.subr.bf16.mxu1 %v20975_v11  ;;  %v25574_v48 = vpop.f32.mrb[105].mxu1  ;;  %v10116_v2 = vpop.f32.mrb[98].mxu0  ;;  %v21018_v36 = vld [vmem:[%s26967_s5 + $0xb28] ss:$20 sps:$4 sm:$0xff]  }
 0x61a   : > { %v10218_v41 = vpop.f32.mrb[106].mxu1  ;;  %v10117_v6 = vpop.f32.mrb[99].mxu0  ;;  %v21019_v11 = vld [vmem:[%s26967_s5 + $0xda8] ss:$20 sps:$4 sm:$0xff]  }
 0x61b   : > { %11278 = vmatpush1.bf16.msra.mxu0 %v20970_v33  ;;  %v10219_v27 = vpop.f32.mrb[107].mxu1 }
 0x61c   : > { %11380 = vmatpush1.bf16.msra.mxu1 %v20973_v9  ;;  %11279 = vmatprep.subr.bf16.mxu0 %v20978_v19 }
 0x61d   : > { %11381 = vmatprep.subr.bf16.mxu1 %v20981_v49 }
 0x61f   : > { %11280 = vmatpush1.bf16.msra.mxu0 %v20976_v51 }
 0x620   : > { %11382 = vmatpush1.bf16.msra.mxu1 %v20979_v61  ;;  %11281 = vmatprep.subr.bf16.mxu0 %v20984_v7 }
 0x621   : > { %11383 = vmatprep.subr.bf16.mxu1 %v20987_v8 }
 0x623   : > { %11282 = vmatpush1.bf16.msra.mxu0 %v20982_v40 }
 0x624   : > { %11384 = vmatpush1.bf16.msra.mxu1 %v20985_v50  ;;  %18636 = vmatprep.subr.bf16.mxu0 %v20988_v28 }
 0x625   : > { %18664 = vmatprep.subr.bf16.mxu1 %v20989_v13 }
 0x626   : > { %11284 = vmatmul.mubr.bf16.vlgmr.msra.gmra.mrb[92].mxu0 %v24316_v56 }
 0x627   : > { %11386 = vmatmul.mubr.bf16.vlgmr.msra.gmra.mrb[100].mxu1 %v24316_v56  ;;  %11293 = vmatprep.mubr.bf16.mxu0 %v24319_v57 }
 0x628   : > { %11395 = vmatprep.mubr.bf16.mxu1 %v24319_v57  ;;  %18637 = vmatpush3.bf16.msra.mxu0 %v20990_v35 }
 0x629   : > { %18665 = vmatpush3.bf16.msra.mxu1 %v20991_v37  ;;  %18638 = vmatprep.subr.bf16.mxu0 %v20992_v45 }
 0x62a   : > { %18666 = vmatprep.subr.bf16.mxu1 %v20993_v52 }
 0x62c   : > { %18639 = vmatpush3.bf16.msra.mxu0 %v20994_v46 }
 0x62d   : > { %18667 = vmatpush3.bf16.msra.mxu1 %v20995_v55  ;;  %18640 = vmatprep.subr.bf16.mxu0 %v20996_v63 }
 0x62e   : > { %11294 = vmatmul.mubr.bf16.gmra.mrb[116].mxu0 %v24346_v54  ;;  %18668 = vmatprep.subr.bf16.mxu1 %v20997_v62 }
 0x62f   : > { %11396 = vmatmul.mubr.bf16.gmra.mrb[124].mxu1 %v24346_v54  ;;  %11436 = vmatprep.mubr.bf16.mxu0 %v23927_v26  ;;  %v21005_v26 = vld [vmem:[%s26967_s5 + $0xe70] ss:$20 sps:$4 sm:$0xff]  }
 0x630   : > { %18641 = vmatpush3.bf16.msra.mxu0 %v20998_v53  ;;  %11484 = vmatprep.mubr.bf16.mxu1 %v24143_v15  ;;  %v21006_v15 = vld [vmem:[%s26967_s5 + $0xab0] ss:$20 sps:$4 sm:$0xff]  }
 0x631   : > { %18669 = vmatpush3.bf16.msra.mxu1 %v20999_v12  ;;  %18642 = vmatprep.subr.bf16.mxu0 %v21000_v18 }
 0x632   : > { %18670 = vmatprep.subr.bf16.mxu1 %v21001_v14  ;;  %v21020_v14 = vld [vmem:[%s26969_s7 + $0x1d0] sm:$0xff]  }
 0x634   : > { %18643 = vmatpush3.bf16.msra.mxu0 %v21002_v59  ;;  %v21021_v59 = vld [vmem:[%s26969_s7 + $0x150] sm:$0xff]  }
 0x635   : > { %18671 = vmatpush3.bf16.msra.mxu1 %v21003_v16  ;;  %18644 = vmatprep.subr.bf16.mxu0 %v21004_v30  ;;  %v21022_v16 = vld [vmem:[%s26969_s7 + $0x190] sm:$0xff]  }
 0x636   : > { %18672 = vmatprep.subr.bf16.mxu1 %v21005_v26  ;;  %v21023_v30 = vld [vmem:[%s26969_s7 + $0x110] sm:$0xff]   ;;  %v21024_v26 = vld [vmem:[%s26969_s7 + $0x1d8] sm:$0xff]  }
 0x638   : > { %18645 = vmatpush3.bf16.msra.mxu0 %v21006_v15  ;;  %v21025_v15 = vld [vmem:[%s26969_s7 + $0x158] sm:$0xff]  }
 0x639   : > { %18673 = vmatpush3.bf16.msra.mxu1 %v21007_v0  ;;  %18646 = vmatprep.subr.bf16.mxu0 %v21008_v60  ;;  %v21026_v0 = vld [vmem:[%s26969_s7 + $0x198] sm:$0xff]  }
 0x63a   : > { %18674 = vmatprep.subr.bf16.mxu1 %v21009_v43  ;;  %v21027_v60 = vld [vmem:[%s26969_s7 + $0x118] sm:$0xff]   ;;  %v21028_v43 = vld [vmem:[%s26969_s7 + $0x1e0] sm:$0xff]  }
 0x63c   : > { %18647 = vmatpush3.bf16.msra.mxu0 %v21010_v58  ;;  %v21029_v58 = vld [vmem:[%s26969_s7 + $0x160] sm:$0xff]  }
 0x63d   : > { %18675 = vmatpush3.bf16.msra.mxu1 %v21011_v17  ;;  %18648 = vmatprep.subr.bf16.mxu0 %v21012_v23  ;;  %v21030_v17 = vld [vmem:[%s26969_s7 + $0x1a0] sm:$0xff]  }
 0x63e   : > { %18676 = vmatprep.subr.bf16.mxu1 %v21013_v47  ;;  %v21031_v23 = vld [vmem:[%s26969_s7 + $0x120] sm:$0xff]   ;;  %v21032_v47 = vld [vmem:[%s26969_s7 + $0x1e8] sm:$0xff]  }
 0x640   : > { %18649 = vmatpush3.bf16.msra.mxu0 %v21014_v21  ;;  %v21033_v21 = vld [vmem:[%s26969_s7 + $0x168] sm:$0xff]  }
 0x641   : > { %18677 = vmatpush3.bf16.msra.mxu1 %v21015_v25  ;;  %18650 = vmatprep.subr.bf16.mxu0 %v21016_v24  ;;  %v21034_v25 = vld [vmem:[%s26969_s7 + $0x1a8] sm:$0xff]  }
 0x642   : > { %18678 = vmatprep.subr.bf16.mxu1 %v21017_v31  ;;  %v21035_v24 = vld [vmem:[%s26969_s7 + $0x128] sm:$0xff]   ;;  %v21036_v31 = vld [vmem:[%s26969_s7 + $0x1f0] sm:$0xff]  }
 0x644   : > { %18651 = vmatpush3.bf16.msra.mxu0 %v21018_v36  ;;  %v21037_v36 = vld [vmem:[%s26969_s7 + $0x170] sm:$0xff]  }
 0x645   : > { %18679 = vmatpush3.bf16.msra.mxu1 %v21019_v11  ;;  %18692 = vmatprep.subr.bf16.mxu0 %v21021_v59  ;;  %v21038_v11 = vld [vmem:[%s26969_s7 + $0x1b0] sm:$0xff]  }
 0x646   : > { %18720 = vmatprep.subr.bf16.mxu1 %v21020_v14 }
 0x647   : > { %11437 = vmatmul.mubr.bf16.vlgmr.msra.gmra.mrb[120].mxu0 %v24098_v3 }
 0x648   : > { %11485 = vmatmul.mubr.bf16.vlgmr.msra.gmra.mrb[128].mxu1 %v24316_v56  ;;  %11444 = vmatprep.mubr.bf16.mxu0 %v24101_v42 }
 0x649   : > { %11492 = vmatprep.mubr.bf16.mxu1 %v24319_v57  ;;  %18721 = vmatpush3.bf16.msra.mxu1 %v21022_v16 }
 0x64a   : > { %18693 = vmatpush3.bf16.msra.mxu0 %v21023_v30  ;;  %18722 = vmatprep.subr.bf16.mxu1 %v21024_v26 }
 0x64b   : > { %18694 = vmatprep.subr.bf16.mxu0 %v21025_v15 }
 0x64d   : > { %18723 = vmatpush3.bf16.msra.mxu1 %v21026_v0 }
 0x64e   : > { %18695 = vmatpush3.bf16.msra.mxu0 %v21027_v60  ;;  %18724 = vmatprep.subr.bf16.mxu1 %v21028_v43 }
 0x64f   : > { %11445 = vmatmul.mubr.bf16.gmra.mrb[124].mxu0 %v24129_v5  ;;  %18696 = vmatprep.subr.bf16.mxu0 %v21029_v58 }
 0x650   : > { %11493 = vmatmul.mubr.bf16.gmra.mrb[132].mxu1 %v24346_v54 }
 0x651   : > { %18725 = vmatpush3.bf16.msra.mxu1 %v21030_v17 }
 0x652   : > { %18697 = vmatpush3.bf16.msra.mxu0 %v21031_v23  ;;  %18726 = vmatprep.subr.bf16.mxu1 %v21032_v47 }
 0x653   : > { %18698 = vmatprep.subr.bf16.mxu0 %v21033_v21 }
 0x655   : > { %18727 = vmatpush3.bf16.msra.mxu1 %v21034_v25 }
 0x656   : > { %18699 = vmatpush3.bf16.msra.mxu0 %v21035_v24  ;;  %18728 = vmatprep.subr.bf16.mxu1 %v21036_v31 }
 0x657   : > { %18700 = vmatprep.subr.bf16.mxu0 %v21037_v36 }
 0x658   : > { %v10163_v33 = vpop.f32.mrb[100].mxu0 }
 0x659   : > { %v25693_v9 = vadd.f32 %v10163_v33, %v25562_v34  ;;  %v10265_v19 = vpop.f32.mrb[108].mxu1  ;;  %v10165_v49 = vpop.f32.mrb[101].mxu0  ;;  %v21039_v33 = vld [vmem:[%s26969_s7 + $0x130] sm:$0xff]   ;;  %18729 = vmatpush3.bf16.msra.mxu1 %v21038_v11 }
 0x65a   : > { %v25696_v51 = vadd.f32 %v10265_v19, %v25567_v22  ;;  %v25699_v3 = vadd.f32 %v10165_v49, %v25569_v10  ;;  %v10267_v56 = vpop.f32.mrb[109].mxu1  ;;  %v10167_v42 = vpop.f32.mrb[102].mxu0  ;;  %18701 = vmatpush3.bf16.msra.mxu0 %v21039_v33  ;;  %v21040_v19 = vld [vmem:[%s26969_s7 + $0x1f8] sm:$0xff]  }
 0x65b   : > { %v25702_v57 = vadd.f32 %v10267_v56, %v25574_v48  ;;  %v10269_v5 = vpop.f32.mrb[110].mxu1  ;;  %v10168_v61 = vpop.f32.mrb[103].mxu0  ;;  %v21041_v49 = vld [vmem:[%s26969_s7 + $0x178] sm:$0xff]   ;;  %18730 = vmatprep.subr.bf16.mxu1 %v21040_v19 }
 0x65c   : > { %v10270_v54 = vpop.f32.mrb[111].mxu1  ;;  %v21042_v56 = vld [vmem:[%s26969_s7 + $0x1b8] sm:$0xff]   ;;  %v21044_v5 = vld [vmem:[%s26969_s7 + $0x200] sm:$0xff]   ;;  %18702 = vmatprep.subr.bf16.mxu0 %v21041_v49 }
 0x65d   : > { %v21043_v42 = vld [vmem:[%s26969_s7 + $0x138] sm:$0xff]   ;;  %v21045_v61 = vld [vmem:[%s26969_s7 + $0x180] sm:$0xff]   ;;  %18731 = vmatpush3.bf16.msra.mxu1 %v21042_v56 }
 0x65e   : > { %v21046_v54 = vld [vmem:[%s26969_s7 + $0x1c0] sm:$0xff]   ;;  %18703 = vmatpush3.bf16.msra.mxu0 %v21043_v42  ;;  %18732 = vmatprep.subr.bf16.mxu1 %v21044_v5 }
 0x65f   : > { %18704 = vmatprep.subr.bf16.mxu0 %v21045_v61 }
 0x661   : > { %18733 = vmatpush3.bf16.msra.mxu1 %v21046_v54 }
 0x671   : > { %v18596_v7 = vpop.f32.mrb[104].mxu0 }
 0x672   : > { %v18624_v8 = vpop.f32.mrb[112].mxu1  ;;  %v18597_v34 = vpop.f32.mrb[105].mxu0 }
 0x673   : > { %v18598_v2 = vadd.f32 %v18597_v34, %v18596_v7  ;;  %v18625_v40 = vpop.f32.mrb[113].mxu1  ;;  %v18599_v41 = vpop.f32.mrb[106].mxu0  ;;  %v21047_v7 = vld [vmem:[%s26969_s7 + $0x140] sm:$0xff]   ;;  %v21049_v34 = vld [vmem:[%s26969_s7 + $0x188] sm:$0xff]  }
 0x674   : > { %v18626_v6 = vadd.f32 %v18625_v40, %v18624_v8  ;;  %v18627_v22 = vpop.f32.mrb[114].mxu1  ;;  %v18600_v50 = vpop.f32.mrb[107].mxu0  ;;  %v21048_v8 = vld [vmem:[%s26969_s7 + $0x208] sm:$0xff]   ;;  %18705 = vmatpush3.bf16.msra.mxu0 %v21047_v7 }
 0x675   : > { %v18601_v27 = vadd.f32 %v18600_v50, %v18599_v41  ;;  %v18628_v10 = vpop.f32.mrb[115].mxu1  ;;  %18734 = vmatprep.subr.bf16.mxu1 %v21048_v8  ;;  %v21051_v41 = vld [vmem:[%s26969_s7 + $0x148] sm:$0xff]   ;;  %18706 = vmatprep.subr.bf16.mxu0 %v21049_v34 }
 0x676   : > { %v25704_v28 = vadd.f32 %v18626_v6, %v18598_v2  ;;  %v18629_v13 = vadd.f32 %v18628_v10, %v18627_v22  ;;  %v21050_v2 = vld [vmem:[%s26969_s7 + $0x1c8] sm:$0xff]  }
 0x677   : > { %18735 = vmatpush3.bf16.msra.mxu1 %v21050_v2 }
 0x678   : > { %v25706_v35 = vadd.f32 %v18629_v13, %v18601_v27  ;;  %18707 = vmatpush3.bf16.msra.mxu0 %v21051_v41 }
 0x679   : > { %v18602_v48 = vpop.f32.mrb[108].mxu0 }
 0x67a   : > { %v18630_v37 = vpop.f32.mrb[116].mxu1  ;;  %v18603_v45 = vpop.f32.mrb[109].mxu0 }
 0x67b   : > { %v18604_v52 = vadd.f32 %v18603_v45, %v18602_v48  ;;  %v18631_v46 = vpop.f32.mrb[117].mxu1  ;;  %v18605_v55 = vpop.f32.mrb[110].mxu0 }
 0x67c   : > { %v18632_v63 = vadd.f32 %v18631_v46, %v18630_v37  ;;  %v18633_v62 = vpop.f32.mrb[118].mxu1  ;;  %v18606_v53 = vpop.f32.mrb[111].mxu0 }
 0x67d   : > { %v18634_v12 = vpop.f32.mrb[119].mxu1 }
 0x67e   : > { %v25708_v18 = vadd.f32 %v18632_v63, %v18604_v52 }
 0x6bb   : > { %v11244_v40 = vpop.f32.mrb[112].mxu0 }
 0x6bc   : > { %v25807_v6 = vadd.f32 %v11244_v40, %v25693_v9  ;;  %v11346_v22 = vpop.f32.mrb[120].mxu1  ;;  %v11246_v50 = vpop.f32.mrb[113].mxu0  ;;  %v21052_v9 = vld [vmem:[%s26969_s7 + $0x40] sm:$0xff]  }
 0x6bd   : > { %v11347_v27 = vadd.f32 %v11346_v22, %v25696_v51  ;;  %v25811_v10 = vadd.f32 %v11246_v50, %v25699_v3  ;;  %v11348_v13 = vpop.f32.mrb[121].mxu1  ;;  %v11248_v48 = vpop.f32.mrb[114].mxu0  ;;  %18752 = vmatprep.subr.bf16.mxu1 %v21052_v9  ;;  %v25822_v51 = vld [vmem:[%s26969_s7 + $0x210] sm:$0xff]   ;;  %v25828_v3 = vld [vmem:[%s26968_s6] sm:$0x1f] }
 0x6be   : > { %v25814_v37 = vadd.f32 %v11348_v13, %v25702_v57  ;;  %v11350_v45 = vpop.f32.mrb[122].mxu1  ;;  %v11249_v52 = vpop.f32.mrb[115].mxu0  ;;  %19112 = vmatprep.subr.bf16.mxu0 %v25822_v51  ;;  %v11505_v57 = vrot.slane %v25828_v3, %v21878_v38  ;;  %v11513_v55 = vrot.slane %v25828_v3, %v21935_v1  ;;  %v25836_v63 = vrot.slane %v25828_v3, %v21881_v39 }
 0x6bf   : > { %v11351_v46 = vpop.f32.mrb[123].mxu1  ;;  %v25840_v62 = vrot.slane %v25828_v3, %v21939_v4 }
 0x6f9   : > { %v11285_v53 = vpop.f32.mrb[92].mxu0 }
 0x6fa   : > { %v11527_v12 = vadd.f32 %v11505_v57, %v11285_v53  ;;  %v11387_v14 = vpop.f32.mrb[100].mxu1  ;;  %v11287_v59 = vpop.f32.mrb[93].mxu0 }
 0x6fb   : > { %v11529_v16 = vadd.f32 %v11513_v55, %v11387_v14  ;;  %v11528_v30 = vadd.f32 %v25836_v63, %v11287_v59  ;;  %v11389_v26 = vpop.f32.mrb[101].mxu1  ;;  %v11289_v38 = vpop.f32.mrb[94].mxu0 }
 0x6fc   : > { %v11542_v15 = vmax.f32 %v11527_v12, 0.0  ;;  %v11530_v1 = vadd.f32 %v25840_v62, %v11389_v26  ;;  %v11532_v0 = vadd.f32 %v11505_v57, %v11289_v38  ;;  %v11391_v60 = vpop.f32.mrb[102].mxu1  ;;  %v11291_v39 = vpop.f32.mrb[95].mxu0 }
 0x6fd   : > { %v11544_v43 = vmax.f32 %v11529_v16, 0.0  ;;  %v11543_v58 = vmax.f32 %v11528_v30, 0.0  ;;  %v11534_v17 = vadd.f32 %v11513_v55, %v11391_v60  ;;  %v11533_v4 = vadd.f32 %v25836_v63, %v11291_v39  ;;  %v11393_v23 = vpop.f32.mrb[103].mxu1 }
 0x6fe   : > { %v11545_v47 = vmax.f32 %v11530_v1, 0.0  ;;  %v11547_v21 = vmax.f32 %v11532_v0, 0.0  ;;  %v11535_v25 = vadd.f32 %v25840_v62, %v11393_v23 }
 0x6ff   : > { %v11562_v24 = vcombine.low %v11542_v15, %v11543_v58  ;;  %v11636_v31 = vcombine.high %v11542_v15, %v11543_v58  ;;  %v11549_v36 = vmax.f32 %v11534_v17, 0.0  ;;  %v11548_v11 = vmax.f32 %v11533_v4, 0.0 }
 0x700   : > { %v11563_v33 = vcombine.low %v11544_v43, %v11545_v47  ;;  %v11637_v19 = vcombine.high %v11544_v43, %v11545_v47  ;;  %v11550_v49 = vmax.f32 %v11535_v25, 0.0 }
 0x701   : > { %v25847_v56 = vrot.slane %v11562_v24, %v21949_v29  ;;  %v25850_v42 = vrot.slane %v11636_v31, %v21949_v29  ;;  %v11716_v5 = vcombine.low %v11547_v21, %v11548_v11  ;;  %v11790_v61 = vcombine.high %v11547_v21, %v11548_v11  ;;  %v11295_v54 = vpop.f32.mrb[116].mxu0 }
 0x702   : > { %v25853_v7 = vrot.slane %v11563_v33, %v21949_v29  ;;  %v25856_v8 = vrot.slane %v11637_v19, %v21949_v29  ;;  %v11717_v34 = vcombine.low %v11549_v36, %v11550_v49  ;;  %v11791_v2 = vcombine.high %v11549_v36, %v11550_v49  ;;  %v11397_v40 = vpop.f32.mrb[124].mxu1  ;;  %v11297_v41 = vpop.f32.mrb[117].mxu0 }
 0x703   : > { %v25859_v22 = vrot.slane %v11716_v5, %v21949_v29  ;;  %v25862_v50 = vrot.slane %v11790_v61, %v21949_v29  ;;  %v11296_v13 = vadd.f32 %v11295_v54, %v25807_v6  ;;  %v11398_v48 = vadd.f32 %v11397_v40, %v11347_v27  ;;  %v11399_v45 = vpop.f32.mrb[125].mxu1  ;;  %v11299_v52 = vpop.f32.mrb[118].mxu0 }
 0x704   : > { %v11585_v46 = vcombine.low %v25847_v56, %v25853_v7  ;;  %v11605_v9 = vcombine.high %v25847_v56, %v25853_v7  ;;  %v11660_v53 = vcombine.low %v25850_v42, %v25856_v8  ;;  %v11680_v12 = vcombine.high %v25850_v42, %v25856_v8  ;;  %v11401_v14 = vpop.f32.mrb[126].mxu1  ;;  %v11300_v59 = vpop.f32.mrb[119].mxu0 }
 0x705   : > { %v25874_v16 = vrot.slane %v11717_v34, %v21949_v29  ;;  %v25877_v6 = vrot.slane %v11791_v2, %v21949_v29  ;;  %v11402_v27 = vpop.f32.mrb[127].mxu1  ;;  %v11537_v30 = vadd.f32 %v11505_v57, %v11296_v13  ;;  %v11539_v26 = vadd.f32 %v11513_v55, %v11398_v48 }
 0x706   : > { %v11298_v60 = vadd.f32 %v11297_v41, %v25811_v10  ;;  %v11400_v39 = vadd.f32 %v11399_v45, %v25814_v37  ;;  %v25899_v56 = vrot.slane %v25828_v3, %v8456_v44  ;;  %v11592_v44 = vrot.slane %v11585_v46, %v21949_v29 }
 0x707   : > { %v11739_v38 = vcombine.low %v25859_v22, %v25874_v16  ;;  %v11759_v15 = vcombine.high %v25859_v22, %v25874_v16  ;;  %v11814_v1 = vcombine.low %v25862_v50, %v25877_v6  ;;  %v11834_v0 = vcombine.high %v25862_v50, %v25877_v6 }
 0x708   : > { %v11552_v43 = vmax.f32 %v11537_v30, 0.0  ;;  %v11554_v58 = vmax.f32 %v11539_v26, 0.0  ;;  %v11538_v57 = vadd.f32 %v25836_v63, %v11298_v60  ;;  %v11540_v55 = vadd.f32 %v25840_v62, %v11400_v39 }
 0x709   : > { %v11613_v30 = vrot.slane %v11605_v9, %v21949_v29  ;;  %v11667_v26 = vrot.slane %v11660_v53, %v21949_v29  ;;  %v11688_v60 = vrot.slane %v11680_v12, %v21949_v29  ;;  %v11746_v39 = vrot.slane %v11739_v38, %v21949_v29 }
 0x70a   : > { %v11553_v17 = vmax.f32 %v11538_v57, 0.0  ;;  %v11555_v4 = vmax.f32 %v11540_v55, 0.0  ;;  %v11767_v55 = vrot.slane %v11759_v15, %v21949_v29 }
 0x70c   : > { %v11870_v23 = vcombine.low %v11552_v43, %v11553_v17  ;;  %v11871_v47 = vcombine.low %v11554_v58, %v11555_v4 }
 0x70e   : > { %v11878_v21 = vrot.slane %v11870_v23, %v21949_v29  ;;  %v11885_v25 = vrot.slane %v11871_v47, %v21949_v29 }
 0x710   : > { %v25893_v24 = vcombine.low %v11878_v21, %v11885_v25 }
 0x71a   : > { %v18652_v31 = vpop.f32.mrb[120].mxu0 }
 0x71b   : > { %v18680_v10 = vpop.f32.mrb[128].mxu1  ;;  %v18653_v36 = vpop.f32.mrb[121].mxu0 }
 0x71c   : > { %v18654_v37 = vadd.f32 %v18653_v36, %v18652_v31  ;;  %v18681_v11 = vpop.f32.mrb[129].mxu1  ;;  %v18655_v33 = vpop.f32.mrb[122].mxu0 }
 0x71d   : > { %v18682_v19 = vadd.f32 %v18681_v11, %v18680_v10  ;;  %v18683_v63 = vpop.f32.mrb[130].mxu1  ;;  %v18656_v49 = vpop.f32.mrb[123].mxu0 }
 0x71e   : > { %v11439_v62 = vadd.f32 %v18654_v37, %v25704_v28  ;;  %v18657_v42 = vadd.f32 %v18656_v49, %v18655_v33  ;;  %v18684_v5 = vpop.f32.mrb[131].mxu1 }
 0x71f   : > { %v18685_v61 = vadd.f32 %v18684_v5, %v18683_v63 }
 0x720   : > { %v11487_v54 = vadd.f32 %v18682_v19, %v11439_v62  ;;  %v11442_v7 = vadd.f32 %v18657_v42, %v25706_v35  ;;  %v11842_v19 = vrot.slane %v11834_v0, %v21949_v29 }
 0x722   : > { %v11531_v8 = vadd.f32 %v25899_v56, %v11487_v54  ;;  %v11490_v34 = vadd.f32 %v18685_v61, %v11442_v7  ;;  %v18658_v2 = vpop.f32.mrb[124].mxu0 }
 0x723   : > { %v18686_v40 = vpop.f32.mrb[132].mxu1  ;;  %v18659_v41 = vpop.f32.mrb[125].mxu0 }
 0x724   : > { %v11546_v22 = vmax.f32 %v11531_v8, 0.0  ;;  %v11536_v28 = vadd.f32 %v25899_v56, %v11490_v34  ;;  %v18660_v13 = vadd.f32 %v18659_v41, %v18658_v2  ;;  %v18687_v32 = vpop.f32.mrb[133].mxu1  ;;  %v18661_v48 = vpop.f32.mrb[126].mxu0  ;;  %v11900_v2 = vrot.slane %v25893_v24, %v21949_v29 }
 0x725   : > { %v18688_v3 = vadd.f32 %v18687_v32, %v18686_v40  ;;  %v18689_v45 = vpop.f32.mrb[134].mxu1  ;;  %v18662_v52 = vpop.f32.mrb[127].mxu0 }
 0x726   : > { %v11584_v14 = vrot.slane %v11546_v22, %v21949_v29  ;;  %v11638_v35 = vcombine.high %v11546_v22, %v11546_v22  ;;  %v11551_v59 = vmax.f32 %v11536_v28, 0.0  ;;  %v11447_v16 = vadd.f32 %v18660_v13, %v25708_v18  ;;  %v18690_v27 = vpop.f32.mrb[135].mxu1 }
 0x727   : > { %v11821_v18 = vrot.slane %v11814_v1, %v21949_v29 }
 0x728   : > { %v11599_v46 = vrot.slane %v11584_v14, %v21949_v29  ;;  %v11606_v43 = vcombine.high %v11584_v14, %v11584_v14  ;;  %v11659_v58 = vrot.slane %v11638_v35, %v21949_v29  ;;  %v11738_v57 = vrot.slane %v11551_v59, %v21949_v29 }
 0x729   : > { %v11792_v17 = vcombine.high %v11551_v59, %v11551_v59  ;;  %v11495_v4 = vadd.f32 %v18688_v3, %v11447_v16 }
 0x72a   : > { %v11600_v9 = vcombine.low %v11592_v44, %v11599_v46  ;;  %v11620_v53 = vrot.slane %v11606_v43, %v21949_v29  ;;  %v11626_v23 = vcombine.high %v11592_v44, %v11599_v46  ;;  %v11674_v12 = vrot.slane %v11659_v58, %v21949_v29 }
 0x72b   : > { %v11681_v38 = vcombine.high %v11659_v58, %v11659_v58  ;;  %v11753_v47 = vrot.slane %v11738_v57, %v21949_v29  ;;  %v11760_v21 = vcombine.high %v11738_v57, %v11738_v57  ;;  %v11813_v25 = vrot.slane %v11792_v17, %v21949_v29 }
 0x72c   : > { %11603 = vst.msk [vmem:[#allocation4 + $0x1] ss:$8 sm:$0xf] %vm25291_vm5, %v11600_v9  ;;  %11604 = vst.msk [vmem:[#allocation4 + $0x1] ss:$8 sm:$0x10] %vm25291_vm5, %v11600_v9  ;;  %v11621_v15 = vcombine.low %v11613_v30, %v11620_v53  ;;  %v11631_v1 = vcombine.high %v11613_v30, %v11620_v53  ;;  %v11675_v31 = vcombine.low %v11667_v26, %v11674_v12 }
 0x72d   : > { %11629 = vst.msk [vmem:[#allocation4 + $0x5] ss:$8 sm:$0xf] %vm25291_vm5, %v11626_v23  ;;  %11630 = vst.msk [vmem:[#allocation4 + $0x5] ss:$8 sm:$0x10] %vm25291_vm5, %v11626_v23  ;;  %v11701_v10 = vcombine.high %v11667_v26, %v11674_v12  ;;  %v11695_v36 = vrot.slane %v11681_v38, %v21949_v29  ;;  %v11754_v37 = vcombine.low %v11746_v39, %v11753_v47 }
 0x72e   : > { %v11774_v11 = vrot.slane %v11760_v21, %v21949_v29  ;;  %v11780_v33 = vcombine.high %v11746_v39, %v11753_v47  ;;  %11624 = vst.msk [vmem:[#allocation4 + $0x3] ss:$8 sm:$0xf] %vm25291_vm5, %v11621_v15  ;;  %11625 = vst.msk [vmem:[#allocation4 + $0x3] ss:$8 sm:$0x10] %vm25291_vm5, %v11621_v15  ;;  %v11828_v50 = vrot.slane %v11813_v25, %v21949_v29 }
 0x72f   : > { %11634 = vst.msk [vmem:[#allocation4 + $0x7] ss:$8 sm:$0xf] %vm25291_vm5, %v11631_v1  ;;  %11635 = vst.msk [vmem:[#allocation4 + $0x7] ss:$8 sm:$0x10] %vm25291_vm5, %v11631_v1  ;;  %v11835_v6 = vcombine.high %v11813_v25, %v11813_v25  ;;  %v11541_v0 = vadd.f32 %v25899_v56, %v11495_v4  ;;  %v11696_v63 = vcombine.low %v11688_v60, %v11695_v36 }
 0x730   : > { %11678 = vst.msk [vmem:[#allocation4 + $0x29] ss:$8 sm:$0xf] %vm25291_vm5, %v11675_v31  ;;  %11679 = vst.msk [vmem:[#allocation4 + $0x29] ss:$8 sm:$0x10] %vm25291_vm5, %v11675_v31  ;;  %v11706_v49 = vcombine.high %v11688_v60, %v11695_v36  ;;  %v11775_v62 = vcombine.low %v11767_v55, %v11774_v11  ;;  %v11785_v42 = vcombine.high %v11767_v55, %v11774_v11 }
 0x731   : > { %11704 = vst.msk [vmem:[#allocation4 + $0x2d] ss:$8 sm:$0xf] %vm25291_vm5, %v11701_v10  ;;  %11705 = vst.msk [vmem:[#allocation4 + $0x2d] ss:$8 sm:$0x10] %vm25291_vm5, %v11701_v10  ;;  %v11829_v5 = vcombine.low %v11821_v18, %v11828_v50  ;;  %v11849_v61 = vrot.slane %v11835_v6, %v21949_v29  ;;  %v11855_v56 = vcombine.high %v11821_v18, %v11828_v50 }
 0x732   : > { %11757 = vst.msk [vmem:[#allocation4 + $0x51] ss:$8 sm:$0xf] %vm25291_vm5, %v11754_v37  ;;  %11758 = vst.msk [vmem:[#allocation4 + $0x51] ss:$8 sm:$0x10] %vm25291_vm5, %v11754_v37 }
 0x733   : > { %11783 = vst.msk [vmem:[#allocation4 + $0x55] ss:$8 sm:$0xf] %vm25291_vm5, %v11780_v33  ;;  %11784 = vst.msk [vmem:[#allocation4 + $0x55] ss:$8 sm:$0x10] %vm25291_vm5, %v11780_v33  ;;  %v11850_v7 = vcombine.low %v11842_v19, %v11849_v61  ;;  %v11860_v8 = vcombine.high %v11842_v19, %v11849_v61 }
 0x734   : > { %v11556_v54 = vmax.f32 %v11541_v0, 0.0  ;;  %11699 = vst.msk [vmem:[#allocation4 + $0x2b] ss:$8 sm:$0xf] %vm25291_vm5, %v11696_v63  ;;  %v21058_v61 = vld [vmem:[%s26969_s7 + $0x218] sm:$0xff]  }
 0x735   : > { %11700 = vst.msk [vmem:[#allocation4 + $0x2b] ss:$8 sm:$0x10] %vm25291_vm5, %v11696_v63  ;;  %11709 = vst.msk [vmem:[#allocation4 + $0x2f] ss:$8 sm:$0xf] %vm25291_vm5, %v11706_v49 }
 0x736   : > { %11710 = vst.msk [vmem:[#allocation4 + $0x2f] ss:$8 sm:$0x10] %vm25291_vm5, %v11706_v49  ;;  %11778 = vst.msk [vmem:[#allocation4 + $0x53] ss:$8 sm:$0xf] %vm25291_vm5, %v11775_v62  ;;  %v11892_v34 = vrot.slane %v11556_v54, %v21949_v29 }
 0x737   : > { %11779 = vst.msk [vmem:[#allocation4 + $0x53] ss:$8 sm:$0x10] %vm25291_vm5, %v11775_v62  ;;  %11788 = vst.msk [vmem:[#allocation4 + $0x57] ss:$8 sm:$0xf] %vm25291_vm5, %v11785_v42 }
 0x738   : > { %11789 = vst.msk [vmem:[#allocation4 + $0x57] ss:$8 sm:$0x10] %vm25291_vm5, %v11785_v42  ;;  %11832 = vst.msk [vmem:[#allocation4 + $0x79] ss:$8 sm:$0xf] %vm25291_vm5, %v11829_v5  ;;  %v11907_v40 = vrot.slane %v11892_v34, %v21949_v29 }
 0x739   : > { %11833 = vst.msk [vmem:[#allocation4 + $0x79] ss:$8 sm:$0x10] %vm25291_vm5, %v11829_v5  ;;  %11858 = vst.msk [vmem:[#allocation4 + $0x7d] ss:$8 sm:$0xf] %vm25291_vm5, %v11855_v56 }
 0x73a   : > { %11859 = vst.msk [vmem:[#allocation4 + $0x7d] ss:$8 sm:$0x10] %vm25291_vm5, %v11855_v56  ;;  %11853 = vst.msk [vmem:[#allocation4 + $0x7b] ss:$8 sm:$0xf] %vm25291_vm5, %v11850_v7  ;;  %v11908_v41 = vcombine.low %v11900_v2, %v11907_v40 }
 0x73b   : > { %11854 = vst.msk [vmem:[#allocation4 + $0x7b] ss:$8 sm:$0x10] %vm25291_vm5, %v11850_v7  ;;  %11863 = vst.msk [vmem:[#allocation4 + $0x7f] ss:$8 sm:$0xf] %vm25291_vm5, %v11860_v8 }
 0x73c   : > { %11864 = vst.msk [vmem:[#allocation4 + $0x7f] ss:$8 sm:$0x10] %vm25291_vm5, %v11860_v8  ;;  %v12012_v22 = vld [vmem:[#allocation4 + $0x8] sm:$0xfe]  ;;  %v26001_v24 = vld [vmem:[#allocation4 + $0x30] sm:$0xff] }
 0x73d   : > { %v12014_v28 = vld [vmem:[#allocation4 + $0x18] sm:$0xfe]  ;;  %v12011_v13 = vld [vmem:[#allocation4] sm:$0xfe]  ;;  %v12013_v48 = vld [vmem:[#allocation4 + $0x10] sm:$0xfe]  ;;  %v12022_v29 = vpack.c.bf16 %v26001_v24, %v12012_v22 }
 0x73e   : > { %11911 = vst.msk [vmem:[#allocation4 + $0xa1] ss:$8 sm:$0xf] %vm25291_vm5, %v11908_v41  ;;  %11912 = vst.msk [vmem:[#allocation4 + $0xa1] ss:$8 sm:$0x10] %vm25291_vm5, %v11908_v41 }
 0x73f   : > { %v26003_v32 = vld [vmem:[#allocation4 + $0x40] sm:$0xff]  ;;  %v26005_v3 = vld [vmem:[#allocation4 + $0x58] sm:$0xff]  ;;  %v26008_v45 = vld [vmem:[#allocation4 + $0x68] sm:$0xff]  ;;  %v12113_v30 = vshrl.u32 %v12022_v29, 16  ;;  %v12115_v26 = vshll.u32 %v12022_v29, 16 }
 0x740   : > { %v12015_v44 = vld [vmem:[#allocation4 + $0x20] sm:$0xfe]  ;;  %v12024_v52 = vpack.c.bf16 %v26003_v32, %v12014_v28  ;;  %v26011_v14 = vld [vmem:[#allocation4 + $0x28] sm:$0xff]  ;;  %v26013_v35 = vld [vmem:[#allocation4 + $0x50] sm:$0xff] }
 0x741   : > { %v12021_v20 = vpack.c.bf16 %v26011_v14, %v12011_v13  ;;  %v26016_v59 = vld [vmem:[#allocation4 + $0x38] sm:$0xff]  ;;  %v26018_v16 = vld [vmem:[#allocation4 + $0x48] sm:$0xff]  ;;  %v12017_v27 = vld [vmem:[#allocation4 + $0x80] sm:$0x1f]  ;;  %v12117_v4 = vrot.slane %v12115_v26, 1 }
 0x742   : > { %v12019_v60 = vld [vmem:[#allocation4 + $0x90] sm:$0x1f]  ;;  %v12023_v39 = vpack.c.bf16 %v26016_v59, %v12013_v48  ;;  %v26022_v46 = vpack.c.bf16 %v26018_v16, %v12015_v44  ;;  %v12027_v43 = vpack.c.bf16 %v12017_v27, %v26005_v3  ;;  %v12137_v57 = vshrl.u32 %v12024_v52, 16  ;;  %v12016_v18 = vld [vmem:[#allocation4 + $0x78] sm:$0x1f]  ;;  %v26029_v12 = vld [vmem:[#allocation4 + $0x60] sm:$0xff] }
 0x743   : > { %v12029_v58 = vpack.c.bf16 %v12019_v60, %v26008_v45  ;;  %v12139_v55 = vshll.u32 %v12024_v52, 16  ;;  %v12018_v17 = vld [vmem:[#allocation4 + $0x88] sm:$0x1f]  ;;  %v26027_v9 = vpack.c.bf16 %v12016_v18, %v26013_v35  ;;  %v12101_v53 = vshrl.u32 %v12021_v20, 16  ;;  %v12020_v63 = vld [vmem:[#allocation4 + $0x98] sm:$0x1f] }
 0x744   : > { %v12103_v23 = vshll.u32 %v12021_v20, 16  ;;  %v12120_v38 = vshll.u32 %v12027_v43, 16  ;;  %v26032_v25 = vpack.c.bf16 %v12018_v17, %v26029_v12  ;;  %v12118_v15 = vor.u32 %v12117_v4, %v12113_v30  ;;  %v26042_v8 = vld [vmem:[#allocation4 + $0x70] sm:$0xff]  ;;  %v21054_v2 = vld [vmem:[%s26969_s7] sm:$0xff]   ;;  %v21055_v22 = vld [vmem:[%s26969_s7 + $0x48] sm:$0xff]  }
 0x745   : > { %v12141_v47 = vrot.slane %v12139_v55, 1  ;;  %v12144_v21 = vshll.u32 %v12029_v58, 16  ;;  %v12108_v31 = vshll.u32 %v26027_v9, 16  ;;  %v12125_v10 = vshrl.u32 %v12023_v39, 16  ;;  %v21056_v48 = vld [vmem:[%s26969_s7 + $0x8] sm:$0xff]   ;;  %v26064_v30 = vld [vmem:[#allocation4 + $0x18] sm:$0xff] }
 0x746   : > { %v12105_v1 = vrot.slane %v12103_v23, 1  ;;  %v12122_v36 = vrot.slane %v12120_v38, 1  ;;  %v12127_v33 = vshll.u32 %v12023_v39, 16  ;;  %v12132_v6 = vshll.u32 %v26032_v25, 16  ;;  %v26057_v29 = vld [vmem:[#allocation4 + $0x8] sm:$0xff]  ;;  %v21057_v55 = vld [vmem:[%s26969_s7 + $0x50] sm:$0xff]  }
 0x747   : > { %v12142_v37 = vor.u32 %v12141_v47, %v12137_v57  ;;  %v12146_v11 = vrot.slane %v12144_v21, 1  ;;  %v12110_v50 = vrot.slane %v12108_v31, 1  ;;  %v12163_v0 = vshrl.u32 %v12027_v43, 16  ;;  %v12903_v26 = vld [vmem:[#allocation4 + $0x78] sm:$0x3f] }
 0x748   : > { %v12106_v19 = vor.u32 %v12105_v1, %v12101_v53  ;;  %v12123_v49 = vsel %vm7239_vm4, %v12118_v15, %v12122_v36  ;;  %v12129_v42 = vrot.slane %v12127_v33, 1  ;;  %v12169_v5 = vshrl.u32 %v12029_v58, 16  ;;  %v12898_v58 = vld [vmem:[#allocation4] sm:$0xfc]  ;;  %v12906_v57 = vld [vmem:[#allocation4 + $0x90] sm:$0x3f] }
 0x749   : > { %v12147_v62 = vsel %vm7239_vm4, %v12142_v37, %v12146_v11  ;;  %12426 = vmatprep.mubr.bf16.mxu0 %v12123_v49  ;;  %v12134_v54 = vrot.slane %v12132_v6, 1  ;;  %v12165_v7 = vor.u32 %v12163_v0, %v12122_v36  ;;  %v12030_v41 = vpack.c.bf16 %v12020_v63, %v26042_v8  ;;  %v13388_v53 = vld [vmem:[#allocation4 + $0x80] sm:$0x7f]  ;;  %v12905_v36 = vld [vmem:[#allocation4 + $0x88] sm:$0x3f]  ;;  %v21059_v37 = vld [vmem:[%s26969_s7 + $0x10] sm:$0xff]  }
 0x74a   : > { %12475 = vmatprep.mubr.bf16.mxu1 %v12147_v62  ;;  %v12111_v56 = vsel %vm7239_vm4, %v12106_v19, %v12110_v50  ;;  %v12130_v34 = vor.u32 %v12129_v42, %v12125_v10  ;;  %v12171_v40 = vor.u32 %v12169_v5, %v12146_v11  ;;  %v12151_v28 = vshll.u32 %v26022_v46, 16  ;;  %v12900_v6 = vld [vmem:[#allocation4 + $0x10] sm:$0xfc]  ;;  %v21060_v0 = vld [vmem:[%s26969_s7 + $0x58] sm:$0xff]  }
 0x74b   : > { %12427 = vmatmul.mubr.bf16.vlgmr.msra.gmra.mrb[128].mxu0 %v12111_v56  ;;  %v12156_v44 = vshll.u32 %v12030_v41, 16  ;;  %v12160_v52 = vshrl.u32 %v26027_v9, 16  ;;  %v12149_v20 = vshrl.u32 %v26022_v46, 16  ;;  %v12166_v60 = vshrl.u32 %v26032_v25, 16  ;;  %v12901_v9 = vld [vmem:[#allocation4 + $0x18] sm:$0xfc] }
 0x74c   : > { %12434 = vmatprep.mubr.bf16.mxu0 %v12165_v7  ;;  %19113 = vmatpush3.bf16.msra.mxu0 %v25822_v51  ;;  %v12135_v13 = vsel %vm7239_vm4, %v12130_v34, %v12134_v54  ;;  %v21063_v51 = vld [vmem:[%s26969_s7 + $0xc0] sm:$0xff]   ;;  %v12153_v27 = vrot.slane %v12151_v28, 1  ;;  %v11934_v43 = vpack.c.bf16 %v26001_v24, %v26057_v29  ;;  %v12172_v17 = vshrl.u32 %v12030_v41, 16  ;;  %v13383_v25 = vld [vmem:[#allocation4 + $0x8] sm:$0xf8] }
 0x74d   : > { %19114 = vmatprep.subr.bf16.mxu0 %v21058_v61  ;;  %12476 = vmatmul.mubr.bf16.vlgmr.msra.gmra.mrb[136].mxu1 %v12135_v13  ;;  %v12158_v39 = vrot.slane %v12156_v44, 1  ;;  %v12162_v46 = vor.u32 %v12160_v52, %v12110_v50  ;;  %v11936_v4 = vpack.c.bf16 %v26003_v32, %v26064_v30  ;;  %v12168_v23 = vor.u32 %v12166_v60, %v12134_v54  ;;  %v13387_v7 = vld [vmem:[#allocation4 + $0x78] sm:$0x7f]  ;;  %v13382_v28 = vld [vmem:[#allocation4] sm:$0xf8] }
 0x74e   : > { %18753 = vmatpush3.bf16.msra.mxu1 %v21054_v2  ;;  %12483 = vmatprep.mubr.bf16.mxu1 %v12171_v40  ;;  %v12154_v18 = vor.u32 %v12153_v27, %v12149_v20  ;;  %v12908_v38 = vpack.c.bf16 %v26011_v14, %v12898_v58  ;;  %v12913_v47 = vpack.c.bf16 %v12903_v26, %v26013_v35  ;;  %v12907_v34 = vld [vmem:[#allocation4 + $0x98] sm:$0x3f]  ;;  %v12902_v52 = vld [vmem:[#allocation4 + $0x20] sm:$0xfc]  ;;  %v21067_v58 = vld [vmem:[%s26969_s7 + $0xc8] sm:$0xff]  }
 0x74f   : > { %18754 = vmatprep.subr.bf16.mxu1 %v21055_v22  ;;  %v12911_v21 = vpack.c.bf16 %v26003_v32, %v12901_v9  ;;  %v12174_v1 = vor.u32 %v12172_v17, %v12158_v39  ;;  %v12916_v31 = vpack.c.bf16 %v12906_v57, %v26008_v45  ;;  %v13393_v10 = vpack.c.bf16 %v26001_v24, %v13383_v25  ;;  %v21061_v13 = vld [vmem:[%s26969_s7 + $0x18] sm:$0xff]   ;;  %v21062_v20 = vld [vmem:[%s26969_s7 + $0x60] sm:$0xff]   ;;  %v13390_v17 = vld [vmem:[#allocation4 + $0x90] sm:$0x7f] }
 0x750   : > { %19115 = vmatpush3.bf16.msra.mxu0 %v21058_v61  ;;  %v12159_v15 = vsel %vm7239_vm4, %v12154_v18, %v12158_v39  ;;  %v12998_v11 = vrot.slane %v12908_v38, 1  ;;  %v26083_v33 = vrot.slane %v12913_v47, 1  ;;  %v13398_v50 = vpack.c.bf16 %v13388_v53, %v26005_v3  ;;  %v21065_v27 = vld [vmem:[%s26969_s7 + $0x80] sm:$0xff]   ;;  %v13385_v47 = vld [vmem:[#allocation4 + $0x18] sm:$0xf8] }
 0x751   : > { %18780 = vmatprep.subr.bf16.mxu0 %v21063_v51  ;;  %v13007_v19 = vrot.slane %v12911_v21, 1  ;;  %v26090_v63 = vrot.slane %v12916_v31, 1  ;;  %v13490_v49 = vshrl.u32 %v13393_v10, 16  ;;  %v13493_v62 = vshll.u32 %v13393_v10, 16  ;;  %v21064_v21 = vld [vmem:[%s26969_s7 + $0x20] sm:$0xff]  }
 0x752   : > { %18755 = vmatpush3.bf16.msra.mxu1 %v21056_v48  ;;  %v12910_v42 = vpack.c.bf16 %v26016_v59, %v12900_v6  ;;  %v26095_v5 = vsel %vm12997_vm7, %v12998_v11, %v26083_v33  ;;  %v13498_v61 = vshrl.u32 %v13398_v50, 16  ;;  %v13501_v56 = vshll.u32 %v13398_v50, 16 }
 0x753   : > { %12435 = vmatmul.mubr.bf16.gmra.mrb[132].mxu0 %v12162_v46  ;;  %18756 = vmatprep.subr.bf16.mxu1 %v21057_v55  ;;  %v12915_v54 = vpack.c.bf16 %v12905_v36, %v26029_v12  ;;  %v26100_v2 = vsel %vm12997_vm7, %v13007_v19, %v26090_v63  ;;  %v13492_v40 = vrot.slane %v13490_v49, 1  ;;  %v13495_v41 = vrot.slane %v13493_v62, 2  ;;  %v13391_v36 = vld [vmem:[#allocation4 + $0x98] sm:$0x7f]  ;;  %v21071_v49 = vld [vmem:[%s26969_s7 + $0xd0] sm:$0xff]  }
 0x754   : > { %19116 = vmatprep.mubr.msk.bf16.mxu0 %vm12387_vm6, %v12159_v15  ;;  %v13004_v22 = vrot.slane %v12910_v42, 1  ;;  %v13500_v48 = vrot.slane %v13498_v61, 1  ;;  %v13503_v44 = vrot.slane %v13501_v56, 2  ;;  %v13392_v51 = vpack.c.bf16 %v26011_v14, %v13382_v28 }
 0x755   : > { %12484 = vmatmul.mubr.bf16.gmra.mrb[140].mxu1 %v12168_v23  ;;  %v26105_v29 = vrot.slane %v12915_v54, 1  ;;  %v13496_v26 = vor.u32 %v13495_v41, %v13492_v40  ;;  %v13397_v60 = vpack.c.bf16 %v13387_v7, %v26013_v35  ;;  %v12912_v39 = vpack.c.bf16 %v26018_v16, %v12902_v52  ;;  %v21068_v54 = vld [vmem:[%s26969_s7 + $0x28] sm:$0xff]  }
 0x756   : > { %18757 = vmatpush3.bf16.msra.mxu1 %v21059_v37  ;;  %12783 = vmatprep.mubr.bf16.mxu1 %v11934_v43  ;;  %v12917_v43 = vpack.c.bf16 %v12907_v34, %v26042_v8  ;;  %v26120_v57 = vor.u32 %v13503_v44, %v13500_v48  ;;  %v13473_v46 = vshrl.u32 %v13392_v51, 16  ;;  %v13476_v18 = vshll.u32 %v13392_v51, 16  ;;  %v21069_v37 = vld [vmem:[%s26969_s7 + $0x88] sm:$0xff]   ;;  %v26164_v48 = vld [vmem:[#allocation4 + $0x80] sm:$0xff]  ;;  %v21073_v44 = vld [vmem:[%s26969_s7 + $0x90] sm:$0xff]  }
 0x757   : > { %18758 = vmatprep.subr.bf16.mxu1 %v21060_v0  ;;  %v26124_v55 = vsel %vm12997_vm7, %v13004_v22, %v26105_v29  ;;  %v13481_v9 = vshrl.u32 %v13397_v60, 16  ;;  %v13484_v53 = vshll.u32 %v13397_v60, 16  ;;  %v13010_v23 = vrot.slane %v12912_v39, 1  ;;  %v13386_v0 = vld [vmem:[#allocation4 + $0x20] sm:$0xf8]  ;;  %v21075_v60 = vld [vmem:[%s26969_s7 + $0xd8] sm:$0xff]  }
 0x758   : > { %v26126_v38 = vrot.slane %v12917_v43, 1  ;;  %v26134_v25 = vsel %vm13471_vm8, %v13496_v26, %v26120_v57  ;;  %v13475_v15 = vrot.slane %v13473_v46, 1  ;;  %v13478_v31 = vrot.slane %v13476_v18, 2  ;;  %v13389_v26 = vld [vmem:[#allocation4 + $0x88] sm:$0x7f] }
 0x759   : > { %v13395_v10 = vpack.c.bf16 %v26003_v32, %v13385_v47  ;;  %v13483_v11 = vrot.slane %v13481_v9, 1  ;;  %v13486_v19 = vrot.slane %v13484_v53, 2  ;;  %v13400_v6 = vpack.c.bf16 %v13390_v17, %v26008_v45  ;;  %v13927_v18 = vld [vmem:[#allocation4 + $0x8] sm:$0xf0]  ;;  %v13384_v47 = vld [vmem:[#allocation4 + $0x10] sm:$0xf8] }
 0x75a   : > { %18759 = vmatpush3.bf16.msra.mxu1 %v21061_v13  ;;  %v26145_v50 = vsel %vm12997_vm7, %v13010_v23, %v26126_v38  ;;  %v13479_v62 = vor.u32 %v13478_v31, %v13475_v15  ;;  %v13396_v56 = vpack.c.bf16 %v26018_v16, %v13386_v0  ;;  %v13401_v30 = vpack.c.bf16 %v13391_v36, %v26042_v8 }
 0x75b   : > { %19117 = vmatmul.mubr.msk.bf16.vlgmr.msra.gmra.mrb[136].mxu0 %vm12387_vm6, %v12174_v1  ;;  %18760 = vmatprep.subr.bf16.mxu1 %v21062_v20  ;;  %v21066_v1 = vld [vmem:[%s26969_s7 + $0x68] sm:$0xff]   ;;  %v13524_v42 = vshrl.u32 %v13395_v10, 16  ;;  %v13527_v61 = vshll.u32 %v13395_v10, 16  ;;  %v26158_v7 = vor.u32 %v13486_v19, %v13483_v11  ;;  %v13532_v34 = vshrl.u32 %v13400_v6, 16  ;;  %v21074_v11 = vld [vmem:[%s26969_s7 + $0x78] sm:$0xff]  }
 0x75c   : > { %18781 = vmatpush3.bf16.msra.mxu0 %v21065_v27  ;;  %12832 = vmatprep.mubr.bf16.mxu0 %v11936_v4  ;;  %v13535_v40 = vshll.u32 %v13400_v6, 16  ;;  %v21070_v4 = vld [vmem:[%s26969_s7 + $0x70] sm:$0xff]   ;;  %v13541_v28 = vshrl.u32 %v13396_v56, 16  ;;  %v13544_v13 = vshll.u32 %v13396_v56, 16  ;;  %v13549_v27 = vshrl.u32 %v13401_v30, 16  ;;  %v21077_v19 = vld [vmem:[%s26969_s7 + $0x98] sm:$0xff]  }
 0x75d   : > { %18782 = vmatprep.subr.bf16.mxu0 %v21067_v58  ;;  %v13526_v41 = vrot.slane %v13524_v42, 1  ;;  %v13529_v22 = vrot.slane %v13527_v61, 2  ;;  %v26171_v51 = vsel %vm13471_vm8, %v13479_v62, %v26158_v7  ;;  %v13534_v52 = vrot.slane %v13532_v34, 1  ;;  %v21078_v42 = vld [vmem:[%s26969_s7 + $0xe0] sm:$0xff]  }
 0x75e   : > { %18761 = vmatpush3.bf16.msra.mxu1 %v21064_v21  ;;  %v13537_v20 = vrot.slane %v13535_v40, 2  ;;  %v13543_v43 = vrot.slane %v13541_v28, 1  ;;  %v13546_v58 = vrot.slane %v13544_v13, 2  ;;  %v13552_v46 = vshll.u32 %v13401_v30, 16  ;;  %v21072_v21 = vld [vmem:[%s26969_s7 + $0x30] sm:$0xff]   ;;  %v26206_v40 = vld [vmem:[#allocation4 + $0x78] sm:$0xff] }
 0x75f   : > { %18762 = vmatprep.subr.bf16.mxu1 %v21066_v1  ;;  %v13530_v39 = vor.u32 %v13529_v22, %v13526_v41  ;;  %v13551_v9 = vrot.slane %v13549_v27, 1  ;;  %v13937_v53 = vpack.c.bf16 %v26001_v24, %v13927_v18  ;;  %v13942_v23 = vpack.c.bf16 %v26164_v48, %v26005_v3  ;;  %v13929_v1 = vld [vmem:[#allocation4 + $0x18] sm:$0xf0]  ;;  %v13926_v28 = vld [vmem:[#allocation4] sm:$0xf0]  ;;  %v26217_v13 = vld [vmem:[#allocation4 + $0x88] sm:$0xff] }
 0x760   : > { %18783 = vmatpush3.bf16.msra.mxu0 %v21069_v37  ;;  %v26176_v17 = vor.u32 %v13537_v20, %v13534_v52  ;;  %v13547_v15 = vor.u32 %v13546_v58, %v13543_v43  ;;  %v13554_v31 = vrot.slane %v13552_v46, 2  ;;  %v13394_v10 = vpack.c.bf16 %v26016_v59, %v13384_v47  ;;  %v26186_v37 = vld [vmem:[#allocation4 + $0x90] sm:$0xff]  ;;  %v21076_v30 = vld [vmem:[%s26969_s7 + $0x38] sm:$0xff]  }
 0x761   : > { %18784 = vmatprep.subr.bf16.mxu0 %v21071_v49  ;;  %v13399_v36 = vpack.c.bf16 %v13389_v26, %v26029_v12  ;;  %v14029_v0 = vrot.slane %v13937_v53, 2  ;;  %v26198_v49 = vrot.slane %v13942_v23, 2  ;;  %v13939_v62 = vpack.c.bf16 %v26003_v32, %v13929_v1  ;;  %v26234_v53 = vld [vmem:[#allocation4 + $0x98] sm:$0xff]  ;;  %v21082_v23 = vld [vmem:[%s26969_s7 + $0xe8] sm:$0xff]  }
 0x762   : > { %18763 = vmatpush3.bf16.msra.mxu1 %v21068_v54  ;;  %v26196_v6 = vsel %vm13471_vm8, %v13530_v39, %v26176_v17  ;;  %v26204_v61 = vor.u32 %v13554_v31, %v13551_v9  ;;  %v13507_v56 = vshrl.u32 %v13394_v10, 16  ;;  %v13510_v54 = vshll.u32 %v13394_v10, 16  ;;  %v21080_v39 = vld [vmem:[%s26969_s7 + $0xa0] sm:$0xff]  }
 0x763   : > { %18764 = vmatprep.subr.bf16.mxu1 %v21070_v4  ;;  %v13515_v34 = vshrl.u32 %v13399_v36, 16  ;;  %v26213_v4 = vsel %vm14025_vm9, %v14029_v0, %v26198_v49  ;;  %v13518_v32 = vshll.u32 %v13399_v36, 16  ;;  %v13944_v41 = vpack.c.bf16 %v26186_v37, %v26008_v45  ;;  %v13930_v9 = vld [vmem:[#allocation4 + $0x20] sm:$0xf0]  ;;  %v11929_v10 = vld [vmem:[#allocation4 + $0x80] sm:$0xf] }
 0x764   : > { %18785 = vmatpush3.bf16.msra.mxu0 %v21073_v44  ;;  %v14035_v22 = vrot.slane %v13939_v62, 2  ;;  %v21079_v44 = vld [vmem:[%s26969_s7 + $0x260] sm:$0xff]   ;;  %v26224_v52 = vsel %vm13471_vm8, %v13547_v15, %v26204_v61  ;;  %v13509_v20 = vrot.slane %v13507_v56, 1  ;;  %v13512_v27 = vrot.slane %v13510_v54, 2 }
 0x765   : > { %18786 = vmatprep.subr.bf16.mxu0 %v21075_v60  ;;  %v13517_v26 = vrot.slane %v13515_v34, 1  ;;  %v13928_v60 = vld [vmem:[#allocation4 + $0x10] sm:$0xf0]  ;;  %v13520_v43 = vrot.slane %v13518_v32, 2  ;;  %v26229_v58 = vrot.slane %v13944_v41, 2  ;;  %v13936_v46 = vpack.c.bf16 %v26011_v14, %v13926_v28  ;;  %v11913_v0 = vld [vmem:[#allocation4] sm:$0xff] }
 0x766   : > { %18765 = vmatpush3.bf16.msra.mxu1 %v21072_v21  ;;  %v13941_v18 = vpack.c.bf16 %v26206_v40, %v26013_v35  ;;  %v13513_v47 = vor.u32 %v13512_v27, %v13509_v20  ;;  %v13938_v21 = vpack.c.bf16 %v26016_v59, %v13928_v60  ;;  %v13943_v15 = vpack.c.bf16 %v26217_v13, %v26029_v12  ;;  %v21081_v62 = vld [vmem:[%s26969_s7 + $0x220] sm:$0xff]   ;;  %v21084_v41 = vld [vmem:[%s26969_s7 + $0xa8] sm:$0xff]  }
 0x767   : > { %18766 = vmatprep.subr.bf16.mxu1 %v21074_v11  ;;  %v13940_v31 = vpack.c.bf16 %v26018_v16, %v13930_v9  ;;  %v26243_v36 = vor.u32 %v13520_v43, %v13517_v26  ;;  %v26247_v1 = vsel %vm14025_vm9, %v14035_v22, %v26229_v58  ;;  %v14026_v11 = vrot.slane %v13936_v46, 2  ;;  %v12899_v43 = vld [vmem:[#allocation4 + $0x8] sm:$0xfc] }
 0x768   : > { %18787 = vmatpush3.bf16.msra.mxu0 %v21077_v19  ;;  %v26249_v19 = vrot.slane %v13941_v18, 2  ;;  %v14032_v56 = vrot.slane %v13938_v21, 2  ;;  %v26254_v54 = vrot.slane %v13943_v15, 2  ;;  %v13945_v34 = vpack.c.bf16 %v26234_v53, %v26042_v8  ;;  %v21087_v18 = vld [vmem:[%s26969_s7 + $0x270] sm:$0xff]  }
 0x769   : > { %18788 = vmatprep.subr.bf16.mxu0 %v21078_v42  ;;  %v12904_v42 = vld [vmem:[#allocation4 + $0x80] sm:$0x3f]  ;;  %v11933_v32 = vpack.c.bf16 %v26011_v14, %v11913_v0  ;;  %v26267_v22 = vsel %vm13471_vm8, %v13513_v47, %v26243_v36  ;;  %v11939_v14 = vpack.c.bf16 %v11929_v10, %v26005_v3  ;;  %v14038_v27 = vrot.slane %v13940_v31, 2  ;;  %v21090_v47 = vld [vmem:[%s26969_s7 + $0xf8] sm:$0xff]   ;;  %v21089_v15 = vld [vmem:[%s26969_s7 + $0x230] sm:$0xff]  }
 0x76a   : > { %18767 = vmatpush3.bf16.msra.mxu1 %v21076_v30  ;;  %v21083_v30 = vld [vmem:[%s26969_s7 + $0x268] sm:$0xff]   ;;  %v26271_v28 = vsel %vm14025_vm9, %v14026_v11, %v26249_v19  ;;  %v26279_v20 = vsel %vm14025_vm9, %v14032_v56, %v26254_v54  ;;  %v26281_v26 = vrot.slane %v13945_v34, 2  ;;  %v12914_v60 = vpack.c.bf16 %v12904_v42, %v26005_v3  ;;  %v21088_v3 = vld [vmem:[%s26969_s7 + $0xb0] sm:$0xff]   ;;  %v21092_v11 = vld [vmem:[%s26969_s7 + $0xb8] sm:$0xff]  }
 0x76b   : > { %18812 = vmatprep.subr.bf16.mxu1 %v21079_v44  ;;  %v21086_v44 = vld [vmem:[%s26969_s7 + $0xf0] sm:$0xff]   ;;  %v12909_v9 = vpack.c.bf16 %v26001_v24, %v12899_v43  ;;  %v21091_v24 = vld [vmem:[%s26969_s7 + $0x278] sm:$0xff]   ;;  %v21094_v0 = vld [vmem:[%s26969_s7 + $0x100] sm:$0xff]  }
 0x76c   : > { %18789 = vmatpush3.bf16.msra.mxu0 %v21080_v39  ;;  %v21085_v39 = vld [vmem:[%s26969_s7 + $0x228] sm:$0xff]   ;;  %v26289_v46 = vsel %vm14025_vm9, %v14038_v27, %v26281_v26  ;;  %v26301_v21 = vrot.slane %v12914_v60, 1  ;;  %v11931_v42 = vld [vmem:[#allocation4 + $0x90] sm:$0xf]  ;;  %v21095_v34 = vld [vmem:[%s26969_s7 + $0x280] sm:$0xff]  }
 0x76d   : > { %18790 = vmatprep.subr.bf16.mxu0 %v21082_v23  ;;  %12784 = vmatmul.mubr.bf16.vlgmr.msra.gmra.mrb[144].mxu1 %v11933_v32  ;;  %v11928_v23 = vld [vmem:[#allocation4 + $0x78] sm:$0xf]  ;;  %v13001_v10 = vrot.slane %v12909_v9, 1  ;;  %v11915_v56 = vld [vmem:[#allocation4 + $0x10] sm:$0xff]  ;;  %v21098_v27 = vld [vmem:[%s26969_s7 + $0x248] sm:$0xff]  }
 0x76e   : > { %12791 = vmatprep.mubr.bf16.mxu1 %v11939_v14  ;;  %18813 = vmatpush3.bf16.msra.mxu1 %v21081_v62  ;;  %v11938_v31 = vpack.c.bf16 %v11928_v23, %v26013_v35  ;;  %v21093_v62 = vld [vmem:[%s26969_s7 + $0x238] sm:$0xff]   ;;  %v11935_v32 = vpack.c.bf16 %v26016_v59, %v11915_v56  ;;  %v21096_v14 = vld [vmem:[%s26969_s7 + $0x240] sm:$0xff]   ;;  %v11930_v59 = vld [vmem:[#allocation4 + $0x88] sm:$0xf] }
 0x76f   : > { %18814 = vmatprep.subr.bf16.mxu1 %v21083_v30  ;;  %v13003_v35 = vsel %vm12997_vm7, %v13001_v10, %v26301_v21  ;;  %v11941_v30 = vpack.c.bf16 %v11931_v42, %v26008_v45  ;;  %v21104_v45 = vld [vmem:[%s26969_s7 + $0x2e0] sm:$0xff]   ;;  %v21100_v60 = vld [vmem:[%s26969_s7 + $0x290] sm:$0xff]   ;;  %v21102_v9 = vld [vmem:[%s26969_s7 + $0x298] sm:$0xff]  }
 0x770   : > { %18791 = vmatpush3.bf16.msra.mxu0 %v21084_v41  ;;  %v21099_v41 = vld [vmem:[%s26969_s7 + $0x108] sm:$0xff]   ;;  %v11917_v43 = vld [vmem:[#allocation4 + $0x20] sm:$0xff]  ;;  %v11932_v23 = vld [vmem:[#allocation4 + $0x98] sm:$0xf] }
 0x771   : > { %18792 = vmatprep.subr.bf16.mxu0 %v21086_v44  ;;  %v21097_v44 = vld [vmem:[%s26969_s7 + $0x288] sm:$0xff]   ;;  %v21107_v10 = vld [vmem:[%s26969_s7 + $0x330] sm:$0xff]   ;;  %v21120_v56 = vld [vmem:[%s26969_s7 + $0x300] sm:$0xff]  }
 0x772   : > { %18815 = vmatpush3.bf16.msra.mxu1 %v21085_v39  ;;  %v11940_v39 = vpack.c.bf16 %v11930_v59, %v26029_v12  ;;  %v21105_v12 = vld [vmem:[%s26969_s7 + $0x2a0] sm:$0xff]   ;;  %v21118_v42 = vld [vmem:[%s26969_s7 + $0x388] sm:$0xff]   ;;  %v21127_v59 = vld [vmem:[%s26969_s7 + $0x358] sm:$0xff]  }
 0x773   : > { %18816 = vmatprep.subr.bf16.mxu1 %v21087_v18  ;;  %v11937_v18 = vpack.c.bf16 %v26018_v16, %v11917_v43  ;;  %v21103_v16 = vld [vmem:[%s26969_s7 + $0x258] sm:$0xff]  }
 0x774   : > { %18793 = vmatpush3.bf16.msra.mxu0 %v21088_v3  ;;  %v21101_v3 = vld [vmem:[%s26969_s7 + $0x250] sm:$0xff]   ;;  %v21133_v43 = vld [vmem:[%s26969_s7 + $0x2d8] sm:$0xff]  }
 0x775   : > { %18794 = vmatprep.subr.bf16.mxu0 %v21090_v47  ;;  %12792 = vmatmul.mubr.bf16.gmra.mrb[148].mxu1 %v11938_v31  ;;  %v21106_v47 = vld [vmem:[%s26969_s7 + $0x370] sm:$0xff]   ;;  %v21108_v31 = vld [vmem:[%s26969_s7 + $0x2e8] sm:$0xff]  }
 0x776   : > { %18817 = vmatpush3.bf16.msra.mxu1 %v21089_v15  ;;  %13263 = vmatprep.mubr.bf16.mxu1 %v13003_v35  ;;  %v11942_v15 = vpack.c.bf16 %v11932_v23, %v26042_v8  ;;  %v21110_v8 = vld [vmem:[%s26969_s7 + $0x378] sm:$0xff]   ;;  %v21114_v35 = vld [vmem:[%s26969_s7 + $0x380] sm:$0xff]   ;;  %v21137_v23 = vld [vmem:[%s26969_s7 + $0x3f0] sm:$0xff]  }
 0x777   : > { %18818 = vmatprep.subr.bf16.mxu1 %v21091_v24  ;;  %v21109_v24 = vld [vmem:[%s26969_s7 + $0x2a8] sm:$0xff]  }
 0x778   : > { %18795 = vmatpush3.bf16.msra.mxu0 %v21092_v11  ;;  %v21112_v11 = vld [vmem:[%s26969_s7 + $0x2f0] sm:$0xff]  }
 0x779   : > { %19120 = vmatprep.subr.bf16.mxu0 %v21094_v0 }
 0x77a   : > { %18819 = vmatpush3.bf16.msra.mxu1 %v21093_v62  ;;  %v21117_v62 = vld [vmem:[%s26969_s7 + $0x2b8] sm:$0xff]  }
 0x77b   : > { %12833 = vmatmul.mubr.bf16.vlgmr.msra.gmra.mrb[140].mxu0 %v11935_v32  ;;  %18820 = vmatprep.subr.bf16.mxu1 %v21095_v34  ;;  %v21119_v34 = vld [vmem:[%s26969_s7 + $0x348] sm:$0xff]   ;;  %v21121_v32 = vld [vmem:[%s26969_s7 + $0x2c0] sm:$0xff]  }
 0x77c   : > { %12840 = vmatprep.mubr.bf16.mxu0 %v11941_v30  ;;  %19121 = vmatpush3.bf16.msra.mxu0 %v21094_v0  ;;  %v21111_v0 = vld [vmem:[%s26969_s7 + $0x338] sm:$0xff]   ;;  %v21122_v30 = vld [vmem:[%s26969_s7 + $0x390] sm:$0xff]  }
 0x77d   : > { %19122 = vmatprep.subr.bf16.mxu0 %v21099_v41 }
 0x77e   : > { %18821 = vmatpush3.bf16.msra.mxu1 %v21096_v14  ;;  %v21126_v14 = vld [vmem:[%s26969_s7 + $0x398] sm:$0xff]  }
 0x77f   : > { %18822 = vmatprep.subr.bf16.mxu1 %v21097_v44  ;;  %v21128_v44 = vld [vmem:[%s26969_s7 + $0x310] sm:$0xff]  }
 0x780   : > { %19123 = vmatpush3.bf16.msra.mxu0 %v21099_v41  ;;  %v21125_v41 = vld [vmem:[%s26969_s7 + $0x2c8] sm:$0xff]  }
 0x781   : > { %18840 = vmatprep.subr.bf16.mxu0 %v21104_v45  ;;  %v21129_v45 = vld [vmem:[%s26969_s7 + $0x2d0] sm:$0xff]  }
 0x782   : > { %18823 = vmatpush3.bf16.msra.mxu1 %v21098_v27  ;;  %v21130_v27 = vld [vmem:[%s26969_s7 + $0x3a0] sm:$0xff]  }
 0x783   : > { %12841 = vmatmul.mubr.bf16.gmra.mrb[144].mxu0 %v11940_v39  ;;  %18824 = vmatprep.subr.bf16.mxu1 %v21100_v60  ;;  %v21132_v60 = vld [vmem:[%s26969_s7 + $0x318] sm:$0xff]   ;;  %v21131_v39 = vld [vmem:[%s26969_s7 + $0x360] sm:$0xff]  }
 0x784   : > { %19124 = vmatprep.mubr.msk.bf16.mxu0 %vm12387_vm6, %v11937_v18  ;;  %v21134_v18 = vld [vmem:[%s26969_s7 + $0x3a8] sm:$0xff]  }
 0x786   : > { %18825 = vmatpush3.bf16.msra.mxu1 %v21101_v3  ;;  %v21136_v3 = vld [vmem:[%s26969_s7 + $0x320] sm:$0xff]  }
 0x787   : > { %18826 = vmatprep.subr.bf16.mxu1 %v21102_v9  ;;  %v21135_v9 = vld [vmem:[%s26969_s7 + $0x368] sm:$0xff]  }
 0x78a   : > { %18827 = vmatpush3.bf16.msra.mxu1 %v21103_v16  ;;  %v21141_v16 = vld [vmem:[%s26969_s7 + $0x328] sm:$0xff]  }
 0x78b   : > { %19125 = vmatmul.mubr.msk.bf16.vlgmr.msra.gmra.mrb[136].mxu0 %vm12387_vm6, %v11942_v15  ;;  %18872 = vmatprep.subr.bf16.mxu1 %v21106_v47  ;;  %v21139_v47 = vld [vmem:[%s26969_s7 + $0x3f8] sm:$0xff]   ;;  %v21146_v15 = vld [vmem:[%s26969_s7 + $0x430] sm:$0xff]  }
 0x78c   : > { %18841 = vmatpush3.bf16.msra.mxu0 %v21105_v12  ;;  %13312 = vmatprep.mubr.bf16.mxu0 %v26100_v2  ;;  %v21113_v2 = vld [vmem:[%s26969_s7 + $0x2b0] sm:$0xff]  }
 0x78d   : > { %18842 = vmatprep.subr.bf16.mxu0 %v21108_v31  ;;  %13264 = vmatmul.mubr.bf16.vlgmr.msra.gmra.mrb[152].mxu1 %v26095_v5  ;;  %v21116_v5 = vld [vmem:[%s26969_s7 + $0x2f8] sm:$0xff]   ;;  %v21138_v12 = vld [vmem:[%s26969_s7 + $0x3b0] sm:$0xff]  }
 0x78e   : > { %13271 = vmatprep.mubr.bf16.mxu1 %v26301_v21  ;;  %18873 = vmatpush3.bf16.msra.mxu1 %v21107_v10  ;;  %v21115_v21 = vld [vmem:[%s26969_s7 + $0x340] sm:$0xff]   ;;  %v21147_v31 = vld [vmem:[%s26969_s7 + $0x410] sm:$0xff]  }
 0x78f   : > { %18874 = vmatprep.subr.bf16.mxu1 %v21110_v8  ;;  %v21154_v10 = vld [vmem:[%s26969_s7 + $0x480] sm:$0xff]  }
 0x790   : > { %18843 = vmatpush3.bf16.msra.mxu0 %v21109_v24  ;;  %v21152_v24 = vld [vmem:[%s26969_s7 + $0x420] sm:$0xff]  }
 0x791   : > { %18844 = vmatprep.subr.bf16.mxu0 %v21112_v11  ;;  %v21155_v8 = vld [vmem:[%s26969_s7 + $0x440] sm:$0xff]   ;;  %v21156_v11 = vld [vmem:[%s26969_s7 + $0x428] sm:$0xff]  }
 0x792   : > { %18875 = vmatpush3.bf16.msra.mxu1 %v21111_v0  ;;  %v21158_v0 = vld [vmem:[%s26969_s7 + $0x488] sm:$0xff]  }
 0x793   : > { %18876 = vmatprep.subr.bf16.mxu1 %v21114_v35  ;;  %v21159_v35 = vld [vmem:[%s26969_s7 + $0x448] sm:$0xff]  }
 0x794   : > { %18845 = vmatpush3.bf16.msra.mxu0 %v21113_v2  ;;  %v21157_v2 = vld [vmem:[%s26969_s7 + $0x3e8] sm:$0xff]  }
 0x795   : > { %18846 = vmatprep.subr.bf16.mxu0 %v21116_v5  ;;  %13272 = vmatmul.mubr.bf16.gmra.mrb[156].mxu1 %v26083_v33  ;;  %v21124_v33 = vld [vmem:[%s26969_s7 + $0x308] sm:$0xff]   ;;  %v21160_v5 = vld [vmem:[%s26969_s7 + $0x500] sm:$0xff]  }
 0x796   : > { %18877 = vmatpush3.bf16.msra.mxu1 %v21115_v21  ;;  %13807 = vmatprep.mubr.bf16.mxu1 %v26134_v25  ;;  %v21123_v25 = vld [vmem:[%s26969_s7 + $0x350] sm:$0xff]   ;;  %v21161_v21 = vld [vmem:[%s26969_s7 + $0x4c0] sm:$0xff]  }
 0x797   : > { %18878 = vmatprep.subr.bf16.mxu1 %v21118_v42  ;;  %v21166_v42 = vld [vmem:[%s26969_s7 + $0x498] sm:$0xff]  }
 0x798   : > { %18847 = vmatpush3.bf16.msra.mxu0 %v21117_v62  ;;  %v21163_v62 = vld [vmem:[%s26969_s7 + $0x450] sm:$0xff]  }
 0x799   : > { %18848 = vmatprep.subr.bf16.mxu0 %v21120_v56  ;;  %v21165_v56 = vld [vmem:[%s26969_s7 + $0x4c8] sm:$0xff]  }
 0x79a   : > { %18879 = vmatpush3.bf16.msra.mxu1 %v21119_v34  ;;  %v21167_v34 = vld [vmem:[%s26969_s7 + $0x458] sm:$0xff]  }
 0x79b   : > { %18880 = vmatprep.subr.bf16.mxu1 %v21122_v30  ;;  %v21171_v30 = vld [vmem:[%s26969_s7 + $0x460] sm:$0xff]  }
 0x79c   : > { %18849 = vmatpush3.bf16.msra.mxu0 %v21121_v32  ;;  %v21168_v32 = vld [vmem:[%s26969_s7 + $0x510] sm:$0xff]  }
 0x79d   : > { %18850 = vmatprep.subr.bf16.mxu0 %v21124_v33  ;;  %v21172_v33 = vld [vmem:[%s26969_s7 + $0x518] sm:$0xff]  }
 0x79e   : > { %18881 = vmatpush3.bf16.msra.mxu1 %v21123_v25  ;;  %v21174_v25 = vld [vmem:[%s26969_s7 + $0x4a8] sm:$0xff]  }
 0x79f   : > { %18882 = vmatprep.subr.bf16.mxu1 %v21126_v14  ;;  %v21175_v14 = vld [vmem:[%s26969_s7 + $0x468] sm:$0xff]  }
 0x7a0   : > { %18851 = vmatpush3.bf16.msra.mxu0 %v21125_v41  ;;  %v21173_v41 = vld [vmem:[%s26969_s7 + $0x4d8] sm:$0xff]  }
 0x7a1   : > { %18852 = vmatprep.subr.bf16.mxu0 %v21128_v44  ;;  %v21176_v44 = vld [vmem:[%s26969_s7 + $0x520] sm:$0xff]  }
 0x7a2   : > { %18883 = vmatpush3.bf16.msra.mxu1 %v21127_v59  ;;  %v21179_v59 = vld [vmem:[%s26969_s7 + $0x470] sm:$0xff]  }
 0x7a3   : > { %18884 = vmatprep.subr.bf16.mxu1 %v21130_v27  ;;  %v21182_v27 = vld [vmem:[%s26969_s7 + $0x4b8] sm:$0xff]  }
 0x7a4   : > { %18853 = vmatpush3.bf16.msra.mxu0 %v21129_v45  ;;  %v21180_v45 = vld [vmem:[%s26969_s7 + $0x528] sm:$0xff]  }
 0x7a5   : > { %18854 = vmatprep.subr.bf16.mxu0 %v21132_v60  ;;  %v21181_v60 = vld [vmem:[%s26969_s7 + $0x4e8] sm:$0xff]  }
 0x7a6   : > { %18885 = vmatpush3.bf16.msra.mxu1 %v21131_v39  ;;  %v21183_v39 = vld [vmem:[%s26969_s7 + $0x478] sm:$0xff]  }
 0x7a7   : > { %18886 = vmatprep.subr.bf16.mxu1 %v21134_v18  ;;  %v21186_v18 = vld [vmem:[%s26969_s7 + $0x540] sm:$0xff]  }
 0x7a8   : > { %18855 = vmatpush3.bf16.msra.mxu0 %v21133_v43  ;;  %v21184_v43 = vld [vmem:[%s26969_s7 + $0x530] sm:$0xff]  }
 0x7a9   : > { %19128 = vmatprep.subr.bf16.mxu0 %v21136_v3 }
 0x7aa   : > { %18887 = vmatpush3.bf16.msra.mxu1 %v21135_v9  ;;  %v26629_v9 = vld [vmem:[#allocation4 + $0x30] sm:$0xff] }
 0x7ab   : > { %13313 = vmatmul.mubr.bf16.vlgmr.msra.gmra.mrb[148].mxu0 %v26124_v55  ;;  %18900 = vmatprep.subr.bf16.mxu1 %v21137_v23  ;;  %v21142_v55 = vld [vmem:[%s26969_s7 + $0x400] sm:$0xff]   ;;  %v21187_v23 = vld [vmem:[%s26969_s7 + $0x538] sm:$0xff]  }
 0x7ac   : > { %13320 = vmatprep.mubr.bf16.mxu0 %v26090_v63  ;;  %19129 = vmatpush3.bf16.msra.mxu0 %v21136_v3  ;;  %v21140_v63 = vld [vmem:[%s26969_s7 + $0x3b8] sm:$0xff]   ;;  %v21185_v3 = vld [vmem:[%s26969_s7 + $0x4f0] sm:$0xff]  }
 0x7ad   : > { %19130 = vmatprep.subr.bf16.mxu0 %v21141_v16  ;;  %13808 = vmatmul.mubr.bf16.vlgmr.msra.gmra.mrb[160].mxu1 %v26171_v51  ;;  %v21143_v51 = vld [vmem:[%s26969_s7 + $0x3c0] sm:$0xff]  }
 0x7ae   : > { %13815 = vmatprep.mubr.bf16.mxu1 %v26120_v57  ;;  %18901 = vmatpush3.bf16.msra.mxu1 %v21138_v12  ;;  %v21144_v57 = vld [vmem:[%s26969_s7 + $0x408] sm:$0xff]   ;;  %v14421_v12 = vld [vmem:[#allocation4 + $0x58] sm:$0xff] }
 0x7af   : > { %18902 = vmatprep.subr.bf16.mxu1 %v21139_v47  ;;  %v14411_v47 = vld [vmem:[#allocation4 + $0x8] sm:$0xe0] }
 0x7b0   : > { %19131 = vmatpush3.bf16.msra.mxu0 %v21141_v16  ;;  %v21191_v16 = vld [vmem:[%s26969_s7 + $0x548] sm:$0xff]  }
 0x7b1   : > { %19136 = vmatprep.subr.bf16.mxu0 %v21146_v15 }
 0x7b2   : > { %18903 = vmatpush3.bf16.msra.mxu1 %v21140_v63  ;;  %v21188_v63 = vld [vmem:[%s26969_s7 + $0x4f8] sm:$0xff]  }
 0x7b3   : > { %13321 = vmatmul.mubr.bf16.gmra.mrb[152].mxu0 %v26105_v29  ;;  %18904 = vmatprep.subr.bf16.mxu1 %v21142_v55  ;;  %v21145_v29 = vld [vmem:[%s26969_s7 + $0x3c8] sm:$0xff]   ;;  %v26644_v55 = vld [vmem:[#allocation4 + $0x40] sm:$0xff] }
 0x7b4   : > { %19132 = vmatprep.mubr.msk.bf16.mxu0 %vm12387_vm6, %v26145_v50  ;;  %v21151_v50 = vld [vmem:[%s26969_s7 + $0x438] sm:$0xff]  }
 0x7b5   : > { %13816 = vmatmul.mubr.bf16.gmra.mrb[164].mxu1 %v26158_v7  ;;  %v21148_v7 = vld [vmem:[%s26969_s7 + $0x3d0] sm:$0xff]  }
 0x7b6   : > { %18905 = vmatpush3.bf16.msra.mxu1 %v21143_v51  ;;  %13856 = vmatprep.mubr.bf16.mxu1 %v26196_v6  ;;  %v21149_v6 = vld [vmem:[%s26969_s7 + $0x418] sm:$0xff]   ;;  %v14423_v51 = vld [vmem:[#allocation4 + $0x68] sm:$0xff] }
 0x7b7   : > { %18906 = vmatprep.subr.bf16.mxu1 %v21144_v57  ;;  %v21189_v57 = vld [vmem:[%s26969_s7 + $0x590] sm:$0xff]  }
 0x7ba   : > { %18907 = vmatpush3.bf16.msra.mxu1 %v21145_v29  ;;  %v26652_v29 = vpack.c.bf16 %v26186_v37, %v14423_v51  ;;  %v21192_v37 = vld [vmem:[%s26969_s7 + $0x598] sm:$0xff]  }
 0x7bb   : > { %19133 = vmatmul.mubr.msk.bf16.vlgmr.msra.gmra.mrb[136].mxu0 %vm12387_vm6, %v26126_v38  ;;  %18908 = vmatprep.subr.bf16.mxu1 %v21147_v31  ;;  %v21150_v38 = vld [vmem:[%s26969_s7 + $0x3d8] sm:$0xff]  }
 0x7bc   : > { %19137 = vmatpush3.bf16.msra.mxu0 %v21146_v15  ;;  %19140 = vmatprep.mubr.msk.bf16.mxu0 %vm12387_vm6, %v26224_v52  ;;  %v21153_v52 = vld [vmem:[%s26969_s7 + $0x3e0] sm:$0xff]   ;;  %v26638_v15 = vpack.c.bf16 %v26164_v48, %v14421_v12  ;;  %v14436_v48 = vpack.c.bf16 %v26629_v9, %v14411_v47  ;;  %v14413_v31 = vld [vmem:[#allocation4 + $0x18] sm:$0xe0]  ;;  %v21212_v12 = vld [vmem:[%s26969_s7 + $0x630] sm:$0xff]  }
 0x7bd   : > { %19138 = vmatprep.subr.bf16.mxu0 %v21151_v50  ;;  %v21211_v47 = vld [vmem:[%s26969_s7 + $0x580] sm:$0xff]  }
 0x7be   : > { %18909 = vmatpush3.bf16.msra.mxu1 %v21148_v7  ;;  %v14438_v7 = vpack.c.bf16 %v26644_v55, %v14413_v31 }
 0x7bf   : > { %18910 = vmatprep.subr.bf16.mxu1 %v21149_v6  ;;  %v21190_v6 = vld [vmem:[%s26969_s7 + $0x550] sm:$0xff]  }
 0x7c0   : > { %19139 = vmatpush3.bf16.msra.mxu0 %v21151_v50  ;;  %v14546_v50 = vshrl.u32 %v26638_v15, 16 }
 0x7c1   : > { %18932 = vmatprep.subr.bf16.mxu0 %v21154_v10  ;;  %v14538_v10 = vshrl.u32 %v14436_v48, 16 }
 0x7c2   : > { %18911 = vmatpush3.bf16.msra.mxu1 %v21150_v38  ;;  %v14541_v38 = vshll.u32 %v14436_v48, 16 }
 0x7c3   : > { %18912 = vmatprep.subr.bf16.mxu1 %v21152_v24  ;;  %v14580_v24 = vshrl.u32 %v26652_v29, 16 }
 0x7c6   : > { %18913 = vmatpush3.bf16.msra.mxu1 %v21153_v52  ;;  %v14583_v52 = vshll.u32 %v26652_v29, 16 }
 0x7c7   : > { %19141 = vmatmul.mubr.msk.bf16.vlgmr.msra.gmra.mrb[136].mxu0 %vm12387_vm6, %v26204_v61  ;;  %18914 = vmatprep.subr.bf16.mxu1 %v21156_v11  ;;  %v21162_v61 = vld [vmem:[%s26969_s7 + $0x490] sm:$0xff]  }
 0x7c8   : > { %18933 = vmatpush3.bf16.msra.mxu0 %v21155_v8  ;;  %14291 = vmatprep.mubr.bf16.mxu0 %v26213_v4  ;;  %v21164_v4 = vld [vmem:[%s26969_s7 + $0x508] sm:$0xff]   ;;  %v14548_v8 = vrot.slane %v14546_v50, 2 }
 0x7c9   : > { %18934 = vmatprep.subr.bf16.mxu0 %v21158_v0  ;;  %v14572_v0 = vshrl.u32 %v14438_v7, 16 }
 0x7ca   : > { %18915 = vmatpush3.bf16.msra.mxu1 %v21157_v2  ;;  %v14575_v2 = vshll.u32 %v14438_v7, 16  ;;  %v26758_v7 = vld [vmem:[#allocation4 + $0x38] sm:$0xff] }
 0x7cb   : > { %18960 = vmatprep.subr.bf16.mxu1 %v21160_v5  ;;  %v21194_v5 = vld [vmem:[%s26969_s7 + $0x5a0] sm:$0xff]  }
 0x7cc   : > { %18935 = vmatpush3.bf16.msra.mxu0 %v21159_v35  ;;  %v21193_v35 = vld [vmem:[%s26969_s7 + $0x558] sm:$0xff]  }
 0x7cd   : > { %18936 = vmatprep.subr.bf16.mxu0 %v21162_v61  ;;  %13857 = vmatmul.mubr.bf16.vlgmr.msra.gmra.mrb[168].mxu1 %v26267_v22  ;;  %v21169_v22 = vld [vmem:[%s26969_s7 + $0x4d0] sm:$0xff]   ;;  %v14540_v61 = vrot.slane %v14538_v10, 2 }
 0x7ce   : > { %13864 = vmatprep.mubr.bf16.mxu1 %v26176_v17  ;;  %18961 = vmatpush3.bf16.msra.mxu1 %v21161_v21  ;;  %v21170_v17 = vld [vmem:[%s26969_s7 + $0x4a0] sm:$0xff]   ;;  %v14582_v21 = vrot.slane %v14580_v24, 2 }
 0x7cf   : > { %18962 = vmatprep.subr.bf16.mxu1 %v21164_v4  ;;  %v14574_v4 = vrot.slane %v14572_v0, 2  ;;  %v14430_v24 = vld [vmem:[#allocation4 + $0xa0] sm:$0x1]  ;;  %v14412_v0 = vld [vmem:[#allocation4 + $0x10] sm:$0xe0] }
 0x7d0   : > { %18937 = vmatpush3.bf16.msra.mxu0 %v21163_v62  ;;  %v14585_v62 = vrot.slane %v14583_v52, 3 }
 0x7d1   : > { %18938 = vmatprep.subr.bf16.mxu0 %v21166_v42  ;;  %v14577_v42 = vrot.slane %v14575_v2, 3  ;;  %v21217_v2 = vld [vmem:[%s26969_s7 + $0x5f8] sm:$0xff]  }
 0x7d2   : > { %18963 = vmatpush3.bf16.msra.mxu1 %v21165_v56 }
 0x7d3   : > { %18964 = vmatprep.subr.bf16.mxu1 %v21168_v32  ;;  %v21198_v32 = vld [vmem:[%s26969_s7 + $0x5a8] sm:$0xff]  }
 0x7d4   : > { %18939 = vmatpush3.bf16.msra.mxu0 %v21167_v34  ;;  %v26684_v34 = vor.u32 %v14585_v62, %v14582_v21  ;;  %v21220_v21 = vld [vmem:[%s26969_s7 + $0x660] sm:$0xff]  }
 0x7d5   : > { %18940 = vmatprep.subr.bf16.mxu0 %v21170_v17  ;;  %13865 = vmatmul.mubr.bf16.gmra.mrb[172].mxu1 %v26243_v36  ;;  %v21178_v36 = vld [vmem:[%s26969_s7 + $0x4b0] sm:$0xff]  }
 0x7d6   : > { %18965 = vmatpush3.bf16.msra.mxu1 %v21169_v22  ;;  %14340 = vmatprep.mubr.bf16.mxu1 %v26247_v1  ;;  %v21177_v1 = vld [vmem:[%s26969_s7 + $0x4e0] sm:$0xff]   ;;  %v14578_v22 = vor.u32 %v14577_v42, %v14574_v4  ;;  %v14433_v42 = vld [vmem:[#allocation4 + $0xb8] sm:$0x1] }
 0x7d7   : > { %18966 = vmatprep.subr.bf16.mxu1 %v21172_v33  ;;  %v21199_v33 = vld [vmem:[%s26969_s7 + $0x568] sm:$0xff]  }
 0x7d8   : > { %18941 = vmatpush3.bf16.msra.mxu0 %v21171_v30  ;;  %v21200_v30 = vld [vmem:[%s26969_s7 + $0x618] sm:$0xff]  }
 0x7d9   : > { %18942 = vmatprep.subr.bf16.mxu0 %v21174_v25  ;;  %v21202_v25 = vld [vmem:[%s26969_s7 + $0x5b0] sm:$0xff]  }
 0x7da   : > { %18967 = vmatpush3.bf16.msra.mxu1 %v21173_v41  ;;  %v21201_v41 = vld [vmem:[%s26969_s7 + $0x5d8] sm:$0xff]  }
 0x7db   : > { %18968 = vmatprep.subr.bf16.mxu1 %v21176_v44  ;;  %v21206_v44 = vld [vmem:[%s26969_s7 + $0x5b8] sm:$0xff]  }
 0x7dc   : > { %18943 = vmatpush3.bf16.msra.mxu0 %v21175_v14  ;;  %v21204_v14 = vld [vmem:[%s26969_s7 + $0x620] sm:$0xff]  }
 0x7dd   : > { %18944 = vmatprep.subr.bf16.mxu0 %v21178_v36  ;;  %v26720_v36 = vld [vmem:[#allocation4 + $0x28] sm:$0xff] }
 0x7de   : > { %18969 = vmatpush3.bf16.msra.mxu1 %v21177_v1  ;;  %v14420_v1 = vld [vmem:[#allocation4 + $0x50] sm:$0xff] }
 0x7df   : > { %18970 = vmatprep.subr.bf16.mxu1 %v21180_v45  ;;  %v26726_v45 = vpack.c.bf16 %v26206_v40, %v14420_v1  ;;  %v21209_v40 = vld [vmem:[%s26969_s7 + $0x5e8] sm:$0xff]  }
 0x7e0   : > { %18945 = vmatpush3.bf16.msra.mxu0 %v21179_v59  ;;  %v21205_v59 = vld [vmem:[%s26969_s7 + $0x5e0] sm:$0xff]   ;;  %v15000_v1 = vld [vmem:[#allocation4 + $0x8] sm:$0xc0] }
 0x7e1   : > { %18946 = vmatprep.subr.bf16.mxu0 %v21182_v27  ;;  %v21208_v27 = vld [vmem:[%s26969_s7 + $0x628] sm:$0xff]  }
 0x7e2   : > { %18971 = vmatpush3.bf16.msra.mxu1 %v21181_v60  ;;  %v14410_v60 = vld [vmem:[#allocation4] sm:$0xe0] }
 0x7e3   : > { %18972 = vmatprep.subr.bf16.mxu1 %v21184_v43  ;;  %v14435_v43 = vpack.c.bf16 %v26720_v36, %v14410_v60 }
 0x7e4   : > { %18947 = vmatpush3.bf16.msra.mxu0 %v21183_v39  ;;  %v21207_v39 = vld [vmem:[%s26969_s7 + $0x578] sm:$0xff]  }
 0x7e5   : > { %19144 = vmatprep.subr.bf16.mxu0 %v21186_v18  ;;  %v14524_v51 = vshll.u32 %v14435_v43, 16 }
 0x7e6   : > { %18973 = vmatpush3.bf16.msra.mxu1 %v21185_v3  ;;  %v14529_v3 = vshrl.u32 %v26726_v45, 16 }
 0x7e7   : > { %14292 = vmatmul.mubr.bf16.vlgmr.msra.gmra.mrb[156].mxu0 %v26271_v28  ;;  %18974 = vmatprep.subr.bf16.mxu1 %v21187_v23  ;;  %v21196_v28 = vld [vmem:[%s26969_s7 + $0x610] sm:$0xff]   ;;  %v14532_v23 = vshll.u32 %v26726_v45, 16 }
 0x7e8   : > { %14299 = vmatprep.mubr.bf16.mxu0 %v26198_v49  ;;  %19145 = vmatpush3.bf16.msra.mxu0 %v21186_v18  ;;  %v14549_v49 = vshll.u32 %v26638_v15, 16  ;;  %v21210_v18 = vld [vmem:[%s26969_s7 + $0x5c0] sm:$0xff]   ;;  %v14531_v31 = vrot.slane %v14529_v3, 2  ;;  %v21227_v3 = vld [vmem:[%s26969_s7 + $0x650] sm:$0xff]  }
 0x7e9   : > { %19146 = vmatprep.subr.bf16.mxu0 %v21191_v16  ;;  %v14534_v50 = vrot.slane %v14532_v23, 3  ;;  %v15108_v23 = vrot.slane %v26638_v15, 3  ;;  %v21248_v15 = vld [vmem:[%s26969_s7 + $0x740] sm:$0xff]  }
 0x7ea   : > { %18975 = vmatpush3.bf16.msra.mxu1 %v21188_v63  ;;  %v14551_v11 = vrot.slane %v14549_v49, 3  ;;  %v14521_v63 = vshrl.u32 %v14435_v43, 16  ;;  %v21216_v49 = vld [vmem:[%s26969_s7 + $0x638] sm:$0xff]  }
 0x7eb   : > { %18992 = vmatprep.subr.bf16.mxu1 %v21189_v57  ;;  %v21214_v57 = vld [vmem:[%s26969_s7 + $0x5c8] sm:$0xff]  }
 0x7ec   : > { %19147 = vmatpush3.bf16.msra.mxu0 %v21191_v16  ;;  %v14431_v16 = vld [vmem:[#allocation4 + $0xa8] sm:$0x1]  ;;  %v14523_v10 = vrot.slane %v14521_v63, 2  ;;  %v21228_v63 = vld [vmem:[%s26969_s7 + $0x670] sm:$0xff]  }
 0x7ed   : > { %19020 = vmatprep.subr.bf16.mxu0 %v21196_v28  ;;  %14341 = vmatmul.mubr.bf16.vlgmr.msra.gmra.mrb[176].mxu1 %v26279_v20  ;;  %v14543_v20 = vrot.slane %v14541_v38, 3  ;;  %v14446_v48 = vpack.c.bf16 %v14431_v16, %v14431_v16  ;;  %v21213_v28 = vld [vmem:[%s26969_s7 + $0x5f0] sm:$0xff]   ;;  %v14526_v38 = vrot.slane %v14524_v51, 3 }
 0x7ee   : > { %14348 = vmatprep.mubr.bf16.mxu1 %v26229_v58  ;;  %18993 = vmatpush3.bf16.msra.mxu1 %v21190_v6  ;;  %v26679_v58 = vor.u32 %v14551_v11, %v14548_v8  ;;  %v14422_v6 = vld [vmem:[#allocation4 + $0x60] sm:$0xff] }
 0x7ef   : > { %14300 = vmatmul.mubr.bf16.gmra.mrb[160].mxu0 %v26249_v19  ;;  %18994 = vmatprep.subr.bf16.mxu1 %v21192_v37  ;;  %v21195_v19 = vld [vmem:[%s26969_s7 + $0x560] sm:$0xff]   ;;  %v14544_v56 = vor.u32 %v14543_v20, %v14540_v61  ;;  %v21215_v37 = vld [vmem:[%s26969_s7 + $0x588] sm:$0xff]   ;;  %v26764_v52 = vpack.c.bf16 %v26217_v13, %v14422_v6  ;;  %v14611_v11 = vshll.u32 %v14446_v48, 16  ;;  %v14445_v61 = vpack.c.bf16 %v14430_v24, %v14430_v24 }
 0x7f0   : > { %19148 = vmatprep.mubr.msk.bf16.mxu0 %vm12387_vm6, %v26289_v46  ;;  %v21197_v46 = vld [vmem:[%s26969_s7 + $0x5d0] sm:$0xff]   ;;  %v21218_v8 = vld [vmem:[%s26969_s7 + $0x6a0] sm:$0xff]   ;;  %v14527_v20 = vor.u32 %v14526_v38, %v14523_v10  ;;  %v21232_v10 = vld [vmem:[%s26969_s7 + $0x658] sm:$0xff]  }
 0x7f1   : > { %v14553_v17 = vsel %vm14519_vm10, %v14544_v56, %v26679_v58  ;;  %v21219_v13 = vld [vmem:[%s26969_s7 + $0x640] sm:$0xff]   ;;  %v14563_v62 = vshrl.u32 %v26764_v52, 16  ;;  %v14566_v4 = vshll.u32 %v26764_v52, 16  ;;  %v21222_v56 = vld [vmem:[%s26969_s7 + $0x6a8] sm:$0xff]  }
 0x7f2   : > { %18995 = vmatpush3.bf16.msra.mxu1 %v21193_v35  ;;  %v14535_v35 = vor.u32 %v14534_v50, %v14531_v31 }
 0x7f3   : > { %18996 = vmatprep.subr.bf16.mxu1 %v21194_v5  ;;  %v14437_v5 = vpack.c.bf16 %v26758_v7, %v14412_v0 }
 0x7f5   : > { %14349 = vmatmul.mubr.bf16.gmra.mrb[180].mxu1 %v26254_v54  ;;  %v14587_v54 = vsel %vm14519_vm10, %v14578_v22, %v26684_v34  ;;  %v14558_v22 = vshll.u32 %v14437_v5, 16 }
 0x7f6   : > { %18997 = vmatpush3.bf16.msra.mxu1 %v21195_v19  ;;  %14880 = vmatprep.mubr.bf16.mxu1 %v14553_v17  ;;  %v14613_v19 = vrot.slane %v14611_v11, 3  ;;  %v14555_v17 = vshrl.u32 %v14437_v5, 16  ;;  %v21230_v11 = vld [vmem:[%s26969_s7 + $0x678] sm:$0xff]  }
 0x7f7   : > { %19149 = vmatmul.mubr.msk.bf16.vlgmr.msra.gmra.mrb[136].mxu0 %vm12387_vm6, %v26281_v26  ;;  %18998 = vmatprep.subr.bf16.mxu1 %v21198_v32  ;;  %v21203_v26 = vld [vmem:[%s26969_s7 + $0x570] sm:$0xff]   ;;  %v14536_v32 = vsel %vm14519_vm10, %v14527_v20, %v14535_v35 }
 0x7f8   : > { %19021 = vmatpush3.bf16.msra.mxu0 %v21197_v46  ;;  %14929 = vmatprep.mubr.bf16.mxu0 %v14587_v54  ;;  %v21221_v46 = vld [vmem:[%s26969_s7 + $0x600] sm:$0xff]   ;;  %v14606_v54 = vshll.u32 %v14445_v61, 16  ;;  %v14557_v43 = vrot.slane %v14555_v17, 2 }
 0x7f9   : > { %19022 = vmatprep.subr.bf16.mxu0 %v21200_v30  ;;  %v14614_v30 = vsel %vm14519_vm10, %v26679_v58, %v14613_v19  ;;  %v21226_v58 = vld [vmem:[%s26969_s7 + $0x6b0] sm:$0xff]  }
 0x7fa   : > { %18999 = vmatpush3.bf16.msra.mxu1 %v21199_v33  ;;  %v21223_v33 = vld [vmem:[%s26969_s7 + $0x648] sm:$0xff]  }
 0x7fb   : > { %19000 = vmatprep.subr.bf16.mxu1 %v21202_v25  ;;  %v14448_v25 = vpack.c.bf16 %v14433_v42, %v14433_v42  ;;  %v21234_v42 = vld [vmem:[%s26969_s7 + $0x6c8] sm:$0xff]  }
 0x7fc   : > { %19023 = vmatpush3.bf16.msra.mxu0 %v21201_v41  ;;  %v26793_v41 = vld [vmem:[#allocation4 + $0x48] sm:$0xff] }
 0x7fd   : > { %19024 = vmatprep.subr.bf16.mxu0 %v21204_v14  ;;  %v21224_v14 = vld [vmem:[%s26969_s7 + $0x668] sm:$0xff]   ;;  %v14621_v16 = vshll.u32 %v14448_v25, 16 }
 0x7fe   : > { %19001 = vmatpush3.bf16.msra.mxu1 %v21203_v26  ;;  %v14565_v26 = vrot.slane %v14563_v62, 2  ;;  %v14434_v62 = vld [vmem:[#allocation4 + $0xc0] sm:$0x1] }
 0x7ff   : > { %19002 = vmatprep.subr.bf16.mxu1 %v21206_v44  ;;  %v14568_v44 = vrot.slane %v14566_v4, 3 }
 0x800   : > { %19025 = vmatpush3.bf16.msra.mxu0 %v21205_v59  ;;  %v14424_v59 = vld [vmem:[#allocation4 + $0x70] sm:$0xff] }
 0x801   : > { %19026 = vmatprep.subr.bf16.mxu0 %v21208_v27  ;;  %v15010_v27 = vpack.c.bf16 %v26629_v9, %v15000_v1  ;;  %v26803_v60 = vpack.c.bf16 %v26234_v53, %v14424_v59  ;;  %v14432_v9 = vld [vmem:[#allocation4 + $0xb0] sm:$0x1]  ;;  %v15002_v59 = vld [vmem:[#allocation4 + $0x18] sm:$0xc0] }
 0x802   : > { %19003 = vmatpush3.bf16.msra.mxu1 %v21207_v39  ;;  %v21225_v39 = vld [vmem:[%s26969_s7 + $0x608] sm:$0xff]  }
 0x803   : > { %19004 = vmatprep.subr.bf16.mxu1 %v21210_v18  ;;  %v14560_v18 = vrot.slane %v14558_v22, 3  ;;  %v15107_v51 = vrot.slane %v15010_v27, 3  ;;  %v14597_v48 = vshrl.u32 %v26803_v60, 16 }
 0x804   : > { %19027 = vmatpush3.bf16.msra.mxu0 %v21209_v40  ;;  %v14414_v40 = vld [vmem:[#allocation4 + $0x20] sm:$0xe0] }
 0x805   : > { %19028 = vmatprep.subr.bf16.mxu0 %v21212_v12  ;;  %v14439_v53 = vpack.c.bf16 %v26793_v41, %v14414_v40  ;;  %v14608_v12 = vrot.slane %v14606_v54, 3  ;;  %v14561_v50 = vor.u32 %v14560_v18, %v14557_v43  ;;  %v15109_v6 = vsel %vm15103_vm11, %v15107_v51, %v15108_v23  ;;  %v21238_v40 = vld [vmem:[%s26969_s7 + $0x690] sm:$0xff]  }
 0x806   : > { %19005 = vmatpush3.bf16.msra.mxu1 %v21211_v47  ;;  %v14569_v47 = vor.u32 %v14568_v44, %v14565_v26 }
 0x807   : > { %19006 = vmatprep.subr.bf16.mxu1 %v21214_v57  ;;  %v21229_v57 = vld [vmem:[%s26969_s7 + $0x6b8] sm:$0xff]   ;;  %v14609_v31 = vsel %vm14519_vm10, %v14535_v35, %v14608_v12  ;;  %v14589_v38 = vshrl.u32 %v14439_v53, 16  ;;  %v14592_v24 = vshll.u32 %v14439_v53, 16  ;;  %v14599_v35 = vrot.slane %v14597_v48, 2  ;;  %v21241_v48 = vld [vmem:[%s26969_s7 + $0x728] sm:$0xff]  }
 0x808   : > { %19029 = vmatpush3.bf16.msra.mxu0 %v21213_v28  ;;  %v14600_v28 = vshll.u32 %v26803_v60, 16  ;;  %v21240_v53 = vld [vmem:[%s26969_s7 + $0x6d8] sm:$0xff]  }
 0x809   : > { %19030 = vmatprep.subr.bf16.mxu0 %v21216_v49  ;;  %v14447_v49 = vpack.c.bf16 %v14432_v9, %v14432_v9  ;;  %v14591_v61 = vrot.slane %v14589_v38, 2  ;;  %v14594_v20 = vrot.slane %v14592_v24, 3  ;;  %v15114_v9 = vrot.slane %v26652_v29, 3 }
 0x80a   : > { %19007 = vmatpush3.bf16.msra.mxu1 %v21215_v37  ;;  %v14623_v37 = vrot.slane %v14621_v16, 3  ;;  %v14602_v5 = vrot.slane %v14600_v28, 3  ;;  %v14999_v28 = vld [vmem:[#allocation4] sm:$0xc0] }
 0x80b   : > { %19052 = vmatprep.subr.bf16.mxu1 %v21218_v8  ;;  %v14570_v8 = vsel %vm14519_vm10, %v14561_v50, %v14569_v47 }
 0x80c   : > { %19031 = vmatpush3.bf16.msra.mxu0 %v21217_v2  ;;  %v14624_v0 = vsel %vm14519_vm10, %v26684_v34, %v14623_v37  ;;  %v21231_v2 = vld [vmem:[%s26969_s7 + $0x6c0] sm:$0xff]   ;;  %v14603_v4 = vor.u32 %v14602_v5, %v14599_v35  ;;  %v21242_v37 = vld [vmem:[%s26969_s7 + $0x698] sm:$0xff]   ;;  %v15105_v35 = vrot.slane %v26726_v45, 3 }
 0x80d   : > { %14881 = vmatmul.mubr.bf16.vlgmr.msra.gmra.mrb[184].mxu1 %v14536_v32  ;;  %19032 = vmatprep.subr.bf16.mxu0 %v21219_v13  ;;  %v14616_v13 = vshll.u32 %v14447_v49, 16  ;;  %v21233_v34 = vld [vmem:[%s26969_s7 + $0x680] sm:$0xff]   ;;  %v14595_v32 = vor.u32 %v14594_v20, %v14591_v61 }
 0x80e   : > { %14888 = vmatprep.mubr.bf16.mxu1 %v14614_v30  ;;  %19053 = vmatpush3.bf16.msra.mxu1 %v21220_v21  ;;  %v21237_v21 = vld [vmem:[%s26969_s7 + $0x720] sm:$0xff]   ;;  %v21235_v30 = vld [vmem:[%s26969_s7 + $0x688] sm:$0xff]  }
 0x80f   : > { %19054 = vmatprep.subr.bf16.mxu1 %v21222_v56  ;;  %v14618_v19 = vrot.slane %v14616_v13, 3  ;;  %v14449_v56 = vpack.c.bf16 %v14434_v62, %v14434_v62  ;;  %v21244_v13 = vld [vmem:[%s26969_s7 + $0x730] sm:$0xff]   ;;  %v15004_v20 = vld [vmem:[#allocation4 + $0xa0] sm:$0x3] }
 0x810   : > { %19033 = vmatpush3.bf16.msra.mxu0 %v21221_v46 }
 0x811   : > { %19034 = vmatprep.subr.bf16.mxu0 %v21223_v33  ;;  %v14619_v17 = vsel %vm14519_vm10, %v14569_v47, %v14618_v19  ;;  %v14604_v33 = vsel %vm14519_vm10, %v14595_v32, %v14603_v4  ;;  %v14626_v1 = vshll.u32 %v14449_v56, 16  ;;  %v21245_v56 = vld [vmem:[%s26969_s7 + $0x6f0] sm:$0xff]   ;;  %v15014_v32 = vpack.c.bf16 %v15004_v20, %v15004_v20 }
 0x812   : > { %19055 = vmatpush3.bf16.msra.mxu1 %v21224_v14  ;;  %v21236_v14 = vld [vmem:[%s26969_s7 + $0x6d0] sm:$0xff]  }
 0x813   : > { %19056 = vmatprep.subr.bf16.mxu1 %v21226_v58 }
 0x814   : > { %19035 = vmatpush3.bf16.msra.mxu0 %v21225_v39  ;;  %v15012_v39 = vpack.c.bf16 %v26644_v55, %v15002_v59  ;;  %v14628_v55 = vrot.slane %v14626_v1, 3  ;;  %v21253_v1 = vld [vmem:[%s26969_s7 + $0x710] sm:$0xff]   ;;  %v15007_v59 = vld [vmem:[#allocation4 + $0xb8] sm:$0x3] }
 0x815   : > { %14889 = vmatmul.mubr.bf16.gmra.mrb[188].mxu1 %v14609_v31  ;;  %19152 = vmatprep.subr.bf16.mxu0 %v21227_v3 }
 0x816   : > { %19057 = vmatpush3.bf16.msra.mxu1 %v21228_v63  ;;  %15379 = vmatprep.mubr.bf16.mxu1 %v15109_v6  ;;  %v21239_v63 = vld [vmem:[%s26969_s7 + $0x6e0] sm:$0xff]   ;;  %v15113_v51 = vrot.slane %v15012_v39, 3  ;;  %v14629_v49 = vsel %vm14519_vm10, %v14603_v4, %v14628_v55  ;;  %v15017_v39 = vpack.c.bf16 %v15007_v59, %v15007_v59  ;;  %v15111_v55 = vrot.slane %v26764_v52, 3 }
 0x817   : > { %14930 = vmatmul.mubr.bf16.vlgmr.msra.gmra.mrb[164].mxu0 %v14570_v8  ;;  %19058 = vmatprep.subr.bf16.mxu1 %v21229_v57 }
 0x818   : > { %14937 = vmatprep.mubr.bf16.mxu0 %v14624_v0  ;;  %19153 = vmatpush3.bf16.msra.mxu0 %v21227_v3  ;;  %v15005_v3 = vld [vmem:[#allocation4 + $0xa8] sm:$0x3]  ;;  %v15115_v38 = vsel %vm15103_vm11, %v15113_v51, %v15114_v9  ;;  %v15125_v51 = vrot.slane %v15017_v39, 3 }
 0x819   : > { %19154 = vmatprep.subr.bf16.mxu0 %v21232_v10  ;;  %v15015_v31 = vpack.c.bf16 %v15005_v3, %v15005_v3  ;;  %v21243_v0 = vld [vmem:[%s26969_s7 + $0x6e8] sm:$0xff]  }
 0x81a   : > { %19059 = vmatpush3.bf16.msra.mxu1 %v21230_v11  ;;  %v15126_v52 = vsel %vm15103_vm11, %v15114_v9, %v15125_v51 }
 0x81b   : > { %19060 = vmatprep.subr.bf16.mxu1 %v21231_v2  ;;  %v15121_v61 = vrot.slane %v15015_v31, 3 }
 0x81c   : > { %19155 = vmatpush3.bf16.msra.mxu0 %v21232_v10  ;;  %v15009_v10 = vpack.c.bf16 %v26720_v36, %v14999_v28 }
 0x81d   : > { %19080 = vmatprep.subr.bf16.mxu0 %v21237_v21 }
 0x81e   : > { %v18708_v46 = vpop.f32.mrb[128].mxu0  ;;  %19061 = vmatpush3.bf16.msra.mxu1 %v21233_v34  ;;  %v15104_v34 = vrot.slane %v15009_v10, 3  ;;  %v15003_v10 = vld [vmem:[#allocation4 + $0x20] sm:$0xc0] }
 0x81f   : > { %v18709_v22 = vpop.f32.mrb[129].mxu0  ;;  %14938 = vmatmul.mubr.bf16.gmra.mrb[168].mxu0 %v14619_v17  ;;  %19062 = vmatprep.subr.bf16.mxu1 %v21234_v42  ;;  %v21246_v17 = vld [vmem:[%s26969_s7 + $0x738] sm:$0xff]  }
 0x820   : > { %v18710_v54 = vadd.f32 %v18709_v22, %v18708_v46  ;;  %v18711_v25 = vpop.f32.mrb[130].mxu0  ;;  %19156 = vmatprep.mubr.msk.bf16.mxu0 %vm12387_vm6, %v14604_v33  ;;  %v18736_v26 = vpop.f32.mrb[136].mxu1  ;;  %v15106_v45 = vsel %vm15103_vm11, %v15104_v34, %v15105_v35  ;;  %v15122_v46 = vsel %vm15103_vm11, %v15108_v23, %v15121_v61  ;;  %v21247_v33 = vld [vmem:[%s26969_s7 + $0x6f8] sm:$0xff]  }
 0x821   : > { %v18712_v44 = vpop.f32.mrb[131].mxu0  ;;  %v18737_v58 = vpop.f32.mrb[137].mxu1 }
 0x822   : > { %v18713_v27 = vadd.f32 %v18712_v44, %v18711_v25  ;;  %v18738_v43 = vadd.f32 %v18737_v58, %v18736_v26  ;;  %19063 = vmatpush3.bf16.msra.mxu1 %v21235_v30  ;;  %v18739_v18 = vpop.f32.mrb[138].mxu1  ;;  %v18464_v30 = vld [vmem:[#allocation5] ss:$0 sm:$0xff]  ;;  %v21249_v25 = vld [vmem:[%s26969_s7 + $0x700] sm:$0xff]   ;;  %v21252_v44 = vld [vmem:[%s26969_s7 + $0x750] sm:$0xff]  }
 0x823   : > { %v18740_v16 = vpop.f32.mrb[139].mxu1  ;;  %19064 = vmatprep.subr.bf16.mxu1 %v21236_v14  ;;  %15505 = vperm.xlu0 %19283, %v18464_v30   ;;  %v21250_v14 = vld [vmem:[%s26969_s7 + $0x748] sm:$0xff]   ;;  %v21254_v58 = vld [vmem:[%s26969_s7 + $0x758] sm:$0xff]  }
 0x824   : > { %v26863_v12 = vadd.f32 %v18738_v43, %v18710_v54  ;;  %v18741_v47 = vadd.f32 %v18740_v16, %v18739_v18  ;;  %v15119_v54 = vrot.slane %v15014_v32, 3  ;;  %v21251_v26 = vld [vmem:[%s26969_s7 + $0x708] sm:$0xff]   ;;  %v21255_v18 = vld [vmem:[%s26969_s7 + $0x718] sm:$0xff]   ;;  %v21256_v16 = vld [vmem:[%s26969_s7 + $0x760] sm:$0xff]  }
 0x826   : > { %v18714_v57 = vpop.f32.mrb[132].mxu0  ;;  %v26871_v50 = vadd.f32 %v18741_v47, %v18713_v27  ;;  %19065 = vmatpush3.bf16.msra.mxu1 %v21238_v40  ;;  %v15120_v23 = vsel %vm15103_vm11, %v15105_v35, %v15119_v54  ;;  %v15001_v27 = vld [vmem:[#allocation4 + $0x10] sm:$0xc0]  ;;  %v15008_v35 = vld [vmem:[#allocation4 + $0xc0] sm:$0x3] }
 0x827   : > { %v18715_v6 = vpop.f32.mrb[133].mxu0  ;;  %19157 = vmatmul.mubr.msk.bf16.vlgmr.msra.gmra.mrb[136].mxu0 %vm12387_vm6, %v14629_v49  ;;  %19066 = vmatprep.subr.bf16.mxu1 %v21240_v53  ;;  %v15011_v40 = vpack.c.bf16 %v26758_v7, %v15001_v27  ;;  %v21257_v7 = vld [vmem:[%s26969_s7 + $0x768] sm:$0xff]  }
 0x828   : > { %v18716_v24 = vadd.f32 %v18715_v6, %v18714_v57  ;;  %v18717_v8 = vpop.f32.mrb[134].mxu0  ;;  %19081 = vmatpush3.bf16.msra.mxu0 %v21239_v63  ;;  %15428 = vmatprep.mubr.bf16.mxu0 %v15115_v38  ;;  %v18742_v11 = vpop.f32.mrb[140].mxu1  ;;  %v15006_v57 = vld [vmem:[#allocation4 + $0xb0] sm:$0x3] }
 0x829   : > { %v18718_v2 = vpop.f32.mrb[135].mxu0  ;;  %19082 = vmatprep.subr.bf16.mxu0 %v21241_v48  ;;  %v18743_v36 = vpop.f32.mrb[141].mxu1  ;;  %v15110_v31 = vrot.slane %v15011_v40, 3 }
 0x82a   : > { %v18719_v5 = vadd.f32 %v18718_v2, %v18717_v8  ;;  %v18744_v21 = vadd.f32 %v18743_v36, %v18742_v11  ;;  %19067 = vmatpush3.bf16.msra.mxu1 %v21242_v37  ;;  %v18745_v62 = vpop.f32.mrb[142].mxu1  ;;  %v15016_v37 = vpack.c.bf16 %v15006_v57, %v15006_v57  ;;  %v15117_v2 = vrot.slane %v26803_v60, 3 }
 0x82b   : > { %v18746_v4 = vpop.f32.mrb[143].mxu1  ;;  %v15112_v6 = vsel %vm15103_vm11, %v15110_v31, %v15111_v55 }
 0x82c   : > { %v26889_v42 = vadd.f32 %v18744_v21, %v18716_v24  ;;  %19083 = vmatpush3.bf16.msra.mxu0 %v21243_v0  ;;  %v18747_v19 = vadd.f32 %v18746_v4, %v18745_v62  ;;  %v15013_v24 = vpack.c.bf16 %v26793_v41, %v15003_v10  ;;  %v15123_v0 = vrot.slane %v15016_v37, 3 }
 0x82d   : > { %15380 = vmatmul.mubr.bf16.vlgmr.msra.gmra.mrb[192].mxu1 %v15106_v45  ;;  %19084 = vmatprep.subr.bf16.mxu0 %v21244_v13  ;;  %v15018_v21 = vpack.c.bf16 %v15008_v35, %v15008_v35 }
 0x82e   : > { %v26901_v22 = vadd.f32 %v18747_v19, %v18719_v5  ;;  %15387 = vmatprep.mubr.bf16.mxu1 %v15122_v46  ;;  %v15116_v9 = vrot.slane %v15013_v24, 3  ;;  %v15124_v61 = vsel %vm15103_vm11, %v15111_v55, %v15123_v0 }
 0x82f   : > { %v15127_v19 = vrot.slane %v15018_v21, 3 }
 0x830   : > { %19085 = vmatpush3.bf16.msra.mxu0 %v21245_v56  ;;  %v15118_v41 = vsel %vm15103_vm11, %v15116_v9, %v15117_v2 }
 0x831   : > { %19086 = vmatprep.subr.bf16.mxu0 %v21246_v17  ;;  %v15128_v32 = vsel %vm15103_vm11, %v15117_v2, %v15127_v19 }
 0x834   : > { %19087 = vmatpush3.bf16.msra.mxu0 %v21247_v33 }
 0x835   : > { %15388 = vmatmul.mubr.bf16.gmra.mrb[196].mxu1 %v15120_v23  ;;  %19088 = vmatprep.subr.bf16.mxu0 %v21248_v15 }
 0x838   : > { %19089 = vmatpush3.bf16.msra.mxu0 %v21249_v25 }
 0x839   : > { %19090 = vmatprep.subr.bf16.mxu0 %v21250_v14 }
 0x83c   : > { %19091 = vmatpush3.bf16.msra.mxu0 %v21251_v26 }
 0x83d   : > { %19092 = vmatprep.subr.bf16.mxu0 %v21252_v44 }
 0x840   : > { %19093 = vmatpush3.bf16.msra.mxu0 %v21253_v1  ;;  %v18768_v43 = vpop.f32.mrb[144].mxu1 }
 0x841   : > { %v18769_v3 = vpop.f32.mrb[145].mxu1  ;;  %19094 = vmatprep.subr.bf16.mxu0 %v21254_v58 }
 0x842   : > { %v18770_v53 = vadd.f32 %v18769_v3, %v18768_v43  ;;  %v18771_v47 = vpop.f32.mrb[146].mxu1 }
 0x843   : > { %v18772_v63 = vpop.f32.mrb[147].mxu1 }
 0x844   : > { %v19176_v48 = vadd.f32 %v18770_v53, %v26863_v12  ;;  %19095 = vmatpush3.bf16.msra.mxu0 %v21255_v18  ;;  %v18773_v28 = vadd.f32 %v18772_v63, %v18771_v47 }
 0x845   : > { %19160 = vmatprep.subr.bf16.mxu0 %v21256_v16 }
 0x846   : > { %v19192_v49 = vadd.f32 %v18773_v28, %v26871_v50 }
 0x847   : > { %15429 = vmatmul.mubr.bf16.vlgmr.msra.gmra.mrb[172].mxu0 %v15112_v6 }
 0x848   : > { %15436 = vmatprep.mubr.bf16.mxu0 %v15126_v52  ;;  %19161 = vmatpush3.bf16.msra.mxu0 %v21256_v16  ;;  %v18774_v12 = vpop.f32.mrb[148].mxu1 }
 0x849   : > { %v18775_v38 = vpop.f32.mrb[149].mxu1  ;;  %19162 = vmatprep.subr.bf16.mxu0 %v21257_v7 }
 0x84a   : > { %v18776_v8 = vadd.f32 %v18775_v38, %v18774_v12  ;;  %v18777_v11 = vpop.f32.mrb[150].mxu1 }
 0x84b   : > { %v18778_v50 = vpop.f32.mrb[151].mxu1 }
 0x84c   : > { %v19168_v36 = vadd.f32 %v18776_v8, %v26889_v42  ;;  %v18779_v29 = vadd.f32 %v18778_v50, %v18777_v11  ;;  %19163 = vmatpush3.bf16.msra.mxu0 %v21257_v7 }
 0x84e   : > { %v18796_v5 = vpop.f32.mrb[140].mxu0  ;;  %v19184_v13 = vadd.f32 %v18779_v29, %v26901_v22 }
 0x84f   : > { %v18797_v20 = vpop.f32.mrb[141].mxu0  ;;  %15437 = vmatmul.mubr.bf16.gmra.mrb[176].mxu0 %v15124_v61 }
 0x850   : > { %v18798_v62 = vadd.f32 %v18797_v20, %v18796_v5  ;;  %v18799_v34 = vpop.f32.mrb[142].mxu0  ;;  %19164 = vmatprep.mubr.msk.bf16.mxu0 %vm12387_vm6, %v15118_v41 }
 0x851   : > { %v18800_v60 = vpop.f32.mrb[143].mxu0 }
 0x852   : > { %v19177_v4 = vadd.f32 %v19176_v48, %v18798_v62  ;;  %v18801_v42 = vadd.f32 %v18800_v60, %v18799_v34 }
 0x854   : > { %v19193_v45 = vadd.f32 %v19192_v49, %v18801_v42 }
 0x856   : > { %v18802_v56 = vpop.f32.mrb[144].mxu0 }
 0x857   : > { %v18803_v46 = vpop.f32.mrb[145].mxu0  ;;  %19165 = vmatmul.mubr.msk.bf16.vlgmr.msra.gmra.mrb[136].mxu0 %vm12387_vm6, %v15128_v32 }
 0x858   : > { %v18804_v17 = vadd.f32 %v18803_v46, %v18802_v56  ;;  %v18805_v22 = vpop.f32.mrb[146].mxu0 }
 0x859   : > { %v18806_v30 = vpop.f32.mrb[147].mxu0 }
 0x85a   : > { %v19169_v33 = vadd.f32 %v19168_v36, %v18804_v17  ;;  %v18807_v54 = vadd.f32 %v18806_v30, %v18805_v22 }
 0x85c   : > { %v19185_v15 = vadd.f32 %v19184_v13, %v18807_v54 }
 0x860   : > { %v18828_v23 = vpop.f32.mrb[152].mxu1 }
 0x861   : > { %v18829_v25 = vpop.f32.mrb[153].mxu1 }
 0x862   : > { %v18830_v14 = vadd.f32 %v18829_v25, %v18828_v23  ;;  %v18831_v26 = vpop.f32.mrb[154].mxu1 }
 0x863   : > { %v18832_v44 = vpop.f32.mrb[155].mxu1 }
 0x864   : > { %v18833_v1 = vadd.f32 %v18832_v44, %v18831_v26 }
 0x868   : > { %v18834_v59 = vpop.f32.mrb[156].mxu1 }
 0x869   : > { %v18835_v58 = vpop.f32.mrb[157].mxu1 }
 0x86a   : > { %v18836_v27 = vadd.f32 %v18835_v58, %v18834_v59  ;;  %v18837_v39 = vpop.f32.mrb[158].mxu1 }
 0x86b   : > { %v18838_v43 = vpop.f32.mrb[159].mxu1 }
 0x86c   : > { %v18839_v18 = vadd.f32 %v18838_v43, %v18837_v39 }
 0x87e   : > { %v18856_v40 = vpop.f32.mrb[148].mxu0 }
 0x87f   : > { %v18857_v3 = vpop.f32.mrb[149].mxu0 }
 0x880   : > { %v18858_v16 = vadd.f32 %v18857_v3, %v18856_v40  ;;  %v18859_v53 = vpop.f32.mrb[150].mxu0  ;;  %v18888_v47 = vpop.f32.mrb[160].mxu1 }
 0x881   : > { %v18860_v55 = vpop.f32.mrb[151].mxu0  ;;  %v18889_v51 = vpop.f32.mrb[161].mxu1 }
 0x882   : > { %v13315_v63 = vadd.f32 %v18858_v16, %v18830_v14  ;;  %v18861_v57 = vadd.f32 %v18860_v55, %v18859_v53  ;;  %v18890_v48 = vadd.f32 %v18889_v51, %v18888_v47  ;;  %v18891_v28 = vpop.f32.mrb[162].mxu1 }
 0x883   : > { %v18892_v49 = vpop.f32.mrb[163].mxu1 }
 0x884   : > { %v19178_v31 = vadd.f32 %v19177_v4, %v13315_v63  ;;  %v13318_v7 = vadd.f32 %v18861_v57, %v18833_v1  ;;  %v18893_v6 = vadd.f32 %v18892_v49, %v18891_v28 }
 0x886   : > { %v19194_v37 = vadd.f32 %v19193_v45, %v13318_v7  ;;  %v18862_v52 = vpop.f32.mrb[152].mxu0 }
 0x887   : > { %v18863_v12 = vpop.f32.mrb[153].mxu0 }
 0x888   : > { %v18864_v10 = vadd.f32 %v18863_v12, %v18862_v52  ;;  %v18865_v38 = vpop.f32.mrb[154].mxu0  ;;  %v18894_v24 = vpop.f32.mrb[164].mxu1 }
 0x889   : > { %v18866_v8 = vpop.f32.mrb[155].mxu0  ;;  %v18895_v0 = vpop.f32.mrb[165].mxu1 }
 0x88a   : > { %v13323_v11 = vadd.f32 %v18864_v10, %v18836_v27  ;;  %v18867_v50 = vadd.f32 %v18866_v8, %v18865_v38  ;;  %v18896_v2 = vadd.f32 %v18895_v0, %v18894_v24  ;;  %v18897_v35 = vpop.f32.mrb[166].mxu1 }
 0x88b   : > { %v18898_v9 = vpop.f32.mrb[167].mxu1 }
 0x88c   : > { %v19170_v36 = vadd.f32 %v19169_v33, %v13323_v11  ;;  %v13326_v29 = vadd.f32 %v18867_v50, %v18839_v18  ;;  %v18899_v5 = vadd.f32 %v18898_v9, %v18897_v35 }
 0x88e   : > { %v19186_v13 = vadd.f32 %v19185_v15, %v13326_v29 }
 0x8a0   : > { %v18916_v61 = vpop.f32.mrb[168].mxu1 }
 0x8a1   : > { %v18917_v20 = vpop.f32.mrb[169].mxu1 }
 0x8a2   : > { %v18918_v21 = vadd.f32 %v18917_v20, %v18916_v61  ;;  %v18919_v41 = vpop.f32.mrb[170].mxu1 }
 0x8a3   : > { %v18920_v62 = vpop.f32.mrb[171].mxu1 }
 0x8a4   : > { %v13859_v34 = vadd.f32 %v18918_v21, %v18890_v48  ;;  %v18921_v60 = vadd.f32 %v18920_v62, %v18919_v41 }
 0x8a6   : > { %v19179_v4 = vadd.f32 %v19178_v31, %v13859_v34  ;;  %v13862_v42 = vadd.f32 %v18921_v60, %v18893_v6 }
 0x8a8   : > { %v19195_v19 = vadd.f32 %v19194_v37, %v13862_v42  ;;  %v18922_v45 = vpop.f32.mrb[172].mxu1 }
 0x8a9   : > { %v18923_v56 = vpop.f32.mrb[173].mxu1 }
 0x8aa   : > { %v18924_v32 = vadd.f32 %v18923_v56, %v18922_v45  ;;  %v18925_v46 = vpop.f32.mrb[174].mxu1 }
 0x8ab   : > { %v18926_v17 = vpop.f32.mrb[175].mxu1 }
 0x8ac   : > { %v13867_v22 = vadd.f32 %v18924_v32, %v18896_v2  ;;  %v18927_v30 = vadd.f32 %v18926_v17, %v18925_v46 }
 0x8ae   : > { %v19171_v33 = vadd.f32 %v19170_v36, %v13867_v22  ;;  %v13870_v54 = vadd.f32 %v18927_v30, %v18899_v5 }
 0x8b0   : > { %v19187_v15 = vadd.f32 %v19186_v13, %v13870_v54 }
 0x8ba   : > { %v18948_v23 = vpop.f32.mrb[156].mxu0 }
 0x8bb   : > { %v18949_v25 = vpop.f32.mrb[157].mxu0 }
 0x8bc   : > { %v18950_v14 = vadd.f32 %v18949_v25, %v18948_v23  ;;  %v18951_v26 = vpop.f32.mrb[158].mxu0 }
 0x8bd   : > { %v18952_v44 = vpop.f32.mrb[159].mxu0 }
 0x8be   : > { %v18953_v1 = vadd.f32 %v18952_v44, %v18951_v26 }
 0x8c0   : > { %v18976_v59 = vpop.f32.mrb[176].mxu1 }
 0x8c1   : > { %v18977_v58 = vpop.f32.mrb[177].mxu1 }
 0x8c2   : > { %v18978_v27 = vadd.f32 %v18977_v58, %v18976_v59  ;;  %v18954_v39 = vpop.f32.mrb[160].mxu0  ;;  %v18979_v43 = vpop.f32.mrb[178].mxu1 }
 0x8c3   : > { %v18955_v18 = vpop.f32.mrb[161].mxu0  ;;  %v18980_v40 = vpop.f32.mrb[179].mxu1 }
 0x8c4   : > { %v14343_v3 = vadd.f32 %v18978_v27, %v18950_v14  ;;  %v18956_v16 = vadd.f32 %v18955_v18, %v18954_v39  ;;  %v18981_v53 = vadd.f32 %v18980_v40, %v18979_v43  ;;  %v18957_v47 = vpop.f32.mrb[162].mxu0 }
 0x8c5   : > { %v18958_v55 = vpop.f32.mrb[163].mxu0 }
 0x8c6   : > { %v19180_v63 = vadd.f32 %v19179_v4, %v14343_v3  ;;  %v14346_v51 = vadd.f32 %v18981_v53, %v18953_v1  ;;  %v18959_v57 = vadd.f32 %v18958_v55, %v18957_v47 }
 0x8c8   : > { %v19196_v48 = vadd.f32 %v19195_v19, %v14346_v51  ;;  %v18982_v28 = vpop.f32.mrb[180].mxu1 }
 0x8c9   : > { %v18983_v31 = vpop.f32.mrb[181].mxu1 }
 0x8ca   : > { %v18984_v7 = vadd.f32 %v18983_v31, %v18982_v28  ;;  %v18985_v49 = vpop.f32.mrb[182].mxu1 }
 0x8cb   : > { %v18986_v6 = vpop.f32.mrb[183].mxu1 }
 0x8cc   : > { %v14351_v37 = vadd.f32 %v18984_v7, %v18956_v16  ;;  %v18987_v52 = vadd.f32 %v18986_v6, %v18985_v49 }
 0x8ce   : > { %v19172_v12 = vadd.f32 %v19171_v33, %v14351_v37  ;;  %v14354_v10 = vadd.f32 %v18987_v52, %v18959_v57 }
 0x8d0   : > { %v19188_v38 = vadd.f32 %v19187_v15, %v14354_v10 }
 0x8e0   : > { %v19008_v24 = vpop.f32.mrb[184].mxu1 }
 0x8e1   : > { %v19009_v8 = vpop.f32.mrb[185].mxu1 }
 0x8e2   : > { %v19010_v11 = vadd.f32 %v19009_v8, %v19008_v24  ;;  %v19011_v0 = vpop.f32.mrb[186].mxu1  ;;  %v15506_v24 = vpop.permute.xlu0 %15505 }
 0x8e3   : > { %v19012_v50 = vpop.f32.mrb[187].mxu1 }
 0x8e4   : > { %v19013_v2 = vadd.f32 %v19012_v50, %v19011_v0 }
 0x8e8   : > { %v19014_v35 = vpop.f32.mrb[188].mxu1 }
 0x8e9   : > { %v19015_v36 = vpop.f32.mrb[189].mxu1 }
 0x8ea   : > { %v19016_v29 = vadd.f32 %v19015_v36, %v19014_v35  ;;  %v19036_v9 = vpop.f32.mrb[164].mxu0  ;;  %v19017_v5 = vpop.f32.mrb[190].mxu1 }
 0x8eb   : > { %v19037_v13 = vpop.f32.mrb[165].mxu0  ;;  %v19018_v61 = vpop.f32.mrb[191].mxu1 }
 0x8ec   : > { %v19038_v20 = vadd.f32 %v19037_v13, %v19036_v9  ;;  %v19019_v21 = vadd.f32 %v19018_v61, %v19017_v5  ;;  %v19039_v41 = vpop.f32.mrb[166].mxu0 }
 0x8ed   : > { %v19040_v62 = vpop.f32.mrb[167].mxu0 }
 0x8ee   : > { %v14932_v34 = vadd.f32 %v19038_v20, %v19010_v11  ;;  %v19041_v60 = vadd.f32 %v19040_v62, %v19039_v41 }
 0x8f0   : > { %v14935_v4 = vadd.f32 %v19041_v60, %v19013_v2  ;;  %v19181_v42 = vadd.f32 %v19180_v63, %v14932_v34 }
 0x8f2   : > { %v19042_v19 = vpop.f32.mrb[168].mxu0  ;;  %v19197_v45 = vadd.f32 %v19196_v48, %v14935_v4 }
 0x8f3   : > { %v19043_v56 = vpop.f32.mrb[169].mxu0 }
 0x8f4   : > { %v19044_v32 = vadd.f32 %v19043_v56, %v19042_v19  ;;  %v19045_v46 = vpop.f32.mrb[170].mxu0 }
 0x8f5   : > { %v19046_v17 = vpop.f32.mrb[171].mxu0 }
 0x8f6   : > { %v14940_v22 = vadd.f32 %v19044_v32, %v19016_v29  ;;  %v19047_v30 = vadd.f32 %v19046_v17, %v19045_v46 }
 0x8f8   : > { %v14943_v33 = vadd.f32 %v19047_v30, %v19019_v21  ;;  %v19173_v54 = vadd.f32 %v19172_v12, %v14940_v22 }
 0x8fa   : > { %v19189_v15 = vadd.f32 %v19188_v38, %v14943_v33 }
 0x900   : > { %v19068_v23 = vpop.f32.mrb[192].mxu1 }
 0x901   : > { %v19069_v25 = vpop.f32.mrb[193].mxu1 }
 0x902   : > { %v19070_v14 = vadd.f32 %v19069_v25, %v19068_v23  ;;  %v19071_v26 = vpop.f32.mrb[194].mxu1 }
 0x903   : > { %v19072_v44 = vpop.f32.mrb[195].mxu1 }
 0x904   : > { %v19073_v1 = vadd.f32 %v19072_v44, %v19071_v26 }
 0x908   : > { %v19074_v59 = vpop.f32.mrb[196].mxu1 }
 0x909   : > { %v19075_v58 = vpop.f32.mrb[197].mxu1 }
 0x90a   : > { %v19076_v27 = vadd.f32 %v19075_v58, %v19074_v59  ;;  %v19077_v39 = vpop.f32.mrb[198].mxu1 }
 0x90b   : > { %v19078_v43 = vpop.f32.mrb[199].mxu1 }
 0x90c   : > { %v19079_v18 = vadd.f32 %v19078_v43, %v19077_v39 }
 0x91a   : > { %v19096_v40 = vpop.f32.mrb[172].mxu0 }
 0x91b   : > { %v19097_v3 = vpop.f32.mrb[173].mxu0 }
 0x91c   : > { %v19098_v16 = vadd.f32 %v19097_v3, %v19096_v40  ;;  %v19099_v53 = vpop.f32.mrb[174].mxu0 }
 0x91d   : > { %v19100_v47 = vpop.f32.mrb[175].mxu0 }
 0x91e   : > { %v15431_v55 = vadd.f32 %v19098_v16, %v19070_v14  ;;  %v19101_v63 = vadd.f32 %v19100_v47, %v19099_v53 }
 0x920   : > { %v15434_v51 = vadd.f32 %v19101_v63, %v19073_v1  ;;  %v19182_v57 = vadd.f32 %v19181_v42, %v15431_v55 }
 0x922   : > { %v19102_v48 = vpop.f32.mrb[176].mxu0  ;;  %v19198_v28 = vadd.f32 %v19197_v45, %v15434_v51 }
 0x923   : > { %v19103_v31 = vpop.f32.mrb[177].mxu0 }
 0x924   : > { %v19104_v7 = vadd.f32 %v19103_v31, %v19102_v48  ;;  %v19105_v49 = vpop.f32.mrb[178].mxu0 }
 0x925   : > { %v19106_v6 = vpop.f32.mrb[179].mxu0 }
 0x926   : > { %v15439_v37 = vadd.f32 %v19104_v7, %v19076_v27  ;;  %v19107_v52 = vadd.f32 %v19106_v6, %v19105_v49 }
 0x928   : > { %v15442_v12 = vadd.f32 %v19107_v52, %v19079_v18  ;;  %v19174_v10 = vadd.f32 %v19173_v54, %v15439_v37 }
 0x92a   : > { %v19166_v38 = vpop.f32.mrb[136].mxu0  ;;  %v19190_v8 = vadd.f32 %v19189_v15, %v15442_v12 }
 0x92b   : > { %v19175_v11 = vadd.f32 %v19174_v10, %v19166_v38  ;;  %v15479_v0 = vpop.f32.mrb[137].mxu0 }
 0x92c   : > { %v19183_v50 = vadd.f32 %v19182_v57, %v15479_v0  ;;  %v19167_v2 = vpop.f32.mrb[138].mxu0 }
 0x92d   : > { %v15510_v35 = vadd.f32 %v19175_v11, %v15506_v24  ;;  %v19191_v36 = vadd.f32 %v19190_v8, %v19167_v2  ;;  %v15482_v29 = vpop.f32.mrb[139].mxu0 }
 0x92e   : > { %v15508_v9 = vadd.f32 %v19183_v50, %v15506_v24  ;;  %v19199_v5 = vadd.f32 %v19198_v28, %v15482_v29 }
 0x92f   : > { %15515 = vst.msk [vmem:[%s314_s16 + $0x10] sm:$0xff] %vm15512_vm12, %v15510_v35  ;;  %v15511_v13 = vadd.f32 %v19191_v36, %v15506_v24 }
 0x930   : > { %15513 = vst.msk [vmem:[%s314_s16] sm:$0xff] %vm15512_vm12, %v15508_v9  ;;  %v15509_v61 = vadd.f32 %v19199_v5, %v15506_v24 }
 0x931   : > { %15517 = vst.msk [vmem:[%s314_s16 + $0x18] sm:$0xf] %vm15516_vm13, %v15511_v13 }
 0x932   : > { %15514 = vst.msk [vmem:[%s314_s16 + $0x8] sm:$0xff] %vm15512_vm12, %v15509_v61 }
 0x933 PF: > { %s21_s11 = sadd.s32 1, %s21264_s11  }
 0x934   : > { %p18_p4 = scmp.ge.s32.totalorder %s21_s11, 4  }
 0x936   :  { %20 = sbr.rel (!%p18_p4) target bundleno = 3 (0x3), region = 164 }

</bundles_post_ra>
